<compile_context>
chip_gen: v7x
topology: tpu7x:2x2x1
jax: 0.10.0
libtpu: 0.0.40
codegen_flags: <defaults>
</compile_context>

<pallas_src>
import functools

import jax
import jax.numpy as jnp
from jax.experimental import pallas as pl
from jax.experimental.pallas import tpu as pltpu


# ----------------------------- in-kernel helpers -----------------------------

def _ln(x, g, b, eps):
    """LayerNorm with stats in f32 (returns f32)."""
    xf = x.astype(jnp.float32)
    mu = jnp.mean(xf, axis=-1, keepdims=True)
    var = jnp.mean(jnp.square(xf - mu), axis=-1, keepdims=True)
    return (xf - mu) * jax.lax.rsqrt(var + eps) * g + b


def _mha(q, k, v, heads):
    """Head-batched multi-head softmax attention on VMEM-resident (T, C) tiles.

    bf16 MXU matmuls with f32 accumulation; softmax stats in f32."""
    T, C = q.shape
    d = C // heads
    qh = jnp.transpose(q.astype(jnp.bfloat16).reshape(T, heads, d), (1, 0, 2))
    kh = jnp.transpose(k.astype(jnp.bfloat16).reshape(T, heads, d), (1, 0, 2))
    vh = jnp.transpose(v.astype(jnp.bfloat16).reshape(T, heads, d), (1, 0, 2))
    s = jnp.einsum('hqd,hkd->hqk', qh, kh,
                   preferred_element_type=jnp.float32) * (d ** -0.5)
    s = s - jnp.max(s, axis=-1, keepdims=True)
    e = jnp.exp(s)
    p = e * pl.reciprocal(jnp.sum(e, axis=-1, keepdims=True), approx=True)
    o = jnp.einsum('hqk,hkd->hqd', p.astype(jnp.bfloat16), vh,
                   preferred_element_type=jnp.float32)
    return jnp.transpose(o, (1, 0, 2)).reshape(T, C)           # f32


def _const_spec(shape):
    nd = len(shape)
    return pl.BlockSpec(shape, lambda *_: (0,) * nd)


_VMEM_LIMIT = 48 * 1024 * 1024   # fits under v7x 64 MiB, above v6e/v5e defaults


# ----------------------------- fused per-layer kernels -----------------------------

def _stage_a_kernel(*refs, n_prev):
    """Adapter mix + adapter + fused q/k projection + routing-score partials."""
    alpha_ref, xs_ref = refs[0], refs[1]
    if n_prev == 0:
        prev_ref = None
        pq_refs = ()
        adwi_ref, adbi_ref, adwo_ref, adbo_ref, wqk_ref = refs[2:7]
        ad_out_ref, q_out_ref, score_ref = refs[7], refs[8], None
    else:
        prev_ref = refs[2]
        pq_refs = refs[3:3 + n_prev]
        adwi_ref, adbi_ref, adwo_ref, adbo_ref, wqk_ref = refs[3 + n_prev:8 + n_prev]
        ad_out_ref = refs[8 + n_prev]
        q_out_ref = refs[9 + n_prev]
        score_ref = refs[10 + n_prev]

    a = alpha_ref[0]
    xv = xs_ref[0]                                       # (T, C), cls at row 0
    tok = xv[1:, :].astype(jnp.float32)                  # (N, C)
    prev = tok if prev_ref is None else prev_ref[0].astype(jnp.float32)
    x = a * prev + (1.0 - a) * tok                       # == tok at layer 0

    # TODO(synk): MambaAdapter (selective SSM) definition is not provided; a
    # shape-preserving SiLU-gated MLP adapter with residual is used as placeholder.
    h = jnp.dot(x.astype(adwi_ref.dtype), adwi_ref[...],
                preferred_element_type=jnp.float32) + adbi_ref[...]
    h = h * jax.nn.sigmoid(h)
    ad = x + jnp.dot(h.astype(adwo_ref.dtype), adwo_ref[...],
                     preferred_element_type=jnp.float32) + adbo_ref[...]
    ad_out_ref[0] = ad.astype(ad_out_ref.dtype)

    # fused conv_q|conv_k projection: one (N, 2C) MXU launch, 128-aligned slices
    C = tok.shape[-1]
    qk = jnp.dot(ad.astype(wqk_ref.dtype), wqk_ref[...],
                 preferred_element_type=jnp.float32)
    q_cur = qk[:, :C]
    k_cur = qk[:, C:]
    q_out_ref[0] = q_cur.astype(q_out_ref.dtype)

    if n_prev:
        # lane-dense (P, C) partials: reduce only over N; wrapper sums B, C.
        parts = [jnp.sum(pq[0].astype(jnp.float32) * k_cur, axis=0, keepdims=True)
                 for pq in pq_refs]
        score_ref[0] = jnp.concatenate(parts, axis=0)


def _stage_b_kernel(*refs, heads, n_prev):
    """Expert fusion + retrieval attention + scale*LN + residual + timm ViT block."""
    route_ref, xs_ref, q_ref = refs[0], refs[1], refs[2]
    pq_refs = refs[3:3 + n_prev]
    (wkv_ref, aw_ref, ng_ref, nb_ref,
     n1g_ref, n1b_ref, qkvw_ref, qkvb_ref, pw_ref, pb_ref,
     n2g_ref, n2b_ref, f1w_ref, f1b_ref, f2w_ref, f2b_ref) = refs[3 + n_prev:19 + n_prev]
    o_ref = refs[19 + n_prev]

    x = xs_ref[0].astype(jnp.float32)                    # (T, C), residual in f32
    C = x.shape[-1]
    q_cur = q_ref[0]                                     # (N, C) bf16

    # fused_q = (q_cur + sum selected prev_Q) / (1 + top_k): SMEM scalar weights
    # (zero for unselected experts).
    fused = route_ref[0] * q_cur.astype(jnp.float32)
    for pidx in range(n_prev):
        fused = fused + route_ref[1 + pidx] * pq_refs[pidx][0].astype(jnp.float32)

    # fused conv_k|conv_v projection, then multi-head retrieval attention
    kv = jnp.dot(fused.astype(wkv_ref.dtype), wkv_ref[...],
                 preferred_element_type=jnp.float32)
    att = _mha(q_cur, kv[:, :C], kv[:, C:], heads)
    att = _ln(att * aw_ref[...], ng_ref[...], nb_ref[...], 1e-5)
    # add to token rows only (row 0 = cls untouched), no slice/re-concat of x
    att_full = jnp.concatenate([jnp.zeros((1, C), att.dtype), att], axis=0)
    x = x + att_full

    # timm ViT block (eval): x + Attn(LN1(x)); x + MLP(LN2(x))
    h1 = _ln(x, n1g_ref[...], n1b_ref[...], 1e-6).astype(qkvw_ref.dtype)
    qkv = jnp.dot(h1, qkvw_ref[...], preferred_element_type=jnp.float32) + qkvb_ref[...]
    a2 = _mha(qkv[:, 0:C], qkv[:, C:2 * C], qkv[:, 2 * C:3 * C], heads)
    a2 = jnp.dot(a2.astype(pw_ref.dtype), pw_ref[...],
                 preferred_element_type=jnp.float32) + pb_ref[...]
    x = x + a2
    h2 = _ln(x, n2g_ref[...], n2b_ref[...], 1e-6).astype(f1w_ref.dtype)
    # TODO(synk): timm ViT uses exact-erf GELU; tanh approximation used here.
    m = jax.nn.gelu(jnp.dot(h2, f1w_ref[...], preferred_element_type=jnp.float32)
                    + f1b_ref[...], approximate=True)
    m = jnp.dot(m.astype(f2w_ref.dtype), f2w_ref[...],
                preferred_element_type=jnp.float32) + f2b_ref[...]
    o_ref[0] = (x + m).astype(o_ref.dtype)


def retrieval_stage_a(alpha, xs, prev_adapter, prev_q_list, p):
    B, T, C = xs.shape
    N = T - 1
    n_prev = len(prev_q_list)
    kernel = functools.partial(_stage_a_kernel, n_prev=n_prev)
    act_t = pl.BlockSpec((1, T, C), lambda b: (b, 0, 0))
    act_n = pl.BlockSpec((1, N, C), lambda b: (b, 0, 0))
    smem = pl.BlockSpec(memory_space=pltpu.MemorySpace.SMEM)
    w_specs = [_const_spec((C, C)), _const_spec((1, C)),
               _const_spec((C, C)), _const_spec((1, C)),
               _const_spec((C, 2 * C))]
    w_args = (p["ad_w_in"], p["ad_b_in"], p["ad_w_out"], p["ad_b_out"], p["conv_qk"])

    if n_prev == 0:
        in_specs = [smem, act_t] + w_specs
        args = (alpha, xs) + w_args
        out_specs = [act_n, act_n]
        out_shape = [jax.ShapeDtypeStruct((B, N, C), xs.dtype),
                     jax.ShapeDtypeStruct((B, N, C), xs.dtype)]
    else:
        in_specs = [smem, act_t, act_n] + [act_n] * n_prev + w_specs
        args = (alpha, xs, prev_adapter, *prev_q_list) + w_args
        out_specs = [act_n, act_n, pl.BlockSpec((1, n_prev, C), lambda b: (b, 0, 0))]
        out_shape = [jax.ShapeDtypeStruct((B, N, C), xs.dtype),
                     jax.ShapeDtypeStruct((B, N, C), xs.dtype),
                     jax.ShapeDtypeStruct((B, n_prev, C), jnp.float32)]

    res = pl.pallas_call(
        kernel, grid=(B,), in_specs=in_specs, out_specs=out_specs, out_shape=out_shape,
        compiler_params=pltpu.CompilerParams(
            dimension_semantics=("parallel",), vmem_limit_bytes=_VMEM_LIMIT),
    )(*args)
    if n_prev == 0:
        return res[0], res[1], None
    return res[0], res[1], res[2]


def retrieval_stage_b(route_w, xs, q_cur, prev_q_list, p, blk, heads):
    B, T, C = xs.shape
    N = T - 1
    n_prev = len(prev_q_list)
    mlp = blk["fc1_w"].shape[1]
    kernel = functools.partial(_stage_b_kernel, heads=heads, n_prev=n_prev)
    act_t = pl.BlockSpec((1, T, C), lambda b: (b, 0, 0))
    act_n = pl.BlockSpec((1, N, C), lambda b: (b, 0, 0))
    in_specs = ([pl.BlockSpec(memory_space=pltpu.MemorySpace.SMEM), act_t, act_n]
                + [act_n] * n_prev
                + [_const_spec((C, 2 * C)),
                   _const_spec((1, C)), _const_spec((1, C)), _const_spec((1, C)),
                   _const_spec((1, C)), _const_spec((1, C)),
                   _const_spec((C, 3 * C)), _const_spec((1, 3 * C)),
                   _const_spec((C, C)), _const_spec((1, C)),
                   _const_spec((1, C)), _const_spec((1, C)),
                   _const_spec((C, mlp)), _const_spec((1, mlp)),
                   _const_spec((mlp, C)), _const_spec((1, C))])
    return pl.pallas_call(
        kernel, grid=(B,), in_specs=in_specs,
        out_specs=act_t,
        out_shape=jax.ShapeDtypeStruct((B, T, C), xs.dtype),
        compiler_params=pltpu.CompilerParams(
            dimension_semantics=("parallel",), vmem_limit_bytes=_VMEM_LIMIT),
    )(route_w, xs, q_cur, *prev_q_list,
      p["conv_kv"], p["adapter_weight"], p["norm_g"], p["norm_b"],
      blk["n1_g"], blk["n1_b"], blk["qkv_w"], blk["qkv_b"], blk["proj_w"], blk["proj_b"],
      blk["n2_g"], blk["n2_b"], blk["fc1_w"], blk["fc1_b"], blk["fc2_w"], blk["fc2_b"])


# ----------------------------- head + patch embed kernels -----------------------------

def _head_kernel(cls_ref, ng_ref, nb_ref, fcw_ref, fcb_ref,
                 bnw_ref, bnb_ref, bnm_ref, bnv_ref, wgt_ref, o_ref):
    x = _ln(cls_ref[...], ng_ref[...], nb_ref[...], 1e-5)
    f = jnp.dot(x.astype(fcw_ref.dtype), fcw_ref[...],
                preferred_element_type=jnp.float32) + fcb_ref[...]
    # eval-mode BatchNorm1d folded to an affine
    scale = bnw_ref[...] * jax.lax.rsqrt(bnv_ref[...] + 1e-5)
    f = (f - bnm_ref[...]) * scale + bnb_ref[...]
    o_ref[...] = jnp.tanh(
        jnp.dot(f.astype(wgt_ref.dtype), wgt_ref[...],
                preferred_element_type=jnp.float32)
    ).astype(o_ref.dtype)


def retrieval_head(cls_feat, p):
    B, _ = cls_feat.shape
    code = p["W_G_T"].shape[1]
    return pl.pallas_call(
        _head_kernel,
        out_shape=jax.ShapeDtypeStruct((B, code), jnp.float32),
    )(cls_feat, p["norm_g"], p["norm_b"], p["fc_w"], p["fc_b"],
      p["bn_w"], p["bn_b"], p["bn_rm"], p["bn_rv"], p["W_G_T"])


def _matmul_kernel(x_ref, w_ref, b_ref, o_ref, acc_ref):
    @pl.when(pl.program_id(2) == 0)
    def _():
        acc_ref[...] = jnp.zeros_like(acc_ref)
    acc_ref[...] += jnp.dot(x_ref[...], w_ref[...], preferred_element_type=jnp.float32)

    @pl.when(pl.program_id(2) == pl.num_programs(2) - 1)
    def _():
        o_ref[...] = (acc_ref[...] + b_ref[...]).astype(o_ref.dtype)


def _pick_tile(dim, candidates):
    for c in candidates:
        if dim % c == 0:
            return c
    return dim


def linear_tiled(x, w, b, out_dtype=None):
    """Tiled (M,K)@(K,N)+b with f32 VMEM accumulator; large MXU-aligned tiles,
    falling back to full blocks for small / non-divisible dims."""
    M, K = x.shape
    N = w.shape[1]
    out_dtype = out_dtype or x.dtype
    tm = _pick_tile(M, (512, 256, 128, 64, 32, 16, 8))
    tn = _pick_tile(N, (512, 256, 128))
    tk = _pick_tile(K, (512, 256, 128))
    grid = (M // tm, N // tn, K // tk)
    return pl.pallas_call(
        _matmul_kernel,
        grid=grid,
        in_specs=[
            pl.BlockSpec((tm, tk), lambda i, j, k: (i, k)),
            pl.BlockSpec((tk, tn), lambda i, j, k: (k, j)),
            pl.BlockSpec((1, tn), lambda i, j, k: (0, j)),
        ],
        out_specs=pl.BlockSpec((tm, tn), lambda i, j, k: (i, j)),
        out_shape=jax.ShapeDtypeStruct((M, N), out_dtype),
        scratch_shapes=[pltpu.VMEM((tm, tn), jnp.float32)],
        compiler_params=pltpu.CompilerParams(
            dimension_semantics=("parallel", "parallel", "arbitrary")),
    )(x, w, b)


# ----------------------------- forward -----------------------------

def forward(params, x, cfg):
    B, Cin, H, W = x.shape
    p_sz, C, heads, depth = cfg["patch"], cfg["C"], cfg["heads"], cfg["depth"]
    gh, gw = H // p_sz, W // p_sz
    NP = gh * gw
    num_routing = depth // 2 + 1

    # --- PatchEmbed: stride-p conv as patch extraction (glue) + tiled Pallas matmul ---
    patches = (x.reshape(B, Cin, gh, p_sz, gw, p_sz)
                .transpose(0, 2, 4, 1, 3, 5)
                .reshape(B * NP, Cin * p_sz * p_sz)).astype(jnp.bfloat16)
    tok = linear_tiled(patches, params["proj_w"], params["proj_b"],
                       out_dtype=jnp.bfloat16).reshape(B, NP, C)
    N = NP  # as in reference: B, N, C taken before cls concat

    cls = jnp.broadcast_to(params["cls_token"], (B, 1, C))
    xs = (jnp.concatenate([cls, tok], axis=1)
          + params["pos_embed"]).astype(jnp.bfloat16)      # pos_drop: identity (eval)

    alpha = params["alpha"].reshape(1).astype(jnp.float32)
    prev_adapter = None          # layer 0 handled in-kernel (mix collapses to tokens)
    prev_q_list = []             # per-layer bf16 (B, N, C) arrays; only live slots DMA'd
    inv_bnc = 1.0 / float(B * N * C)

    for i in range(depth):
        adapter_out, q_cur, score_part = retrieval_stage_a(
            alpha, xs, prev_adapter, prev_q_list, params)
        prev_adapter = adapter_out

        if i > 0:
            # score_p = mean(prev_Q[p] * current_K) over B*N*C; top-k expert selection.
            scores = jnp.sum(score_part, axis=(0, 2)) * inv_bnc        # (i,)
            top_k = min(num_routing, i)
            _, idx = jax.lax.top_k(scores, top_k)
            mask = jnp.sum(jax.nn.one_hot(idx, i, dtype=jnp.float32), axis=0)
            inv = 1.0 / (1.0 + top_k)
            route_w = jnp.concatenate(
                [jnp.full((1,), inv, jnp.float32), mask * inv])
        else:
            route_w = jnp.ones((1,), jnp.float32)

        xs = retrieval_stage_b(route_w, xs, q_cur, prev_q_list,
                               params, params["blocks"][i], heads)
        prev_q_list.append(q_cur)

    # NOTE: the same norm gamma/beta are used here and inside each layer — this is
    # intentional: the reference applies the same self.norm module in both places.
    return retrieval_head(xs[:, 0, :], params)


# ----------------------------- parameter init -----------------------------

def init_params(key, cfg):
    C, p, Cin = cfg["C"], cfg["patch"], cfg["in_chans"]
    NP = (cfg["img"] // p) ** 2
    mlp = int(cfg["mlp_ratio"] * C)
    fc_dim, code = cfg["fc_dim"], cfg["code_length"]
    keys = iter(jax.random.split(key, 256))
    # matrices in bf16 (MXU fast path), biases / norm params / stats in f32
    nrm = lambda shape, s=0.02: (jax.random.normal(next(keys), shape, jnp.float32)
                                 * s).astype(jnp.bfloat16)
    zeros = lambda shape: jnp.zeros(shape, jnp.float32)
    ones = lambda shape: jnp.ones(shape, jnp.float32)

    conv_q, conv_k, conv_v = nrm((C, C)), nrm((C, C)), nrm((C, C))
    params = dict(
        proj_w=nrm((Cin * p * p, C)), proj_b=zeros((1, C)),
        cls_token=nrm((1, 1, C)), pos_embed=nrm((1, NP + 1, C)),
        alpha=jnp.asarray(0.35, jnp.float32),
        ad_w_in=nrm((C, C)), ad_b_in=zeros((1, C)),
        ad_w_out=nrm((C, C)), ad_b_out=zeros((1, C)),
        adapter_weight=jax.random.uniform(next(keys), (1, C), jnp.float32, -0.1, 0.1),
        # fused projections: conv_q|conv_k for stage A, conv_k|conv_v for stage B
        conv_qk=jnp.concatenate([conv_q, conv_k], axis=1),
        conv_kv=jnp.concatenate([conv_k, conv_v], axis=1),
        norm_g=ones((1, C)), norm_b=zeros((1, C)),
        fc_w=nrm((C, fc_dim)), fc_b=zeros((1, fc_dim)),
        bn_w=ones((1, fc_dim)), bn_b=zeros((1, fc_dim)),
        bn_rm=zeros((1, fc_dim)), bn_rv=ones((1, fc_dim)),
        # F.linear(features, W_G) == features @ W_G.T — pre-transposed once here.
        W_G_T=nrm((fc_dim, code), s=0.5),
    )
    blocks = []
    for _ in range(cfg["depth"]):
        blocks.append(dict(
            n1_g=ones((1, C)), n1_b=zeros((1, C)),
            qkv_w=nrm((C, 3 * C)), qkv_b=zeros((1, 3 * C)),
            proj_w=nrm((C, C)), proj_b=zeros((1, C)),
            n2_g=ones((1, C)), n2_b=zeros((1, C)),
            fc1_w=nrm((C, mlp)), fc1_b=zeros((1, mlp)),
            fc2_w=nrm((mlp, C)), fc2_b=zeros((1, C)),
        ))
    params["blocks"] = blocks
    return params


# ----------------------------- main -----------------------------

if __name__ == "__main__":
    cfg = dict(in_chans=3, img=32, patch=8, C=128, heads=4, depth=2,
               mlp_ratio=4.0, code_length=32, fc_dim=256)
    key = jax.random.PRNGKey(0)
    pkey, xkey = jax.random.split(key)
    params = init_params(pkey, cfg)
    x = jax.random.normal(xkey, (2, cfg["in_chans"], cfg["img"], cfg["img"]), jnp.float32)

    fwd = jax.jit(functools.partial(forward, cfg=cfg))
    out = jax.block_until_ready(fwd(params, x))
    assert out.shape == (2, cfg["code_length"])
    assert bool(jnp.all(jnp.isfinite(out)))
    print("KERNEL_OK")
</pallas_src>

<mosaic_0001>
module attributes {stable_mosaic.version = 11 : i64} {
  func.func @_matmul_kernel(%arg0: i32, %arg1: i32, %arg2: i32, %arg3: memref<32x192xbf16, #tpu.memory_space<vmem>>, %arg4: memref<192x128xbf16, #tpu.memory_space<vmem>>, %arg5: memref<1x128xf32, #tpu.memory_space<vmem>>, %arg6: memref<32x128xbf16, #tpu.memory_space<vmem>>, %arg7: memref<32x128xf32, #tpu.memory_space<vmem>>) attributes {dimension_semantics = [#tpu.dimension_semantics<parallel>, #tpu.dimension_semantics<parallel>, #tpu.dimension_semantics<arbitrary>], iteration_bounds = array<i64: 1, 1, 1>, scalar_prefetch = 0 : i64, scratch_operands = 1 : i64, tpu.core_type = #tpu.core_type<tc>, window_params = [{transform_indices = @transform_0, window_bounds = array<i64: 32, 192>}, {transform_indices = @transform_1, window_bounds = array<i64: 192, 128>}, {transform_indices = @transform_2, window_bounds = array<i64: 1, 128>}, {transform_indices = @transform_3, window_bounds = array<i64: 32, 128>}]} {
    %c0_i32 = arith.constant 0 : i32
    %0 = arith.cmpi eq, %arg2, %c0_i32 : i32
    %1 = arith.extui %0 : i1 to i32
    %c0_i32_0 = arith.constant 0 : i32
    %2 = arith.cmpi ne, %1, %c0_i32_0 : i32
    scf.if %2 {
      %cst_10 = arith.constant 0.000000e+00 : f32
      %12 = vector.broadcast %cst_10 : f32 to vector<32x128xf32>
      %c0_11 = arith.constant 0 : index
      %c0_12 = arith.constant 0 : index
      %13 = vector.load %arg7[%c0_11, %c0_12] : memref<32x128xf32, #tpu.memory_space<vmem>>, vector<32x128xf32>
      tpu.vector_store %arg7[%c0_11, %c0_12], %12 {strides = array<i32>} : memref<32x128xf32, #tpu.memory_space<vmem>>, vector<32x128xf32>,
    } else {
    }
    %c0 = arith.constant 0 : index
    %c0_1 = arith.constant 0 : index
    %3 = vector.load %arg7[%c0, %c0_1] : memref<32x128xf32, #tpu.memory_space<vmem>>, vector<32x128xf32>
    %c0_2 = arith.constant 0 : index
    %c0_3 = arith.constant 0 : index
    %4 = vector.load %arg3[%c0_2, %c0_3] : memref<32x192xbf16, #tpu.memory_space<vmem>>, vector<32x192xbf16>
    %c0_4 = arith.constant 0 : index
    %c0_5 = arith.constant 0 : index
    %5 = vector.load %arg4[%c0_4, %c0_5] : memref<192x128xbf16, #tpu.memory_space<vmem>>, vector<192x128xbf16>
    %cst = arith.constant dense<0.000000e+00> : vector<32x128xf32>
    %6 = tpu.matmul %4, %5, %cst {dimension_numbers = #tpu.dot_dimension_numbers<[1], [0], [0], [1], [0, 0, 1, 1], [], []>} : vector<32x192xbf16>, vector<192x128xbf16>, vector<32x128xf32> -> vector<32x128xf32>
    %7 = arith.addf %3, %6 : vector<32x128xf32>
    %c0_6 = arith.constant 0 : index
    %c0_7 = arith.constant 0 : index
    %8 = vector.load %arg7[%c0_6, %c0_7] : memref<32x128xf32, #tpu.memory_space<vmem>>, vector<32x128xf32>
    tpu.vector_store %arg7[%c0_6, %c0_7], %7 {strides = array<i32>} : memref<32x128xf32, #tpu.memory_space<vmem>>, vector<32x128xf32>,
    %c0_i32_8 = arith.constant 0 : i32
    %9 = arith.cmpi eq, %arg2, %c0_i32_8 : i32
    %10 = arith.extui %9 : i1 to i32
    %c0_i32_9 = arith.constant 0 : i32
    %11 = arith.cmpi ne, %10, %c0_i32_9 : i32
    scf.if %11 {
      %c0_10 = arith.constant 0 : index
      %c0_11 = arith.constant 0 : index
      %12 = vector.load %arg7[%c0_10, %c0_11] : memref<32x128xf32, #tpu.memory_space<vmem>>, vector<32x128xf32>
      %c0_12 = arith.constant 0 : index
      %c0_13 = arith.constant 0 : index
      %13 = vector.load %arg5[%c0_12, %c0_13] : memref<1x128xf32, #tpu.memory_space<vmem>>, vector<1x128xf32>
      %14 = vector.broadcast %13 : vector<1x128xf32> to vector<32x128xf32>
      %15 = arith.addf %12, %14 : vector<32x128xf32>
      %16 = arith.truncf %15 : vector<32x128xf32> to vector<32x128xbf16>
      %c0_14 = arith.constant 0 : index
      %c0_15 = arith.constant 0 : index
      %17 = vector.load %arg6[%c0_14, %c0_15] : memref<32x128xbf16, #tpu.memory_space<vmem>>, vector<32x128xbf16>
      tpu.vector_store %arg6[%c0_14, %c0_15], %16 {strides = array<i32>} : memref<32x128xbf16, #tpu.memory_space<vmem>>, vector<32x128xbf16>,
    } else {
    }
    return
  }
  func.func @transform_0(%arg0: i32, %arg1: i32, %arg2: i32) -> (i32, i32) {
    %c0_i32 = arith.constant 0 : i32
    return %arg0, %arg2 : i32, i32
  }
  func.func @transform_1(%arg0: i32, %arg1: i32, %arg2: i32) -> (i32, i32) {
    %c0_i32 = arith.constant 0 : i32
    return %arg2, %arg1 : i32, i32
  }
  func.func @transform_2(%arg0: i32, %arg1: i32, %arg2: i32) -> (i32, i32) {
    %c0_i32 = arith.constant 0 : i32
    %c0_i32_0 = arith.constant 0 : i32
    return %c0_i32, %arg1 : i32, i32
  }
  func.func @transform_3(%arg0: i32, %arg1: i32, %arg2: i32) -> (i32, i32) {
    %c0_i32 = arith.constant 0 : i32
    return %arg0, %arg1 : i32, i32
  }
}

module attributes {stable_mosaic.version = 11 : i64} {
  func.func @_stage_a_kernel(%arg0: i32, %arg1: memref<1xf32, #tpu.memory_space<smem>>, %arg2: memref<1x17x128xbf16, #tpu.memory_space<vmem>>, %arg3: memref<128x128xbf16, #tpu.memory_space<vmem>>, %arg4: memref<1x128xf32, #tpu.memory_space<vmem>>, %arg5: memref<128x128xbf16, #tpu.memory_space<vmem>>, %arg6: memref<1x128xf32, #tpu.memory_space<vmem>>, %arg7: memref<128x256xbf16, #tpu.memory_space<vmem>>, %arg8: memref<1x16x128xbf16, #tpu.memory_space<vmem>>, %arg9: memref<1x16x128xbf16, #tpu.memory_space<vmem>>) attributes {dimension_semantics = [#tpu.dimension_semantics<parallel>], iteration_bounds = array<i64: 2>, scalar_prefetch = 0 : i64, scratch_operands = 0 : i64, tpu.core_type = #tpu.core_type<tc>, window_params = [{transform_indices = @transform_0, window_bounds = array<i64: 1>}, {transform_indices = @transform_1, window_bounds = array<i64: 1, 17, 128>}, {pipeline_mode = #tpu.pipeline_mode<synchronous>, transform_indices = @transform_2, window_bounds = array<i64: 128, 128>}, {pipeline_mode = #tpu.pipeline_mode<synchronous>, transform_indices = @transform_3, window_bounds = array<i64: 1, 128>}, {pipeline_mode = #tpu.pipeline_mode<synchronous>, transform_indices = @transform_4, window_bounds = array<i64: 128, 128>}, {pipeline_mode = #tpu.pipeline_mode<synchronous>, transform_indices = @transform_5, window_bounds = array<i64: 1, 128>}, {pipeline_mode = #tpu.pipeline_mode<synchronous>, transform_indices = @transform_6, window_bounds = array<i64: 128, 256>}, {transform_indices = @transform_7, window_bounds = array<i64: 1, 16, 128>}, {transform_indices = @transform_8, window_bounds = array<i64: 1, 16, 128>}]} {
    %c0 = arith.constant 0 : index
    %0 = memref.load %arg1[%c0] : memref<1xf32, #tpu.memory_space<smem>>
    %c0_0 = arith.constant 0 : index
    %c0_1 = arith.constant 0 : index
    %c0_2 = arith.constant 0 : index
    %1 = vector.load %arg2[%c0_0, %c0_1, %c0_2] : memref<1x17x128xbf16, #tpu.memory_space<vmem>>, vector<1x17x128xbf16>
    %2 = vector.shape_cast %1 : vector<1x17x128xbf16> to vector<17x128xbf16>
    %3 = vector.extract_strided_slice %2 {offsets = [1, 0], sizes = [16, 128], strides = [1, 1]} : vector<17x128xbf16> to vector<16x128xbf16>
    %4 = arith.extf %3 : vector<16x128xbf16> to vector<16x128xf32>
    %5 = vector.broadcast %0 : f32 to vector<16x128xf32>
    %6 = arith.mulf %5, %4 : vector<16x128xf32>
    %cst = arith.constant 1.000000e+00 : f32
    %7 = arith.subf %cst, %0 : f32
    %8 = vector.broadcast %7 : f32 to vector<16x128xf32>
    %9 = arith.mulf %8, %4 : vector<16x128xf32>
    %10 = arith.addf %6, %9 : vector<16x128xf32>
    %11 = arith.truncf %10 : vector<16x128xf32> to vector<16x128xbf16>
    %c0_3 = arith.constant 0 : index
    %c0_4 = arith.constant 0 : index
    %12 = vector.load %arg3[%c0_3, %c0_4] : memref<128x128xbf16, #tpu.memory_space<vmem>>, vector<128x128xbf16>
    %cst_5 = arith.constant dense<0.000000e+00> : vector<16x128xf32>
    %13 = tpu.matmul %11, %12, %cst_5 {dimension_numbers = #tpu.dot_dimension_numbers<[1], [0], [0], [1], [0, 0, 1, 1], [], []>} : vector<16x128xbf16>, vector<128x128xbf16>, vector<16x128xf32> -> vector<16x128xf32>
    %c0_6 = arith.constant 0 : index
    %c0_7 = arith.constant 0 : index
    %14 = vector.load %arg4[%c0_6, %c0_7] : memref<1x128xf32, #tpu.memory_space<vmem>>, vector<1x128xf32>
    %15 = vector.broadcast %14 : vector<1x128xf32> to vector<16x128xf32>
    %16 = arith.addf %13, %15 : vector<16x128xf32>
    %17 = arith.negf %16 : vector<16x128xf32>
    %18 = math.exp %17 : vector<16x128xf32>
    %cst_8 = arith.constant 1.000000e+00 : f32
    %19 = vector.broadcast %cst_8 : f32 to vector<16x128xf32>
    %20 = arith.addf %19, %18 : vector<16x128xf32>
    %21 = arith.divf %19, %20 : vector<16x128xf32>
    %22 = arith.mulf %16, %21 : vector<16x128xf32>
    %23 = arith.truncf %22 : vector<16x128xf32> to vector<16x128xbf16>
    %c0_9 = arith.constant 0 : index
    %c0_10 = arith.constant 0 : index
    %24 = vector.load %arg5[%c0_9, %c0_10] : memref<128x128xbf16, #tpu.memory_space<vmem>>, vector<128x128xbf16>
    %cst_11 = arith.constant dense<0.000000e+00> : vector<16x128xf32>
    %25 = tpu.matmul %23, %24, %cst_11 {dimension_numbers = #tpu.dot_dimension_numbers<[1], [0], [0], [1], [0, 0, 1, 1], [], []>} : vector<16x128xbf16>, vector<128x128xbf16>, vector<16x128xf32> -> vector<16x128xf32>
    %26 = arith.addf %10, %25 : vector<16x128xf32>
    %c0_12 = arith.constant 0 : index
    %c0_13 = arith.constant 0 : index
    %27 = vector.load %arg6[%c0_12, %c0_13] : memref<1x128xf32, #tpu.memory_space<vmem>>, vector<1x128xf32>
    %28 = vector.broadcast %27 : vector<1x128xf32> to vector<16x128xf32>
    %29 = arith.addf %26, %28 : vector<16x128xf32>
    %30 = arith.truncf %29 : vector<16x128xf32> to vector<16x128xbf16>
    %c0_14 = arith.constant 0 : index
    %c0_15 = arith.constant 0 : index
    %c0_16 = arith.constant 0 : index
    %31 = vector.load %arg8[%c0_14, %c0_15, %c0_16] : memref<1x16x128xbf16, #tpu.memory_space<vmem>>, vector<1x16x128xbf16>
    %32 = vector.shape_cast %31 : vector<1x16x128xbf16> to vector<16x128xbf16>
    %33 = vector.shape_cast %30 : vector<16x128xbf16> to vector<1x16x128xbf16>
    tpu.vector_store %arg8[%c0_14, %c0_15, %c0_16], %33 {strides = array<i32>} : memref<1x16x128xbf16, #tpu.memory_space<vmem>>, vector<1x16x128xbf16>,
    %34 = arith.truncf %29 : vector<16x128xf32> to vector<16x128xbf16>
    %c0_17 = arith.constant 0 : index
    %c0_18 = arith.constant 0 : index
    %35 = vector.load %arg7[%c0_17, %c0_18] : memref<128x256xbf16, #tpu.memory_space<vmem>>, vector<128x256xbf16>
    %cst_19 = arith.constant dense<0.000000e+00> : vector<16x256xf32>
    %36 = tpu.matmul %34, %35, %cst_19 {dimension_numbers = #tpu.dot_dimension_numbers<[1], [0], [0], [1], [0, 0, 1, 1], [], []>} : vector<16x128xbf16>, vector<128x256xbf16>, vector<16x256xf32> -> vector<16x256xf32>
    %37 = vector.extract_strided_slice %36 {offsets = [0, 0], sizes = [16, 128], strides = [1, 1]} : vector<16x256xf32> to vector<16x128xf32>
    %38 = arith.truncf %37 : vector<16x128xf32> to vector<16x128xbf16>
    %c0_20 = arith.constant 0 : index
    %c0_21 = arith.constant 0 : index
    %c0_22 = arith.constant 0 : index
    %39 = vector.load %arg9[%c0_20, %c0_21, %c0_22] : memref<1x16x128xbf16, #tpu.memory_space<vmem>>, vector<1x16x128xbf16>
    %40 = vector.shape_cast %39 : vector<1x16x128xbf16> to vector<16x128xbf16>
    %41 = vector.shape_cast %38 : vector<16x128xbf16> to vector<1x16x128xbf16>
    tpu.vector_store %arg9[%c0_20, %c0_21, %c0_22], %41 {strides = array<i32>} : memref<1x16x128xbf16, #tpu.memory_space<vmem>>, vector<1x16x128xbf16>,
    return
  }
  func.func @transform_0(%arg0: i32) -> i32 {
    %c0_i32 = arith.constant 0 : i32
    %c0_i32_0 = arith.constant 0 : i32
    return %c0_i32 : i32
  }
  func.func @transform_1(%arg0: i32) -> (i32, i32, i32) {
    %c0_i32 = arith.constant 0 : i32
    %c0_i32_0 = arith.constant 0 : i32
    %c0_i32_1 = arith.constant 0 : i32
    return %arg0, %c0_i32, %c0_i32_0 : i32, i32, i32
  }
  func.func @transform_2(%arg0: i32) -> (i32, i32) {
    %c0_i32 = arith.constant 0 : i32
    %c0_i32_0 = arith.constant 0 : i32
    %c0_i32_1 = arith.constant 0 : i32
    return %c0_i32, %c0_i32_0 : i32, i32
  }
  func.func @transform_3(%arg0: i32) -> (i32, i32) {
    %c0_i32 = arith.constant 0 : i32
    %c0_i32_0 = arith.constant 0 : i32
    %c0_i32_1 = arith.constant 0 : i32
    return %c0_i32, %c0_i32_0 : i32, i32
  }
  func.func @transform_4(%arg0: i32) -> (i32, i32) {
    %c0_i32 = arith.constant 0 : i32
    %c0_i32_0 = arith.constant 0 : i32
    %c0_i32_1 = arith.constant 0 : i32
    return %c0_i32, %c0_i32_0 : i32, i32
  }
  func.func @transform_5(%arg0: i32) -> (i32, i32) {
    %c0_i32 = arith.constant 0 : i32
    %c0_i32_0 = arith.constant 0 : i32
    %c0_i32_1 = arith.constant 0 : i32
    return %c0_i32, %c0_i32_0 : i32, i32
  }
  func.func @transform_6(%arg0: i32) -> (i32, i32) {
    %c0_i32 = arith.constant 0 : i32
    %c0_i32_0 = arith.constant 0 : i32
    %c0_i32_1 = arith.constant 0 : i32
    return %c0_i32, %c0_i32_0 : i32, i32
  }
  func.func @transform_7(%arg0: i32) -> (i32, i32, i32) {
    %c0_i32 = arith.constant 0 : i32
    %c0_i32_0 = arith.constant 0 : i32
    %c0_i32_1 = arith.constant 0 : i32
    return %arg0, %c0_i32, %c0_i32_0 : i32, i32, i32
  }
  func.func @transform_8(%arg0: i32) -> (i32, i32, i32) {
    %c0_i32 = arith.constant 0 : i32
    %c0_i32_0 = arith.constant 0 : i32
    %c0_i32_1 = arith.constant 0 : i32
    return %arg0, %c0_i32, %c0_i32_0 : i32, i32, i32
  }
}

module attributes {stable_mosaic.version = 11 : i64} {
  func.func @_stage_a_kernel(%arg0: i32, %arg1: memref<1xf32, #tpu.memory_space<smem>>, %arg2: memref<1x17x128xbf16, #tpu.memory_space<vmem>>, %arg3: memref<1x16x128xbf16, #tpu.memory_space<vmem>>, %arg4: memref<1x16x128xbf16, #tpu.memory_space<vmem>>, %arg5: memref<128x128xbf16, #tpu.memory_space<vmem>>, %arg6: memref<1x128xf32, #tpu.memory_space<vmem>>, %arg7: memref<128x128xbf16, #tpu.memory_space<vmem>>, %arg8: memref<1x128xf32, #tpu.memory_space<vmem>>, %arg9: memref<128x256xbf16, #tpu.memory_space<vmem>>, %arg10: memref<1x16x128xbf16, #tpu.memory_space<vmem>>, %arg11: memref<1x16x128xbf16, #tpu.memory_space<vmem>>, %arg12: memref<1x1x128xf32, #tpu.memory_space<vmem>>) attributes {dimension_semantics = [#tpu.dimension_semantics<parallel>], iteration_bounds = array<i64: 2>, scalar_prefetch = 0 : i64, scratch_operands = 0 : i64, tpu.core_type = #tpu.core_type<tc>, window_params = [{transform_indices = @transform_0, window_bounds = array<i64: 1>}, {transform_indices = @transform_1, window_bounds = array<i64: 1, 17, 128>}, {transform_indices = @transform_2, window_bounds = array<i64: 1, 16, 128>}, {transform_indices = @transform_3, window_bounds = array<i64: 1, 16, 128>}, {pipeline_mode = #tpu.pipeline_mode<synchronous>, transform_indices = @transform_4, window_bounds = array<i64: 128, 128>}, {pipeline_mode = #tpu.pipeline_mode<synchronous>, transform_indices = @transform_5, window_bounds = array<i64: 1, 128>}, {pipeline_mode = #tpu.pipeline_mode<synchronous>, transform_indices = @transform_6, window_bounds = array<i64: 128, 128>}, {pipeline_mode = #tpu.pipeline_mode<synchronous>, transform_indices = @transform_7, window_bounds = array<i64: 1, 128>}, {pipeline_mode = #tpu.pipeline_mode<synchronous>, transform_indices = @transform_8, window_bounds = array<i64: 128, 256>}, {transform_indices = @transform_9, window_bounds = array<i64: 1, 16, 128>}, {transform_indices = @transform_10, window_bounds = array<i64: 1, 16, 128>}, {transform_indices = @transform_11, window_bounds = array<i64: 1, 1, 128>}]} {
    %c0 = arith.constant 0 : index
    %0 = memref.load %arg1[%c0] : memref<1xf32, #tpu.memory_space<smem>>
    %c0_0 = arith.constant 0 : index
    %c0_1 = arith.constant 0 : index
    %c0_2 = arith.constant 0 : index
    %1 = vector.load %arg2[%c0_0, %c0_1, %c0_2] : memref<1x17x128xbf16, #tpu.memory_space<vmem>>, vector<1x17x128xbf16>
    %2 = vector.shape_cast %1 : vector<1x17x128xbf16> to vector<17x128xbf16>
    %3 = vector.extract_strided_slice %2 {offsets = [1, 0], sizes = [16, 128], strides = [1, 1]} : vector<17x128xbf16> to vector<16x128xbf16>
    %4 = arith.extf %3 : vector<16x128xbf16> to vector<16x128xf32>
    %c0_3 = arith.constant 0 : index
    %c0_4 = arith.constant 0 : index
    %c0_5 = arith.constant 0 : index
    %5 = vector.load %arg3[%c0_3, %c0_4, %c0_5] : memref<1x16x128xbf16, #tpu.memory_space<vmem>>, vector<1x16x128xbf16>
    %6 = vector.shape_cast %5 : vector<1x16x128xbf16> to vector<16x128xbf16>
    %7 = arith.extf %6 : vector<16x128xbf16> to vector<16x128xf32>
    %8 = vector.broadcast %0 : f32 to vector<16x128xf32>
    %9 = arith.mulf %8, %7 : vector<16x128xf32>
    %cst = arith.constant 1.000000e+00 : f32
    %10 = arith.subf %cst, %0 : f32
    %11 = vector.broadcast %10 : f32 to vector<16x128xf32>
    %12 = arith.mulf %11, %4 : vector<16x128xf32>
    %13 = arith.addf %9, %12 : vector<16x128xf32>
    %14 = arith.truncf %13 : vector<16x128xf32> to vector<16x128xbf16>
    %c0_6 = arith.constant 0 : index
    %c0_7 = arith.constant 0 : index
    %15 = vector.load %arg5[%c0_6, %c0_7] : memref<128x128xbf16, #tpu.memory_space<vmem>>, vector<128x128xbf16>
    %cst_8 = arith.constant dense<0.000000e+00> : vector<16x128xf32>
    %16 = tpu.matmul %14, %15, %cst_8 {dimension_numbers = #tpu.dot_dimension_numbers<[1], [0], [0], [1], [0, 0, 1, 1], [], []>} : vector<16x128xbf16>, vector<128x128xbf16>, vector<16x128xf32> -> vector<16x128xf32>
    %c0_9 = arith.constant 0 : index
    %c0_10 = arith.constant 0 : index
    %17 = vector.load %arg6[%c0_9, %c0_10] : memref<1x128xf32, #tpu.memory_space<vmem>>, vector<1x128xf32>
    %18 = vector.broadcast %17 : vector<1x128xf32> to vector<16x128xf32>
    %19 = arith.addf %16, %18 : vector<16x128xf32>
    %20 = arith.negf %19 : vector<16x128xf32>
    %21 = math.exp %20 : vector<16x128xf32>
    %cst_11 = arith.constant 1.000000e+00 : f32
    %22 = vector.broadcast %cst_11 : f32 to vector<16x128xf32>
    %23 = arith.addf %22, %21 : vector<16x128xf32>
    %24 = arith.divf %22, %23 : vector<16x128xf32>
    %25 = arith.mulf %19, %24 : vector<16x128xf32>
    %26 = arith.truncf %25 : vector<16x128xf32> to vector<16x128xbf16>
    %c0_12 = arith.constant 0 : index
    %c0_13 = arith.constant 0 : index
    %27 = vector.load %arg7[%c0_12, %c0_13] : memref<128x128xbf16, #tpu.memory_space<vmem>>, vector<128x128xbf16>
    %cst_14 = arith.constant dense<0.000000e+00> : vector<16x128xf32>
    %28 = tpu.matmul %26, %27, %cst_14 {dimension_numbers = #tpu.dot_dimension_numbers<[1], [0], [0], [1], [0, 0, 1, 1], [], []>} : vector<16x128xbf16>, vector<128x128xbf16>, vector<16x128xf32> -> vector<16x128xf32>
    %29 = arith.addf %13, %28 : vector<16x128xf32>
    %c0_15 = arith.constant 0 : index
    %c0_16 = arith.constant 0 : index
    %30 = vector.load %arg8[%c0_15, %c0_16] : memref<1x128xf32, #tpu.memory_space<vmem>>, vector<1x128xf32>
    %31 = vector.broadcast %30 : vector<1x128xf32> to vector<16x128xf32>
    %32 = arith.addf %29, %31 : vector<16x128xf32>
    %33 = arith.truncf %32 : vector<16x128xf32> to vector<16x128xbf16>
    %c0_17 = arith.constant 0 : index
    %c0_18 = arith.constant 0 : index
    %c0_19 = arith.constant 0 : index
    %34 = vector.load %arg10[%c0_17, %c0_18, %c0_19] : memref<1x16x128xbf16, #tpu.memory_space<vmem>>, vector<1x16x128xbf16>
    %35 = vector.shape_cast %34 : vector<1x16x128xbf16> to vector<16x128xbf16>
    %36 = vector.shape_cast %33 : vector<16x128xbf16> to vector<1x16x128xbf16>
    tpu.vector_store %arg10[%c0_17, %c0_18, %c0_19], %36 {strides = array<i32>} : memref<1x16x128xbf16, #tpu.memory_space<vmem>>, vector<1x16x128xbf16>,
    %37 = arith.truncf %32 : vector<16x128xf32> to vector<16x128xbf16>
    %c0_20 = arith.constant 0 : index
    %c0_21 = arith.constant 0 : index
    %38 = vector.load %arg9[%c0_20, %c0_21] : memref<128x256xbf16, #tpu.memory_space<vmem>>, vector<128x256xbf16>
    %cst_22 = arith.constant dense<0.000000e+00> : vector<16x256xf32>
    %39 = tpu.matmul %37, %38, %cst_22 {dimension_numbers = #tpu.dot_dimension_numbers<[1], [0], [0], [1], [0, 0, 1, 1], [], []>} : vector<16x128xbf16>, vector<128x256xbf16>, vector<16x256xf32> -> vector<16x256xf32>
    %40 = vector.extract_strided_slice %39 {offsets = [0, 0], sizes = [16, 128], strides = [1, 1]} : vector<16x256xf32> to vector<16x128xf32>
    %41 = vector.extract_strided_slice %39 {offsets = [0, 128], sizes = [16, 128], strides = [1, 1]} : vector<16x256xf32> to vector<16x128xf32>
    %42 = arith.truncf %40 : vector<16x128xf32> to vector<16x128xbf16>
    %c0_23 = arith.constant 0 : index
    %c0_24 = arith.constant 0 : index
    %c0_25 = arith.constant 0 : index
    %43 = vector.load %arg11[%c0_23, %c0_24, %c0_25] : memref<1x16x128xbf16, #tpu.memory_space<vmem>>, vector<1x16x128xbf16>
    %44 = vector.shape_cast %43 : vector<1x16x128xbf16> to vector<16x128xbf16>
    %45 = vector.shape_cast %42 : vector<16x128xbf16> to vector<1x16x128xbf16>
    tpu.vector_store %arg11[%c0_23, %c0_24, %c0_25], %45 {strides = array<i32>} : memref<1x16x128xbf16, #tpu.memory_space<vmem>>, vector<1x16x128xbf16>,
    %c0_26 = arith.constant 0 : index
    %c0_27 = arith.constant 0 : index
    %c0_28 = arith.constant 0 : index
    %46 = vector.load %arg4[%c0_26, %c0_27, %c0_28] : memref<1x16x128xbf16, #tpu.memory_space<vmem>>, vector<1x16x128xbf16>
    %47 = vector.shape_cast %46 : vector<1x16x128xbf16> to vector<16x128xbf16>
    %48 = arith.extf %47 : vector<16x128xbf16> to vector<16x128xf32>
    %49 = arith.mulf %48, %41 : vector<16x128xf32>
    %cst_29 = arith.constant dense<0.000000e+00> : vector<128xf32>
    %50 = vector.multi_reduction <add>, %49, %cst_29 [0] : vector<16x128xf32> to vector<128xf32>
    %51 = vector.shape_cast %50 : vector<128xf32> to vector<1x128xf32>
    %c0_30 = arith.constant 0 : index
    %c0_31 = arith.constant 0 : index
    %c0_32 = arith.constant 0 : index
    %52 = vector.load %arg12[%c0_30, %c0_31, %c0_32] : memref<1x1x128xf32, #tpu.memory_space<vmem>>, vector<1x1x128xf32>
    %53 = vector.shape_cast %52 : vector<1x1x128xf32> to vector<1x128xf32>
    %54 = vector.shape_cast %51 : vector<1x128xf32> to vector<1x1x128xf32>
    tpu.vector_store %arg12[%c0_30, %c0_31, %c0_32], %54 {strides = array<i32>} : memref<1x1x128xf32, #tpu.memory_space<vmem>>, vector<1x1x128xf32>,
    return
  }
  func.func @transform_0(%arg0: i32) -> i32 {
    %c0_i32 = arith.constant 0 : i32
    %c0_i32_0 = arith.constant 0 : i32
    return %c0_i32 : i32
  }
  func.func @transform_1(%arg0: i32) -> (i32, i32, i32) {
    %c0_i32 = arith.constant 0 : i32
    %c0_i32_0 = arith.constant 0 : i32
    %c0_i32_1 = arith.constant 0 : i32
    return %arg0, %c0_i32, %c0_i32_0 : i32, i32, i32
  }
  func.func @transform_2(%arg0: i32) -> (i32, i32, i32) {
    %c0_i32 = arith.constant 0 : i32
    %c0_i32_0 = arith.constant 0 : i32
    %c0_i32_1 = arith.constant 0 : i32
    return %arg0, %c0_i32, %c0_i32_0 : i32, i32, i32
  }
  func.func @transform_3(%arg0: i32) -> (i32, i32, i32) {
    %c0_i32 = arith.constant 0 : i32
    %c0_i32_0 = arith.constant 0 : i32
    %c0_i32_1 = arith.constant 0 : i32
    return %arg0, %c0_i32, %c0_i32_0 : i32, i32, i32
  }
  func.func @transform_4(%arg0: i32) -> (i32, i32) {
    %c0_i32 = arith.constant 0 : i32
    %c0_i32_0 = arith.constant 0 : i32
    %c0_i32_1 = arith.constant 0 : i32
    return %c0_i32, %c0_i32_0 : i32, i32
  }
  func.func @transform_5(%arg0: i32) -> (i32, i32) {
    %c0_i32 = arith.constant 0 : i32
    %c0_i32_0 = arith.constant 0 : i32
    %c0_i32_1 = arith.constant 0 : i32
    return %c0_i32, %c0_i32_0 : i32, i32
  }
  func.func @transform_6(%arg0: i32) -> (i32, i32) {
    %c0_i32 = arith.constant 0 : i32
    %c0_i32_0 = arith.constant 0 : i32
    %c0_i32_1 = arith.constant 0 : i32
    return %c0_i32, %c0_i32_0 : i32, i32
  }
  func.func @transform_7(%arg0: i32) -> (i32, i32) {
    %c0_i32 = arith.constant 0 : i32
    %c0_i32_0 = arith.constant 0 : i32
    %c0_i32_1 = arith.constant 0 : i32
    return %c0_i32, %c0_i32_0 : i32, i32
  }
  func.func @transform_8(%arg0: i32) -> (i32, i32) {
    %c0_i32 = arith.constant 0 : i32
    %c0_i32_0 = arith.constant 0 : i32
    %c0_i32_1 = arith.constant 0 : i32
    return %c0_i32, %c0_i32_0 : i32, i32
  }
  func.func @transform_9(%arg0: i32) -> (i32, i32, i32) {
    %c0_i32 = arith.constant 0 : i32
    %c0_i32_0 = arith.constant 0 : i32
    %c0_i32_1 = arith.constant 0 : i32
    return %arg0, %c0_i32, %c0_i32_0 : i32, i32, i32
  }
  func.func @transform_10(%arg0: i32) -> (i32, i32, i32) {
    %c0_i32 = arith.constant 0 : i32
    %c0_i32_0 = arith.constant 0 : i32
    %c0_i32_1 = arith.constant 0 : i32
    return %arg0, %c0_i32, %c0_i32_0 : i32, i32, i32
  }
  func.func @transform_11(%arg0: i32) -> (i32, i32, i32) {
    %c0_i32 = arith.constant 0 : i32
    %c0_i32_0 = arith.constant 0 : i32
    %c0_i32_1 = arith.constant 0 : i32
    return %arg0, %c0_i32, %c0_i32_0 : i32, i32, i32
  }
}

module attributes {stable_mosaic.version = 11 : i64} {
  func.func @_stage_b_kernel(%arg0: i32, %arg1: memref<1xf32, #tpu.memory_space<smem>>, %arg2: memref<1x17x128xbf16, #tpu.memory_space<vmem>>, %arg3: memref<1x16x128xbf16, #tpu.memory_space<vmem>>, %arg4: memref<128x256xbf16, #tpu.memory_space<vmem>>, %arg5: memref<1x128xf32, #tpu.memory_space<vmem>>, %arg6: memref<1x128xf32, #tpu.memory_space<vmem>>, %arg7: memref<1x128xf32, #tpu.memory_space<vmem>>, %arg8: memref<1x128xf32, #tpu.memory_space<vmem>>, %arg9: memref<1x128xf32, #tpu.memory_space<vmem>>, %arg10: memref<128x384xbf16, #tpu.memory_space<vmem>>, %arg11: memref<1x384xf32, #tpu.memory_space<vmem>>, %arg12: memref<128x128xbf16, #tpu.memory_space<vmem>>, %arg13: memref<1x128xf32, #tpu.memory_space<vmem>>, %arg14: memref<1x128xf32, #tpu.memory_space<vmem>>, %arg15: memref<1x128xf32, #tpu.memory_space<vmem>>, %arg16: memref<128x512xbf16, #tpu.memory_space<vmem>>, %arg17: memref<1x512xf32, #tpu.memory_space<vmem>>, %arg18: memref<512x128xbf16, #tpu.memory_space<vmem>>, %arg19: memref<1x128xf32, #tpu.memory_space<vmem>>, %arg20: memref<1x17x128xbf16, #tpu.memory_space<vmem>>) attributes {dimension_semantics = [#tpu.dimension_semantics<parallel>], iteration_bounds = array<i64: 2>, scalar_prefetch = 0 : i64, scratch_operands = 0 : i64, tpu.core_type = #tpu.core_type<tc>, window_params = [{transform_indices = @transform_0, window_bounds = array<i64: 1>}, {transform_indices = @transform_1, window_bounds = array<i64: 1, 17, 128>}, {transform_indices = @transform_2, window_bounds = array<i64: 1, 16, 128>}, {pipeline_mode = #tpu.pipeline_mode<synchronous>, transform_indices = @transform_3, window_bounds = array<i64: 128, 256>}, {pipeline_mode = #tpu.pipeline_mode<synchronous>, transform_indices = @transform_4, window_bounds = array<i64: 1, 128>}, {pipeline_mode = #tpu.pipeline_mode<synchronous>, transform_indices = @transform_5, window_bounds = array<i64: 1, 128>}, {pipeline_mode = #tpu.pipeline_mode<synchronous>, transform_indices = @transform_6, window_bounds = array<i64: 1, 128>}, {pipeline_mode = #tpu.pipeline_mode<synchronous>, transform_indices = @transform_7, window_bounds = array<i64: 1, 128>}, {pipeline_mode = #tpu.pipeline_mode<synchronous>, transform_indices = @transform_8, window_bounds = array<i64: 1, 128>}, {pipeline_mode = #tpu.pipeline_mode<synchronous>, transform_indices = @transform_9, window_bounds = array<i64: 128, 384>}, {pipeline_mode = #tpu.pipeline_mode<synchronous>, transform_indices = @transform_10, window_bounds = array<i64: 1, 384>}, {pipeline_mode = #tpu.pipeline_mode<synchronous>, transform_indices = @transform_11, window_bounds = array<i64: 128, 128>}, {pipeline_mode = #tpu.pipeline_mode<synchronous>, transform_indices = @transform_12, window_bounds = array<i64: 1, 128>}, {pipeline_mode = #tpu.pipeline_mode<synchronous>, transform_indices = @transform_13, window_bounds = array<i64: 1, 128>}, {pipeline_mode = #tpu.pipeline_mode<synchronous>, transform_indices = @transform_14, window_bounds = array<i64: 1, 128>}, {pipeline_mode = #tpu.pipeline_mode<synchronous>, transform_indices = @transform_15, window_bounds = array<i64: 128, 512>}, {pipeline_mode = #tpu.pipeline_mode<synchronous>, transform_indices = @transform_16, window_bounds = array<i64: 1, 512>}, {pipeline_mode = #tpu.pipeline_mode<synchronous>, transform_indices = @transform_17, window_bounds = array<i64: 512, 128>}, {pipeline_mode = #tpu.pipeline_mode<synchronous>, transform_indices = @transform_18, window_bounds = array<i64: 1, 128>}, {transform_indices = @transform_19, window_bounds = array<i64: 1, 17, 128>}]} {
    %c0 = arith.constant 0 : index
    %c0_0 = arith.constant 0 : index
    %c0_1 = arith.constant 0 : index
    %0 = vector.load %arg2[%c0, %c0_0, %c0_1] : memref<1x17x128xbf16, #tpu.memory_space<vmem>>, vector<1x17x128xbf16>
    %1 = vector.shape_cast %0 : vector<1x17x128xbf16> to vector<17x128xbf16>
    %2 = arith.extf %1 : vector<17x128xbf16> to vector<17x128xf32>
    %c0_2 = arith.constant 0 : index
    %c0_3 = arith.constant 0 : index
    %c0_4 = arith.constant 0 : index
    %3 = vector.load %arg3[%c0_2, %c0_3, %c0_4] : memref<1x16x128xbf16, #tpu.memory_space<vmem>>, vector<1x16x128xbf16>
    %4 = vector.shape_cast %3 : vector<1x16x128xbf16> to vector<16x128xbf16>
    %c0_5 = arith.constant 0 : index
    %5 = memref.load %arg1[%c0_5] : memref<1xf32, #tpu.memory_space<smem>>
    %6 = arith.extf %4 : vector<16x128xbf16> to vector<16x128xf32>
    %7 = vector.broadcast %5 : f32 to vector<16x128xf32>
    %8 = arith.mulf %7, %6 : vector<16x128xf32>
    %9 = arith.truncf %8 : vector<16x128xf32> to vector<16x128xbf16>
    %c0_6 = arith.constant 0 : index
    %c0_7 = arith.constant 0 : index
    %10 = vector.load %arg4[%c0_6, %c0_7] : memref<128x256xbf16, #tpu.memory_space<vmem>>, vector<128x256xbf16>
    %cst = arith.constant dense<0.000000e+00> : vector<16x256xf32>
    %11 = tpu.matmul %9, %10, %cst {dimension_numbers = #tpu.dot_dimension_numbers<[1], [0], [0], [1], [0, 0, 1, 1], [], []>} : vector<16x128xbf16>, vector<128x256xbf16>, vector<16x256xf32> -> vector<16x256xf32>
    %12 = vector.extract_strided_slice %11 {offsets = [0, 0], sizes = [16, 128], strides = [1, 1]} : vector<16x256xf32> to vector<16x128xf32>
    %13 = vector.extract_strided_slice %11 {offsets = [0, 128], sizes = [16, 128], strides = [1, 1]} : vector<16x256xf32> to vector<16x128xf32>
    %14 = vector.shape_cast %4 : vector<16x128xbf16> to vector<16x4x32xbf16>
    %15 = tpu.transpose %14, [1, 0, 2] : vector<16x4x32xbf16> -> vector<4x16x32xbf16>
    %16 = arith.truncf %12 : vector<16x128xf32> to vector<16x128xbf16>
    %17 = vector.shape_cast %16 : vector<16x128xbf16> to vector<16x4x32xbf16>
    %18 = tpu.transpose %17, [1, 0, 2] : vector<16x4x32xbf16> -> vector<4x16x32xbf16>
    %19 = arith.truncf %13 : vector<16x128xf32> to vector<16x128xbf16>
    %20 = vector.shape_cast %19 : vector<16x128xbf16> to vector<16x4x32xbf16>
    %21 = tpu.transpose %20, [1, 0, 2] : vector<16x4x32xbf16> -> vector<4x16x32xbf16>
    "tpu.trace_start"() <{level = 10 : i32, message = "hqd,hkd->hqk"}> : () -> ()
    %cst_8 = arith.constant dense<0.000000e+00> : vector<4x16x16xf32>
    %22 = tpu.matmul %15, %18, %cst_8 {dimension_numbers = #tpu.dot_dimension_numbers<[2], [2], [1], [1], [0, 0, 0, 1, 1, 1], [0], [0]>} : vector<4x16x32xbf16>, vector<4x16x32xbf16>, vector<4x16x16xf32> -> vector<4x16x16xf32>
    "tpu.trace_stop"() : () -> ()
    %cst_9 = arith.constant 0.176776692 : f32
    %23 = vector.broadcast %cst_9 : f32 to vector<4x16x16xf32>
    %24 = arith.mulf %22, %23 : vector<4x16x16xf32>
    %cst_10 = arith.constant dense<0xFF800000> : vector<4x16xf32>
    %25 = vector.multi_reduction <maximumf>, %24, %cst_10 [2] : vector<4x16x16xf32> to vector<4x16xf32>
    %26 = vector.shape_cast %25 : vector<4x16xf32> to vector<4x16x1xf32>
    %27 = vector.broadcast %26 : vector<4x16x1xf32> to vector<4x16x16xf32>
    %28 = arith.subf %24, %27 : vector<4x16x16xf32>
    %29 = math.exp %28 : vector<4x16x16xf32>
    %cst_11 = arith.constant dense<0.000000e+00> : vector<4x16xf32>
    %30 = vector.multi_reduction <add>, %29, %cst_11 [2] : vector<4x16x16xf32> to vector<4x16xf32>
    %31 = vector.shape_cast %30 : vector<4x16xf32> to vector<4x16x1xf32>
    %32 = tpu.reciprocal %31 {approx = true} : vector<4x16x1xf32> -> vector<4x16x1xf32>
    %33 = vector.broadcast %32 : vector<4x16x1xf32> to vector<4x16x16xf32>
    %34 = arith.mulf %29, %33 : vector<4x16x16xf32>
    %35 = arith.truncf %34 : vector<4x16x16xf32> to vector<4x16x16xbf16>
    "tpu.trace_start"() <{level = 10 : i32, message = "hqk,hkd->hqd"}> : () -> ()
    %cst_12 = arith.constant dense<0.000000e+00> : vector<4x16x32xf32>
    %36 = tpu.matmul %35, %21, %cst_12 {dimension_numbers = #tpu.dot_dimension_numbers<[2], [1], [1], [2], [0, 0, 0, 1, 1, 2], [0], [0]>} : vector<4x16x16xbf16>, vector<4x16x32xbf16>, vector<4x16x32xf32> -> vector<4x16x32xf32>
    "tpu.trace_stop"() : () -> ()
    %37 = tpu.transpose %36, [1, 0, 2] : vector<4x16x32xf32> -> vector<16x4x32xf32>
    %38 = vector.shape_cast %37 : vector<16x4x32xf32> to vector<16x128xf32>
    %c0_13 = arith.constant 0 : index
    %c0_14 = arith.constant 0 : index
    %39 = vector.load %arg5[%c0_13, %c0_14] : memref<1x128xf32, #tpu.memory_space<vmem>>, vector<1x128xf32>
    %40 = vector.broadcast %39 : vector<1x128xf32> to vector<16x128xf32>
    %41 = arith.mulf %38, %40 : vector<16x128xf32>
    %c0_15 = arith.constant 0 : index
    %c0_16 = arith.constant 0 : index
    %42 = vector.load %arg6[%c0_15, %c0_16] : memref<1x128xf32, #tpu.memory_space<vmem>>, vector<1x128xf32>
    %c0_17 = arith.constant 0 : index
    %c0_18 = arith.constant 0 : index
    %43 = vector.load %arg7[%c0_17, %c0_18] : memref<1x128xf32, #tpu.memory_space<vmem>>, vector<1x128xf32>
    %cst_19 = arith.constant dense<0.000000e+00> : vector<16xf32>
    %44 = vector.multi_reduction <add>, %41, %cst_19 [1] : vector<16x128xf32> to vector<16xf32>
    %45 = vector.shape_cast %44 : vector<16xf32> to vector<16x1xf32>
    %cst_20 = arith.constant 1.280000e+02 : f32
    %46 = vector.broadcast %cst_20 : f32 to vector<16x1xf32>
    %47 = arith.divf %45, %46 : vector<16x1xf32>
    %48 = vector.broadcast %47 : vector<16x1xf32> to vector<16x128xf32>
    %49 = arith.subf %41, %48 : vector<16x128xf32>
    %50 = arith.mulf %49, %49 : vector<16x128xf32>
    %cst_21 = arith.constant dense<0.000000e+00> : vector<16xf32>
    %51 = vector.multi_reduction <add>, %50, %cst_21 [1] : vector<16x128xf32> to vector<16xf32>
    %52 = vector.shape_cast %51 : vector<16xf32> to vector<16x1xf32>
    %cst_22 = arith.constant 1.280000e+02 : f32
    %53 = vector.broadcast %cst_22 : f32 to vector<16x1xf32>
    %54 = arith.divf %52, %53 : vector<16x1xf32>
    %55 = vector.broadcast %47 : vector<16x1xf32> to vector<16x128xf32>
    %56 = arith.subf %41, %55 : vector<16x128xf32>
    %cst_23 = arith.constant 9.99999974E-6 : f32
    %57 = vector.broadcast %cst_23 : f32 to vector<16x1xf32>
    %58 = arith.addf %54, %57 : vector<16x1xf32>
    %59 = math.rsqrt %58 : vector<16x1xf32>
    %60 = vector.broadcast %59 : vector<16x1xf32> to vector<16x128xf32>
    %61 = arith.mulf %56, %60 : vector<16x128xf32>
    %62 = vector.broadcast %42 : vector<1x128xf32> to vector<16x128xf32>
    %63 = arith.mulf %61, %62 : vector<16x128xf32>
    %64 = vector.broadcast %43 : vector<1x128xf32> to vector<16x128xf32>
    %65 = arith.addf %63, %64 : vector<16x128xf32>
    %cst_24 = arith.constant 0.000000e+00 : f32
    %66 = vector.broadcast %cst_24 : f32 to vector<1x128xf32>
    %67 = tpu.concatenate %66, %65 in 0 : vector<1x128xf32>, vector<16x128xf32> -> vector<17x128xf32>
    %68 = arith.addf %2, %67 : vector<17x128xf32>
    %c0_25 = arith.constant 0 : index
    %c0_26 = arith.constant 0 : index
    %69 = vector.load %arg8[%c0_25, %c0_26] : memref<1x128xf32, #tpu.memory_space<vmem>>, vector<1x128xf32>
    %c0_27 = arith.constant 0 : index
    %c0_28 = arith.constant 0 : index
    %70 = vector.load %arg9[%c0_27, %c0_28] : memref<1x128xf32, #tpu.memory_space<vmem>>, vector<1x128xf32>
    %cst_29 = arith.constant dense<0.000000e+00> : vector<17xf32>
    %71 = vector.multi_reduction <add>, %68, %cst_29 [1] : vector<17x128xf32> to vector<17xf32>
    %72 = vector.shape_cast %71 : vector<17xf32> to vector<17x1xf32>
    %cst_30 = arith.constant 1.280000e+02 : f32
    %73 = vector.broadcast %cst_30 : f32 to vector<17x1xf32>
    %74 = arith.divf %72, %73 : vector<17x1xf32>
    %75 = vector.broadcast %74 : vector<17x1xf32> to vector<17x128xf32>
    %76 = arith.subf %68, %75 : vector<17x128xf32>
    %77 = arith.mulf %76, %76 : vector<17x128xf32>
    %cst_31 = arith.constant dense<0.000000e+00> : vector<17xf32>
    %78 = vector.multi_reduction <add>, %77, %cst_31 [1] : vector<17x128xf32> to vector<17xf32>
    %79 = vector.shape_cast %78 : vector<17xf32> to vector<17x1xf32>
    %cst_32 = arith.constant 1.280000e+02 : f32
    %80 = vector.broadcast %cst_32 : f32 to vector<17x1xf32>
    %81 = arith.divf %79, %80 : vector<17x1xf32>
    %82 = vector.broadcast %74 : vector<17x1xf32> to vector<17x128xf32>
    %83 = arith.subf %68, %82 : vector<17x128xf32>
    %cst_33 = arith.constant 9.99999997E-7 : f32
    %84 = vector.broadcast %cst_33 : f32 to vector<17x1xf32>
    %85 = arith.addf %81, %84 : vector<17x1xf32>
    %86 = math.rsqrt %85 : vector<17x1xf32>
    %87 = vector.broadcast %86 : vector<17x1xf32> to vector<17x128xf32>
    %88 = arith.mulf %83, %87 : vector<17x128xf32>
    %89 = vector.broadcast %69 : vector<1x128xf32> to vector<17x128xf32>
    %90 = arith.mulf %88, %89 : vector<17x128xf32>
    %91 = vector.broadcast %70 : vector<1x128xf32> to vector<17x128xf32>
    %92 = arith.addf %90, %91 : vector<17x128xf32>
    %93 = arith.truncf %92 : vector<17x128xf32> to vector<17x128xbf16>
    %c0_34 = arith.constant 0 : index
    %c0_35 = arith.constant 0 : index
    %94 = vector.load %arg10[%c0_34, %c0_35] : memref<128x384xbf16, #tpu.memory_space<vmem>>, vector<128x384xbf16>
    %cst_36 = arith.constant dense<0.000000e+00> : vector<17x384xf32>
    %95 = tpu.matmul %93, %94, %cst_36 {dimension_numbers = #tpu.dot_dimension_numbers<[1], [0], [0], [1], [0, 0, 1, 1], [], []>} : vector<17x128xbf16>, vector<128x384xbf16>, vector<17x384xf32> -> vector<17x384xf32>
    %c0_37 = arith.constant 0 : index
    %c0_38 = arith.constant 0 : index
    %96 = vector.load %arg11[%c0_37, %c0_38] : memref<1x384xf32, #tpu.memory_space<vmem>>, vector<1x384xf32>
    %97 = vector.broadcast %96 : vector<1x384xf32> to vector<17x384xf32>
    %98 = arith.addf %95, %97 : vector<17x384xf32>
    %99 = vector.extract_strided_slice %98 {offsets = [0, 0], sizes = [17, 128], strides = [1, 1]} : vector<17x384xf32> to vector<17x128xf32>
    %100 = vector.extract_strided_slice %98 {offsets = [0, 128], sizes = [17, 128], strides = [1, 1]} : vector<17x384xf32> to vector<17x128xf32>
    %101 = vector.extract_strided_slice %98 {offsets = [0, 256], sizes = [17, 128], strides = [1, 1]} : vector<17x384xf32> to vector<17x128xf32>
    %102 = arith.truncf %99 : vector<17x128xf32> to vector<17x128xbf16>
    %103 = vector.shape_cast %102 : vector<17x128xbf16> to vector<17x4x32xbf16>
    %104 = tpu.transpose %103, [1, 0, 2] : vector<17x4x32xbf16> -> vector<4x17x32xbf16>
    %105 = arith.truncf %100 : vector<17x128xf32> to vector<17x128xbf16>
    %106 = vector.shape_cast %105 : vector<17x128xbf16> to vector<17x4x32xbf16>
    %107 = tpu.transpose %106, [1, 0, 2] : vector<17x4x32xbf16> -> vector<4x17x32xbf16>
    %108 = arith.truncf %101 : vector<17x128xf32> to vector<17x128xbf16>
    %109 = vector.shape_cast %108 : vector<17x128xbf16> to vector<17x4x32xbf16>
    %110 = tpu.transpose %109, [1, 0, 2] : vector<17x4x32xbf16> -> vector<4x17x32xbf16>
    "tpu.trace_start"() <{level = 10 : i32, message = "hqd,hkd->hqk"}> : () -> ()
    %cst_39 = arith.constant dense<0.000000e+00> : vector<4x17x17xf32>
    %111 = tpu.matmul %104, %107, %cst_39 {dimension_numbers = #tpu.dot_dimension_numbers<[2], [2], [1], [1], [0, 0, 0, 1, 1, 1], [0], [0]>} : vector<4x17x32xbf16>, vector<4x17x32xbf16>, vector<4x17x17xf32> -> vector<4x17x17xf32>
    "tpu.trace_stop"() : () -> ()
    %cst_40 = arith.constant 0.176776692 : f32
    %112 = vector.broadcast %cst_40 : f32 to vector<4x17x17xf32>
    %113 = arith.mulf %111, %112 : vector<4x17x17xf32>
    %cst_41 = arith.constant dense<0xFF800000> : vector<4x17xf32>
    %114 = vector.multi_reduction <maximumf>, %113, %cst_41 [2] : vector<4x17x17xf32> to vector<4x17xf32>
    %115 = vector.shape_cast %114 : vector<4x17xf32> to vector<4x17x1xf32>
    %116 = vector.broadcast %115 : vector<4x17x1xf32> to vector<4x17x17xf32>
    %117 = arith.subf %113, %116 : vector<4x17x17xf32>
    %118 = math.exp %117 : vector<4x17x17xf32>
    %cst_42 = arith.constant dense<0.000000e+00> : vector<4x17xf32>
    %119 = vector.multi_reduction <add>, %118, %cst_42 [2] : vector<4x17x17xf32> to vector<4x17xf32>
    %120 = vector.shape_cast %119 : vector<4x17xf32> to vector<4x17x1xf32>
    %121 = tpu.reciprocal %120 {approx = true} : vector<4x17x1xf32> -> vector<4x17x1xf32>
    %122 = vector.broadcast %121 : vector<4x17x1xf32> to vector<4x17x17xf32>
    %123 = arith.mulf %118, %122 : vector<4x17x17xf32>
    %124 = arith.truncf %123 : vector<4x17x17xf32> to vector<4x17x17xbf16>
    "tpu.trace_start"() <{level = 10 : i32, message = "hqk,hkd->hqd"}> : () -> ()
    %cst_43 = arith.constant dense<0.000000e+00> : vector<4x17x32xf32>
    %125 = tpu.matmul %124, %110, %cst_43 {dimension_numbers = #tpu.dot_dimension_numbers<[2], [1], [1], [2], [0, 0, 0, 1, 1, 2], [0], [0]>} : vector<4x17x17xbf16>, vector<4x17x32xbf16>, vector<4x17x32xf32> -> vector<4x17x32xf32>
    "tpu.trace_stop"() : () -> ()
    %126 = tpu.transpose %125, [1, 0, 2] : vector<4x17x32xf32> -> vector<17x4x32xf32>
    %127 = vector.shape_cast %126 : vector<17x4x32xf32> to vector<17x128xf32>
    %128 = arith.truncf %127 : vector<17x128xf32> to vector<17x128xbf16>
    %c0_44 = arith.constant 0 : index
    %c0_45 = arith.constant 0 : index
    %129 = vector.load %arg12[%c0_44, %c0_45] : memref<128x128xbf16, #tpu.memory_space<vmem>>, vector<128x128xbf16>
    %cst_46 = arith.constant dense<0.000000e+00> : vector<17x128xf32>
    %130 = tpu.matmul %128, %129, %cst_46 {dimension_numbers = #tpu.dot_dimension_numbers<[1], [0], [0], [1], [0, 0, 1, 1], [], []>} : vector<17x128xbf16>, vector<128x128xbf16>, vector<17x128xf32> -> vector<17x128xf32>
    %c0_47 = arith.constant 0 : index
    %c0_48 = arith.constant 0 : index
    %131 = vector.load %arg13[%c0_47, %c0_48] : memref<1x128xf32, #tpu.memory_space<vmem>>, vector<1x128xf32>
    %132 = vector.broadcast %131 : vector<1x128xf32> to vector<17x128xf32>
    %133 = arith.addf %130, %132 : vector<17x128xf32>
    %134 = arith.addf %68, %133 : vector<17x128xf32>
    %c0_49 = arith.constant 0 : index
    %c0_50 = arith.constant 0 : index
    %135 = vector.load %arg14[%c0_49, %c0_50] : memref<1x128xf32, #tpu.memory_space<vmem>>, vector<1x128xf32>
    %c0_51 = arith.constant 0 : index
    %c0_52 = arith.constant 0 : index
    %136 = vector.load %arg15[%c0_51, %c0_52] : memref<1x128xf32, #tpu.memory_space<vmem>>, vector<1x128xf32>
    %cst_53 = arith.constant dense<0.000000e+00> : vector<17xf32>
    %137 = vector.multi_reduction <add>, %134, %cst_53 [1] : vector<17x128xf32> to vector<17xf32>
    %138 = vector.shape_cast %137 : vector<17xf32> to vector<17x1xf32>
    %cst_54 = arith.constant 1.280000e+02 : f32
    %139 = vector.broadcast %cst_54 : f32 to vector<17x1xf32>
    %140 = arith.divf %138, %139 : vector<17x1xf32>
    %141 = vector.broadcast %140 : vector<17x1xf32> to vector<17x128xf32>
    %142 = arith.subf %134, %141 : vector<17x128xf32>
    %143 = arith.mulf %142, %142 : vector<17x128xf32>
    %cst_55 = arith.constant dense<0.000000e+00> : vector<17xf32>
    %144 = vector.multi_reduction <add>, %143, %cst_55 [1] : vector<17x128xf32> to vector<17xf32>
    %145 = vector.shape_cast %144 : vector<17xf32> to vector<17x1xf32>
    %cst_56 = arith.constant 1.280000e+02 : f32
    %146 = vector.broadcast %cst_56 : f32 to vector<17x1xf32>
    %147 = arith.divf %145, %146 : vector<17x1xf32>
    %148 = vector.broadcast %140 : vector<17x1xf32> to vector<17x128xf32>
    %149 = arith.subf %134, %148 : vector<17x128xf32>
    %cst_57 = arith.constant 9.99999997E-7 : f32
    %150 = vector.broadcast %cst_57 : f32 to vector<17x1xf32>
    %151 = arith.addf %147, %150 : vector<17x1xf32>
    %152 = math.rsqrt %151 : vector<17x1xf32>
    %153 = vector.broadcast %152 : vector<17x1xf32> to vector<17x128xf32>
    %154 = arith.mulf %149, %153 : vector<17x128xf32>
    %155 = vector.broadcast %135 : vector<1x128xf32> to vector<17x128xf32>
    %156 = arith.mulf %154, %155 : vector<17x128xf32>
    %157 = vector.broadcast %136 : vector<1x128xf32> to vector<17x128xf32>
    %158 = arith.addf %156, %157 : vector<17x128xf32>
    %159 = arith.truncf %158 : vector<17x128xf32> to vector<17x128xbf16>
    %c0_58 = arith.constant 0 : index
    %c0_59 = arith.constant 0 : index
    %160 = vector.load %arg16[%c0_58, %c0_59] : memref<128x512xbf16, #tpu.memory_space<vmem>>, vector<128x512xbf16>
    %cst_60 = arith.constant dense<0.000000e+00> : vector<17x512xf32>
    %161 = tpu.matmul %159, %160, %cst_60 {dimension_numbers = #tpu.dot_dimension_numbers<[1], [0], [0], [1], [0, 0, 1, 1], [], []>} : vector<17x128xbf16>, vector<128x512xbf16>, vector<17x512xf32> -> vector<17x512xf32>
    %c0_61 = arith.constant 0 : index
    %c0_62 = arith.constant 0 : index
    %162 = vector.load %arg17[%c0_61, %c0_62] : memref<1x512xf32, #tpu.memory_space<vmem>>, vector<1x512xf32>
    %163 = vector.broadcast %162 : vector<1x512xf32> to vector<17x512xf32>
    %164 = arith.addf %161, %163 : vector<17x512xf32>
    %165 = arith.mulf %164, %164 : vector<17x512xf32>
    %166 = arith.mulf %164, %165 : vector<17x512xf32>
    %cst_63 = arith.constant 4.471500e-02 : f32
    %167 = vector.broadcast %cst_63 : f32 to vector<17x512xf32>
    %168 = arith.mulf %167, %166 : vector<17x512xf32>
    %169 = arith.addf %164, %168 : vector<17x512xf32>
    %cst_64 = arith.constant 0.797884583 : f32
    %170 = vector.broadcast %cst_64 : f32 to vector<17x512xf32>
    %171 = arith.mulf %170, %169 : vector<17x512xf32>
    %172 = math.tanh %171 : vector<17x512xf32>
    %cst_65 = arith.constant 1.000000e+00 : f32
    %173 = vector.broadcast %cst_65 : f32 to vector<17x512xf32>
    %174 = arith.addf %173, %172 : vector<17x512xf32>
    %cst_66 = arith.constant 5.000000e-01 : f32
    %175 = vector.broadcast %cst_66 : f32 to vector<17x512xf32>
    %176 = arith.mulf %175, %174 : vector<17x512xf32>
    %177 = arith.mulf %164, %176 : vector<17x512xf32>
    %178 = arith.truncf %177 : vector<17x512xf32> to vector<17x512xbf16>
    %c0_67 = arith.constant 0 : index
    %c0_68 = arith.constant 0 : index
    %179 = vector.load %arg18[%c0_67, %c0_68] : memref<512x128xbf16, #tpu.memory_space<vmem>>, vector<512x128xbf16>
    %cst_69 = arith.constant dense<0.000000e+00> : vector<17x128xf32>
    %180 = tpu.matmul %178, %179, %cst_69 {dimension_numbers = #tpu.dot_dimension_numbers<[1], [0], [0], [1], [0, 0, 1, 1], [], []>} : vector<17x512xbf16>, vector<512x128xbf16>, vector<17x128xf32> -> vector<17x128xf32>
    %c0_70 = arith.constant 0 : index
    %c0_71 = arith.constant 0 : index
    %181 = vector.load %arg19[%c0_70, %c0_71] : memref<1x128xf32, #tpu.memory_space<vmem>>, vector<1x128xf32>
    %182 = vector.broadcast %181 : vector<1x128xf32> to vector<17x128xf32>
    %183 = arith.addf %180, %182 : vector<17x128xf32>
    %184 = arith.addf %134, %183 : vector<17x128xf32>
    %185 = arith.truncf %184 : vector<17x128xf32> to vector<17x128xbf16>
    %c0_72 = arith.constant 0 : index
    %c0_73 = arith.constant 0 : index
    %c0_74 = arith.constant 0 : index
    %186 = vector.load %arg20[%c0_72, %c0_73, %c0_74] : memref<1x17x128xbf16, #tpu.memory_space<vmem>>, vector<1x17x128xbf16>
    %187 = vector.shape_cast %186 : vector<1x17x128xbf16> to vector<17x128xbf16>
    %188 = vector.shape_cast %185 : vector<17x128xbf16> to vector<1x17x128xbf16>
    tpu.vector_store %arg20[%c0_72, %c0_73, %c0_74], %188 {strides = array<i32>} : memref<1x17x128xbf16, #tpu.memory_space<vmem>>, vector<1x17x128xbf16>,
    return
  }
  func.func @transform_0(%arg0: i32) -> i32 {
    %c0_i32 = arith.constant 0 : i32
    %c0_i32_0 = arith.constant 0 : i32
    return %c0_i32 : i32
  }
  func.func @transform_1(%arg0: i32) -> (i32, i32, i32) {
    %c0_i32 = arith.constant 0 : i32
    %c0_i32_0 = arith.constant 0 : i32
    %c0_i32_1 = arith.constant 0 : i32
    return %arg0, %c0_i32, %c0_i32_0 : i32, i32, i32
  }
  func.func @transform_2(%arg0: i32) -> (i32, i32, i32) {
    %c0_i32 = arith.constant 0 : i32
    %c0_i32_0 = arith.constant 0 : i32
    %c0_i32_1 = arith.constant 0 : i32
    return %arg0, %c0_i32, %c0_i32_0 : i32, i32, i32
  }
  func.func @transform_3(%arg0: i32) -> (i32, i32) {
    %c0_i32 = arith.constant 0 : i32
    %c0_i32_0 = arith.constant 0 : i32
    %c0_i32_1 = arith.constant 0 : i32
    return %c0_i32, %c0_i32_0 : i32, i32
  }
  func.func @transform_4(%arg0: i32) -> (i32, i32) {
    %c0_i32 = arith.constant 0 : i32
    %c0_i32_0 = arith.constant 0 : i32
    %c0_i32_1 = arith.constant 0 : i32
    return %c0_i32, %c0_i32_0 : i32, i32
  }
  func.func @transform_5(%arg0: i32) -> (i32, i32) {
    %c0_i32 = arith.constant 0 : i32
    %c0_i32_0 = arith.constant 0 : i32
    %c0_i32_1 = arith.constant 0 : i32
    return %c0_i32, %c0_i32_0 : i32, i32
  }
  func.func @transform_6(%arg0: i32) -> (i32, i32) {
    %c0_i32 = arith.constant 0 : i32
    %c0_i32_0 = arith.constant 0 : i32
    %c0_i32_1 = arith.constant 0 : i32
    return %c0_i32, %c0_i32_0 : i32, i32
  }
  func.func @transform_7(%arg0: i32) -> (i32, i32) {
    %c0_i32 = arith.constant 0 : i32
    %c0_i32_0 = arith.constant 0 : i32
    %c0_i32_1 = arith.constant 0 : i32
    return %c0_i32, %c0_i32_0 : i32, i32
  }
  func.func @transform_8(%arg0: i32) -> (i32, i32) {
    %c0_i32 = arith.constant 0 : i32
    %c0_i32_0 = arith.constant 0 : i32
    %c0_i32_1 = arith.constant 0 : i32
    return %c0_i32, %c0_i32_0 : i32, i32
  }
  func.func @transform_9(%arg0: i32) -> (i32, i32) {
    %c0_i32 = arith.constant 0 : i32
    %c0_i32_0 = arith.constant 0 : i32
    %c0_i32_1 = arith.constant 0 : i32
    return %c0_i32, %c0_i32_0 : i32, i32
  }
  func.func @transform_10(%arg0: i32) -> (i32, i32) {
    %c0_i32 = arith.constant 0 : i32
    %c0_i32_0 = arith.constant 0 : i32
    %c0_i32_1 = arith.constant 0 : i32
    return %c0_i32, %c0_i32_0 : i32, i32
  }
  func.func @transform_11(%arg0: i32) -> (i32, i32) {
    %c0_i32 = arith.constant 0 : i32
    %c0_i32_0 = arith.constant 0 : i32
    %c0_i32_1 = arith.constant 0 : i32
    return %c0_i32, %c0_i32_0 : i32, i32
  }
  func.func @transform_12(%arg0: i32) -> (i32, i32) {
    %c0_i32 = arith.constant 0 : i32
    %c0_i32_0 = arith.constant 0 : i32
    %c0_i32_1 = arith.constant 0 : i32
    return %c0_i32, %c0_i32_0 : i32, i32
  }
  func.func @transform_13(%arg0: i32) -> (i32, i32) {
    %c0_i32 = arith.constant 0 : i32
    %c0_i32_0 = arith.constant 0 : i32
    %c0_i32_1 = arith.constant 0 : i32
    return %c0_i32, %c0_i32_0 : i32, i32
  }
  func.func @transform_14(%arg0: i32) -> (i32, i32) {
    %c0_i32 = arith.constant 0 : i32
    %c0_i32_0 = arith.constant 0 : i32
    %c0_i32_1 = arith.constant 0 : i32
    return %c0_i32, %c0_i32_0 : i32, i32
  }
  func.func @transform_15(%arg0: i32) -> (i32, i32) {
    %c0_i32 = arith.constant 0 : i32
    %c0_i32_0 = arith.constant 0 : i32
    %c0_i32_1 = arith.constant 0 : i32
    return %c0_i32, %c0_i32_0 : i32, i32
  }
  func.func @transform_16(%arg0: i32) -> (i32, i32) {
    %c0_i32 = arith.constant 0 : i32
    %c0_i32_0 = arith.constant 0 : i32
    %c0_i32_1 = arith.constant 0 : i32
    return %c0_i32, %c0_i32_0 : i32, i32
  }
  func.func @transform_17(%arg0: i32) -> (i32, i32) {
    %c0_i32 = arith.constant 0 : i32
    %c0_i32_0 = arith.constant 0 : i32
    %c0_i32_1 = arith.constant 0 : i32
    return %c0_i32, %c0_i32_0 : i32, i32
  }
  func.func @transform_18(%arg0: i32) -> (i32, i32) {
    %c0_i32 = arith.constant 0 : i32
    %c0_i32_0 = arith.constant 0 : i32
    %c0_i32_1 = arith.constant 0 : i32
    return %c0_i32, %c0_i32_0 : i32, i32
  }
  func.func @transform_19(%arg0: i32) -> (i32, i32, i32) {
    %c0_i32 = arith.constant 0 : i32
    %c0_i32_0 = arith.constant 0 : i32
    %c0_i32_1 = arith.constant 0 : i32
    return %arg0, %c0_i32, %c0_i32_0 : i32, i32, i32
  }
}

module attributes {stable_mosaic.version = 11 : i64} {
  func.func @_stage_b_kernel(%arg0: i32, %arg1: memref<2xf32, #tpu.memory_space<smem>>, %arg2: memref<1x17x128xbf16, #tpu.memory_space<vmem>>, %arg3: memref<1x16x128xbf16, #tpu.memory_space<vmem>>, %arg4: memref<1x16x128xbf16, #tpu.memory_space<vmem>>, %arg5: memref<128x256xbf16, #tpu.memory_space<vmem>>, %arg6: memref<1x128xf32, #tpu.memory_space<vmem>>, %arg7: memref<1x128xf32, #tpu.memory_space<vmem>>, %arg8: memref<1x128xf32, #tpu.memory_space<vmem>>, %arg9: memref<1x128xf32, #tpu.memory_space<vmem>>, %arg10: memref<1x128xf32, #tpu.memory_space<vmem>>, %arg11: memref<128x384xbf16, #tpu.memory_space<vmem>>, %arg12: memref<1x384xf32, #tpu.memory_space<vmem>>, %arg13: memref<128x128xbf16, #tpu.memory_space<vmem>>, %arg14: memref<1x128xf32, #tpu.memory_space<vmem>>, %arg15: memref<1x128xf32, #tpu.memory_space<vmem>>, %arg16: memref<1x128xf32, #tpu.memory_space<vmem>>, %arg17: memref<128x512xbf16, #tpu.memory_space<vmem>>, %arg18: memref<1x512xf32, #tpu.memory_space<vmem>>, %arg19: memref<512x128xbf16, #tpu.memory_space<vmem>>, %arg20: memref<1x128xf32, #tpu.memory_space<vmem>>, %arg21: memref<1x17x128xbf16, #tpu.memory_space<vmem>>) attributes {dimension_semantics = [#tpu.dimension_semantics<parallel>], iteration_bounds = array<i64: 2>, scalar_prefetch = 0 : i64, scratch_operands = 0 : i64, tpu.core_type = #tpu.core_type<tc>, window_params = [{transform_indices = @transform_0, window_bounds = array<i64: 2>}, {transform_indices = @transform_1, window_bounds = array<i64: 1, 17, 128>}, {transform_indices = @transform_2, window_bounds = array<i64: 1, 16, 128>}, {transform_indices = @transform_3, window_bounds = array<i64: 1, 16, 128>}, {pipeline_mode = #tpu.pipeline_mode<synchronous>, transform_indices = @transform_4, window_bounds = array<i64: 128, 256>}, {pipeline_mode = #tpu.pipeline_mode<synchronous>, transform_indices = @transform_5, window_bounds = array<i64: 1, 128>}, {pipeline_mode = #tpu.pipeline_mode<synchronous>, transform_indices = @transform_6, window_bounds = array<i64: 1, 128>}, {pipeline_mode = #tpu.pipeline_mode<synchronous>, transform_indices = @transform_7, window_bounds = array<i64: 1, 128>}, {pipeline_mode = #tpu.pipeline_mode<synchronous>, transform_indices = @transform_8, window_bounds = array<i64: 1, 128>}, {pipeline_mode = #tpu.pipeline_mode<synchronous>, transform_indices = @transform_9, window_bounds = array<i64: 1, 128>}, {pipeline_mode = #tpu.pipeline_mode<synchronous>, transform_indices = @transform_10, window_bounds = array<i64: 128, 384>}, {pipeline_mode = #tpu.pipeline_mode<synchronous>, transform_indices = @transform_11, window_bounds = array<i64: 1, 384>}, {pipeline_mode = #tpu.pipeline_mode<synchronous>, transform_indices = @transform_12, window_bounds = array<i64: 128, 128>}, {pipeline_mode = #tpu.pipeline_mode<synchronous>, transform_indices = @transform_13, window_bounds = array<i64: 1, 128>}, {pipeline_mode = #tpu.pipeline_mode<synchronous>, transform_indices = @transform_14, window_bounds = array<i64: 1, 128>}, {pipeline_mode = #tpu.pipeline_mode<synchronous>, transform_indices = @transform_15, window_bounds = array<i64: 1, 128>}, {pipeline_mode = #tpu.pipeline_mode<synchronous>, transform_indices = @transform_16, window_bounds = array<i64: 128, 512>}, {pipeline_mode = #tpu.pipeline_mode<synchronous>, transform_indices = @transform_17, window_bounds = array<i64: 1, 512>}, {pipeline_mode = #tpu.pipeline_mode<synchronous>, transform_indices = @transform_18, window_bounds = array<i64: 512, 128>}, {pipeline_mode = #tpu.pipeline_mode<synchronous>, transform_indices = @transform_19, window_bounds = array<i64: 1, 128>}, {transform_indices = @transform_20, window_bounds = array<i64: 1, 17, 128>}]} {
    %c0 = arith.constant 0 : index
    %c0_0 = arith.constant 0 : index
    %c0_1 = arith.constant 0 : index
    %0 = vector.load %arg2[%c0, %c0_0, %c0_1] : memref<1x17x128xbf16, #tpu.memory_space<vmem>>, vector<1x17x128xbf16>
    %1 = vector.shape_cast %0 : vector<1x17x128xbf16> to vector<17x128xbf16>
    %2 = arith.extf %1 : vector<17x128xbf16> to vector<17x128xf32>
    %c0_2 = arith.constant 0 : index
    %c0_3 = arith.constant 0 : index
    %c0_4 = arith.constant 0 : index
    %3 = vector.load %arg3[%c0_2, %c0_3, %c0_4] : memref<1x16x128xbf16, #tpu.memory_space<vmem>>, vector<1x16x128xbf16>
    %4 = vector.shape_cast %3 : vector<1x16x128xbf16> to vector<16x128xbf16>
    %c0_5 = arith.constant 0 : index
    %5 = memref.load %arg1[%c0_5] : memref<2xf32, #tpu.memory_space<smem>>
    %6 = arith.extf %4 : vector<16x128xbf16> to vector<16x128xf32>
    %7 = vector.broadcast %5 : f32 to vector<16x128xf32>
    %8 = arith.mulf %7, %6 : vector<16x128xf32>
    %c1 = arith.constant 1 : index
    %9 = memref.load %arg1[%c1] : memref<2xf32, #tpu.memory_space<smem>>
    %c0_6 = arith.constant 0 : index
    %c0_7 = arith.constant 0 : index
    %c0_8 = arith.constant 0 : index
    %10 = vector.load %arg4[%c0_6, %c0_7, %c0_8] : memref<1x16x128xbf16, #tpu.memory_space<vmem>>, vector<1x16x128xbf16>
    %11 = vector.shape_cast %10 : vector<1x16x128xbf16> to vector<16x128xbf16>
    %12 = arith.extf %11 : vector<16x128xbf16> to vector<16x128xf32>
    %13 = vector.broadcast %9 : f32 to vector<16x128xf32>
    %14 = arith.mulf %13, %12 : vector<16x128xf32>
    %15 = arith.addf %8, %14 : vector<16x128xf32>
    %16 = arith.truncf %15 : vector<16x128xf32> to vector<16x128xbf16>
    %c0_9 = arith.constant 0 : index
    %c0_10 = arith.constant 0 : index
    %17 = vector.load %arg5[%c0_9, %c0_10] : memref<128x256xbf16, #tpu.memory_space<vmem>>, vector<128x256xbf16>
    %cst = arith.constant dense<0.000000e+00> : vector<16x256xf32>
    %18 = tpu.matmul %16, %17, %cst {dimension_numbers = #tpu.dot_dimension_numbers<[1], [0], [0], [1], [0, 0, 1, 1], [], []>} : vector<16x128xbf16>, vector<128x256xbf16>, vector<16x256xf32> -> vector<16x256xf32>
    %19 = vector.extract_strided_slice %18 {offsets = [0, 0], sizes = [16, 128], strides = [1, 1]} : vector<16x256xf32> to vector<16x128xf32>
    %20 = vector.extract_strided_slice %18 {offsets = [0, 128], sizes = [16, 128], strides = [1, 1]} : vector<16x256xf32> to vector<16x128xf32>
    %21 = vector.shape_cast %4 : vector<16x128xbf16> to vector<16x4x32xbf16>
    %22 = tpu.transpose %21, [1, 0, 2] : vector<16x4x32xbf16> -> vector<4x16x32xbf16>
    %23 = arith.truncf %19 : vector<16x128xf32> to vector<16x128xbf16>
    %24 = vector.shape_cast %23 : vector<16x128xbf16> to vector<16x4x32xbf16>
    %25 = tpu.transpose %24, [1, 0, 2] : vector<16x4x32xbf16> -> vector<4x16x32xbf16>
    %26 = arith.truncf %20 : vector<16x128xf32> to vector<16x128xbf16>
    %27 = vector.shape_cast %26 : vector<16x128xbf16> to vector<16x4x32xbf16>
    %28 = tpu.transpose %27, [1, 0, 2] : vector<16x4x32xbf16> -> vector<4x16x32xbf16>
    "tpu.trace_start"() <{level = 10 : i32, message = "hqd,hkd->hqk"}> : () -> ()
    %cst_11 = arith.constant dense<0.000000e+00> : vector<4x16x16xf32>
    %29 = tpu.matmul %22, %25, %cst_11 {dimension_numbers = #tpu.dot_dimension_numbers<[2], [2], [1], [1], [0, 0, 0, 1, 1, 1], [0], [0]>} : vector<4x16x32xbf16>, vector<4x16x32xbf16>, vector<4x16x16xf32> -> vector<4x16x16xf32>
    "tpu.trace_stop"() : () -> ()
    %cst_12 = arith.constant 0.176776692 : f32
    %30 = vector.broadcast %cst_12 : f32 to vector<4x16x16xf32>
    %31 = arith.mulf %29, %30 : vector<4x16x16xf32>
    %cst_13 = arith.constant dense<0xFF800000> : vector<4x16xf32>
    %32 = vector.multi_reduction <maximumf>, %31, %cst_13 [2] : vector<4x16x16xf32> to vector<4x16xf32>
    %33 = vector.shape_cast %32 : vector<4x16xf32> to vector<4x16x1xf32>
    %34 = vector.broadcast %33 : vector<4x16x1xf32> to vector<4x16x16xf32>
    %35 = arith.subf %31, %34 : vector<4x16x16xf32>
    %36 = math.exp %35 : vector<4x16x16xf32>
    %cst_14 = arith.constant dense<0.000000e+00> : vector<4x16xf32>
    %37 = vector.multi_reduction <add>, %36, %cst_14 [2] : vector<4x16x16xf32> to vector<4x16xf32>
    %38 = vector.shape_cast %37 : vector<4x16xf32> to vector<4x16x1xf32>
    %39 = tpu.reciprocal %38 {approx = true} : vector<4x16x1xf32> -> vector<4x16x1xf32>
    %40 = vector.broadcast %39 : vector<4x16x1xf32> to vector<4x16x16xf32>
    %41 = arith.mulf %36, %40 : vector<4x16x16xf32>
    %42 = arith.truncf %41 : vector<4x16x16xf32> to vector<4x16x16xbf16>
    "tpu.trace_start"() <{level = 10 : i32, message = "hqk,hkd->hqd"}> : () -> ()
    %cst_15 = arith.constant dense<0.000000e+00> : vector<4x16x32xf32>
    %43 = tpu.matmul %42, %28, %cst_15 {dimension_numbers = #tpu.dot_dimension_numbers<[2], [1], [1], [2], [0, 0, 0, 1, 1, 2], [0], [0]>} : vector<4x16x16xbf16>, vector<4x16x32xbf16>, vector<4x16x32xf32> -> vector<4x16x32xf32>
    "tpu.trace_stop"() : () -> ()
    %44 = tpu.transpose %43, [1, 0, 2] : vector<4x16x32xf32> -> vector<16x4x32xf32>
    %45 = vector.shape_cast %44 : vector<16x4x32xf32> to vector<16x128xf32>
    %c0_16 = arith.constant 0 : index
    %c0_17 = arith.constant 0 : index
    %46 = vector.load %arg6[%c0_16, %c0_17] : memref<1x128xf32, #tpu.memory_space<vmem>>, vector<1x128xf32>
    %47 = vector.broadcast %46 : vector<1x128xf32> to vector<16x128xf32>
    %48 = arith.mulf %45, %47 : vector<16x128xf32>
    %c0_18 = arith.constant 0 : index
    %c0_19 = arith.constant 0 : index
    %49 = vector.load %arg7[%c0_18, %c0_19] : memref<1x128xf32, #tpu.memory_space<vmem>>, vector<1x128xf32>
    %c0_20 = arith.constant 0 : index
    %c0_21 = arith.constant 0 : index
    %50 = vector.load %arg8[%c0_20, %c0_21] : memref<1x128xf32, #tpu.memory_space<vmem>>, vector<1x128xf32>
    %cst_22 = arith.constant dense<0.000000e+00> : vector<16xf32>
    %51 = vector.multi_reduction <add>, %48, %cst_22 [1] : vector<16x128xf32> to vector<16xf32>
    %52 = vector.shape_cast %51 : vector<16xf32> to vector<16x1xf32>
    %cst_23 = arith.constant 1.280000e+02 : f32
    %53 = vector.broadcast %cst_23 : f32 to vector<16x1xf32>
    %54 = arith.divf %52, %53 : vector<16x1xf32>
    %55 = vector.broadcast %54 : vector<16x1xf32> to vector<16x128xf32>
    %56 = arith.subf %48, %55 : vector<16x128xf32>
    %57 = arith.mulf %56, %56 : vector<16x128xf32>
    %cst_24 = arith.constant dense<0.000000e+00> : vector<16xf32>
    %58 = vector.multi_reduction <add>, %57, %cst_24 [1] : vector<16x128xf32> to vector<16xf32>
    %59 = vector.shape_cast %58 : vector<16xf32> to vector<16x1xf32>
    %cst_25 = arith.constant 1.280000e+02 : f32
    %60 = vector.broadcast %cst_25 : f32 to vector<16x1xf32>
    %61 = arith.divf %59, %60 : vector<16x1xf32>
    %62 = vector.broadcast %54 : vector<16x1xf32> to vector<16x128xf32>
    %63 = arith.subf %48, %62 : vector<16x128xf32>
    %cst_26 = arith.constant 9.99999974E-6 : f32
    %64 = vector.broadcast %cst_26 : f32 to vector<16x1xf32>
    %65 = arith.addf %61, %64 : vector<16x1xf32>
    %66 = math.rsqrt %65 : vector<16x1xf32>
    %67 = vector.broadcast %66 : vector<16x1xf32> to vector<16x128xf32>
    %68 = arith.mulf %63, %67 : vector<16x128xf32>
    %69 = vector.broadcast %49 : vector<1x128xf32> to vector<16x128xf32>
    %70 = arith.mulf %68, %69 : vector<16x128xf32>
    %71 = vector.broadcast %50 : vector<1x128xf32> to vector<16x128xf32>
    %72 = arith.addf %70, %71 : vector<16x128xf32>
    %cst_27 = arith.constant 0.000000e+00 : f32
    %73 = vector.broadcast %cst_27 : f32 to vector<1x128xf32>
    %74 = tpu.concatenate %73, %72 in 0 : vector<1x128xf32>, vector<16x128xf32> -> vector<17x128xf32>
    %75 = arith.addf %2, %74 : vector<17x128xf32>
    %c0_28 = arith.constant 0 : index
    %c0_29 = arith.constant 0 : index
    %76 = vector.load %arg9[%c0_28, %c0_29] : memref<1x128xf32, #tpu.memory_space<vmem>>, vector<1x128xf32>
    %c0_30 = arith.constant 0 : index
    %c0_31 = arith.constant 0 : index
    %77 = vector.load %arg10[%c0_30, %c0_31] : memref<1x128xf32, #tpu.memory_space<vmem>>, vector<1x128xf32>
    %cst_32 = arith.constant dense<0.000000e+00> : vector<17xf32>
    %78 = vector.multi_reduction <add>, %75, %cst_32 [1] : vector<17x128xf32> to vector<17xf32>
    %79 = vector.shape_cast %78 : vector<17xf32> to vector<17x1xf32>
    %cst_33 = arith.constant 1.280000e+02 : f32
    %80 = vector.broadcast %cst_33 : f32 to vector<17x1xf32>
    %81 = arith.divf %79, %80 : vector<17x1xf32>
    %82 = vector.broadcast %81 : vector<17x1xf32> to vector<17x128xf32>
    %83 = arith.subf %75, %82 : vector<17x128xf32>
    %84 = arith.mulf %83, %83 : vector<17x128xf32>
    %cst_34 = arith.constant dense<0.000000e+00> : vector<17xf32>
    %85 = vector.multi_reduction <add>, %84, %cst_34 [1] : vector<17x128xf32> to vector<17xf32>
    %86 = vector.shape_cast %85 : vector<17xf32> to vector<17x1xf32>
    %cst_35 = arith.constant 1.280000e+02 : f32
    %87 = vector.broadcast %cst_35 : f32 to vector<17x1xf32>
    %88 = arith.divf %86, %87 : vector<17x1xf32>
    %89 = vector.broadcast %81 : vector<17x1xf32> to vector<17x128xf32>
    %90 = arith.subf %75, %89 : vector<17x128xf32>
    %cst_36 = arith.constant 9.99999997E-7 : f32
    %91 = vector.broadcast %cst_36 : f32 to vector<17x1xf32>
    %92 = arith.addf %88, %91 : vector<17x1xf32>
    %93 = math.rsqrt %92 : vector<17x1xf32>
    %94 = vector.broadcast %93 : vector<17x1xf32> to vector<17x128xf32>
    %95 = arith.mulf %90, %94 : vector<17x128xf32>
    %96 = vector.broadcast %76 : vector<1x128xf32> to vector<17x128xf32>
    %97 = arith.mulf %95, %96 : vector<17x128xf32>
    %98 = vector.broadcast %77 : vector<1x128xf32> to vector<17x128xf32>
    %99 = arith.addf %97, %98 : vector<17x128xf32>
    %100 = arith.truncf %99 : vector<17x128xf32> to vector<17x128xbf16>
    %c0_37 = arith.constant 0 : index
    %c0_38 = arith.constant 0 : index
    %101 = vector.load %arg11[%c0_37, %c0_38] : memref<128x384xbf16, #tpu.memory_space<vmem>>, vector<128x384xbf16>
    %cst_39 = arith.constant dense<0.000000e+00> : vector<17x384xf32>
    %102 = tpu.matmul %100, %101, %cst_39 {dimension_numbers = #tpu.dot_dimension_numbers<[1], [0], [0], [1], [0, 0, 1, 1], [], []>} : vector<17x128xbf16>, vector<128x384xbf16>, vector<17x384xf32> -> vector<17x384xf32>
    %c0_40 = arith.constant 0 : index
    %c0_41 = arith.constant 0 : index
    %103 = vector.load %arg12[%c0_40, %c0_41] : memref<1x384xf32, #tpu.memory_space<vmem>>, vector<1x384xf32>
    %104 = vector.broadcast %103 : vector<1x384xf32> to vector<17x384xf32>
    %105 = arith.addf %102, %104 : vector<17x384xf32>
    %106 = vector.extract_strided_slice %105 {offsets = [0, 0], sizes = [17, 128], strides = [1, 1]} : vector<17x384xf32> to vector<17x128xf32>
    %107 = vector.extract_strided_slice %105 {offsets = [0, 128], sizes = [17, 128], strides = [1, 1]} : vector<17x384xf32> to vector<17x128xf32>
    %108 = vector.extract_strided_slice %105 {offsets = [0, 256], sizes = [17, 128], strides = [1, 1]} : vector<17x384xf32> to vector<17x128xf32>
    %109 = arith.truncf %106 : vector<17x128xf32> to vector<17x128xbf16>
    %110 = vector.shape_cast %109 : vector<17x128xbf16> to vector<17x4x32xbf16>
    %111 = tpu.transpose %110, [1, 0, 2] : vector<17x4x32xbf16> -> vector<4x17x32xbf16>
    %112 = arith.truncf %107 : vector<17x128xf32> to vector<17x128xbf16>
    %113 = vector.shape_cast %112 : vector<17x128xbf16> to vector<17x4x32xbf16>
    %114 = tpu.transpose %113, [1, 0, 2] : vector<17x4x32xbf16> -> vector<4x17x32xbf16>
    %115 = arith.truncf %108 : vector<17x128xf32> to vector<17x128xbf16>
    %116 = vector.shape_cast %115 : vector<17x128xbf16> to vector<17x4x32xbf16>
    %117 = tpu.transpose %116, [1, 0, 2] : vector<17x4x32xbf16> -> vector<4x17x32xbf16>
    "tpu.trace_start"() <{level = 10 : i32, message = "hqd,hkd->hqk"}> : () -> ()
    %cst_42 = arith.constant dense<0.000000e+00> : vector<4x17x17xf32>
    %118 = tpu.matmul %111, %114, %cst_42 {dimension_numbers = #tpu.dot_dimension_numbers<[2], [2], [1], [1], [0, 0, 0, 1, 1, 1], [0], [0]>} : vector<4x17x32xbf16>, vector<4x17x32xbf16>, vector<4x17x17xf32> -> vector<4x17x17xf32>
    "tpu.trace_stop"() : () -> ()
    %cst_43 = arith.constant 0.176776692 : f32
    %119 = vector.broadcast %cst_43 : f32 to vector<4x17x17xf32>
    %120 = arith.mulf %118, %119 : vector<4x17x17xf32>
    %cst_44 = arith.constant dense<0xFF800000> : vector<4x17xf32>
    %121 = vector.multi_reduction <maximumf>, %120, %cst_44 [2] : vector<4x17x17xf32> to vector<4x17xf32>
    %122 = vector.shape_cast %121 : vector<4x17xf32> to vector<4x17x1xf32>
    %123 = vector.broadcast %122 : vector<4x17x1xf32> to vector<4x17x17xf32>
    %124 = arith.subf %120, %123 : vector<4x17x17xf32>
    %125 = math.exp %124 : vector<4x17x17xf32>
    %cst_45 = arith.constant dense<0.000000e+00> : vector<4x17xf32>
    %126 = vector.multi_reduction <add>, %125, %cst_45 [2] : vector<4x17x17xf32> to vector<4x17xf32>
    %127 = vector.shape_cast %126 : vector<4x17xf32> to vector<4x17x1xf32>
    %128 = tpu.reciprocal %127 {approx = true} : vector<4x17x1xf32> -> vector<4x17x1xf32>
    %129 = vector.broadcast %128 : vector<4x17x1xf32> to vector<4x17x17xf32>
    %130 = arith.mulf %125, %129 : vector<4x17x17xf32>
    %131 = arith.truncf %130 : vector<4x17x17xf32> to vector<4x17x17xbf16>
    "tpu.trace_start"() <{level = 10 : i32, message = "hqk,hkd->hqd"}> : () -> ()
    %cst_46 = arith.constant dense<0.000000e+00> : vector<4x17x32xf32>
    %132 = tpu.matmul %131, %117, %cst_46 {dimension_numbers = #tpu.dot_dimension_numbers<[2], [1], [1], [2], [0, 0, 0, 1, 1, 2], [0], [0]>} : vector<4x17x17xbf16>, vector<4x17x32xbf16>, vector<4x17x32xf32> -> vector<4x17x32xf32>
    "tpu.trace_stop"() : () -> ()
    %133 = tpu.transpose %132, [1, 0, 2] : vector<4x17x32xf32> -> vector<17x4x32xf32>
    %134 = vector.shape_cast %133 : vector<17x4x32xf32> to vector<17x128xf32>
    %135 = arith.truncf %134 : vector<17x128xf32> to vector<17x128xbf16>
    %c0_47 = arith.constant 0 : index
    %c0_48 = arith.constant 0 : index
    %136 = vector.load %arg13[%c0_47, %c0_48] : memref<128x128xbf16, #tpu.memory_space<vmem>>, vector<128x128xbf16>
    %cst_49 = arith.constant dense<0.000000e+00> : vector<17x128xf32>
    %137 = tpu.matmul %135, %136, %cst_49 {dimension_numbers = #tpu.dot_dimension_numbers<[1], [0], [0], [1], [0, 0, 1, 1], [], []>} : vector<17x128xbf16>, vector<128x128xbf16>, vector<17x128xf32> -> vector<17x128xf32>
    %c0_50 = arith.constant 0 : index
    %c0_51 = arith.constant 0 : index
    %138 = vector.load %arg14[%c0_50, %c0_51] : memref<1x128xf32, #tpu.memory_space<vmem>>, vector<1x128xf32>
    %139 = vector.broadcast %138 : vector<1x128xf32> to vector<17x128xf32>
    %140 = arith.addf %137, %139 : vector<17x128xf32>
    %141 = arith.addf %75, %140 : vector<17x128xf32>
    %c0_52 = arith.constant 0 : index
    %c0_53 = arith.constant 0 : index
    %142 = vector.load %arg15[%c0_52, %c0_53] : memref<1x128xf32, #tpu.memory_space<vmem>>, vector<1x128xf32>
    %c0_54 = arith.constant 0 : index
    %c0_55 = arith.constant 0 : index
    %143 = vector.load %arg16[%c0_54, %c0_55] : memref<1x128xf32, #tpu.memory_space<vmem>>, vector<1x128xf32>
    %cst_56 = arith.constant dense<0.000000e+00> : vector<17xf32>
    %144 = vector.multi_reduction <add>, %141, %cst_56 [1] : vector<17x128xf32> to vector<17xf32>
    %145 = vector.shape_cast %144 : vector<17xf32> to vector<17x1xf32>
    %cst_57 = arith.constant 1.280000e+02 : f32
    %146 = vector.broadcast %cst_57 : f32 to vector<17x1xf32>
    %147 = arith.divf %145, %146 : vector<17x1xf32>
    %148 = vector.broadcast %147 : vector<17x1xf32> to vector<17x128xf32>
    %149 = arith.subf %141, %148 : vector<17x128xf32>
    %150 = arith.mulf %149, %149 : vector<17x128xf32>
    %cst_58 = arith.constant dense<0.000000e+00> : vector<17xf32>
    %151 = vector.multi_reduction <add>, %150, %cst_58 [1] : vector<17x128xf32> to vector<17xf32>
    %152 = vector.shape_cast %151 : vector<17xf32> to vector<17x1xf32>
    %cst_59 = arith.constant 1.280000e+02 : f32
    %153 = vector.broadcast %cst_59 : f32 to vector<17x1xf32>
    %154 = arith.divf %152, %153 : vector<17x1xf32>
    %155 = vector.broadcast %147 : vector<17x1xf32> to vector<17x128xf32>
    %156 = arith.subf %141, %155 : vector<17x128xf32>
    %cst_60 = arith.constant 9.99999997E-7 : f32
    %157 = vector.broadcast %cst_60 : f32 to vector<17x1xf32>
    %158 = arith.addf %154, %157 : vector<17x1xf32>
    %159 = math.rsqrt %158 : vector<17x1xf32>
    %160 = vector.broadcast %159 : vector<17x1xf32> to vector<17x128xf32>
    %161 = arith.mulf %156, %160 : vector<17x128xf32>
    %162 = vector.broadcast %142 : vector<1x128xf32> to vector<17x128xf32>
    %163 = arith.mulf %161, %162 : vector<17x128xf32>
    %164 = vector.broadcast %143 : vector<1x128xf32> to vector<17x128xf32>
    %165 = arith.addf %163, %164 : vector<17x128xf32>
    %166 = arith.truncf %165 : vector<17x128xf32> to vector<17x128xbf16>
    %c0_61 = arith.constant 0 : index
    %c0_62 = arith.constant 0 : index
    %167 = vector.load %arg17[%c0_61, %c0_62] : memref<128x512xbf16, #tpu.memory_space<vmem>>, vector<128x512xbf16>
    %cst_63 = arith.constant dense<0.000000e+00> : vector<17x512xf32>
    %168 = tpu.matmul %166, %167, %cst_63 {dimension_numbers = #tpu.dot_dimension_numbers<[1], [0], [0], [1], [0, 0, 1, 1], [], []>} : vector<17x128xbf16>, vector<128x512xbf16>, vector<17x512xf32> -> vector<17x512xf32>
    %c0_64 = arith.constant 0 : index
    %c0_65 = arith.constant 0 : index
    %169 = vector.load %arg18[%c0_64, %c0_65] : memref<1x512xf32, #tpu.memory_space<vmem>>, vector<1x512xf32>
    %170 = vector.broadcast %169 : vector<1x512xf32> to vector<17x512xf32>
    %171 = arith.addf %168, %170 : vector<17x512xf32>
    %172 = arith.mulf %171, %171 : vector<17x512xf32>
    %173 = arith.mulf %171, %172 : vector<17x512xf32>
    %cst_66 = arith.constant 4.471500e-02 : f32
    %174 = vector.broadcast %cst_66 : f32 to vector<17x512xf32>
    %175 = arith.mulf %174, %173 : vector<17x512xf32>
    %176 = arith.addf %171, %175 : vector<17x512xf32>
    %cst_67 = arith.constant 0.797884583 : f32
    %177 = vector.broadcast %cst_67 : f32 to vector<17x512xf32>
    %178 = arith.mulf %177, %176 : vector<17x512xf32>
    %179 = math.tanh %178 : vector<17x512xf32>
    %cst_68 = arith.constant 1.000000e+00 : f32
    %180 = vector.broadcast %cst_68 : f32 to vector<17x512xf32>
    %181 = arith.addf %180, %179 : vector<17x512xf32>
    %cst_69 = arith.constant 5.000000e-01 : f32
    %182 = vector.broadcast %cst_69 : f32 to vector<17x512xf32>
    %183 = arith.mulf %182, %181 : vector<17x512xf32>
    %184 = arith.mulf %171, %183 : vector<17x512xf32>
    %185 = arith.truncf %184 : vector<17x512xf32> to vector<17x512xbf16>
    %c0_70 = arith.constant 0 : index
    %c0_71 = arith.constant 0 : index
    %186 = vector.load %arg19[%c0_70, %c0_71] : memref<512x128xbf16, #tpu.memory_space<vmem>>, vector<512x128xbf16>
    %cst_72 = arith.constant dense<0.000000e+00> : vector<17x128xf32>
    %187 = tpu.matmul %185, %186, %cst_72 {dimension_numbers = #tpu.dot_dimension_numbers<[1], [0], [0], [1], [0, 0, 1, 1], [], []>} : vector<17x512xbf16>, vector<512x128xbf16>, vector<17x128xf32> -> vector<17x128xf32>
    %c0_73 = arith.constant 0 : index
    %c0_74 = arith.constant 0 : index
    %188 = vector.load %arg20[%c0_73, %c0_74] : memref<1x128xf32, #tpu.memory_space<vmem>>, vector<1x128xf32>
    %189 = vector.broadcast %188 : vector<1x128xf32> to vector<17x128xf32>
    %190 = arith.addf %187, %189 : vector<17x128xf32>
    %191 = arith.addf %141, %190 : vector<17x128xf32>
    %192 = arith.truncf %191 : vector<17x128xf32> to vector<17x128xbf16>
    %c0_75 = arith.constant 0 : index
    %c0_76 = arith.constant 0 : index
    %c0_77 = arith.constant 0 : index
    %193 = vector.load %arg21[%c0_75, %c0_76, %c0_77] : memref<1x17x128xbf16, #tpu.memory_space<vmem>>, vector<1x17x128xbf16>
    %194 = vector.shape_cast %193 : vector<1x17x128xbf16> to vector<17x128xbf16>
    %195 = vector.shape_cast %192 : vector<17x128xbf16> to vector<1x17x128xbf16>
    tpu.vector_store %arg21[%c0_75, %c0_76, %c0_77], %195 {strides = array<i32>} : memref<1x17x128xbf16, #tpu.memory_space<vmem>>, vector<1x17x128xbf16>,
    return
  }
  func.func @transform_0(%arg0: i32) -> i32 {
    %c0_i32 = arith.constant 0 : i32
    %c0_i32_0 = arith.constant 0 : i32
    return %c0_i32 : i32
  }
  func.func @transform_1(%arg0: i32) -> (i32, i32, i32) {
    %c0_i32 = arith.constant 0 : i32
    %c0_i32_0 = arith.constant 0 : i32
    %c0_i32_1 = arith.constant 0 : i32
    return %arg0, %c0_i32, %c0_i32_0 : i32, i32, i32
  }
  func.func @transform_2(%arg0: i32) -> (i32, i32, i32) {
    %c0_i32 = arith.constant 0 : i32
    %c0_i32_0 = arith.constant 0 : i32
    %c0_i32_1 = arith.constant 0 : i32
    return %arg0, %c0_i32, %c0_i32_0 : i32, i32, i32
  }
  func.func @transform_3(%arg0: i32) -> (i32, i32, i32) {
    %c0_i32 = arith.constant 0 : i32
    %c0_i32_0 = arith.constant 0 : i32
    %c0_i32_1 = arith.constant 0 : i32
    return %arg0, %c0_i32, %c0_i32_0 : i32, i32, i32
  }
  func.func @transform_4(%arg0: i32) -> (i32, i32) {
    %c0_i32 = arith.constant 0 : i32
    %c0_i32_0 = arith.constant 0 : i32
    %c0_i32_1 = arith.constant 0 : i32
    return %c0_i32, %c0_i32_0 : i32, i32
  }
  func.func @transform_5(%arg0: i32) -> (i32, i32) {
    %c0_i32 = arith.constant 0 : i32
    %c0_i32_0 = arith.constant 0 : i32
    %c0_i32_1 = arith.constant 0 : i32
    return %c0_i32, %c0_i32_0 : i32, i32
  }
  func.func @transform_6(%arg0: i32) -> (i32, i32) {
    %c0_i32 = arith.constant 0 : i32
    %c0_i32_0 = arith.constant 0 : i32
    %c0_i32_1 = arith.constant 0 : i32
    return %c0_i32, %c0_i32_0 : i32, i32
  }
  func.func @transform_7(%arg0: i32) -> (i32, i32) {
    %c0_i32 = arith.constant 0 : i32
    %c0_i32_0 = arith.constant 0 : i32
    %c0_i32_1 = arith.constant 0 : i32
    return %c0_i32, %c0_i32_0 : i32, i32
  }
  func.func @transform_8(%arg0: i32) -> (i32, i32) {
    %c0_i32 = arith.constant 0 : i32
    %c0_i32_0 = arith.constant 0 : i32
    %c0_i32_1 = arith.constant 0 : i32
    return %c0_i32, %c0_i32_0 : i32, i32
  }
  func.func @transform_9(%arg0: i32) -> (i32, i32) {
    %c0_i32 = arith.constant 0 : i32
    %c0_i32_0 = arith.constant 0 : i32
    %c0_i32_1 = arith.constant 0 : i32
    return %c0_i32, %c0_i32_0 : i32, i32
  }
  func.func @transform_10(%arg0: i32) -> (i32, i32) {
    %c0_i32 = arith.constant 0 : i32
    %c0_i32_0 = arith.constant 0 : i32
    %c0_i32_1 = arith.constant 0 : i32
    return %c0_i32, %c0_i32_0 : i32, i32
  }
  func.func @transform_11(%arg0: i32) -> (i32, i32) {
    %c0_i32 = arith.constant 0 : i32
    %c0_i32_0 = arith.constant 0 : i32
    %c0_i32_1 = arith.constant 0 : i32
    return %c0_i32, %c0_i32_0 : i32, i32
  }
  func.func @transform_12(%arg0: i32) -> (i32, i32) {
    %c0_i32 = arith.constant 0 : i32
    %c0_i32_0 = arith.constant 0 : i32
    %c0_i32_1 = arith.constant 0 : i32
    return %c0_i32, %c0_i32_0 : i32, i32
  }
  func.func @transform_13(%arg0: i32) -> (i32, i32) {
    %c0_i32 = arith.constant 0 : i32
    %c0_i32_0 = arith.constant 0 : i32
    %c0_i32_1 = arith.constant 0 : i32
    return %c0_i32, %c0_i32_0 : i32, i32
  }
  func.func @transform_14(%arg0: i32) -> (i32, i32) {
    %c0_i32 = arith.constant 0 : i32
    %c0_i32_0 = arith.constant 0 : i32
    %c0_i32_1 = arith.constant 0 : i32
    return %c0_i32, %c0_i32_0 : i32, i32
  }
  func.func @transform_15(%arg0: i32) -> (i32, i32) {
    %c0_i32 = arith.constant 0 : i32
    %c0_i32_0 = arith.constant 0 : i32
    %c0_i32_1 = arith.constant 0 : i32
    return %c0_i32, %c0_i32_0 : i32, i32
  }
  func.func @transform_16(%arg0: i32) -> (i32, i32) {
    %c0_i32 = arith.constant 0 : i32
    %c0_i32_0 = arith.constant 0 : i32
    %c0_i32_1 = arith.constant 0 : i32
    return %c0_i32, %c0_i32_0 : i32, i32
  }
  func.func @transform_17(%arg0: i32) -> (i32, i32) {
    %c0_i32 = arith.constant 0 : i32
    %c0_i32_0 = arith.constant 0 : i32
    %c0_i32_1 = arith.constant 0 : i32
    return %c0_i32, %c0_i32_0 : i32, i32
  }
  func.func @transform_18(%arg0: i32) -> (i32, i32) {
    %c0_i32 = arith.constant 0 : i32
    %c0_i32_0 = arith.constant 0 : i32
    %c0_i32_1 = arith.constant 0 : i32
    return %c0_i32, %c0_i32_0 : i32, i32
  }
  func.func @transform_19(%arg0: i32) -> (i32, i32) {
    %c0_i32 = arith.constant 0 : i32
    %c0_i32_0 = arith.constant 0 : i32
    %c0_i32_1 = arith.constant 0 : i32
    return %c0_i32, %c0_i32_0 : i32, i32
  }
  func.func @transform_20(%arg0: i32) -> (i32, i32, i32) {
    %c0_i32 = arith.constant 0 : i32
    %c0_i32_0 = arith.constant 0 : i32
    %c0_i32_1 = arith.constant 0 : i32
    return %arg0, %c0_i32, %c0_i32_0 : i32, i32, i32
  }
}

module attributes {stable_mosaic.version = 11 : i64} {
  func.func @_head_kernel(%arg0: memref<2x128xbf16, #tpu.memory_space<vmem>>, %arg1: memref<1x128xf32, #tpu.memory_space<vmem>>, %arg2: memref<1x128xf32, #tpu.memory_space<vmem>>, %arg3: memref<128x256xbf16, #tpu.memory_space<vmem>>, %arg4: memref<1x256xf32, #tpu.memory_space<vmem>>, %arg5: memref<1x256xf32, #tpu.memory_space<vmem>>, %arg6: memref<1x256xf32, #tpu.memory_space<vmem>>, %arg7: memref<1x256xf32, #tpu.memory_space<vmem>>, %arg8: memref<1x256xf32, #tpu.memory_space<vmem>>, %arg9: memref<256x32xbf16, #tpu.memory_space<vmem>>, %arg10: memref<2x32xf32, #tpu.memory_space<vmem>>) attributes {dimension_semantics = [], scalar_prefetch = 0 : i64, scratch_operands = 0 : i64, tpu.core_type = #tpu.core_type<tc>} {
    %c0 = arith.constant 0 : index
    %c0_0 = arith.constant 0 : index
    %0 = vector.load %arg0[%c0, %c0_0] : memref<2x128xbf16, #tpu.memory_space<vmem>>, vector<2x128xbf16>
    %c0_1 = arith.constant 0 : index
    %c0_2 = arith.constant 0 : index
    %1 = vector.load %arg1[%c0_1, %c0_2] : memref<1x128xf32, #tpu.memory_space<vmem>>, vector<1x128xf32>
    %c0_3 = arith.constant 0 : index
    %c0_4 = arith.constant 0 : index
    %2 = vector.load %arg2[%c0_3, %c0_4] : memref<1x128xf32, #tpu.memory_space<vmem>>, vector<1x128xf32>
    %3 = arith.extf %0 : vector<2x128xbf16> to vector<2x128xf32>
    %cst = arith.constant dense<0.000000e+00> : vector<2xf32>
    %4 = vector.multi_reduction <add>, %3, %cst [1] : vector<2x128xf32> to vector<2xf32>
    %5 = vector.shape_cast %4 : vector<2xf32> to vector<2x1xf32>
    %cst_5 = arith.constant 1.280000e+02 : f32
    %6 = vector.broadcast %cst_5 : f32 to vector<2x1xf32>
    %7 = arith.divf %5, %6 : vector<2x1xf32>
    %8 = vector.broadcast %7 : vector<2x1xf32> to vector<2x128xf32>
    %9 = arith.subf %3, %8 : vector<2x128xf32>
    %10 = arith.mulf %9, %9 : vector<2x128xf32>
    %cst_6 = arith.constant dense<0.000000e+00> : vector<2xf32>
    %11 = vector.multi_reduction <add>, %10, %cst_6 [1] : vector<2x128xf32> to vector<2xf32>
    %12 = vector.shape_cast %11 : vector<2xf32> to vector<2x1xf32>
    %cst_7 = arith.constant 1.280000e+02 : f32
    %13 = vector.broadcast %cst_7 : f32 to vector<2x1xf32>
    %14 = arith.divf %12, %13 : vector<2x1xf32>
    %15 = vector.broadcast %7 : vector<2x1xf32> to vector<2x128xf32>
    %16 = arith.subf %3, %15 : vector<2x128xf32>
    %cst_8 = arith.constant 9.99999974E-6 : f32
    %17 = vector.broadcast %cst_8 : f32 to vector<2x1xf32>
    %18 = arith.addf %14, %17 : vector<2x1xf32>
    %19 = math.rsqrt %18 : vector<2x1xf32>
    %20 = vector.broadcast %19 : vector<2x1xf32> to vector<2x128xf32>
    %21 = arith.mulf %16, %20 : vector<2x128xf32>
    %22 = vector.broadcast %1 : vector<1x128xf32> to vector<2x128xf32>
    %23 = arith.mulf %21, %22 : vector<2x128xf32>
    %24 = vector.broadcast %2 : vector<1x128xf32> to vector<2x128xf32>
    %25 = arith.addf %23, %24 : vector<2x128xf32>
    %26 = arith.truncf %25 : vector<2x128xf32> to vector<2x128xbf16>
    %c0_9 = arith.constant 0 : index
    %c0_10 = arith.constant 0 : index
    %27 = vector.load %arg3[%c0_9, %c0_10] : memref<128x256xbf16, #tpu.memory_space<vmem>>, vector<128x256xbf16>
    %cst_11 = arith.constant dense<0.000000e+00> : vector<2x256xf32>
    %28 = tpu.matmul %26, %27, %cst_11 {dimension_numbers = #tpu.dot_dimension_numbers<[1], [0], [0], [1], [0, 0, 1, 1], [], []>} : vector<2x128xbf16>, vector<128x256xbf16>, vector<2x256xf32> -> vector<2x256xf32>
    %c0_12 = arith.constant 0 : index
    %c0_13 = arith.constant 0 : index
    %29 = vector.load %arg4[%c0_12, %c0_13] : memref<1x256xf32, #tpu.memory_space<vmem>>, vector<1x256xf32>
    %30 = vector.broadcast %29 : vector<1x256xf32> to vector<2x256xf32>
    %31 = arith.addf %28, %30 : vector<2x256xf32>
    %c0_14 = arith.constant 0 : index
    %c0_15 = arith.constant 0 : index
    %32 = vector.load %arg5[%c0_14, %c0_15] : memref<1x256xf32, #tpu.memory_space<vmem>>, vector<1x256xf32>
    %c0_16 = arith.constant 0 : index
    %c0_17 = arith.constant 0 : index
    %33 = vector.load %arg8[%c0_16, %c0_17] : memref<1x256xf32, #tpu.memory_space<vmem>>, vector<1x256xf32>
    %cst_18 = arith.constant 9.99999974E-6 : f32
    %34 = vector.broadcast %cst_18 : f32 to vector<1x256xf32>
    %35 = arith.addf %33, %34 : vector<1x256xf32>
    %36 = math.rsqrt %35 : vector<1x256xf32>
    %37 = arith.mulf %32, %36 : vector<1x256xf32>
    %c0_19 = arith.constant 0 : index
    %c0_20 = arith.constant 0 : index
    %38 = vector.load %arg7[%c0_19, %c0_20] : memref<1x256xf32, #tpu.memory_space<vmem>>, vector<1x256xf32>
    %39 = vector.broadcast %38 : vector<1x256xf32> to vector<2x256xf32>
    %40 = arith.subf %31, %39 : vector<2x256xf32>
    %41 = vector.broadcast %37 : vector<1x256xf32> to vector<2x256xf32>
    %42 = arith.mulf %40, %41 : vector<2x256xf32>
    %c0_21 = arith.constant 0 : index
    %c0_22 = arith.constant 0 : index
    %43 = vector.load %arg6[%c0_21, %c0_22] : memref<1x256xf32, #tpu.memory_space<vmem>>, vector<1x256xf32>
    %44 = vector.broadcast %43 : vector<1x256xf32> to vector<2x256xf32>
    %45 = arith.addf %42, %44 : vector<2x256xf32>
    %46 = arith.truncf %45 : vector<2x256xf32> to vector<2x256xbf16>
    %c0_23 = arith.constant 0 : index
    %c0_24 = arith.constant 0 : index
    %47 = vector.load %arg9[%c0_23, %c0_24] : memref<256x32xbf16, #tpu.memory_space<vmem>>, vector<256x32xbf16>
    %cst_25 = arith.constant dense<0.000000e+00> : vector<2x32xf32>
    %48 = tpu.matmul %46, %47, %cst_25 {dimension_numbers = #tpu.dot_dimension_numbers<[1], [0], [0], [1], [0, 0, 1, 1], [], []>} : vector<2x256xbf16>, vector<256x32xbf16>, vector<2x32xf32> -> vector<2x32xf32>
    %49 = math.tanh %48 : vector<2x32xf32>
    %c0_26 = arith.constant 0 : index
    %c0_27 = arith.constant 0 : index
    %50 = vector.load %arg10[%c0_26, %c0_27] : memref<2x32xf32, #tpu.memory_space<vmem>>, vector<2x32xf32>
    tpu.vector_store %arg10[%c0_26, %c0_27], %49 {strides = array<i32>} : memref<2x32xf32, #tpu.memory_space<vmem>>, vector<2x32xf32>,
    return
  }
}

</mosaic_0001>

<bundles_post_ra>
// kernel: forward.6
= control target key start
LH: loop header
LB: loop body
LE: loop exit
PB: predicated region body
PF: predicated region fallthrough
CT: control target
= control target key end

     0   :  { %v332_v0 = vmov 0   ;;  %vm145_vm0 = vcmask 523264   ;;  %s434_s1 = inlined_call_operand.vmem [shape: bf16[192,128], index: 1, kind: input, shape index: {}]   ;;  %s435_s0 = inlined_call_operand.vmem [shape: bf16[32,192], index: 0, kind: input, shape index: {}]   ;;  %s436_s2 = inlined_call_operand.vmem [shape: f32[1,128], index: 2, kind: input, shape index: {}]   ;;  %s437_s3 = inlined_call_operand.vmem [shape: bf16[32,128], index: 3, kind: output, shape index: {}]  }
   0x1   :  { %152 = vmatprep.subr.bf16.mxu0 %v332_v0  ;;  %289 = vmatprep.subr.bf16.mxu1 %v332_v0  ;;  %v314_v1 = vld [vmem:[%s434_s1] sm:$0xff]   ;;  %v315_v2 = vld [vmem:[%s434_s1 + $0x8] sm:$0xff]   ;;  %v316_v3 = vld [vmem:[%s434_s1 + $0x10] sm:$0xff]  }
   0x2   :  { %153 = vmatpush1.bf16.msra.mxu0 %v314_v1  ;;  %301 = vmatpush1.bf16.msra.mxu1 %v314_v1  ;;  %v317_v4 = vld [vmem:[%s434_s1 + $0x18] sm:$0xff]   ;;  %v328_v5 = vld [vmem:[%s435_s0 + $0x4] ss:$8 sps:$4 sm:$0xff]   ;;  %v320_v9 = vld [vmem:[%s434_s1 + $0x30] sm:$0xff]  }
   0x3   :  { %154 = vmatprep.subr.bf16.mxu0 %v332_v0  ;;  %290 = vmatprep.subr.bf16.mxu1 %v332_v0  ;;  %v318_v6 = vld [vmem:[%s434_s1 + $0x20] sm:$0xff]   ;;  %v331_v7 = vld [vmem:[%s435_s0 + $0x14] ss:$8 sps:$4 sm:$0xff]   ;;  %v319_v8 = vld [vmem:[%s434_s1 + $0x28] sm:$0xff]  }
   0x4   :  { %267 = vmatprep.mubr.msk.bf16.mxu0 %vm145_vm0, %v328_v5  ;;  %268 = vmatprep.mubr.msk.bf16.mxu1 %vm145_vm0, %v331_v7  ;;  %v321_v10 = vld [vmem:[%s434_s1 + $0x38] sm:$0xff]   ;;  %v322_v11 = vld [vmem:[%s434_s1 + $0x40] sm:$0xff]   ;;  %v323_v12 = vld [vmem:[%s434_s1 + $0x48] sm:$0xff]  }
   0x5   :  { %v324_v13 = vld [vmem:[%s434_s1 + $0x50] sm:$0xff]   ;;  %v325_v14 = vld [vmem:[%s434_s1 + $0x58] sm:$0xff]   ;;  %v326_v15 = vld [vmem:[%s435_s0] ss:$8 sps:$4 sm:$0xff]  }
   0x6   :  { %155 = vmatpush1.bf16.msra.mxu0 %v315_v2  ;;  %302 = vmatpush1.bf16.msra.mxu1 %v315_v2  ;;  %v329_v16 = vld [vmem:[%s435_s0 + $0x10] ss:$8 sps:$4 sm:$0xff]   ;;  %v269_v18 = vld [vmem:[%s436_s2] ss:$0 sm:$0xff] }
   0x7   :  { %156 = vmatprep.subr.bf16.mxu0 %v332_v0  ;;  %291 = vmatprep.subr.bf16.mxu1 %v332_v0 }
   0xa   :  { %157 = vmatpush1.bf16.msra.mxu0 %v316_v3  ;;  %303 = vmatpush1.bf16.msra.mxu1 %v316_v3 }
   0xb   :  { %158 = vmatprep.subr.bf16.mxu0 %v332_v0  ;;  %292 = vmatprep.subr.bf16.mxu1 %v332_v0 }
   0xe   :  { %159 = vmatpush1.bf16.msra.mxu0 %v317_v4  ;;  %304 = vmatpush1.bf16.msra.mxu1 %v317_v4 }
   0xf   :  { %160 = vmatprep.subr.bf16.mxu0 %v332_v0  ;;  %293 = vmatprep.subr.bf16.mxu1 %v332_v0 }
  0x12   :  { %161 = vmatpush1.bf16.msra.mxu0 %v318_v6  ;;  %305 = vmatpush1.bf16.msra.mxu1 %v318_v6 }
  0x13   :  { %162 = vmatprep.subr.bf16.mxu0 %v332_v0  ;;  %294 = vmatprep.subr.bf16.mxu1 %v332_v0 }
  0x16   :  { %163 = vmatpush1.bf16.msra.mxu0 %v319_v8  ;;  %306 = vmatpush1.bf16.msra.mxu1 %v319_v8 }
  0x17   :  { %164 = vmatprep.subr.bf16.mxu0 %v332_v0  ;;  %295 = vmatprep.subr.bf16.mxu1 %v332_v0 }
  0x1a   :  { %165 = vmatpush1.bf16.msra.mxu0 %v320_v9  ;;  %307 = vmatpush1.bf16.msra.mxu1 %v320_v9 }
  0x1b   :  { %166 = vmatprep.subr.bf16.mxu0 %v332_v0  ;;  %296 = vmatprep.subr.bf16.mxu1 %v332_v0 }
  0x1e   :  { %167 = vmatpush1.bf16.msra.mxu0 %v321_v10  ;;  %308 = vmatpush1.bf16.msra.mxu1 %v321_v10 }
  0x1f   :  { %168 = vmatprep.subr.bf16.mxu0 %v332_v0  ;;  %297 = vmatprep.subr.bf16.mxu1 %v332_v0 }
  0x22   :  { %169 = vmatpush1.bf16.msra.mxu0 %v322_v11  ;;  %309 = vmatpush1.bf16.msra.mxu1 %v322_v11 }
  0x23   :  { %170 = vmatprep.subr.bf16.mxu0 %v332_v0  ;;  %298 = vmatprep.subr.bf16.mxu1 %v332_v0 }
  0x26   :  { %171 = vmatpush1.bf16.msra.mxu0 %v323_v12  ;;  %310 = vmatpush1.bf16.msra.mxu1 %v323_v12 }
  0x27   :  { %172 = vmatprep.subr.bf16.mxu0 %v332_v0  ;;  %299 = vmatprep.subr.bf16.mxu1 %v332_v0 }
  0x2a   :  { %173 = vmatpush1.bf16.msra.mxu0 %v324_v13  ;;  %311 = vmatpush1.bf16.msra.mxu1 %v324_v13 }
  0x2b   :  { %174 = vmatprep.subr.bf16.mxu0 %v332_v0  ;;  %300 = vmatprep.subr.bf16.mxu1 %v332_v0 }
  0x2e   :  { %175 = vmatpush1.bf16.msra.mxu0 %v325_v14  ;;  %312 = vmatpush1.bf16.msra.mxu1 %v325_v14 }
  0x31   :  { %185 = vmatmul.mubr.bf16.vlgmr.msra.gmra.mrb[0].mxu0 %v326_v15  ;;  %193 = vmatmul.mubr.bf16.vlgmr.msra.gmra.mrb[0].mxu1 %v329_v16 }
 0x104   :  { %v186_v17 = vpop.f32.mrb[0].mxu0  ;;  %v194_v19 = vpop.f32.mrb[0].mxu1 }
 0x105   :  { %v188_v20 = vpop.f32.mrb[1].mxu0  ;;  %v196_v21 = vpop.f32.mrb[1].mxu1  ;;  %v223_v24 = vadd.f32 %v269_v18, %v186_v17  ;;  %v225_v25 = vadd.f32 %v269_v18, %v194_v19 }
 0x106   :  { %v189_v22 = vpop.f32.mrb[2].mxu0  ;;  %v197_v23 = vpop.f32.mrb[2].mxu1 }
 0x107   :  { %v224_v26 = vadd.f32 %v269_v18, %v189_v22  ;;  %v226_v27 = vadd.f32 %v269_v18, %v197_v23  ;;  %v191_v28 = vpop.f32.mrb[3].mxu0  ;;  %v199_v29 = vpop.f32.mrb[3].mxu1 }
 0x109   :  { %v281_v30 = vpack.c.bf16 %v224_v26, %v223_v24  ;;  %v286_v31 = vpack.c.bf16 %v226_v27, %v225_v25 }
 0x10b   :  { %282 = vst [vmem:[%s437_s3] sm:$0xff] %v281_v30   ;;  %288 = vst [vmem:[%s437_s3 + $0x8] sm:$0xff] %v286_v31  }

// kernel: forward.7
= control target key start
LH: loop header
LB: loop body
LE: loop exit
PB: predicated region body
PF: predicated region fallthrough
CT: control target
= control target key end

     0   :  { %s1145_s29 = smov 0   ;;  %s1304_s0 = inlined_call_operand.<no memory space> [shape: f32[1], index: 0, kind: input, shape index: {}]   ;;  %s1305_s1 = inlined_call_operand.vmem [shape: bf16[2,17,128], index: 1, kind: input, shape index: {}]   ;;  %s1306_s2 = inlined_call_operand.vmem [shape: bf16[128,128], index: 2, kind: input, shape index: {}]   ;;  %s1307_s3 = inlined_call_operand.vmem [shape: f32[1,128], index: 3, kind: input, shape index: {}]   ;;  %s1308_s4 = inlined_call_operand.vmem [shape: bf16[128,128], index: 4, kind: input, shape index: {}]   ;;  %s1309_s5 = inlined_call_operand.vmem [shape: f32[1,128], index: 5, kind: input, shape index: {}]   ;;  %s1310_s6 = inlined_call_operand.vmem [shape: bf16[128,256], index: 6, kind: input, shape index: {}]   ;;  %s1311_s7 = inlined_call_operand.vmem [shape: bf16[2,16,128], index: 7, kind: output, shape index: {0}]   ;;  %s1312_s8 = inlined_call_operand.vmem [shape: bf16[2,16,128], index: 8, kind: output, shape index: {1}]  }
   0x1   :  { %14 = sst [smem:[#allocation2]] %s1304_s0 }
   0x2 LB: > { %s899_s30 = sadd.s32 4294967295, %s1092_s29   ;;  %p903_p0 = scmp.ge.s32.totalorder %s1092_s29, 1  ;;  %s1092_s29 = sphi %s1145_s29, %s20_s29  }
   0x3   : > { %p266_p1 = scmp.lt.s32.totalorder %s1092_s29, 3 }
   0x5   : > { %p267_p2 = pnand %p903_p0, %p266_p1 }
   0x6   : > { %v1038_v0 = vld [vmem:[%s1306_s2] sm:$0xff] (!%p267_p2)   ;;  %v1094_v1 = vmov (!%p267_p2), 0.0   ;;  %v1039_v2 = vld [vmem:[%s1306_s2 + $0x8] sm:$0xff] (!%p267_p2)   ;;  %vm1095_vm0 = vmmov (!%p267_p2), 0   ;;  %p305_p3 = scmp.lt.s32.totalorder (!%p267_p2), %s899_s30, 1  ;;  %v1040_v3 = vld [vmem:[%s1306_s2 + $0x10] sm:$0xff] (!%p267_p2)  }
   0x7   : > { %270 = sbr.rel (%p267_p2) target bundleno = 732 (0x2dc), region = 48  ;;  %986 = vmatprep.subr.bf16.mxu0 (!%p267_p2), %v1094_v1  ;;  %1006 = vmatprep.subr.bf16.mxu1 (!%p267_p2), %v1094_v1  ;;  %v1041_v4 = vld [vmem:[%s1306_s2 + $0x18] sm:$0xff] (!%p267_p2)   ;;  %s321_s20 = sld [smem:[#allocation2]] (!%p267_p2)  ;;  %v1042_v10 = vld [vmem:[%s1306_s2 + $0x20] sm:$0xff] (!%p267_p2)   ;;  %v1043_v15 = vld [vmem:[%s1306_s2 + $0x28] sm:$0xff] (!%p267_p2)   ;;  %vm590_vm2 = vcmask (!%p267_p2), 1040384  }
   0x8   : > { %987 = vmatpush3.bf16.msra.mxu0 (!%p267_p2), %v1038_v0  ;;  %1002 = vmatprep.mubr.msk.bf16.mxu0 (!%p267_p2), %vm1095_vm0, %v1094_v1  ;;  %v1044_v25 = vld [vmem:[%s1306_s2 + $0x30] sm:$0xff] (!%p267_p2)   ;;  %v1045_v30 = vld [vmem:[%s1306_s2 + $0x38] sm:$0xff] (!%p267_p2)   ;;  %vm365_vm1 = vsmask.f32 (!%p267_p2), 7424  ;;  %v1046_v34 = vld [vmem:[%s1308_s4] sm:$0xff] (!%p267_p2)  }
   0x9   : > { %988 = vmatprep.subr.bf16.mxu0 (!%p267_p2), %v1094_v1  ;;  %1022 = vmatprep.mubr.msk.bf16.mxu1 (!%p267_p2), %vm1095_vm0, %v1094_v1  ;;  %v1047_v35 = vld [vmem:[%s1308_s4 + $0x8] sm:$0xff] (!%p267_p2)   ;;  %v1048_v36 = vld [vmem:[%s1308_s4 + $0x10] sm:$0xff] (!%p267_p2)   ;;  %v1049_v37 = vld [vmem:[%s1308_s4 + $0x18] sm:$0xff] (!%p267_p2)   ;;  %vm620_vm3 = vsmask.f32 (!%p267_p2), 3328 }
   0xa   : > { %1007 = vmatpush3.bf16.msra.mxu1 (!%p267_p2), %v1046_v34  ;;  %v1050_v38 = vld [vmem:[%s1308_s4 + $0x20] sm:$0xff] (!%p267_p2)   ;;  %v1051_v39 = vld [vmem:[%s1308_s4 + $0x28] sm:$0xff] (!%p267_p2)   ;;  %v1052_v40 = vld [vmem:[%s1308_s4 + $0x30] sm:$0xff] (!%p267_p2)   ;;  %vm621_vm4 = vsmask.f32 (!%p267_p2), 7440 }
   0xb   : > { %1008 = vmatprep.subr.bf16.mxu1 (!%p267_p2), %v1094_v1  ;;  %v1053_v41 = vld [vmem:[%s1308_s4 + $0x38] sm:$0xff] (!%p267_p2)   ;;  %v1054_v42 = vld [vmem:[%s1310_s6] ss:$8 sps:$4 sm:$0xff] (!%p267_p2)   ;;  %v1056_v43 = vld [vmem:[%s1310_s6 + $0x4] ss:$8 sps:$4 sm:$0xff] (!%p267_p2)  }
   0xc   : > { %989 = vmatpush3.bf16.msra.mxu0 (!%p267_p2), %v1039_v2  ;;  %v1059_v44 = vld [vmem:[%s1310_s6 + $0x14] ss:$8 sps:$4 sm:$0xff] (!%p267_p2)   ;;  %v1057_v45 = vld [vmem:[%s1310_s6 + $0x10] ss:$8 sps:$4 sm:$0xff] (!%p267_p2)   ;;  %v1062_v46 = vld [vmem:[%s1310_s6 + $0x24] ss:$8 sps:$4 sm:$0xff] (!%p267_p2)  }
   0xd   : > { %990 = vmatprep.subr.bf16.mxu0 (!%p267_p2), %v1094_v1  ;;  %v328_v11 = vstv (!%p267_p2), %s321_s20  ;;  %s332_s23 = ssub.f32 (!%p267_p2), 1.0, %s321_s20  ;;  %v1060_v47 = vld [vmem:[%s1310_s6 + $0x20] ss:$8 sps:$4 sm:$0xff] (!%p267_p2)   ;;  %v1065_v48 = vld [vmem:[%s1310_s6 + $0x34] ss:$8 sps:$4 sm:$0xff] (!%p267_p2)   ;;  %vm622_vm5 = vmor (!%p267_p2), %vm620_vm3, %vm621_vm4 }
   0xe   : > { %s1314_s30 = smov (!%p305_p3, %s899_s30), 1  ;;  %1009 = vmatpush3.bf16.msra.mxu1 %v1047_v35  ;;  %v1063_v49 = vld [vmem:[%s1310_s6 + $0x30] ss:$8 sps:$4 sm:$0xff]   ;;  %v909_v50 = vld [vmem:[%s1307_s3] ss:$0 sm:$0xff] }
   0xf   : > { %s1026_s14 = smul.u32 12, %s1314_s30  ;;  %v333_v16 = vstv %s332_s23  ;;  %1010 = vmatprep.subr.bf16.mxu1 %v1094_v1 }
  0x10   : > { %991 = vmatpush3.bf16.msra.mxu0 %v1040_v3 }
  0x11   : > { %s309_s19 = scalar_lea.vmem %s1305_s1, %s1026_s14  ;;  %992 = vmatprep.subr.bf16.mxu0 %v1094_v1 }
  0x12   : > { %v960_v5 = vld [vmem:[%s309_s19] sm:$0xff]   ;;  %v324_v6 = vld [vmem:[%s309_s19 + $0x8] sm:$0x1]  ;;  %1011 = vmatpush3.bf16.msra.mxu1 %v1048_v36  ;;  %s952_s19 = sshll.u32 %s1314_s30, 3 }
  0x13   : > { %v961_v7 = vunpack.c.l.bf16 %v960_v5  ;;  %v962_v8 = vunpack.c.h.bf16 %v960_v5  ;;  %v327_v9 = vunpack.c.l.bf16 %v324_v6  ;;  %1012 = vmatprep.subr.bf16.mxu1 %v1094_v1  ;;  %v1066_v5 = vld [vmem:[%s1310_s6 + $0x40] ss:$8 sps:$4 sm:$0xff]   ;;  %v1071_v6 = vld [vmem:[%s1310_s6 + $0x54] ss:$8 sps:$4 sm:$0xff]   ;;  %s314_s22 = scalar_lea.vmem %s1311_s7, %s952_s19  ;;  %s319_s24 = scalar_lea.vmem %s1312_s8, %s952_s19 }
  0x14   : > { %993 = vmatpush3.bf16.msra.mxu0 %v1041_v4  ;;  %v1068_v4 = vld [vmem:[%s1310_s6 + $0x44] ss:$8 sps:$4 sm:$0xff]  }
  0x15   : > { %994 = vmatprep.subr.bf16.mxu0 %v1094_v1  ;;  %v329_v12 = vmul.f32 %v961_v7, %v328_v11  ;;  %v330_v13 = vmul.f32 %v962_v8, %v328_v11  ;;  %v331_v14 = vmul.f32 %v328_v11, %v327_v9  ;;  %v334_v17 = vmul.f32 %v961_v7, %v333_v16  ;;  %v1069_v7 = vld [vmem:[%s1310_s6 + $0x50] ss:$8 sps:$4 sm:$0xff]  }
  0x16   : > { %v335_v18 = vmul.f32 %v962_v8, %v333_v16  ;;  %v336_v19 = vmul.f32 %v333_v16, %v327_v9  ;;  %1013 = vmatpush3.bf16.msra.mxu1 %v1049_v37  ;;  %v1074_v8 = vld [vmem:[%s1310_s6 + $0x64] ss:$8 sps:$4 sm:$0xff]   ;;  %v1072_v9 = vld [vmem:[%s1310_s6 + $0x60] ss:$8 sps:$4 sm:$0xff]   ;;  %v1075_v11 = vld [vmem:[%s1310_s6 + $0x70] ss:$8 sps:$4 sm:$0xff]  }
  0x17   : > { %v1186_v20 = vadd.f32 %v334_v17, %v329_v12  ;;  %1014 = vmatprep.subr.bf16.mxu1 %v1094_v1  ;;  %v1096_v12 = vmov 0   ;;  %v928_v16 = vld [vmem:[%s1309_s5] ss:$0 sm:$0xff] }
  0x18   : > { %995 = vmatpush3.bf16.msra.mxu0 %v1042_v10  ;;  %v1188_v21 = vadd.f32 %v335_v18, %v330_v13  ;;  %v1190_v22 = vadd.f32 %v336_v19, %v331_v14  ;;  %v1077_v10 = vld [vmem:[%s1310_s6 + $0x74] ss:$8 sps:$4 sm:$0xff]  }
  0x19   : > { %996 = vmatprep.subr.bf16.mxu0 %v1094_v1 }
  0x1a   : > { %v340_v23 = vpack.c.bf16 %v1188_v21, %v1186_v20  ;;  %v341_v24 = vpack.c.bf16 %v1190_v22, %v1190_v22  ;;  %1015 = vmatpush3.bf16.msra.mxu1 %v1050_v38 }
  0x1b   : > { %1016 = vmatprep.subr.bf16.mxu1 %v1094_v1 }
  0x1c   : > { %997 = vmatpush3.bf16.msra.mxu0 %v1043_v15  ;;  %v367_v26 = vshrl.u32 %v340_v23, 16  ;;  %v369_v27 = vshll.u32 %v340_v23, 16  ;;  %v374_v28 = vshll.u32 %v341_v24, 16 }
  0x1d   : > { %998 = vmatprep.subr.bf16.mxu0 %v1094_v1 }
  0x1e   : > { %v371_v29 = vrot.slane %v369_v27, 1  ;;  %v376_v31 = vrot.slane %v374_v28, 1  ;;  %1017 = vmatpush3.bf16.msra.mxu1 %v1051_v39 }
  0x1f   : > { %1018 = vmatprep.subr.bf16.mxu1 %v1094_v1 }
  0x20   : > { %999 = vmatpush3.bf16.msra.mxu0 %v1044_v25  ;;  %v372_v32 = vor.u32 %v371_v29, %v367_v26 }
  0x21   : > { %1000 = vmatprep.subr.bf16.mxu0 %v1094_v1 }
  0x22   : > { %v377_v33 = vsel %vm365_vm1, %v372_v32, %v376_v31  ;;  %1019 = vmatpush3.bf16.msra.mxu1 %v1052_v40 }
  0x23   : > { %1020 = vmatprep.subr.bf16.mxu1 %v1094_v1 }
  0x24   : > { %1001 = vmatpush3.bf16.msra.mxu0 %v1045_v30 }
  0x25   : > { %760 = vmatprep.subr.bf16.mxu0 %v1056_v43 }
  0x26   : > { %1021 = vmatpush3.bf16.msra.mxu1 %v1053_v41 }
  0x27   : > { %1003 = vmatmul.mubr.bf16.vlgmr.msra.gmra.mrb[0].mxu0 %v377_v33 }
  0x28   : > { %761 = vmatpush1.bf16.msra.mxu0 %v1054_v42  ;;  %792 = vmatprep.mubr.bf16.mxu0 %v1096_v12 }
  0x29   : > { %762 = vmatprep.subr.bf16.mxu0 %v1059_v44 }
  0x2c   : > { %763 = vmatpush1.bf16.msra.mxu0 %v1057_v45 }
  0x2d   : > { %764 = vmatprep.subr.bf16.mxu0 %v1062_v46 }
  0x30   : > { %765 = vmatpush1.bf16.msra.mxu0 %v1060_v47 }
  0x31   : > { %766 = vmatprep.subr.bf16.mxu0 %v1065_v48 }
  0x34   : > { %767 = vmatpush1.bf16.msra.mxu0 %v1063_v49 }
  0x35   : > { %768 = vmatprep.subr.bf16.mxu0 %v1068_v4 }
  0x38   : > { %769 = vmatpush1.bf16.msra.mxu0 %v1066_v5 }
  0x39   : > { %770 = vmatprep.subr.bf16.mxu0 %v1071_v6 }
  0x3c   : > { %771 = vmatpush1.bf16.msra.mxu0 %v1069_v7 }
  0x3d   : > { %772 = vmatprep.subr.bf16.mxu0 %v1074_v8 }
  0x40   : > { %773 = vmatpush1.bf16.msra.mxu0 %v1072_v9 }
  0x41   : > { %774 = vmatprep.subr.bf16.mxu0 %v1077_v10 }
  0x44   : > { %775 = vmatpush1.bf16.msra.mxu0 %v1075_v11 }
  0xfa   : > { %v461_v51 = vpop.f32.mrb[0].mxu0 }
  0xfb   : > { %v462_v52 = vadd.f32 %v909_v50, %v461_v51  ;;  %v1004_v53 = vpop.f32.mrb[1].mxu0 }
  0xfc   : > { %v464_v54 = vpop.f32.mrb[2].mxu0 }
  0xfd   : > { %v918_v55 = vmul.f32 -1.442695, %v462_v52  ;;  %v465_v56 = vadd.f32 %v909_v50, %v464_v54  ;;  %v1005_v57 = vpop.f32.mrb[3].mxu0 }
  0xff   : > { %1078 = vpow2.f32 %v918_v55  ;;  %v919_v58 = vmul.f32 -1.442695, %v465_v56 }
 0x101   : > { %1080 = vpow2.f32 %v919_v58 }
 0x109   : > { %v1079_v59 = vpop.eup %1078 }
 0x10a   : > { %v474_v60 = vadd.f32 1.0, %v1079_v59 }
 0x10b   : > { %v1081_v61 = vpop.eup %1080 }
 0x10c   : > { %1082 = vrcp.f32 %v474_v60  ;;  %v475_v62 = vadd.f32 1.0, %v1081_v61 }
 0x10e   : > { %1084 = vrcp.f32 %v475_v62 }
 0x116   : > { %v1083_v63 = vpop.eup %1082 }
 0x117   : > { %v480_v1 = vmul.f32 %v1083_v63, %v462_v52 }
 0x118   : > { %v1085_v0 = vpop.eup %1084 }
 0x119   : > { %v481_v2 = vmul.f32 %v1085_v0, %v465_v56 }
 0x11b   : > { %v482_v3 = vpack.c.bf16 %v481_v2, %v480_v1 }
 0x11d   : > { %1023 = vmatmul.mubr.bf16.vlgmr.msra.gmra.mrb[0].mxu1 %v482_v3 }
 0x1f0   : > { %v581_v13 = vpop.f32.mrb[0].mxu1 }
 0x1f1   : > { %v591_v14 = vrot.slane %v581_v13, 7  ;;  %v1024_v15 = vpop.f32.mrb[1].mxu1 }
 0x1f2   : > { %v584_v17 = vpop.f32.mrb[2].mxu1 }
 0x1f3   : > { %v597_v18 = vadd.f32 %v591_v14, %v1186_v20  ;;  %v592_v19 = vrot.slane %v584_v17, 7  ;;  %v1025_v23 = vpop.f32.mrb[3].mxu1 }
 0x1f5   : > { %v607_v24 = vadd.f32 %v928_v16, %v597_v18  ;;  %v593_v25 = vsel %vm590_vm2, %v591_v14, %v592_v19  ;;  %v599_v26 = vadd.f32 %v592_v19, %v1190_v22 }
 0x1f6   : > { %v598_v27 = vadd.f32 %v593_v25, %v1188_v21 }
 0x1f7   : > { %v954_v28 = vpack.c.bf16 %v607_v24, %v607_v24  ;;  %v609_v29 = vadd.f32 %v928_v16, %v599_v26 }
 0x1f8   : > { %v608_v30 = vadd.f32 %v928_v16, %v598_v27 }
 0x1f9   : > { %v624_v31 = vshrl.u32 %v954_v28, 16  ;;  %v627_v32 = vshll.u32 %v954_v28, 16  ;;  %v611_v33 = vpack.c.bf16 %v609_v29, %v609_v29 }
 0x1fa   : > { %v610_v34 = vpack.c.bf16 %v608_v30, %v607_v24  ;;  %v955_v35 = vpack.c.bf16 %v608_v30, %v608_v30 }
 0x1fb   : > { %v626_v36 = vrot.slane %v624_v31, 4  ;;  %v629_v37 = vrot.slane %v627_v32, 5  ;;  %v643_v39 = vshll.u32 %v611_v33, 16 }
 0x1fc   : > { %v633_v20 = vshll.u32 %v955_v35, 16  ;;  %v637_v38 = vshrl.u32 %v955_v35, 16  ;;  %v670_v40 = vshll.u32 %v610_v34, 16  ;;  %v668_v41 = vshrl.u32 %v610_v34, 16 }
 0x1fd   : > { %v630_v22 = vor.u32 %v629_v37, %v626_v36  ;;  %v677_v45 = vrot.slane %v643_v39, 1  ;;  %v645_v49 = vrot.slane %v643_v39, 5 }
 0x1fe   : > { %v639_v21 = vrot.slane %v637_v38, 4  ;;  %v672_v42 = vrot.slane %v670_v40, 1  ;;  %v635_v43 = vrot.slane %v633_v20, 5 }
 0x1ff   : > { %v631_v44 = vrot.slane %v630_v22, 4 }
 0x200   : > { %v673_v46 = vor.u32 %v672_v42, %v668_v41  ;;  %v640_v47 = vor.u32 %v639_v21, %v635_v43 }
 0x201   : > { %v636_v48 = vsel %vm622_vm5, %v631_v44, %v635_v43 }
 0x202   : > { %v678_v50 = vsel %vm365_vm1, %v673_v46, %v677_v45  ;;  %v641_v51 = vrot.slane %v640_v47, 4  ;;  %649 = vst [vmem:[%s314_s22] sm:$0xf] %v636_v48 }
 0x203   : > { %793 = vmatmul.mubr.bf16.vlgmr.msra.gmra.mrb[4].mxu0 %v678_v50 }
 0x204   : > { %v646_v52 = vsel %vm622_vm5, %v641_v51, %v645_v49 }
 0x205   : > { %650 = vst [vmem:[%s314_s22 + $0x4] sm:$0xf] %v646_v52 }
 0x2d6   : > { %v794_v53 = vpop.f32.mrb[4].mxu0 }
 0x2d7   : > { %v796_v54 = vpop.f32.mrb[5].mxu0 }
 0x2d8   : > { %v797_v55 = vpop.f32.mrb[6].mxu0 }
 0x2d9   : > { %v966_v56 = vpack.c.bf16 %v797_v55, %v794_v53  ;;  %v799_v57 = vpop.f32.mrb[7].mxu0 }
 0x2db   : > { %967 = vst [vmem:[%s319_s24] sm:$0xff] %v966_v56  }
 0x2dc PF: > { %s20_s29 = sadd.s32 1, %s1092_s29  }
 0x2dd   : > { %p17_p4 = scmp.ge.s32.totalorder %s20_s29, 4  }
 0x2df   :  { %19 = sbr.rel (!%p17_p4) target bundleno = 2 (0x2), region = 90 }

// kernel: forward.9
= control target key start
LH: loop header
LB: loop body
LE: loop exit
PB: predicated region body
PF: predicated region fallthrough
CT: control target
= control target key end

     0   :  { %s1765_s0 = inlined_call_operand.<no memory space> [shape: f32[1], index: 0, kind: input, shape index: {}]   ;;  %s1766_s1 = inlined_call_operand.vmem [shape: bf16[2,17,128], index: 1, kind: input, shape index: {}]   ;;  %s1767_s2 = inlined_call_operand.vmem [shape: bf16[2,16,128], index: 2, kind: input, shape index: {}]   ;;  %s1768_s3 = inlined_call_operand.vmem [shape: bf16[2,16,128], index: 3, kind: input, shape index: {}]   ;;  %s1769_s4 = inlined_call_operand.vmem [shape: bf16[128,128], index: 4, kind: input, shape index: {}]   ;;  %s1770_s5 = inlined_call_operand.vmem [shape: f32[1,128], index: 5, kind: input, shape index: {}]   ;;  %s1771_s6 = inlined_call_operand.vmem [shape: bf16[128,128], index: 6, kind: input, shape index: {}]   ;;  %s1772_s7 = inlined_call_operand.vmem [shape: f32[1,128], index: 7, kind: input, shape index: {}]   ;;  %s1773_s8 = inlined_call_operand.vmem [shape: bf16[128,256], index: 8, kind: input, shape index: {}]   ;;  %s1774_s9 = inlined_call_operand.hbm [shape: bf16[2,16,128], index: 9, kind: output, shape index: {0}]   ;;  %s1775_s10 = inlined_call_operand.vmem [shape: bf16[2,16,128], index: 10, kind: output, shape index: {1}]   ;;  %s1776_s11 = inlined_call_operand.hbm [shape: f32[2,1,128], index: 11, kind: output, shape index: {2}]  }
   0x1   :  { %17 = sst [smem:[#allocation2]] %s1765_s0 }
   0x2   :  { %18 = vsyncpa [#allocation4], 0 }
   0x3   :  { %20 = vsyncpa [#allocation4 + $0x1], 0 }
   0x4   :  { %21 = vsyncpa [#allocation6], 0 }
   0x5   :  { %23 = vsyncpa [#allocation6 + $0x1], 0  ;;  %s1486_s19 = smov 0   ;;  %s1488_s20 = smov 0  }
   0x6   :  { %s1490_s21 = smov 0   ;;  %s1492_s22 = smov 0  }
   0x7 LB: > { %1778 = sst [smem:[#allocation9_spill]] %s1410_s21  ;;  %s1507_s0 = sadd.s32 4294967295, %s1414_s22   ;;  %s1414_s22 = sphi %s1492_s22, %s1786_s22   ;;  %s1410_s21 = sphi %s1490_s21, %s1783_s21   ;;  %s1406_s20 = sphi %s1488_s20, %s1785_s20   ;;  %s1402_s19 = sphi %s1486_s19, %s1784_s19  }
   0x8   : > { %s1076_s23 = sadd.s32 4294967294, %s1414_s22   ;;  %s1511_s24 = sadd.s32 1, %s1414_s22  }
   0x9   : > { %s240_s25 = sadd.s32 1, %s1410_s21  ;;  %s237_s26 = ssub.s32 %s1414_s22, %s1511_s24 }
   0xa   : > { %p250_p0 = scmp.ne.s32.totalorder %s1410_s21, %s1406_s20  ;;  %p238_p1 = scmp.eq.s32.totalorder %s237_s26, 0 }
   0xb   : > { %p251_p2 = scmp.eq.s32.totalorder %s1507_s0, 1  ;;  %p256_p3 = scmp.ne.s32.totalorder %s1406_s20, %s1402_s19 }
   0xc   : > { %p257_p4 = scmp.eq.s32.totalorder %s1076_s23, 1  ;;  %p1079_p7 = scmp.ge.s32.totalorder %s1414_s22, 1 }
   0xd   : > { %s1522_s27 = scalar_select %p238_p1, %s1410_s21, %s240_s25  }
   0xe   : > { %p1524_p5 = por %p251_p2, %p250_p0  ;;  %p1528_p6 = por %p257_p4, %p256_p3 }
   0xf   : > { %1779 = sst [smem:[#allocation10_spill]] %s1522_s27  ;;  %p369_p8 = scmp.lt.s32.totalorder %s1414_s22, 3 }
  0x11   : > { %p370_p9 = pnand %p1079_p7, %p369_p8 }
  0x12   : > { %v1272_v0 = vld [vmem:[%s1769_s4] sm:$0xff] (!%p370_p9)   ;;  %v1416_v1 = vmov (!%p370_p9), 0.0   ;;  %v1273_v2 = vld [vmem:[%s1769_s4 + $0x8] sm:$0xff] (!%p370_p9)   ;;  %vm1417_vm0 = vmmov (!%p370_p9), 0   ;;  %p428_p10 = scmp.lt.s32.totalorder (!%p370_p9), %s1507_s0, 1  ;;  %v1274_v3 = vld [vmem:[%s1769_s4 + $0x10] sm:$0xff] (!%p370_p9)  }
  0x13   : > { %373 = sbr.rel (%p370_p9) target bundleno = 762 (0x2fa), region = 56  ;;  %1182 = vmatprep.subr.bf16.mxu0 (!%p370_p9), %v1416_v1  ;;  %1202 = vmatprep.subr.bf16.mxu1 (!%p370_p9), %v1416_v1  ;;  %v1275_v4 = vld [vmem:[%s1769_s4 + $0x18] sm:$0xff] (!%p370_p9)   ;;  %s449_s16 = sld [smem:[#allocation2]] (!%p370_p9)  ;;  %v1276_v7 = vld [vmem:[%s1769_s4 + $0x20] sm:$0xff] (!%p370_p9)   ;;  %v1277_v12 = vld [vmem:[%s1769_s4 + $0x28] sm:$0xff] (!%p370_p9)   ;;  %vm471_vm1 = vcmask (!%p370_p9), 1046528  }
  0x14   : > { %1183 = vmatpush3.bf16.msra.mxu0 (!%p370_p9), %v1272_v0  ;;  %1198 = vmatprep.mubr.msk.bf16.mxu0 (!%p370_p9), %vm1417_vm0, %v1416_v1  ;;  %v1278_v25 = vld [vmem:[%s1769_s4 + $0x30] sm:$0xff] (!%p370_p9)   ;;  %v1279_v30 = vld [vmem:[%s1769_s4 + $0x38] sm:$0xff] (!%p370_p9)   ;;  %v1280_v32 = vld [vmem:[%s1771_s6] sm:$0xff] (!%p370_p9)  }
  0x15   : > { %1184 = vmatprep.subr.bf16.mxu0 (!%p370_p9), %v1416_v1  ;;  %1218 = vmatprep.mubr.msk.bf16.mxu1 (!%p370_p9), %vm1417_vm0, %v1416_v1  ;;  %v1281_v33 = vld [vmem:[%s1771_s6 + $0x8] sm:$0xff] (!%p370_p9)   ;;  %v1282_v34 = vld [vmem:[%s1771_s6 + $0x10] sm:$0xff] (!%p370_p9)   ;;  %v1283_v35 = vld [vmem:[%s1771_s6 + $0x18] sm:$0xff] (!%p370_p9)  }
  0x16   : > { %1203 = vmatpush3.bf16.msra.mxu1 (!%p370_p9), %v1280_v32  ;;  %v1284_v36 = vld [vmem:[%s1771_s6 + $0x20] sm:$0xff] (!%p370_p9)   ;;  %v1285_v37 = vld [vmem:[%s1771_s6 + $0x28] sm:$0xff] (!%p370_p9)   ;;  %v1286_v38 = vld [vmem:[%s1771_s6 + $0x30] sm:$0xff] (!%p370_p9)  }
  0x17   : > { %1204 = vmatprep.subr.bf16.mxu1 (!%p370_p9), %v1416_v1  ;;  %v1287_v39 = vld [vmem:[%s1771_s6 + $0x38] sm:$0xff] (!%p370_p9)   ;;  %v1288_v40 = vld [vmem:[%s1773_s8] ss:$8 sps:$4 sm:$0xff] (!%p370_p9)   ;;  %v1290_v41 = vld [vmem:[%s1773_s8 + $0x4] ss:$8 sps:$4 sm:$0xff] (!%p370_p9)  }
  0x18   : > { %1185 = vmatpush3.bf16.msra.mxu0 (!%p370_p9), %v1273_v2  ;;  %v1293_v42 = vld [vmem:[%s1773_s8 + $0x14] ss:$8 sps:$4 sm:$0xff] (!%p370_p9)   ;;  %v1291_v43 = vld [vmem:[%s1773_s8 + $0x10] ss:$8 sps:$4 sm:$0xff] (!%p370_p9)   ;;  %v1296_v44 = vld [vmem:[%s1773_s8 + $0x24] ss:$8 sps:$4 sm:$0xff] (!%p370_p9)  }
  0x19   : > { %1186 = vmatprep.subr.bf16.mxu0 (!%p370_p9), %v1416_v1  ;;  %v460_v16 = vstv (!%p370_p9), %s449_s16  ;;  %v1294_v45 = vld [vmem:[%s1773_s8 + $0x20] ss:$8 sps:$4 sm:$0xff] (!%p370_p9)   ;;  %v1299_v46 = vld [vmem:[%s1773_s8 + $0x34] ss:$8 sps:$4 sm:$0xff] (!%p370_p9)   ;;  %v1297_v47 = vld [vmem:[%s1773_s8 + $0x30] ss:$8 sps:$4 sm:$0xff] (!%p370_p9)  }
  0x1a   : > { %s429_s15 = scalar_select %p428_p10, %s1507_s0, 1  ;;  %1205 = vmatpush3.bf16.msra.mxu1 %v1281_v33  ;;  %v1302_v48 = vld [vmem:[%s1773_s8 + $0x44] ss:$8 sps:$4 sm:$0xff]   ;;  %v1300_v49 = vld [vmem:[%s1773_s8 + $0x40] ss:$8 sps:$4 sm:$0xff]  }
  0x1b   : > { %1206 = vmatprep.subr.bf16.mxu1 %v1416_v1  ;;  %v1305_v50 = vld [vmem:[%s1773_s8 + $0x54] ss:$8 sps:$4 sm:$0xff]   ;;  %v1303_v51 = vld [vmem:[%s1773_s8 + $0x50] ss:$8 sps:$4 sm:$0xff]   ;;  %v1088_v52 = vld [vmem:[%s1770_s5] ss:$0 sm:$0xff] }
  0x1c   : > { %s1222_s18 = smul.u32 12, %s429_s15  ;;  %s1551_s23 = sshll.u32 %s429_s15, 3  ;;  %1187 = vmatpush3.bf16.msra.mxu0 %v1274_v3 }
  0x1d   : > { %s437_s21 = scalar_lea.vmem %s1767_s2, %s1551_s23  ;;  %1188 = vmatprep.subr.bf16.mxu0 %v1416_v1  ;;  %s1419_s15 = smov [#allocation3]  }
  0x1e   : > { %s432_s30 = scalar_lea.vmem %s1766_s1, %s1222_s18  ;;  %v1147_v8 = vld [vmem:[%s437_s21] sm:$0xff]   ;;  %s463_s18 = ssub.f32 1.0, %s449_s16  ;;  %1207 = vmatpush3.bf16.msra.mxu1 %v1282_v34 }
  0x1f   : > { %v1143_v5 = vld [vmem:[%s432_s30] sm:$0xff]   ;;  %v452_v6 = vld [vmem:[%s432_s30 + $0x8] sm:$0x1]  ;;  %v1148_v13 = vunpack.c.l.bf16 %v1147_v8  ;;  %v1149_v14 = vunpack.c.h.bf16 %v1147_v8  ;;  %1208 = vmatprep.subr.bf16.mxu1 %v1416_v1  ;;  %v1311_v8 = vld [vmem:[%s1773_s8 + $0x74] ss:$8 sps:$4 sm:$0xff]   ;;  %s1669_s16 = sand.u32 1, %s1406_s20  }
  0x20   : > { %1189 = vmatpush3.bf16.msra.mxu0 %v1275_v4  ;;  %v1144_v9 = vunpack.c.l.bf16 %v1143_v5  ;;  %v1145_v10 = vunpack.c.h.bf16 %v1143_v5  ;;  %v455_v11 = vunpack.c.l.bf16 %v452_v6  ;;  %v464_v15 = vstv %s463_s18  ;;  %v1308_v6 = vld [vmem:[%s1773_s8 + $0x64] ss:$8 sps:$4 sm:$0xff]   ;;  %s1080_s18 = sshll.u32 %s1669_s16, 3  ;;  %s1141_s21 = sshll.u32 %s1507_s0, 7 }
  0x21   : > { %1190 = vmatprep.subr.bf16.mxu0 %v1416_v1  ;;  %v461_v23 = vmul.f32 %v1148_v13, %v460_v16  ;;  %v462_v24 = vmul.f32 %v1149_v14, %v460_v16  ;;  %v1107_v14 = vld [vmem:[%s1772_s7] ss:$0 sm:$0xff]  ;;  %s414_s27 = scalar_lea.vmem [#allocation3], %s1080_s18  ;;  %s1681_s12 = scalar_lea.hbm %s1774_s9, %s1141_s21 }
  0x22   : > { %v465_v17 = vmul.f32 %v1144_v9, %v464_v15  ;;  %v466_v18 = vmul.f32 %v1145_v10, %v464_v15  ;;  %v467_v19 = vmul.f32 %v464_v15, %v455_v11  ;;  %1209 = vmatpush3.bf16.msra.mxu1 %v1283_v35  ;;  %v1309_v9 = vld [vmem:[%s1773_s8 + $0x70] ss:$8 sps:$4 sm:$0xff]   ;;  %v1418_v10 = vmov 0   ;;  %s921_s25 = sshll.u32 %s414_s27, 4  ;;  %s899_s13 = scalar_lea.sflag [#allocation4], %s1669_s16  ;;  %s1683_s25 = int_to_ptr.vmem [resolvable:$true] %s921_s25 }
  0x23   : > { %1210 = vmatprep.subr.bf16.mxu1 %v1416_v1  ;;  %s1320_s14 = scalar_lea.vmem %s1683_s25, 128  ;;  %s1324_s17 = sshll.u32 %s1419_s15, 4  ;;  %s1325_s17 = int_to_ptr.vmem [resolvable:$false] %s1324_s17 }
  0x24   : > { %1191 = vmatpush3.bf16.msra.mxu0 %v1276_v7  ;;  %v472_v20 = vrot.slane %v465_v17, 1  ;;  %v473_v21 = vrot.slane %v466_v18, 1  ;;  %v475_v22 = vrot.slane %v467_v19, 1  ;;  %v1306_v7 = vld [vmem:[%s1773_s8 + $0x60] ss:$8 sps:$4 sm:$0xff]   ;;  %p1321_p11 = scmp.ne.s32.totalorder %s1683_s25, %s1320_s14  ;;  %s1326_s18 = scalar_lea.vmem %s1325_s17, 256 }
  0x25   : > { %1192 = vmatprep.subr.bf16.mxu0 %v1416_v1  ;;  %p1327_p0 = scmp.lt.s32.totalorder %s1683_s25, %s1325_s17  ;;  %p1328_p1 = scmp.lt.s32.totalorder %s1326_s18, %s1320_s14 }
  0x26   : > { %v474_v26 = vsel %vm471_vm1, %v472_v20, %v473_v21  ;;  %v476_v27 = vsel %vm471_vm1, %v473_v21, %v475_v22  ;;  %1211 = vmatpush3.bf16.msra.mxu1 %v1284_v36  ;;  %p1322_p12 = pnand %p1321_p11, %p1524_p5 }
  0x27   : > { %v1576_v28 = vadd.f32 %v474_v26, %v461_v23  ;;  %v1578_v29 = vadd.f32 %v476_v27, %v462_v24  ;;  %1212 = vmatprep.subr.bf16.mxu1 %v1416_v1  ;;  %p1329_p2 = por %p1328_p1, %p1327_p0 }
  0x28   : > { %1193 = vmatpush3.bf16.msra.mxu0 %v1277_v12  ;;  %p1323_p13 = pneg %p1322_p12 }
  0x29   : > { %1194 = vmatprep.subr.bf16.mxu0 %v1416_v1  ;;  %v481_v31 = vpack.c.bf16 %v1578_v29, %v1576_v28 }
  0x2a   : > { %1213 = vmatpush3.bf16.msra.mxu1 %v1285_v37  ;;  %p1330_p3 = pnand %p1329_p2, %p1323_p13 }
  0x2b   : > { %1214 = vmatprep.subr.bf16.mxu1 %v1416_v1 }
  0x2c   : > { %1195 = vmatpush3.bf16.msra.mxu0 %v1278_v25 }
  0x2d   : > { %1196 = vmatprep.subr.bf16.mxu0 %v1416_v1 }
  0x2e   : > { %1215 = vmatpush3.bf16.msra.mxu1 %v1286_v38 }
  0x2f   : > { %1216 = vmatprep.subr.bf16.mxu1 %v1416_v1 }
  0x30   : > { %1197 = vmatpush3.bf16.msra.mxu0 %v1279_v30 }
  0x31   : > { %831 = vmatprep.subr.bf16.mxu0 %v1290_v41 }
  0x32   : > { %1217 = vmatpush3.bf16.msra.mxu1 %v1287_v39 }
  0x33   : > { %1199 = vmatmul.mubr.bf16.vlgmr.msra.gmra.mrb[0].mxu0 %v481_v31 }
  0x34   : > { %832 = vmatpush1.bf16.msra.mxu0 %v1288_v40  ;;  %863 = vmatprep.mubr.bf16.mxu0 %v1418_v10 }
  0x35   : > { %833 = vmatprep.subr.bf16.mxu0 %v1293_v42 }
  0x38   : > { %834 = vmatpush1.bf16.msra.mxu0 %v1291_v43 }
  0x39   : > { %835 = vmatprep.subr.bf16.mxu0 %v1296_v44 }
  0x3c   : > { %836 = vmatpush1.bf16.msra.mxu0 %v1294_v45 }
  0x3d   : > { %837 = vmatprep.subr.bf16.mxu0 %v1299_v46 }
  0x40   : > { %838 = vmatpush1.bf16.msra.mxu0 %v1297_v47 }
  0x41   : > { %839 = vmatprep.subr.bf16.mxu0 %v1302_v48 }
  0x44   : > { %840 = vmatpush1.bf16.msra.mxu0 %v1300_v49 }
  0x45   : > { %841 = vmatprep.subr.bf16.mxu0 %v1305_v50 }
  0x48   : > { %842 = vmatpush1.bf16.msra.mxu0 %v1303_v51 }
  0x49   : > { %843 = vmatprep.subr.bf16.mxu0 %v1308_v6 }
  0x4c   : > { %844 = vmatpush1.bf16.msra.mxu0 %v1306_v7 }
  0x4d   : > { %845 = vmatprep.subr.bf16.mxu0 %v1311_v8 }
  0x50   : > { %846 = vmatpush1.bf16.msra.mxu0 %v1309_v9 }
 0x106   : > { %v587_v53 = vpop.f32.mrb[0].mxu0 }
 0x107   : > { %v588_v54 = vadd.f32 %v1088_v52, %v587_v53  ;;  %v1200_v55 = vpop.f32.mrb[1].mxu0 }
 0x108   : > { %v590_v56 = vpop.f32.mrb[2].mxu0 }
 0x109   : > { %v1097_v57 = vmul.f32 -1.442695, %v588_v54  ;;  %v591_v58 = vadd.f32 %v1088_v52, %v590_v56  ;;  %v1201_v59 = vpop.f32.mrb[3].mxu0 }
 0x10b   : > { %1312 = vpow2.f32 %v1097_v57  ;;  %v1098_v60 = vmul.f32 -1.442695, %v591_v58 }
 0x10d   : > { %1314 = vpow2.f32 %v1098_v60 }
 0x115   : > { %v1313_v61 = vpop.eup %1312 }
 0x116   : > { %v600_v62 = vadd.f32 1.0, %v1313_v61 }
 0x117   : > { %v1315_v63 = vpop.eup %1314 }
 0x118   : > { %1316 = vrcp.f32 %v600_v62  ;;  %v601_v0 = vadd.f32 1.0, %v1315_v63 }
 0x11a   : > { %1318 = vrcp.f32 %v601_v0 }
 0x122   : > { %v1317_v1 = vpop.eup %1316 }
 0x123   : > { %v606_v3 = vmul.f32 %v1317_v1, %v588_v54 }
 0x124   : > { %v1319_v2 = vpop.eup %1318 }
 0x125   : > { %v607_v4 = vmul.f32 %v1319_v2, %v591_v58 }
 0x127   : > { %v608_v5 = vpack.c.bf16 %v607_v4, %v606_v3 }
 0x129   : > { %1219 = vmatmul.mubr.bf16.vlgmr.msra.gmra.mrb[0].mxu1 %v608_v5 }
 0x1fc   : > { %v707_v11 = vpop.f32.mrb[0].mxu1 }
 0x1fd   : > { %v714_v12 = vadd.f32 %v707_v11, %v1576_v28  ;;  %v1220_v13 = vpop.f32.mrb[1].mxu1 }
 0x1fe   : > { %v710_v15 = vpop.f32.mrb[2].mxu1 }
 0x1ff   : > { %v715_v16 = vadd.f32 %v710_v15, %v1578_v29  ;;  %v1221_v17 = vpop.f32.mrb[3].mxu1  ;;  %v723_v18 = vadd.f32 %v1107_v14, %v714_v12 }
 0x201   : > { %v724_v19 = vadd.f32 %v1107_v14, %v715_v16 }
 0x203   : > { %v725_v20 = vpack.c.bf16 %v724_v19, %v723_v18 }
 0x205   : > { %1154 = vst [vmem:[%s414_s27] sm:$0xff] %v725_v20   ;;  %864 = vmatmul.mubr.bf16.vlgmr.msra.gmra.mrb[4].mxu0 %v725_v20 }
 0x206   : > { %1333 = shalt.err (!%p1330_p3)
}
 0x207   : > { %s1334_s27 = scalar_lea.hbm %s1681_s12, 128  ;;  %s1338_s30 = scalar_lea.hbm %s1774_s9, 256 }
 0x208   : > { %p1335_p4 = scmp.ne.s32.totalorder %s1681_s12, %s1334_s27  ;;  %p1339_p9 = scmp.lt.u32.totalorder %s1681_s12, %s1774_s9 }
 0x209   : > { %p1340_p10 = scmp.lt.u32.totalorder %s1338_s30, %s1334_s27  ;;  %p1342_p12 = scmp.lt.u32.totalorder %s1334_s27, %s1681_s12 }
 0x20a   : > { %p1336_p7 = pnand %p1335_p4, %p1524_p5 }
 0x20b   : > { %p1341_p11 = por %p1340_p10, %p1339_p9 }
 0x20c   : > { %p1337_p8 = pneg %p1336_p7 }
 0x20d   : > { %p1343_p13 = por %p1342_p12, %p1341_p11 }
 0x20f   : > { %p1344_p0 = pnand %p1343_p13, %p1337_p8 }
 0x211   : > { %1347 = shalt.err (!%p1344_p0)
}
 0x212   : > { %s1420_s14 = smov 64   ;;  %s1421_s18 = smov 4  }
 0x213   : > { %1223 = dma.vmem_to_hbm [thread:$0]  (%p1524_p5), %s1683_s25, 128, %s1681_s12, %s899_s13, %s1420_s14, %s1420_s14, %s1421_s18  }
 0x214   : > { %s442_s30 = scalar_lea.vmem %s1768_s3, %s1551_s23  ;;  %s447_s17 = scalar_lea.vmem %s1775_s10, %s1551_s23 }
 0x215   : > { %v1161_v21 = vld [vmem:[%s442_s30] sm:$0xff]   ;;  %s1131_s25 = sshll.u32 %s1507_s0, 4  ;;  %s427_s12 = scalar_lea.vmem [#allocation5], %s1669_s16 }
 0x216   : > { %v1162_v23 = vunpack.c.l.bf16 %v1161_v21  ;;  %v1163_v24 = vunpack.c.h.bf16 %v1161_v21  ;;  %s940_s13 = sshll.u32 %s427_s12, 4  ;;  %s1722_s18 = scalar_lea.hbm %s1776_s11, %s1131_s25  ;;  %s1724_s13 = int_to_ptr.vmem [resolvable:$true] %s940_s13 }
 0x217   : > { %s909_s21 = scalar_lea.sflag [#allocation6], %s1669_s16  ;;  %s1348_s26 = scalar_lea.vmem %s1724_s13, 16 }
 0x218   : > { %p1349_p1 = scmp.ne.s32.totalorder %s1724_s13, %s1348_s26  ;;  %s1422_s0 = smov [#allocation5]  }
 0x219   : > { %s1352_s30 = sshll.u32 %s1422_s0, 4  ;;  %s1353_s30 = int_to_ptr.vmem [resolvable:$false] %s1352_s30 }
 0x21a   : > { %p1350_p2 = pnand %p1349_p1, %p1524_p5  ;;  %s1354_s27 = scalar_lea.vmem %s1353_s30, 32 }
 0x21b   : > { %p1355_p4 = scmp.lt.s32.totalorder %s1724_s13, %s1353_s30  ;;  %p1356_p7 = scmp.lt.s32.totalorder %s1354_s27, %s1348_s26 }
 0x21c   : > { %p1351_p3 = pneg %p1350_p2 }
 0x21d   : > { %p1357_p8 = por %p1356_p7, %p1355_p4 }
 0x21f   : > { %p1358_p9 = pnand %p1357_p8, %p1351_p3 }
 0x2d8   : > { %v865_v22 = vpop.f32.mrb[4].mxu0 }
 0x2d9   : > { %v867_v25 = vpop.f32.mrb[5].mxu0 }
 0x2da   : > { %v869_v26 = vpop.f32.mrb[6].mxu0  ;;  %v888_v29 = vmul.f32 %v1162_v23, %v867_v25 }
 0x2db   : > { %v1158_v27 = vpack.c.bf16 %v869_v26, %v865_v22  ;;  %v871_v28 = vpop.f32.mrb[7].mxu0 }
 0x2dc   : > { %v889_v30 = vmul.f32 %v1163_v24, %v871_v28 }
 0x2dd   : > { %1159 = vst [vmem:[%s447_s17] sm:$0xff] %v1158_v27  }
 0x2de   : > { %v890_v31 = vadd.f32 %v889_v30, %v888_v29 }
 0x2e0   : > { %v891_v32 = vrot.slane %v890_v31, 4 }
 0x2e2   : > { %v892_v33 = vadd.f32 %v891_v32, %v890_v31 }
 0x2e4   : > { %v893_v34 = vrot.slane %v892_v33, 2 }
 0x2e6   : > { %v894_v35 = vadd.f32 %v893_v34, %v892_v33 }
 0x2e8   : > { %v895_v36 = vrot.slane %v894_v35, 1 }
 0x2ea   : > { %v896_v37 = vadd.f32 %v895_v36, %v894_v35 }
 0x2ec   : > { %897 = vst [vmem:[%s427_s12] sm:$0x1] %v896_v37 }
 0x2ed   : > { %1361 = shalt.err (!%p1358_p9)
}
 0x2ee   : > { %s1362_s16 = scalar_lea.hbm %s1722_s18, 16  ;;  %s1366_s25 = scalar_lea.hbm %s1776_s11, 32 }
 0x2ef   : > { %p1363_p10 = scmp.ne.s32.totalorder %s1722_s18, %s1362_s16  ;;  %p1367_p13 = scmp.lt.u32.totalorder %s1722_s18, %s1776_s11 }
 0x2f0   : > { %p1368_p0 = scmp.lt.u32.totalorder %s1366_s25, %s1362_s16  ;;  %p1370_p2 = scmp.lt.u32.totalorder %s1362_s16, %s1722_s18 }
 0x2f1   : > { %p1364_p11 = pnand %p1363_p10, %p1524_p5 }
 0x2f2   : > { %p1369_p1 = por %p1368_p0, %p1367_p13 }
 0x2f3   : > { %p1365_p12 = pneg %p1364_p11 }
 0x2f4   : > { %p1371_p3 = por %p1370_p2, %p1369_p1 }
 0x2f6   : > { %p1372_p4 = pnand %p1371_p3, %p1365_p12 }
 0x2f8   : > { %1375 = shalt.err (!%p1372_p4)
}
 0x2f9   : > { %1224 = dma.vmem_to_hbm [thread:$0]  (%p1524_p5), %s1724_s13, 16, %s1722_s18, %s909_s21  }
 0x2fa PF: > { %p1234_p7 = scmp.ge.s32.totalorder %s1414_s22, 2  ;;  %s952_s23 = sand.u32 1, %s1402_s19  }
 0x2fb   : > { %s953_s26 = scalar_lea.sflag [#allocation4], %s952_s23 }
 0x2fc   : > { %p1228_p8 = pnand %p1234_p7, %p1528_p6 }
 0x2fe   : > { %1393 = dma.done.wait (!%p1228_p8), %s953_s26, 128  }
 0x2ff   : > { %1395 = vsyncadd (!%p1228_p8), %s953_s26, 4294967168  ;;  %s970_s0 = scalar_lea.sflag [#allocation6], %s952_s23 }
 0x300   : > { %1397 = dma.done.wait (!%p1228_p8), %s970_s0, 16  }
 0x301   : > { %1399 = vsyncadd (!%p1228_p8), %s970_s0, 4294967280  ;;  %s1782_s28 = sld [smem:[#allocation9_spill]]  ;;  %s1783_s21 = sld [smem:[#allocation10_spill]] }
 0x302   : > { %p26_p5 = scmp.ge.s32.totalorder %s1511_s24, 4   ;;  %s1784_s19 = smov %s1406_s20 }
 0x303   : > { %s1786_s22 = smov %s1511_s24 }
 0x304   :  { %28 = sbr.rel (!%p26_p5) target bundleno = 7 (0x7), region = 126 }
 0x307   : > { %s1785_s20 = smov %s1782_s28 }
 0x30b   :  { %974 = vsyncpa [#allocation4], 1 }
 0x30c   :  { %976 = vsyncpa [#allocation4 + $0x1], 1 }
 0x30d   :  { %977 = vsyncpa [#allocation6], 1 }
 0x30e   :  { %979 = vsyncpa [#allocation6 + $0x1], 1 }

// kernel: forward.11
= control target key start
LH: loop header
LB: loop body
LE: loop exit
PB: predicated region body
PF: predicated region fallthrough
CT: control target
= control target key end

     0   :  { %vm41_vm0 = vcmask 1041408   ;;  %s772_s0 = inlined_call_operand.vmem [shape: bf16[2,128], index: 0, kind: input, shape index: {}]   ;;  %s773_s1 = inlined_call_operand.vmem [shape: f32[1,128], index: 1, kind: input, shape index: {}]   ;;  %s774_s2 = inlined_call_operand.vmem [shape: f32[1,128], index: 2, kind: input, shape index: {}]   ;;  %s775_s3 = inlined_call_operand.vmem [shape: bf16[128,256], index: 3, kind: input, shape index: {}]   ;;  %s776_s4 = inlined_call_operand.vmem [shape: f32[1,256], index: 4, kind: input, shape index: {}]   ;;  %s777_s5 = inlined_call_operand.vmem [shape: f32[1,256], index: 5, kind: input, shape index: {}]   ;;  %s778_s6 = inlined_call_operand.vmem [shape: f32[1,256], index: 6, kind: input, shape index: {}]   ;;  %s779_s7 = inlined_call_operand.vmem [shape: f32[1,256], index: 7, kind: input, shape index: {}]   ;;  %s780_s8 = inlined_call_operand.vmem [shape: f32[1,256], index: 8, kind: input, shape index: {}]   ;;  %s781_s9 = inlined_call_operand.vmem [shape: bf16[256,32], index: 9, kind: input, shape index: {}]   ;;  %s782_s10 = inlined_call_operand.hbm [shape: f32[2,32], index: 10, kind: output, shape index: {}]  }
   0x1   :  { %v37_v0 = vld [vmem:[%s772_s0] sm:$0x1] }
   0x2   :  { %v40_v1 = vunpack.c.l.bf16 %v37_v0 }
   0x4   :  { %v42_v2 = vsel %vm41_vm0, %v40_v1, 0.0 }
   0x5   :  { %43 = vadd.xlane.f32.xlu0 %v42_v2 }
   0x6   :  { %15 = vsyncpa [#allocation3], 0  ;;  %v511_v3 = vld [vmem:[%s775_s3 + $0x4] ss:$8 sps:$4 sm:$0xff]   ;;  %v513_v4 = vld [vmem:[%s775_s3] ss:$8 sps:$4 sm:$0xff]   ;;  %v89_v53 = vlaneseq }
   0x7   :  { %v514_v5 = vld [vmem:[%s775_s3 + $0x14] ss:$8 sps:$4 sm:$0xff]   ;;  %179 = vmatprep.subr.bf16.mxu0 %v511_v3  ;;  %v516_v6 = vld [vmem:[%s775_s3 + $0x10] ss:$8 sps:$4 sm:$0xff]   ;;  %v517_v7 = vld [vmem:[%s775_s3 + $0x24] ss:$8 sps:$4 sm:$0xff]  }
   0x8   :  { %180 = vmatpush1.bf16.msra.mxu0 %v513_v4  ;;  %v519_v13 = vld [vmem:[%s775_s3 + $0x20] ss:$8 sps:$4 sm:$0xff]   ;;  %v520_v14 = vld [vmem:[%s775_s3 + $0x34] ss:$8 sps:$4 sm:$0xff]   ;;  %v522_v15 = vld [vmem:[%s775_s3 + $0x30] ss:$8 sps:$4 sm:$0xff]  }
   0x9   :  { %181 = vmatprep.subr.bf16.mxu0 %v514_v5  ;;  %v523_v16 = vld [vmem:[%s775_s3 + $0x44] ss:$8 sps:$4 sm:$0xff]   ;;  %v525_v17 = vld [vmem:[%s775_s3 + $0x40] ss:$8 sps:$4 sm:$0xff]   ;;  %v526_v18 = vld [vmem:[%s775_s3 + $0x54] ss:$8 sps:$4 sm:$0xff]  }
   0xa   :  { %v581_v19 = vmov 0   ;;  %v528_v20 = vld [vmem:[%s775_s3 + $0x50] ss:$8 sps:$4 sm:$0xff]   ;;  %v529_v21 = vld [vmem:[%s775_s3 + $0x64] ss:$8 sps:$4 sm:$0xff]   ;;  %v90_v54 = vshrl.u32 %v89_v53, 7 }
   0xb   :  { %211 = vmatprep.mubr.bf16.mxu0 %v581_v19  ;;  %v531_v22 = vld [vmem:[%s775_s3 + $0x60] ss:$8 sps:$4 sm:$0xff]   ;;  %v532_v23 = vld [vmem:[%s775_s3 + $0x74] ss:$8 sps:$4 sm:$0xff]   ;;  %v534_v24 = vld [vmem:[%s775_s3 + $0x70] ss:$8 sps:$4 sm:$0xff]  }
   0xc   :  { %182 = vmatpush1.bf16.msra.mxu0 %v516_v6  ;;  %v535_v25 = vld [vmem:[%s781_s9 + $0x40] sm:$0xff]   ;;  %v537_v27 = vld [vmem:[%s781_s9 + $0x48] sm:$0xff]   ;;  %v539_v29 = vld [vmem:[%s781_s9 + $0x50] sm:$0xff]   ;;  %v91_v55 = vsub.s32 0, %v90_v54  ;;  %v95_v59 = vsub.s32 1, %v90_v54  ;;  %vm437_vm1 = vcmask 254976  }
   0xd   :  { %183 = vmatprep.subr.bf16.mxu0 %v517_v7  ;;  %v536_v26 = vld [vmem:[%s781_s9] sm:$0xff]   ;;  %487 = vmatprep.subr.bf16.mxu1 %v535_v25  ;;  %v538_v28 = vld [vmem:[%s781_s9 + $0x8] sm:$0xff]   ;;  %v540_v30 = vld [vmem:[%s781_s9 + $0x10] sm:$0xff]  }
   0xe   :  { %488 = vmatpush3.bf16.msra.mxu1 %v536_v26  ;;  %v541_v31 = vld [vmem:[%s781_s9 + $0x58] sm:$0xff]   ;;  %v543_v33 = vld [vmem:[%s781_s9 + $0x60] sm:$0xff]   ;;  %v545_v45 = vld [vmem:[%s781_s9 + $0x68] sm:$0xff]  }
   0xf   :  { %489 = vmatprep.subr.bf16.mxu1 %v537_v27  ;;  %v542_v32 = vld [vmem:[%s781_s9 + $0x18] sm:$0xff]   ;;  %v544_v34 = vld [vmem:[%s781_s9 + $0x20] sm:$0xff]   ;;  %v546_v46 = vld [vmem:[%s781_s9 + $0x28] sm:$0xff]  }
  0x10   :  { %184 = vmatpush1.bf16.msra.mxu0 %v519_v13  ;;  %v453_v39 = vld [vmem:[%s773_s1] ss:$0 sm:$0xff]  ;;  %v547_v47 = vld [vmem:[%s781_s9 + $0x70] sm:$0xff]   ;;  %v549_v49 = vld [vmem:[%s781_s9 + $0x78] sm:$0xff]  }
  0x11   :  { %185 = vmatprep.subr.bf16.mxu0 %v520_v14  ;;  %v454_v41 = vld [vmem:[%s774_s2] ss:$0 sm:$0xff]  ;;  %v548_v48 = vld [vmem:[%s781_s9 + $0x30] sm:$0xff]   ;;  %v550_v50 = vld [vmem:[%s781_s9 + $0x38] sm:$0xff]  }
  0x12   :  { %490 = vmatpush3.bf16.msra.mxu1 %v538_v28  ;;  %v221_v51 = vld [vmem:[%s780_s8] sm:$0x3] }
  0x13   :  { %491 = vmatprep.subr.bf16.mxu1 %v539_v29  ;;  %v222_v52 = vadd.f32 1e-05, %v221_v51  ;;  %v87_v57 = vld [vmem:[%s776_s4] sm:$0x3]  ;;  %s582_s4 = smov [#allocation2]  }
  0x14   :  { %186 = vmatpush1.bf16.msra.mxu0 %v522_v15  ;;  %v220_v58 = vld [vmem:[%s777_s5] sm:$0x3]  ;;  %v92_v61 = vrot.slane %v87_v57, %v91_v55  ;;  %v96_v63 = vrot.slane %v87_v57, %v95_v59  ;;  %s445_s5 = sshll.u32 %s582_s4, 4  ;;  %s446_s5 = int_to_ptr.vmem [resolvable:$true] %s445_s5 }
  0x15   :  { %187 = vmatprep.subr.bf16.mxu0 %v523_v16  ;;  %v225_v60 = vld [vmem:[%s779_s7] sm:$0x3]  ;;  %p562_p1 = scmp.lt.s32.totalorder %s446_s5, %s446_s5 }
  0x16   :  { %492 = vmatpush3.bf16.msra.mxu1 %v540_v30  ;;  %v230_v0 = vrot.slane %v225_v60, %v91_v55  ;;  %v234_v2 = vrot.slane %v225_v60, %v95_v59  ;;  %v252_v3 = vld [vmem:[%s778_s6] sm:$0x3]  ;;  %s557_s6 = scalar_lea.vmem %s446_s5, 32 }
  0x17   :  { %493 = vmatprep.subr.bf16.mxu1 %v541_v31  ;;  %v261_v14 = vrot.slane %v252_v3, %v95_v59  ;;  %p558_p0 = scmp.ne.s32.totalorder %s446_s5, %s557_s6  ;;  %p563_p2 = scmp.lt.s32.totalorder %s557_s6, %s557_s6 }
  0x18   :  { %188 = vmatpush1.bf16.msra.mxu0 %v525_v17 }
  0x19   :  { %189 = vmatprep.subr.bf16.mxu0 %v526_v18  ;;  %p564_p3 = por %p563_p2, %p562_p1 }
  0x1a   :  { %494 = vmatpush3.bf16.msra.mxu1 %v542_v32 }
  0x1b   :  { %495 = vmatprep.subr.bf16.mxu1 %v543_v33  ;;  %p565_p4 = pnand %p564_p3, %p558_p0 }
  0x1c   :  { %190 = vmatpush1.bf16.msra.mxu0 %v528_v20 }
  0x1d   :  { %191 = vmatprep.subr.bf16.mxu0 %v529_v21 }
  0x1e   :  { %496 = vmatpush3.bf16.msra.mxu1 %v544_v34 }
  0x1f   :  { %497 = vmatprep.subr.bf16.mxu1 %v545_v45 }
  0x20   :  { %192 = vmatpush1.bf16.msra.mxu0 %v531_v22 }
  0x21   :  { %193 = vmatprep.subr.bf16.mxu0 %v532_v23 }
  0x22   :  { %498 = vmatpush3.bf16.msra.mxu1 %v546_v46 }
  0x23   :  { %499 = vmatprep.subr.bf16.mxu1 %v547_v47 }
  0x24   :  { %194 = vmatpush1.bf16.msra.mxu0 %v534_v24 }
  0x26   :  { %500 = vmatpush3.bf16.msra.mxu1 %v548_v48 }
  0x27   :  { %501 = vmatprep.subr.bf16.mxu1 %v549_v49 }
  0x2a   :  { %502 = vmatpush3.bf16.msra.mxu1 %v550_v50 }
  0x92   :  { %v44_v8 = vpop.xlane.xlu0 %43 }
  0x93   :  { %v46_v9 = vmul.f32 0.0078125, %v44_v8 }
  0x95   :  { %v47_v10 = vsub.f32 %v40_v1, %v46_v9 }
  0x97   :  { %v48_v11 = vmul.f32 %v47_v10, %v47_v10 }
  0x99   :  { %v49_v12 = vsel %vm41_vm0, %v48_v11, 0.0 }
  0x9a   :  { %50 = vadd.xlane.f32.xlu0 %v49_v12  ;;  %v257_v12 = vrot.slane %v252_v3, %v91_v55 }
 0x127   :  { %v51_v35 = vpop.xlane.xlu0 %50 }
 0x128   :  { %v52_v36 = vmul.f32 0.0078125, %v51_v35 }
 0x12a   :  { %v53_v37 = vadd.f32 1e-05, %v52_v36 }
 0x12c   :  { %551 = vrsqrt.f32 %v53_v37 }
 0x12d   :  { %553 = vrsqrt.f32 %v222_v52 }
 0x136   :  { %v552_v38 = vpop.eup %551 }
 0x137   :  { %v55_v40 = vmul.f32 %v552_v38, %v47_v10  ;;  %v554_v56 = vpop.eup %553 }
 0x138   :  { %v224_v62 = vmul.f32 %v554_v56, %v220_v58 }
 0x139   :  { %v62_v42 = vmul.f32 %v453_v39, %v55_v40 }
 0x13a   :  { %v243_v5 = vrot.slane %v224_v62, %v91_v55  ;;  %v247_v9 = vrot.slane %v224_v62, %v95_v59 }
 0x13b   :  { %v69_v43 = vadd.f32 %v454_v41, %v62_v42 }
 0x13d   :  { %v70_v44 = vpack.c.bf16 %v69_v43, %v69_v43 }
 0x13f   :  { %212 = vmatmul.mubr.bf16.vlgmr.msra.gmra.mrb[0].mxu0 %v70_v44 }
 0x212   :  { %v213_v1 = vpop.f32.mrb[0].mxu0 }
 0x213   :  { %v214_v4 = vadd.f32 %v213_v1, %v92_v61  ;;  %v215_v6 = vpop.f32.mrb[1].mxu0 }
 0x214   :  { %v216_v7 = vadd.f32 %v215_v6, %v96_v63  ;;  %v217_v8 = vpop.f32.mrb[2].mxu0 }
 0x215   :  { %v237_v10 = vsub.f32 %v214_v4, %v230_v0  ;;  %v218_v11 = vpop.f32.mrb[3].mxu0 }
 0x216   :  { %v238_v13 = vsub.f32 %v216_v7, %v234_v2 }
 0x217   :  { %v250_v15 = vmul.f32 %v243_v5, %v237_v10 }
 0x218   :  { %v251_v16 = vmul.f32 %v247_v9, %v238_v13 }
 0x219   :  { %v264_v17 = vadd.f32 %v257_v12, %v250_v15 }
 0x21a   :  { %v265_v18 = vadd.f32 %v261_v14, %v251_v16 }
 0x21b   :  { %v266_v20 = vpack.c.bf16 %v264_v17, %v264_v17 }
 0x21c   :  { %v267_v19 = vpack.c.bf16 %v265_v18, %v265_v18 }
 0x21e   :  { %428 = vmatprep.mubr.bf16.mxu1 %v267_v19 }
 0x21f   :  { %429 = vmatmul.mubr.bf16.vlgmr.msra.gmra.mrb[0].mxu1 %v266_v20 }
 0x2f2   :  { %v503_v21 = vpop.f32.mrb[0].mxu1 }
 0x2f3   :  { %v504_v22 = vpop.f32.mrb[1].mxu1 }
 0x2f4   :  { %v505_v23 = vadd.f32 %v504_v22, %v503_v21  ;;  %v506_v24 = vpop.f32.mrb[2].mxu1 }
 0x2f5   :  { %v507_v25 = vpop.f32.mrb[3].mxu1 }
 0x2f6   :  { %555 = vtanh.f32 %v505_v23 }
 0x300   :  { %v556_v26 = vpop.eup %555 }
 0x301   :  { %438 = vst.msk [vmem:[#allocation2] sm:$0x3] %vm437_vm1, %v556_v26 }
 0x302   :  { %568 = shalt.err (!%p565_p4)
}
 0x303   :  { %s569_s24 = scalar_lea.hbm %s782_s10, 32 }
 0x304   :  { %p570_p5 = scmp.ne.s32.totalorder %s782_s10, %s569_s24  ;;  %p573_p6 = scmp.lt.u32.totalorder %s569_s24, %s782_s10 }
 0x306   :  { %p575_p7 = pnand %p573_p6, %p570_p5 }
 0x308   :  { %578 = shalt.err (!%p575_p7)
}
 0x309   :  { %448 = dma.vmem_to_hbm [thread:$0]  %s446_s5, 32, %s782_s10, [#allocation3]  }
 0x30a   :  { %579 = dma.done.wait [#allocation3], 32  }
 0x30b   :  { %580 = vsyncadd [#allocation3], 4294967264 }
 0x30c   :  { %452 = vsyncpa [#allocation3], 1 }

// kernel: forward.8
= control target key start
LH: loop header
LB: loop body
LE: loop exit
PB: predicated region body
PF: predicated region fallthrough
CT: control target
= control target key end

     0   :  { %s6850_s21 = smov 0   ;;  %s8195_s0 = inlined_call_operand.<no memory space> [shape: f32[1], index: 0, kind: input, shape index: {}]   ;;  %s8196_s1 = inlined_call_operand.vmem [shape: bf16[2,17,128], index: 1, kind: input, shape index: {}]   ;;  %s8197_s2 = inlined_call_operand.vmem [shape: bf16[2,16,128], index: 2, kind: input, shape index: {}]   ;;  %s8198_s3 = inlined_call_operand.vmem [shape: bf16[128,256], index: 3, kind: input, shape index: {}]   ;;  %s8199_s4 = inlined_call_operand.vmem [shape: f32[1,128], index: 4, kind: input, shape index: {}]   ;;  %s8200_s5 = inlined_call_operand.vmem [shape: f32[1,128], index: 5, kind: input, shape index: {}]   ;;  %s8201_s6 = inlined_call_operand.vmem [shape: f32[1,128], index: 6, kind: input, shape index: {}]   ;;  %s8202_s7 = inlined_call_operand.vmem [shape: f32[1,128], index: 7, kind: input, shape index: {}]   ;;  %s8203_s8 = inlined_call_operand.vmem [shape: f32[1,128], index: 8, kind: input, shape index: {}]   ;;  %s8204_s9 = inlined_call_operand.vmem [shape: bf16[128,384], index: 9, kind: input, shape index: {}]   ;;  %s8205_s10 = inlined_call_operand.vmem [shape: f32[1,384], index: 10, kind: input, shape index: {}]   ;;  %s8206_s11 = inlined_call_operand.vmem [shape: bf16[128,128], index: 11, kind: input, shape index: {}]   ;;  %s8207_s12 = inlined_call_operand.vmem [shape: f32[1,128], index: 12, kind: input, shape index: {}]   ;;  %s8208_s13 = inlined_call_operand.vmem [shape: f32[1,128], index: 13, kind: input, shape index: {}]   ;;  %s8209_s14 = inlined_call_operand.vmem [shape: f32[1,128], index: 14, kind: input, shape index: {}]   ;;  %s8210_s15 = inlined_call_operand.vmem [shape: bf16[128,512], index: 15, kind: input, shape index: {}]   ;;  %s8211_s16 = inlined_call_operand.vmem [shape: f32[1,512], index: 16, kind: input, shape index: {}]   ;;  %s8212_s17 = inlined_call_operand.vmem [shape: bf16[512,128], index: 17, kind: input, shape index: {}]   ;;  %s8213_s18 = inlined_call_operand.vmem [shape: f32[1,128], index: 18, kind: input, shape index: {}]   ;;  %s8214_s19 = inlined_call_operand.vmem [shape: bf16[2,17,128], index: 19, kind: output, shape index: {}]  }
   0x1   :  { %8230 = sst [smem:[#allocation8_spill]] %s8195_s0 }
   0x2   :  { %8231 = sst [smem:[#allocation9_spill]] %s8196_s1  ;;  %s8234_s20 = sld [smem:[#allocation8_spill]] }
   0x3   :  { %8232 = sst [smem:[#allocation10_spill]] %s8197_s2 }
   0x4   :  { %8233 = sst [smem:[#allocation11_spill]] %s8198_s3 }
   0x8   :  { %24 = sst [smem:[#allocation2]] %s8234_s20 }
   0x9 LB: > { %8235 = sst [smem:[#allocation3_spill]] %s6737_s21  ;;  %s5955_s1 = sadd.s32 4294967295, %s6737_s21   ;;  %s6737_s21 = sphi %s6850_s21, %s30_s21  }
   0xa   : > { %p5959_p0 = scmp.ge.s32.totalorder %s6737_s21, 1  ;;  %p548_p1 = scmp.lt.s32.totalorder %s6737_s21, 3 }
   0xc   : > { %p549_p2 = pnand %p5959_p0, %p548_p1 }
   0xe   : > { %552 = sbr.rel (%p549_p2) target bundleno = 4403 (0x1133), region = 96 }
  0x15   : > { %s8236_s23 = sld [smem:[#allocation11_spill]]  ;;  %v8227_v2 = vmov 0   ;;  %p609_p3 = scmp.lt.s32.totalorder %s5955_s1, 1  ;;  %v8221_v31 = vmov 0.0   ;;  %vm6744_vm0 = vmmov 0   ;;  %v821_v34 = vlaneseq }
  0x16   : > { %768 = vmatprep.mubr.bf16.mxu0 %v8227_v2  ;;  %s8237_s2 = sld [smem:[#allocation10_spill]]  ;;  %s633_s25 = sld [smem:[#allocation2]]  ;;  %6275 = vmatprep.subr.bf16.mxu1 %v8221_v31  ;;  %v6745_v32 = vmov 1983009808   ;;  %v6746_v39 = vmov 1934713408   ;;  %v6946_v41 = vpack.i.b16 %v8227_v2, %v8227_v2 }
  0x17   : > { %s8258_s1 = smov (!%p609_p3, %s5955_s1), 1  ;;  %s6740_s22 = smov 32   ;;  %6277 = vmatprep.mubr.msk.bf16.mxu1 %vm6744_vm0, %v8221_v31  ;;  %v819_v33 = vunpack.c.l.s4 %v6745_v32  ;;  %v6942_v36 = vshrl.u32 %v821_v34, 7  ;;  %v836_v40 = vunpack.c.l.s4 %v6746_v39  ;;  %vm1626_vm1 = vcmask 261120  }
  0x18   : > { %s6138_s27 = sshll.u32 %s8258_s1, 3  ;;  %vm1832_vm2 = vcmask 130048   ;;  %vm2399_vm3 = vcmask 523264   ;;  %vm2402_vm4 = vcmask 785408   ;;  %s8217_s26 = smul.u32 12, %s8258_s1  ;;  %vm2457_vm5 = vcmask 1040384  }
  0x19   : > { %v820_v35 = vunpack.c.0.s8 %v819_v33  ;;  %8238 = vst [vmem:[#allocation4_spill] sm:$0xff] %v6942_v36  ;;  %v837_v48 = vunpack.c.0.s8 %v836_v40  ;;  %s8239_s0 = sld [smem:[#allocation9_spill]]  ;;  %vm4162_vm6 = vcmask 131072   ;;  %vm4155_vm7 = vcmask 138240   ;;  %s8255_s30 = smul.u32 12, %s8258_s1 }
  0x1a   : > { %vm5883_vm8 = vsmask.f32 256 }
  0x1b   : > { %v6467_v0 = vld [vmem:[%s8236_s23 + $0x4] ss:$8 sps:$4 sm:$0xff]   ;;  %v6469_v1 = vld [vmem:[%s8236_s23] ss:$8 sps:$4 sm:$0xff]   ;;  %v6470_v3 = vld [vmem:[%s8236_s23 + $0x14] ss:$8 sps:$4 sm:$0xff]   ;;  %v6949_v43 = vsub.s32 %v820_v35, %v6942_v36  ;;  %v6957_v62 = vsub.s32 %v837_v48, %v6942_v36 }
  0x1c   : > { %736 = vmatprep.subr.bf16.mxu0 %v6467_v0  ;;  %v6472_v4 = vld [vmem:[%s8236_s23 + $0x10] ss:$8 sps:$4 sm:$0xff]   ;;  %v6473_v5 = vld [vmem:[%s8236_s23 + $0x24] ss:$8 sps:$4 sm:$0xff]   ;;  %v6475_v6 = vld [vmem:[%s8236_s23 + $0x20] ss:$8 sps:$4 sm:$0xff]   ;;  %s618_s24 = scalar_lea.vmem %s8237_s2, %s6138_s27  ;;  %v636_v20 = vstv %s633_s25  ;;  %s623_s25 = scalar_lea.vmem %s8214_s19, %s8255_s30 }
  0x1d   : > { %737 = vmatpush1.bf16.msra.mxu0 %v6469_v1  ;;  %v6476_v7 = vld [vmem:[%s8236_s23 + $0x34] ss:$8 sps:$4 sm:$0xff]   ;;  %v6478_v8 = vld [vmem:[%s8236_s23 + $0x30] ss:$8 sps:$4 sm:$0xff]   ;;  %v6479_v9 = vld [vmem:[%s8236_s23 + $0x44] ss:$8 sps:$4 sm:$0xff]  }
  0x1e   : > { %738 = vmatprep.subr.bf16.mxu0 %v6470_v3  ;;  %v6481_v10 = vld [vmem:[%s8236_s23 + $0x40] ss:$8 sps:$4 sm:$0xff]   ;;  %v6482_v11 = vld [vmem:[%s8236_s23 + $0x54] ss:$8 sps:$4 sm:$0xff]   ;;  %v6484_v12 = vld [vmem:[%s8236_s23 + $0x50] ss:$8 sps:$4 sm:$0xff]  }
  0x1f   : > { %v6901_v13 = vld [vmem:[%s618_s24] sm:$0xf]  ;;  %v6903_v14 = vld [vmem:[%s618_s24 + $0x4] sm:$0xf]  ;;  %v6488_v17 = vld [vmem:[%s8236_s23 + $0x74] ss:$8 sps:$4 sm:$0xff]   ;;  %s613_s27 = scalar_lea.vmem %s8239_s0, %s8217_s26 }
  0x20   : > { %v6485_v15 = vld [vmem:[%s8236_s23 + $0x64] ss:$8 sps:$4 sm:$0xff]   ;;  %v6487_v16 = vld [vmem:[%s8236_s23 + $0x60] ss:$8 sps:$4 sm:$0xff]   ;;  %v634_v18 = vunpack.c.l.bf16 %v6901_v13  ;;  %v635_v19 = vunpack.c.l.bf16 %v6903_v14  ;;  %v6490_v21 = vld [vmem:[%s8236_s23 + $0x70] ss:$8 sps:$4 sm:$0xff]  }
  0x21   : > { %739 = vmatpush1.bf16.msra.mxu0 %v6472_v4  ;;  %s6741_s2 = smov 96   ;;  %s6742_s24 = smov 64   ;;  %v796_v55 = vshrl.u32 %v6901_v13, 16  ;;  %v808_v63 = vshrl.u32 %v6903_v14, 16  ;;  %vm5884_vm9 = vmand %vm2457_vm5, %vm5883_vm8 }
  0x22   : > { %740 = vmatprep.subr.bf16.mxu0 %v6473_v5  ;;  %v637_v22 = vmul.f32 %v636_v20, %v634_v18  ;;  %v638_v23 = vmul.f32 %v636_v20, %v635_v19 }
  0x24   : > { %v639_v24 = vpack.c.bf16 %v638_v23, %v637_v22 }
  0x25   : > { %741 = vmatpush1.bf16.msra.mxu0 %v6475_v6 }
  0x26   : > { %742 = vmatprep.subr.bf16.mxu0 %v6476_v7 }
  0x29   : > { %743 = vmatpush1.bf16.msra.mxu0 %v6478_v8 }
  0x2a   : > { %744 = vmatprep.subr.bf16.mxu0 %v6479_v9 }
  0x2d   : > { %745 = vmatpush1.bf16.msra.mxu0 %v6481_v10 }
  0x2e   : > { %746 = vmatprep.subr.bf16.mxu0 %v6482_v11 }
  0x31   : > { %747 = vmatpush1.bf16.msra.mxu0 %v6484_v12 }
  0x32   : > { %748 = vmatprep.subr.bf16.mxu0 %v6485_v15 }
  0x35   : > { %749 = vmatpush1.bf16.msra.mxu0 %v6487_v16 }
  0x36   : > { %750 = vmatprep.subr.bf16.mxu0 %v6488_v17 }
  0x39   : > { %751 = vmatpush1.bf16.msra.mxu0 %v6490_v21 }
  0x3a   : > { %6299 = vmatprep.subr.bf16.mxu0 %v8221_v31 }
  0x3c   : > { %769 = vmatmul.mubr.bf16.vlgmr.msra.gmra.mrb[0].mxu0 %v639_v24 }
  0x3d   : > { %6301 = vmatprep.mubr.msk.bf16.mxu0 %vm6744_vm0, %v8221_v31 }
 0x10f   : > { %v770_v25 = vpop.f32.mrb[0].mxu0 }
 0x110   : > { %v772_v26 = vpop.f32.mrb[1].mxu0 }
 0x111   : > { %v774_v27 = vpop.f32.mrb[2].mxu0 }
 0x112   : > { %v1077_v28 = vpack.c.bf16 %v774_v27, %v770_v25  ;;  %v776_v29 = vpop.f32.mrb[3].mxu0 }
 0x113   : > { %v6919_v30 = vpack.c.bf16 %v776_v29, %v772_v26 }
 0x114   : > { %1083 = vrot.lane.b32.xlu1 %v1077_v28, %s6740_s22  ;;  %1079 = vrot.lane.b32.xlu0 %v1077_v28, %s6741_s2  ;;  %v1089_v47 = vshrl.u32 %v1077_v28, 16 }
 0x118   : > { %781 = vrot.lane.b32.xlu1 %v6901_v13, %s6741_s2  ;;  %1081 = vrot.lane.b32.xlu0 %v1077_v28, %s6742_s24 }
 0x11c   : > { %785 = vrot.lane.b32.xlu1 %v6901_v13, %s6742_s24  ;;  %783 = vrot.lane.b32.xlu0 %v6903_v14, %s6741_s2 }
 0x120   : > { %789 = vrot.lane.b32.xlu1 %v6901_v13, %s6740_s22  ;;  %787 = vrot.lane.b32.xlu0 %v6903_v14, %s6742_s24 }
 0x124   : > { %791 = vrot.lane.b32.xlu0 %v6903_v14, %s6740_s22 }
 0x186   : > { %v1084_v37 = vpop.permute.xlu1 %1083  ;;  %v1080_v38 = vpop.permute.xlu0 %1079 }
 0x187   : > { %v1087_v42 = vpack.i.b16 %v1080_v38, %v1077_v28  ;;  %v1090_v44 = vshrl.u32 %v1080_v38, 16  ;;  %v1098_v49 = vshrl.u32 %v1084_v37, 16 }
 0x189   : > { %v1107_v50 = vcombine.high %v1087_v42, %v6946_v41  ;;  %v1091_v53 = vpack.i.b16 %v1090_v44, %v1089_v47  ;;  %v1114_v54 = vrot.slane %v1087_v42, %v6949_v43 }
 0x18a   : > { %v782_v45 = vpop.permute.xlu1 %781  ;;  %v1082_v46 = vpop.permute.xlu0 %1081 }
 0x18b   : > { %v1095_v51 = vpack.i.b16 %v1084_v37, %v1082_v46  ;;  %v1097_v52 = vshrl.u32 %v1082_v46, 16  ;;  %v797_v56 = vshrl.u32 %v782_v45, 16  ;;  %v1121_v1 = vrot.slane %v1107_v50, %v6949_v43 }
 0x18c   : > { %v1173_v6 = vcombine.high %v1091_v53, %v6946_v41  ;;  %v795_v7 = vpack.i.b16 %v782_v45, %v6901_v13  ;;  %v1180_v10 = vrot.slane %v1091_v53, %v6949_v43 }
 0x18d   : > { %v1099_v57 = vpack.i.b16 %v1098_v49, %v1097_v52  ;;  %v1122_v58 = vcombine.high %v1095_v51, %v6946_v41  ;;  %v1129_v59 = vrot.slane %v1095_v51, %v6949_v43  ;;  %v798_v11 = vpack.i.b16 %v797_v56, %v796_v55 }
 0x18e   : > { %v786_v60 = vpop.permute.xlu1 %785  ;;  %v784_v61 = vpop.permute.xlu0 %783  ;;  %v1187_v13 = vrot.slane %v1173_v6, %v6949_v43  ;;  %v824_v23 = vrot.slane %v795_v7, %v6949_v43 }
 0x18f   : > { %v809_v0 = vshrl.u32 %v784_v61, 16  ;;  %v1136_v3 = vrot.slane %v1122_v58, %v6949_v43  ;;  %v1137_v4 = vcombine.low %v1114_v54, %v1129_v59  ;;  %v1138_v5 = vcombine.high %v1114_v54, %v1129_v59 }
 0x190   : > { %v1188_v8 = vcombine.high %v1099_v57, %v6946_v41  ;;  %v1195_v9 = vrot.slane %v1099_v57, %v6949_v43  ;;  %v807_v17 = vpack.i.b16 %v784_v61, %v6903_v14  ;;  %v802_v22 = vshrl.u32 %v786_v60, 16 }
 0x191   : > { %v1153_v15 = vcombine.low %v1121_v1, %v1136_v3  ;;  %v1154_v16 = vcombine.high %v1121_v1, %v1136_v3  ;;  %v810_v18 = vpack.i.b16 %v809_v0, %v808_v63  ;;  %v1145_v20 = vrot.slane %v1137_v4, %v6957_v62 }
 0x192   : > { %v788_v12 = vpop.permute.xlu0 %787  ;;  %v790_v19 = vpop.permute.xlu1 %789  ;;  %v1152_v21 = vrot.slane %v1138_v5, %v6957_v62  ;;  %v1202_v24 = vrot.slane %v1188_v8, %v6949_v43  ;;  %v1203_v25 = vcombine.low %v1180_v10, %v1195_v9  ;;  %v858_v26 = vrot.slane %v798_v11, %v6949_v43 }
 0x193   : > { %v1204_v27 = vcombine.high %v1180_v10, %v1195_v9  ;;  %v801_v28 = vpack.i.b16 %v790_v19, %v786_v60  ;;  %v803_v29 = vshrl.u32 %v790_v19, 16  ;;  %v1161_v32 = vrot.slane %v1153_v15, %v6957_v62 }
 0x194   : > { %v1168_v33 = vrot.slane %v1154_v16, %v6957_v62  ;;  %v892_v34 = vrot.slane %v807_v17, %v6949_v43  ;;  %v926_v35 = vrot.slane %v810_v18, %v6949_v43  ;;  %v1239_v37 = vcombine.low %v1145_v20, %v1152_v21 }
 0x195   : > { %v804_v38 = vpack.i.b16 %v803_v29, %v802_v22  ;;  %v832_v39 = vrot.slane %v801_v28, %v6949_v43  ;;  %v1211_v42 = vrot.slane %v1203_v25, %v6957_v62  ;;  %v1219_v44 = vcombine.low %v1187_v13, %v1202_v24 }
 0x196   : > { %v792_v14 = vpop.permute.xlu0 %791  ;;  %v814_v45 = vshrl.u32 %v788_v12, 16  ;;  %v1218_v47 = vrot.slane %v1204_v27, %v6957_v62  ;;  %v1220_v48 = vcombine.high %v1187_v13, %v1202_v24  ;;  %v5984_v51 = vcombine.high %v1145_v20, %v1152_v21 }
 0x197   : > { %v813_v40 = vpack.i.b16 %v792_v14, %v788_v12  ;;  %v815_v46 = vshrl.u32 %v792_v14, 16  ;;  %v866_v49 = vrot.slane %v804_v38, %v6949_v43  ;;  %v1255_v52 = vcombine.low %v1161_v32, %v1168_v33 }
 0x198   : > { %v5985_v53 = vcombine.high %v1161_v32, %v1168_v33  ;;  %v833_v55 = vcombine.low %v824_v23, %v832_v39  ;;  %v834_v56 = vcombine.high %v824_v23, %v832_v39  ;;  %v1227_v59 = vrot.slane %v1219_v44, %v6957_v62 }
 0x199   : > { %v900_v50 = vrot.slane %v813_v40, %v6949_v43  ;;  %v816_v54 = vpack.i.b16 %v815_v46, %v814_v45  ;;  %v867_v57 = vcombine.low %v858_v26, %v866_v49  ;;  %v868_v58 = vcombine.high %v858_v26, %v866_v49 }
 0x19a   : > { %v1234_v0 = vrot.slane %v1220_v48, %v6957_v62  ;;  %v1289_v1 = vcombine.low %v1211_v42, %v1218_v47  ;;  %v5986_v9 = vcombine.high %v1211_v42, %v1218_v47  ;;  %v841_v10 = vrot.slane %v833_v55, %v6957_v62 }
 0x19b   : > { %v901_v60 = vcombine.low %v892_v34, %v900_v50  ;;  %v902_v61 = vcombine.high %v892_v34, %v900_v50  ;;  %v934_v63 = vrot.slane %v816_v54, %v6949_v43  ;;  %v875_v3 = vrot.slane %v867_v57, %v6957_v62 }
 0x19c   : > { %v882_v4 = vrot.slane %v868_v58, %v6957_v62  ;;  %v848_v11 = vrot.slane %v834_v56, %v6957_v62  ;;  %v1246_v12 = vrot.slane %v1239_v37, %v6949_v43  ;;  %v1262_v17 = vrot.slane %v1255_v52, %v6949_v43 }
 0x19d   : > { %v909_v5 = vrot.slane %v901_v60, %v6957_v62  ;;  %v916_v6 = vrot.slane %v902_v61, %v6957_v62  ;;  %v935_v7 = vcombine.low %v926_v35, %v934_v63  ;;  %v936_v8 = vcombine.high %v926_v35, %v934_v63 }
 0x19e   : > { %v1270_v18 = vrot.slane %v5985_v53, %v6949_v43  ;;  %v978_v19 = vcombine.low %v875_v3, %v882_v4  ;;  %v5981_v20 = vcombine.high %v875_v3, %v882_v4  ;;  %v1254_v21 = vrot.slane %v5984_v51, %v6949_v43 }
 0x19f   : > { %v943_v15 = vrot.slane %v935_v7, %v6957_v62  ;;  %v950_v16 = vrot.slane %v936_v8, %v6957_v62  ;;  %v1296_v22 = vrot.slane %v1289_v1, %v6949_v43  ;;  %v1003_v13 = vcombine.low %v909_v5, %v916_v6 }
 0x1a0   : > { %v5982_v23 = vcombine.high %v909_v5, %v916_v6  ;;  %v953_v26 = vcombine.low %v841_v10, %v848_v11  ;;  %v5980_v27 = vcombine.high %v841_v10, %v848_v11  ;;  %v1304_v28 = vrot.slane %v5986_v9, %v6949_v43 }
 0x1a1   : > { %v1028_v24 = vcombine.low %v943_v15, %v950_v16  ;;  %v5983_v25 = vcombine.high %v943_v15, %v950_v16  ;;  %v1305_v29 = vcombine.low %v1227_v59, %v1234_v0  ;;  %v1279_v33 = vcombine.low %v1262_v17, %v1270_v18 }
 0x1a2   : > { %v5987_v34 = vcombine.high %v1227_v59, %v1234_v0  ;;  %v985_v35 = vrot.slane %v978_v19, %v6949_v43  ;;  %v993_v37 = vrot.slane %v5981_v20, %v6949_v43  ;;  %v1271_v38 = vcombine.low %v1246_v12, %v1254_v21 }
 0x1a3   : > { %v1035_v14 = vrot.slane %v1028_v24, %v6949_v43  ;;  %v1043_v32 = vrot.slane %v5983_v25, %v6949_v43  ;;  %v1312_v39 = vrot.slane %v1305_v29, %v6949_v43  ;;  %v1010_v40 = vrot.slane %v1003_v13, %v6949_v43 }
 0x1a4   : > { %v1018_v42 = vrot.slane %v5982_v23, %v6949_v43  ;;  %v1320_v44 = vrot.slane %v5987_v34, %v6949_v43  ;;  %v1321_v45 = vcombine.low %v1296_v22, %v1304_v28  ;;  %v960_v46 = vrot.slane %v953_v26, %v6949_v43 }
 0x1a5   : > { %v968_v47 = vrot.slane %v5980_v27, %v6949_v43  ;;  %v1044_v48 = vcombine.low %v1035_v14, %v1043_v32  ;;  %v1286_v49 = vrot.slane %v1279_v33, %v6957_v62  ;;  %v1278_v51 = vrot.slane %v1271_v38, %v6957_v62 }
 0x1a6   : > { %v1329_v50 = vcombine.low %v1312_v39, %v1320_v44  ;;  %v994_v52 = vcombine.low %v985_v35, %v993_v37  ;;  %v1019_v53 = vcombine.low %v1010_v40, %v1018_v42  ;;  %v1328_v54 = vrot.slane %v1321_v45, %v6957_v62 }
 0x1a7   : > { %v969_v56 = vcombine.low %v960_v46, %v968_v47  ;;  %v1287_v57 = vcombine.low %v1278_v51, %v1286_v49  ;;  %v1051_v59 = vrot.slane %v1044_v48, %v6957_v62  ;;  %v1288_v18 = vcombine.high %v1278_v51, %v1286_v49 }
 0x1a8   : > { %v1336_v55 = vrot.slane %v1329_v50, %v6957_v62  ;;  %v1001_v61 = vrot.slane %v994_v52, %v6957_v62  ;;  %v1026_v63 = vrot.slane %v1019_v53, %v6957_v62 }
 0x1a9   : > { %v976_v3 = vrot.slane %v969_v56, %v6957_v62  ;;  %v1342_v5 = vshrl.u32 %v1287_v57, 16  ;;  %v1069_v9 = vshrl.u32 %v1051_v59, 16  ;;  %v1052_v22 = vcombine.high %v1051_v59, %v8227_v2 }
 0x1aa   : > { %v1337_v58 = vcombine.low %v1328_v54, %v1336_v55  ;;  %v1067_v4 = vpack.i.b16 %v1051_v59, %v1026_v63  ;;  %v1057_v11 = vshrl.u32 %v1001_v61, 16  ;;  %v1068_v12 = vshrl.u32 %v1026_v63, 16 }
 0x1ab   : > { %v1055_v6 = vpack.i.b16 %v1001_v61, %v976_v3  ;;  %v1338_v15 = vcombine.high %v1328_v54, %v1336_v55  ;;  %v1056_v16 = vshrl.u32 %v976_v3, 16  ;;  %v1002_v23 = vcombine.high %v1001_v61, %v8227_v2 }
 0x1ac   : > { %v1341_v60 = vpack.i.b16 %v1337_v58, %v1287_v57  ;;  %v1343_v0 = vshrl.u32 %v1337_v58, 16  ;;  %v1070_v17 = vpack.i.b16 %v1069_v9, %v1068_v12  ;;  %v1027_v24 = vcombine.high %v1026_v63, %v8227_v2 }
 0x1ad   : > { %v5992_v7 = vcombine.low %v1055_v6, %v1067_v4  ;;  %v1058_v19 = vpack.i.b16 %v1057_v11, %v1056_v16  ;;  %v1347_v20 = vpack.i.b16 %v1338_v15, %v1288_v18  ;;  %v1349_v25 = vshrl.u32 %v1338_v15, 16 }
 0x1ae   : > { %v1631_v1 = vsel %vm1626_vm1, %v1341_v60, 0  ;;  %v1344_v8 = vpack.i.b16 %v1343_v0, %v1342_v5  ;;  %v977_v26 = vcombine.high %v976_v3, %v8227_v2  ;;  %v1073_v27 = vpack.i.b16 %v1052_v22, %v1027_v24 }
 0x1af   : > { %6276 = vmatpush3.bf16.xpose.msra.mxu1 %v1631_v1  ;;  %v5994_v21 = vcombine.low %v1058_v19, %v1070_v17  ;;  %v1731_v13 = vsel %vm1626_vm1, %v1347_v20, 0  ;;  %v1348_v28 = vshrl.u32 %v1288_v18, 16  ;;  %v1075_v33 = vshrl.u32 %v1052_v22, 16 }
 0x1b0   : > { %6281 = vmatprep.subr.bf16.mxu1 %v8221_v31  ;;  %v1681_v10 = vsel %vm1626_vm1, %v1344_v8, 0  ;;  %v1061_v29 = vpack.i.b16 %v1002_v23, %v977_v26  ;;  %v1063_v35 = vshrl.u32 %v1002_v23, 16  ;;  %v1074_v37 = vshrl.u32 %v1027_v24, 16 }
 0x1b1   : > { %v1350_v14 = vpack.i.b16 %v1349_v25, %v1348_v28  ;;  %v1062_v38 = vshrl.u32 %v977_v26, 16 }
 0x1b2   : > { %v5996_v32 = vcombine.low %v1061_v29, %v1073_v27  ;;  %v1076_v39 = vpack.i.b16 %v1075_v33, %v1074_v37 }
 0x1b3   : > { %v1781_v34 = vsel %vm1626_vm1, %v1350_v14, 0  ;;  %v1064_v40 = vpack.i.b16 %v1063_v35, %v1062_v38 }
 0x1b5   : > { %v5998_v42 = vcombine.low %v1064_v40, %v1076_v39 }
 0x1b6   : > { %6278 = vmatmul.mubr.msk.bf16.vlgmr.msra.gmra.mrb[0].mxu1 %vm1626_vm1, %v5992_v7 }
 0x1b7   : > { %6282 = vmatpush3.bf16.xpose.msra.mxu1 %v1681_v10  ;;  %6283 = vmatprep.mubr.msk.bf16.mxu1 %vm6744_vm0, %v8221_v31 }
 0x1b8   : > { %6287 = vmatprep.subr.bf16.mxu1 %v8221_v31 }
 0x1be   : > { %6284 = vmatmul.mubr.msk.bf16.vlgmr.msra.gmra.mrb[4].mxu1 %vm1626_vm1, %v5994_v21 }
 0x1bf   : > { %6288 = vmatpush3.bf16.xpose.msra.mxu1 %v1731_v13  ;;  %6289 = vmatprep.mubr.msk.bf16.mxu1 %vm6744_vm0, %v8221_v31 }
 0x1c0   : > { %6293 = vmatprep.subr.bf16.mxu1 %v8221_v31 }
 0x1c6   : > { %6290 = vmatmul.mubr.msk.bf16.vlgmr.msra.gmra.mrb[8].mxu1 %vm1626_vm1, %v5996_v32 }
 0x1c7   : > { %6294 = vmatpush3.bf16.xpose.msra.mxu1 %v1781_v34  ;;  %6295 = vmatprep.mubr.msk.bf16.mxu1 %vm6744_vm0, %v8221_v31 }
 0x1c8   : > { %6305 = vmatprep.subr.bf16.mxu1 %v8221_v31 }
 0x1ce   : > { %6296 = vmatmul.mubr.msk.bf16.vlgmr.msra.gmra.mrb[12].mxu1 %vm1626_vm1, %v5998_v42 }
 0x1cf   : > { %6307 = vmatprep.mubr.msk.bf16.mxu1 %vm6744_vm0, %v8221_v31 }
 0x289   : > { %v1667_v44 = vpop.f32.mrb[0].mxu1 }
 0x28a   : > { %v1824_v45 = vmul.f32 0.17677669, %v1667_v44  ;;  %v6279_v46 = vpop.f32.mrb[1].mxu1 }
 0x28b   : > { %v1670_v47 = vpop.f32.mrb[2].mxu1 }
 0x28c   : > { %v1825_v48 = vmul.f32 0.17677669, %v1670_v47  ;;  %v6280_v49 = vpop.f32.mrb[3].mxu1  ;;  %v1833_v50 = vsel %vm1832_vm2, %v1824_v45, -inf }
 0x28d   : > { %1834 = vmax.xlane.f32.xlu1 %v1833_v50 }
 0x28e   : > { %v1836_v51 = vsel %vm1832_vm2, %v1825_v48, -inf }
 0x28f   : > { %1837 = vmax.xlane.f32.xlu0 %v1836_v51 }
 0x291   : > { %v1717_v52 = vpop.f32.mrb[4].mxu1 }
 0x292   : > { %v1826_v53 = vmul.f32 0.17677669, %v1717_v52  ;;  %v6285_v54 = vpop.f32.mrb[5].mxu1 }
 0x293   : > { %v1720_v55 = vpop.f32.mrb[6].mxu1  ;;  %v1363_v54 = vshrl.u32 %v6919_v30, 16 }
 0x294   : > { %v1827_v56 = vmul.f32 0.17677669, %v1720_v55  ;;  %v6286_v57 = vpop.f32.mrb[7].mxu1  ;;  %v1839_v58 = vsel %vm1832_vm2, %v1826_v53, -inf }
 0x295   : > { %1840 = vmax.xlane.f32.xlu0 %v1839_v58 }
 0x296   : > { %v1842_v59 = vsel %vm1832_vm2, %v1827_v56, -inf }
 0x297   : > { %1843 = vmax.xlane.f32.xlu1 %v1842_v59 }
 0x299   : > { %v1767_v60 = vpop.f32.mrb[8].mxu1 }
 0x29a   : > { %v1828_v61 = vmul.f32 0.17677669, %v1767_v60  ;;  %v6291_v63 = vpop.f32.mrb[9].mxu1 }
 0x29b   : > { %v1770_v0 = vpop.f32.mrb[10].mxu1 }
 0x29c   : > { %v1829_v1 = vmul.f32 0.17677669, %v1770_v0  ;;  %v6292_v3 = vpop.f32.mrb[11].mxu1  ;;  %v1845_v4 = vsel %vm1832_vm2, %v1828_v61, -inf }
 0x29d   : > { %1846 = vmax.xlane.f32.xlu0 %v1845_v4 }
 0x29e   : > { %v1848_v5 = vsel %vm1832_vm2, %v1829_v1, -inf }
 0x29f   : > { %1849 = vmax.xlane.f32.xlu1 %v1848_v5 }
 0x2a1   : > { %v1817_v6 = vpop.f32.mrb[12].mxu1 }
 0x2a2   : > { %v1830_v7 = vmul.f32 0.17677669, %v1817_v6  ;;  %v6297_v8 = vpop.f32.mrb[13].mxu1 }
 0x2a3   : > { %v1820_v9 = vpop.f32.mrb[14].mxu1 }
 0x2a4   : > { %v1831_v10 = vmul.f32 0.17677669, %v1820_v9  ;;  %v6298_v11 = vpop.f32.mrb[15].mxu1  ;;  %v1851_v12 = vsel %vm1832_vm2, %v1830_v7, -inf }
 0x2a5   : > { %1852 = vmax.xlane.f32.xlu0 %v1851_v12 }
 0x2a6   : > { %v1854_v15 = vsel %vm1832_vm2, %v1831_v10, -inf }
 0x2a7   : > { %1855 = vmax.xlane.f32.xlu1 %v1854_v15 }
 0x2b8   : > { %1355 = vrot.lane.b32.xlu1 %v6919_v30, %s6742_s24 }
 0x2bb   : > { %1353 = vrot.lane.b32.xlu0 %v6919_v30, %s6741_s2 }
 0x2bc   : > { %1357 = vrot.lane.b32.xlu1 %v6919_v30, %s6740_s22 }
 0x31a   : > { %v1835_v16 = vpop.xlane.xlu1 %1834 }
 0x31b   : > { %v1857_v17 = vsub.f32 %v1824_v45, %v1835_v16 }
 0x31c   : > { %v1838_v18 = vpop.xlane.xlu0 %1837 }
 0x31d   : > { %v1865_v19 = vmul.f32 1.442695, %v1857_v17  ;;  %v1858_v20 = vsub.f32 %v1825_v48, %v1838_v18 }
 0x31f   : > { %6611 = vpow2.f32 %v1865_v19  ;;  %v1867_v21 = vmul.f32 1.442695, %v1858_v20 }
 0x321   : > { %6613 = vpow2.f32 %v1867_v21 }
 0x322   : > { %v1841_v22 = vpop.xlane.xlu0 %1840 }
 0x323   : > { %v1859_v13 = vsub.f32 %v1826_v53, %v1841_v22 }
 0x324   : > { %v1844_v23 = vpop.xlane.xlu1 %1843 }
 0x325   : > { %v1869_v24 = vmul.f32 1.442695, %v1859_v13  ;;  %v1860_v25 = vsub.f32 %v1827_v56, %v1844_v23 }
 0x327   : > { %6615 = vpow2.f32 %v1869_v24  ;;  %v1871_v26 = vmul.f32 1.442695, %v1860_v25 }
 0x329   : > { %v7056_v27 = vpop.eup %6611  ;;  %6617 = vpow2.f32 %v1871_v26 }
 0x32a   : > { %v1847_v28 = vpop.xlane.xlu0 %1846  ;;  %v1881_v29 = vsel %vm1832_vm2, %v7056_v27, 0.0 }
 0x32b   : > { %v7060_v14 = vpop.eup %6613  ;;  %v1861_v32 = vsub.f32 %v1828_v61, %v1847_v28  ;;  %1882 = vadd.xlane.f32.xlu0 %v1881_v29 }
 0x32c   : > { %v1850_v33 = vpop.xlane.xlu1 %1849  ;;  %v1884_v34 = vsel %vm1832_vm2, %v7060_v14, 0.0 }
 0x32d   : > { %v1873_v35 = vmul.f32 1.442695, %v1861_v32  ;;  %v1862_v37 = vsub.f32 %v1829_v1, %v1850_v33  ;;  %1885 = vadd.xlane.f32.xlu1 %v1884_v34 }
 0x32f   : > { %6619 = vpow2.f32 %v1873_v35  ;;  %v1875_v38 = vmul.f32 1.442695, %v1862_v37 }
 0x331   : > { %v7064_v39 = vpop.eup %6615  ;;  %6621 = vpow2.f32 %v1875_v38 }
 0x332   : > { %v1853_v40 = vpop.xlane.xlu0 %1852  ;;  %v1887_v42 = vsel %vm1832_vm2, %v7064_v39, 0.0 }
 0x333   : > { %v7068_v44 = vpop.eup %6617  ;;  %v1863_v45 = vsub.f32 %v1830_v7, %v1853_v40  ;;  %1888 = vadd.xlane.f32.xlu0 %v1887_v42 }
 0x334   : > { %v1856_v46 = vpop.xlane.xlu1 %1855  ;;  %v1890_v50 = vsel %vm1832_vm2, %v7068_v44, 0.0 }
 0x335   : > { %v1877_v47 = vmul.f32 1.442695, %v1863_v45  ;;  %v1864_v48 = vsub.f32 %v1831_v10, %v1856_v46 }
 0x336   : > { %v1354_v49 = vpop.permute.xlu0 %1353 }
 0x337   : > { %6623 = vpow2.f32 %v1877_v47  ;;  %v1879_v51 = vmul.f32 1.442695, %v1864_v48  ;;  %v1364_v52 = vshrl.u32 %v1354_v49, 16  ;;  %1891 = vadd.xlane.f32.xlu0 %v1890_v50  ;;  %v1361_v53 = vpack.i.b16 %v1354_v49, %v6919_v30 }
 0x338   : > { %v1356_v55 = vpop.permute.xlu1 %1355 }
 0x339   : > { %v7074_v56 = vpop.eup %6619  ;;  %6625 = vpow2.f32 %v1879_v51  ;;  %v1365_v57 = vpack.i.b16 %v1364_v52, %v1363_v54  ;;  %v1375_v60 = vcombine.high %v1361_v53, %v6946_v41  ;;  %v1371_v0 = vshrl.u32 %v1356_v55, 16 }
 0x33a   : > { %v1893_v58 = vsel %vm1832_vm2, %v7074_v56, 0.0  ;;  %v1382_v4 = vrot.slane %v1361_v53, %v6949_v43 }
 0x33b   : > { %v7078_v59 = vpop.eup %6621  ;;  %1894 = vadd.xlane.f32.xlu1 %v1893_v58  ;;  %v1441_v3 = vcombine.high %v1365_v57, %v6946_v41  ;;  %v1389_v8 = vrot.slane %v1375_v60, %v6949_v43  ;;  %v1448_v16 = vrot.slane %v1365_v57, %v6949_v43 }
 0x33c   : > { %v1358_v61 = vpop.permute.xlu1 %1357  ;;  %v1896_v63 = vsel %vm1832_vm2, %v7078_v59, 0.0 }
 0x33d   : > { %v1369_v1 = vpack.i.b16 %v1358_v61, %v1356_v55  ;;  %v1372_v30 = vshrl.u32 %v1358_v61, 16  ;;  %1897 = vadd.xlane.f32.xlu0 %v1896_v63  ;;  %v1455_v17 = vrot.slane %v1441_v3, %v6949_v43 }
 0x33f   : > { %v1373_v5 = vpack.i.b16 %v1372_v30, %v1371_v0  ;;  %v1390_v6 = vcombine.high %v1369_v1, %v6946_v41  ;;  %v1397_v7 = vrot.slane %v1369_v1, %v6949_v43 }
 0x341   : > { %v7088_v9 = vpop.eup %6623  ;;  %v1404_v10 = vrot.slane %v1390_v6, %v6949_v43  ;;  %v1405_v11 = vcombine.low %v1382_v4, %v1397_v7  ;;  %v1406_v12 = vcombine.high %v1382_v4, %v1397_v7  ;;  %v1456_v15 = vcombine.high %v1373_v5, %v6946_v41 }
 0x342   : > { %v1463_v18 = vrot.slane %v1373_v5, %v6949_v43  ;;  %v1899_v19 = vsel %vm1832_vm2, %v7088_v9, 0.0 }
 0x343   : > { %v7097_v20 = vpop.eup %6625  ;;  %v1413_v21 = vrot.slane %v1405_v11, %v6957_v62  ;;  %v1420_v22 = vrot.slane %v1406_v12, %v6957_v62  ;;  %v1421_v13 = vcombine.low %v1389_v8, %v1404_v10  ;;  %v1422_v23 = vcombine.high %v1389_v8, %v1404_v10  ;;  %1900 = vadd.xlane.f32.xlu1 %v1899_v19 }
 0x344   : > { %v1470_v41 = vrot.slane %v1456_v15, %v6949_v43  ;;  %v1471_v24 = vcombine.low %v1448_v16, %v1463_v18  ;;  %v1472_v25 = vcombine.high %v1448_v16, %v1463_v18  ;;  %v1902_v26 = vsel %vm1832_vm2, %v7097_v20, 0.0 }
 0x345   : > { %v1429_v28 = vrot.slane %v1421_v13, %v6957_v62  ;;  %v1436_v29 = vrot.slane %v1422_v23, %v6957_v62  ;;  %v1507_v32 = vcombine.low %v1413_v21, %v1420_v22  ;;  %v5988_v33 = vcombine.high %v1413_v21, %v1420_v22  ;;  %1903 = vadd.xlane.f32.xlu0 %v1902_v26 }
 0x346   : > { %v1479_v34 = vrot.slane %v1471_v24, %v6957_v62  ;;  %v1486_v35 = vrot.slane %v1472_v25, %v6957_v62  ;;  %v1487_v37 = vcombine.low %v1455_v17, %v1470_v41  ;;  %v1488_v38 = vcombine.high %v1455_v17, %v1470_v41 }
 0x347   : > { %v1514_v40 = vrot.slane %v1507_v32, %v6949_v43  ;;  %v1522_v42 = vrot.slane %v5988_v33, %v6949_v43  ;;  %v1523_v45 = vcombine.low %v1429_v28, %v1436_v29  ;;  %v5989_v46 = vcombine.high %v1429_v28, %v1436_v29 }
 0x348   : > { %v1495_v47 = vrot.slane %v1487_v37, %v6957_v62  ;;  %v1502_v48 = vrot.slane %v1488_v38, %v6957_v62  ;;  %v1557_v49 = vcombine.low %v1479_v34, %v1486_v35  ;;  %v5990_v50 = vcombine.high %v1479_v34, %v1486_v35 }
 0x349   : > { %v1530_v51 = vrot.slane %v1523_v45, %v6949_v43  ;;  %v1538_v52 = vrot.slane %v5989_v46, %v6949_v43  ;;  %v1539_v53 = vcombine.low %v1514_v40, %v1522_v42 }
 0x34a   : > { %v1564_v54 = vrot.slane %v1557_v49, %v6949_v43  ;;  %v1572_v55 = vrot.slane %v5990_v50, %v6949_v43  ;;  %v1573_v57 = vcombine.low %v1495_v47, %v1502_v48  ;;  %v5991_v58 = vcombine.high %v1495_v47, %v1502_v48 }
 0x34b   : > { %v1547_v60 = vcombine.low %v1530_v51, %v1538_v52  ;;  %v1546_v1 = vrot.slane %v1539_v53, %v6957_v62 }
 0x34c   : > { %v1580_v61 = vrot.slane %v1573_v57, %v6949_v43  ;;  %v1588_v63 = vrot.slane %v5991_v58, %v6949_v43  ;;  %v1589_v0 = vcombine.low %v1564_v54, %v1572_v55 }
 0x34d   : > { %v1554_v30 = vrot.slane %v1547_v60, %v6957_v62 }
 0x34e   : > { %v1597_v3 = vcombine.low %v1580_v61, %v1588_v63  ;;  %v1596_v6 = vrot.slane %v1589_v0, %v6957_v62 }
 0x34f   : > { %v1555_v4 = vcombine.low %v1546_v1, %v1554_v30  ;;  %v1556_v5 = vcombine.high %v1546_v1, %v1554_v30 }
 0x350   : > { %v1604_v7 = vrot.slane %v1597_v3, %v6957_v62 }
 0x351   : > { %v1611_v11 = vshrl.u32 %v1555_v4, 16  ;;  %v1619_v12 = vshrl.u32 %v1556_v5, 16 }
 0x352   : > { %v1605_v8 = vcombine.low %v1596_v6, %v1604_v7  ;;  %v1606_v10 = vcombine.high %v1596_v6, %v1604_v7 }
 0x354   : > { %v1609_v15 = vpack.i.b16 %v1605_v8, %v1555_v4  ;;  %v1612_v16 = vshrl.u32 %v1605_v8, 16  ;;  %v1617_v17 = vpack.i.b16 %v1606_v10, %v1556_v5  ;;  %v1620_v18 = vshrl.u32 %v1606_v10, 16 }
 0x356   : > { %6300 = vmatpush3.bf16.msra.mxu0 %v1609_v15  ;;  %v1613_v19 = vpack.i.b16 %v1612_v16, %v1611_v11  ;;  %v1621_v21 = vpack.i.b16 %v1620_v18, %v1619_v12 }
 0x357   : > { %6311 = vmatprep.subr.bf16.mxu0 %v8221_v31 }
 0x358   : > { %6306 = vmatpush3.bf16.msra.mxu1 %v1613_v19 }
 0x359   : > { %6317 = vmatprep.subr.bf16.mxu1 %v8221_v31 }
 0x3b8   : > { %v1883_v22 = vpop.xlane.xlu0 %1882 }
 0x3b9   : > { %6627 = vrcp.f32 %v1883_v22 }
 0x3ba   : > { %v1886_v13 = vpop.xlane.xlu1 %1885 }
 0x3bb   : > { %6629 = vrcp.f32 %v1886_v13 }
 0x3c0   : > { %v1889_v23 = vpop.xlane.xlu0 %1888 }
 0x3c1   : > { %6631 = vrcp.f32 %v1889_v23 }
 0x3c3   : > { %v6628_v41 = vpop.eup %6627 }
 0x3c4   : > { %v1892_v24 = vpop.xlane.xlu0 %1891  ;;  %v1913_v26 = vmul.f32 %v6628_v41, %v7056_v27 }
 0x3c5   : > { %v6630_v25 = vpop.eup %6629  ;;  %6633 = vrcp.f32 %v1892_v24 }
 0x3c6   : > { %v1914_v28 = vmul.f32 %v6630_v25, %v7060_v14 }
 0x3c8   : > { %v1895_v29 = vpop.xlane.xlu1 %1894  ;;  %v1921_v32 = vpack.c.bf16 %v1914_v28, %v1913_v26 }
 0x3c9   : > { %6635 = vrcp.f32 %v1895_v29 }
 0x3ca   : > { %v1898_v33 = vpop.xlane.xlu0 %1897  ;;  %6302 = vmatmul.mubr.msk.bf16.vlgmr.msra.gmra.mrb[4].mxu0 %vm1832_vm2, %v1921_v32 }
 0x3cb   : > { %6637 = vrcp.f32 %v1898_v33  ;;  %6312 = vmatpush3.bf16.msra.mxu0 %v1617_v17  ;;  %6313 = vmatprep.mubr.msk.bf16.mxu0 %vm6744_vm0, %v8221_v31  ;;  %v6632_v34 = vpop.eup %6631 }
 0x3cc   : > { %v1915_v37 = vmul.f32 %v6632_v34, %v7064_v39 }
 0x3cf   : > { %v6634_v35 = vpop.eup %6633 }
 0x3d0   : > { %v1916_v38 = vmul.f32 %v6634_v35, %v7068_v44  ;;  %v1901_v27 = vpop.xlane.xlu1 %1900 }
 0x3d1   : > { %6639 = vrcp.f32 %v1901_v27 }
 0x3d2   : > { %v1904_v14 = vpop.xlane.xlu0 %1903  ;;  %v1922_v40 = vpack.c.bf16 %v1916_v38, %v1915_v37 }
 0x3d3   : > { %v6636_v42 = vpop.eup %6635  ;;  %6641 = vrcp.f32 %v1904_v14 }
 0x3d4   : > { %6308 = vmatmul.mubr.msk.bf16.vlgmr.msra.gmra.mrb[16].mxu1 %vm1832_vm2, %v1922_v40  ;;  %v1917_v46 = vmul.f32 %v6636_v42, %v7074_v56 }
 0x3d5   : > { %v6638_v45 = vpop.eup %6637  ;;  %6318 = vmatpush3.bf16.msra.mxu1 %v1621_v21  ;;  %6319 = vmatprep.mubr.msk.bf16.mxu1 %vm6744_vm0, %v8221_v31 }
 0x3d6   : > { %v1918_v47 = vmul.f32 %v6638_v45, %v7078_v59 }
 0x3d8   : > { %v1923_v39 = vpack.c.bf16 %v1918_v47, %v1917_v46 }
 0x3da   : > { %6314 = vmatmul.mubr.msk.bf16.vlgmr.msra.gmra.mrb[8].mxu0 %vm1832_vm2, %v1923_v39 }
 0x3db   : > { %v6640_v44 = vpop.eup %6639  ;;  %2734 = vmatprep.mubr.bf16.mxu0 %v8227_v2 }
 0x3dc   : > { %v1919_v49 = vmul.f32 %v6640_v44, %v7088_v9 }
 0x3dd   : > { %v6642_v48 = vpop.eup %6641 }
 0x3de   : > { %v1920_v50 = vmul.f32 %v6642_v48, %v7097_v20 }
 0x3e0   : > { %v1924_v51 = vpack.c.bf16 %v1920_v50, %v1919_v49 }
 0x3e2   : > { %6320 = vmatmul.mubr.msk.bf16.vlgmr.msra.gmra.mrb[20].mxu1 %vm1832_vm2, %v1924_v51 }
 0x49d   : > { %v1962_v52 = vpop.f32.mrb[4].mxu0 }
 0x49e   : > { %v6303_v53 = vpop.f32.mrb[5].mxu0 }
 0x49f   : > { %v1965_v54 = vpop.f32.mrb[6].mxu0 }
 0x4a0   : > { %v6304_v56 = vpop.f32.mrb[7].mxu0 }
 0x4a7   : > { %v2006_v55 = vpop.f32.mrb[16].mxu1 }
 0x4a8   : > { %v6309_v59 = vpop.f32.mrb[17].mxu1 }
 0x4a9   : > { %v2009_v57 = vpop.f32.mrb[18].mxu1 }
 0x4aa   : > { %v6310_v58 = vpop.f32.mrb[19].mxu1 }
 0x4ad   : > { %v2050_v60 = vpop.f32.mrb[8].mxu0 }
 0x4ae   : > { %v2101_v61 = vcombine.low %v1962_v52, %v2050_v60  ;;  %v2102_v63 = vcombine.high %v1962_v52, %v2050_v60  ;;  %v6315_v0 = vpop.f32.mrb[9].mxu0 }
 0x4af   : > { %v2053_v1 = vpop.f32.mrb[10].mxu0 }
 0x4b0   : > { %v2169_v30 = vcombine.low %v1965_v54, %v2053_v1  ;;  %v2170_v9 = vcombine.high %v1965_v54, %v2053_v1  ;;  %v6316_v3 = vpop.f32.mrb[11].mxu0  ;;  %v2109_v7 = vrot.slane %v2101_v61, %v6949_v43  ;;  %v2116_v8 = vrot.slane %v2102_v63, %v6949_v43 }
 0x4b2   : > { %v2177_v13 = vrot.slane %v2169_v30, %v6949_v43  ;;  %v2184_v23 = vrot.slane %v2170_v9, %v6949_v43 }
 0x4b5   : > { %v2094_v20 = vpop.f32.mrb[20].mxu1 }
 0x4b6   : > { %v2117_v4 = vcombine.low %v2006_v55, %v2094_v20  ;;  %v2118_v5 = vcombine.high %v2006_v55, %v2094_v20  ;;  %v6321_v6 = vpop.f32.mrb[21].mxu1 }
 0x4b7   : > { %v2097_v10 = vpop.f32.mrb[22].mxu1 }
 0x4b8   : > { %v2125_v11 = vrot.slane %v2117_v4, %v6949_v43  ;;  %v2132_v12 = vrot.slane %v2118_v5, %v6949_v43  ;;  %v2185_v15 = vcombine.low %v2009_v57, %v2097_v10  ;;  %v2186_v16 = vcombine.high %v2009_v57, %v2097_v10  ;;  %v6322_v17 = vpop.f32.mrb[23].mxu1 }
 0x4ba   : > { %v2133_v18 = vcombine.low %v2109_v7, %v2125_v11  ;;  %v2134_v19 = vcombine.high %v2109_v7, %v2125_v11  ;;  %v2149_v21 = vcombine.low %v2116_v8, %v2132_v12  ;;  %v2150_v22 = vcombine.high %v2116_v8, %v2132_v12 }
 0x4bb   : > { %v2193_v41 = vrot.slane %v2185_v15, %v6949_v43  ;;  %v2200_v24 = vrot.slane %v2186_v16, %v6949_v43 }
 0x4bc   : > { %v2141_v25 = vrot.slane %v2133_v18, %v6957_v62  ;;  %v2148_v26 = vrot.slane %v2134_v19, %v6957_v62  ;;  %v2157_v28 = vrot.slane %v2149_v21, %v6957_v62  ;;  %v2164_v29 = vrot.slane %v2150_v22, %v6957_v62 }
 0x4bd   : > { %v2201_v32 = vcombine.low %v2177_v13, %v2193_v41  ;;  %v2202_v33 = vcombine.high %v2177_v13, %v2193_v41  ;;  %v2217_v34 = vcombine.low %v2184_v23, %v2200_v24  ;;  %v2218_v35 = vcombine.high %v2184_v23, %v2200_v24  ;;  %v6008_v41 = vld [vmem:[%s8199_s4] ss:$0 sm:$0xff] }
 0x4be   : > { %v2237_v37 = vcombine.low %v2141_v25, %v2148_v26  ;;  %v6004_v38 = vcombine.high %v2141_v25, %v2148_v26  ;;  %v2253_v27 = vcombine.low %v2157_v28, %v2164_v29  ;;  %v6005_v14 = vcombine.high %v2157_v28, %v2164_v29 }
 0x4bf   : > { %v2209_v40 = vrot.slane %v2201_v32, %v6957_v62  ;;  %v2216_v42 = vrot.slane %v2202_v33, %v6957_v62  ;;  %v2225_v45 = vrot.slane %v2217_v34, %v6957_v62  ;;  %v2232_v46 = vrot.slane %v2218_v35, %v6957_v62 }
 0x4c0   : > { %v2244_v47 = vrot.slane %v2237_v37, %v6949_v43  ;;  %v2252_v39 = vrot.slane %v6004_v38, %v6949_v43  ;;  %v2260_v44 = vrot.slane %v2253_v27, %v6949_v43  ;;  %v2268_v48 = vrot.slane %v6005_v14, %v6949_v43 }
 0x4c1   : > { %v2305_v49 = vcombine.low %v2209_v40, %v2216_v42  ;;  %v6006_v50 = vcombine.high %v2209_v40, %v2216_v42  ;;  %v2321_v51 = vcombine.low %v2225_v45, %v2232_v46  ;;  %v6007_v52 = vcombine.high %v2225_v45, %v2232_v46 }
 0x4c2   : > { %v2269_v53 = vcombine.low %v2244_v47, %v2252_v39  ;;  %v2285_v54 = vcombine.low %v2260_v44, %v2268_v48  ;;  %v2270_v56 = vcombine.high %v2244_v47, %v2252_v39  ;;  %v2286_v55 = vcombine.high %v2260_v44, %v2268_v48 }
 0x4c3   : > { %v2312_v59 = vrot.slane %v2305_v49, %v6949_v43  ;;  %v2320_v57 = vrot.slane %v6006_v50, %v6949_v43  ;;  %v2328_v58 = vrot.slane %v2321_v51, %v6949_v43  ;;  %v2336_v60 = vrot.slane %v6007_v52, %v6949_v43  ;;  %v6009_v52 = vld [vmem:[%s8200_s5] ss:$0 sm:$0xff] }
 0x4c4   : > { %v2277_v61 = vrot.slane %v2269_v53, %v6957_v62  ;;  %v2293_v63 = vrot.slane %v2285_v54, %v6957_v62  ;;  %v2284_v0 = vrot.slane %v2270_v56, %v6957_v62  ;;  %v2300_v1 = vrot.slane %v2286_v55, %v6957_v62  ;;  %v6010_v54 = vld [vmem:[%s8201_s6] ss:$0 sm:$0xff] }
 0x4c5   : > { %v2337_v30 = vcombine.low %v2312_v59, %v2320_v57  ;;  %v2353_v9 = vcombine.low %v2328_v58, %v2336_v60  ;;  %v2338_v3 = vcombine.high %v2312_v59, %v2320_v57  ;;  %v2354_v20 = vcombine.high %v2328_v58, %v2336_v60  ;;  %v6143_v56 = vld [vmem:[%s613_s27] sm:$0xff]  }
 0x4c6   : > { %v2302_v4 = vcombine.high %v2277_v61, %v2293_v63  ;;  %v2303_v5 = vcombine.low %v2284_v0, %v2300_v1  ;;  %v2304_v6 = vcombine.high %v2284_v0, %v2300_v1  ;;  %v2301_v7 = vcombine.low %v2277_v61, %v2293_v63  ;;  %v627_v63 = vld [vmem:[%s613_s27 + $0x8] sm:$0x1] }
 0x4c7   : > { %v2345_v8 = vrot.slane %v2337_v30, %v6957_v62  ;;  %v2361_v10 = vrot.slane %v2353_v9, %v6957_v62  ;;  %v2352_v11 = vrot.slane %v2338_v3, %v6957_v62  ;;  %v2368_v12 = vrot.slane %v2354_v20, %v6957_v62 }
 0x4c8   : > { %2375 = vrot.lane.b32.xlu1 %v2302_v4, %s6740_s22  ;;  %v6144_v60 = vunpack.c.l.bf16 %v6143_v56  ;;  %v630_v3 = vunpack.c.l.bf16 %v627_v63  ;;  %v6145_v20 = vunpack.c.h.bf16 %v6143_v56 }
 0x4c9   : > { %v2370_v15 = vcombine.high %v2345_v8, %v2361_v10  ;;  %v2371_v16 = vcombine.low %v2352_v11, %v2368_v12  ;;  %v2372_v17 = vcombine.high %v2352_v11, %v2368_v12  ;;  %v2369_v18 = vcombine.low %v2345_v8, %v2361_v10  ;;  %v6491_v10 = vld [vmem:[%s8204_s9] ss:$12 sps:$4 sm:$0xff]   ;;  %v6493_v11 = vld [vmem:[%s8204_s9 + $0x4] ss:$12 sps:$4 sm:$0xff]   ;;  %v6494_v12 = vld [vmem:[%s8204_s9 + $0x8] ss:$12 sps:$4 sm:$0xff]  }
 0x4ca   : > { %2702 = vmatprep.subr.bf16.mxu0 %v6493_v11  ;;  %6323 = vmatprep.subr.bf16.mxu1 %v6494_v12 }
 0x4cb   : > { %2377 = vrot.lane.b32.xlu0 %v2370_v15, %s6740_s22  ;;  %2703 = vmatpush1.bf16.msra.mxu0 %v6491_v10 }
 0x4cc   : > { %2383 = vrot.lane.b32.xlu1 %v2303_v5, %s6742_s24  ;;  %6324 = vmatpush3.bf16.msra.mxu1 %v6494_v12 }
 0x4cf   : > { %2391 = vrot.lane.b32.xlu0 %v2304_v6, %s6741_s2 }
 0x4d0   : > { %2385 = vrot.lane.b32.xlu1 %v2371_v16, %s6742_s24 }
 0x4d4   : > { %2393 = vrot.lane.b32.xlu1 %v2372_v17, %s6741_s2 }
 0x53a   : > { %v2376_v19 = vpop.permute.xlu1 %2375 }
 0x53b   : > { %v2397_v22 = vsel %vm1626_vm1, %v2301_v7, %v2376_v19 }
 0x53d   : > { %v2378_v21 = vpop.permute.xlu0 %2377 }
 0x53e   : > { %v2384_v13 = vpop.permute.xlu1 %2383  ;;  %v2398_v29 = vsel %vm1626_vm1, %v2369_v18, %v2378_v21 }
 0x53f   : > { %v2400_v23 = vsel %vm2399_vm3, %v2397_v22, %v2384_v13 }
 0x541   : > { %v2392_v24 = vpop.permute.xlu0 %2391 }
 0x542   : > { %v2403_v25 = vsel %vm2402_vm4, %v2400_v23, %v2392_v24  ;;  %v2386_v26 = vpop.permute.xlu1 %2385 }
 0x543   : > { %v2412_v28 = vmul.f32 %v6008_v41, %v2403_v25  ;;  %v2401_v32 = vsel %vm2399_vm3, %v2398_v29, %v2386_v26  ;;  %v6495_v29 = vld [vmem:[%s8204_s9 + $0x18] ss:$12 sps:$4 sm:$0xff]  }
 0x545   : > { %2416 = vadd.xlane.f32.xlu0 %v2412_v28 }
 0x546   : > { %v2394_v33 = vpop.permute.xlu1 %2393 }
 0x547   : > { %v2404_v34 = vsel %vm2402_vm4, %v2401_v32, %v2394_v33  ;;  %v6498_v32 = vld [vmem:[%s8204_s9 + $0x20] ss:$12 sps:$4 sm:$0xff]  }
 0x548   : > { %v2413_v35 = vmul.f32 %v6008_v41, %v2404_v34  ;;  %6325 = vmatprep.subr.bf16.mxu1 %v6498_v32  ;;  %v6501_v33 = vld [vmem:[%s8204_s9 + $0x34] ss:$12 sps:$4 sm:$0xff]   ;;  %v6499_v34 = vld [vmem:[%s8204_s9 + $0x30] ss:$12 sps:$4 sm:$0xff]  }
 0x549   : > { %6326 = vmatpush3.bf16.msra.mxu1 %v6498_v32 }
 0x54a   : > { %2418 = vadd.xlane.f32.xlu1 %v2413_v35 }
 0x5d2   : > { %v2417_v37 = vpop.xlane.xlu0 %2416 }
 0x5d3   : > { %v2421_v38 = vmul.f32 0.0078125, %v2417_v37  ;;  %v6505_v37 = vld [vmem:[%s8204_s9 + $0x4c] ss:$12 sps:$4 sm:$0xff]  }
 0x5d5   : > { %v2423_v27 = vsub.f32 %v2412_v28, %v2421_v38  ;;  %v6497_v28 = vld [vmem:[%s8204_s9 + $0x1c] ss:$12 sps:$4 sm:$0xff]  }
 0x5d6   : > { %2704 = vmatprep.subr.bf16.mxu0 %v6497_v28  ;;  %v6503_v38 = vld [vmem:[%s8204_s9 + $0x48] ss:$12 sps:$4 sm:$0xff]  }
 0x5d7   : > { %v2419_v14 = vpop.xlane.xlu1 %2418  ;;  %v2425_v40 = vmul.f32 %v2423_v27, %v2423_v27  ;;  %2705 = vmatpush1.bf16.msra.mxu0 %v6495_v29 }
 0x5d8   : > { %v2422_v42 = vmul.f32 0.0078125, %v2419_v14  ;;  %2706 = vmatprep.subr.bf16.mxu0 %v6501_v33  ;;  %v6509_v14 = vld [vmem:[%s8204_s9 + $0x64] ss:$12 sps:$4 sm:$0xff]  }
 0x5d9   : > { %2427 = vadd.xlane.f32.xlu0 %v2425_v40  ;;  %v6507_v40 = vld [vmem:[%s8204_s9 + $0x60] ss:$12 sps:$4 sm:$0xff]  }
 0x5da   : > { %v2424_v45 = vsub.f32 %v2413_v35, %v2422_v42  ;;  %v6502_v35 = vld [vmem:[%s8204_s9 + $0x38] ss:$12 sps:$4 sm:$0xff]   ;;  %v6510_v42 = vld [vmem:[%s8204_s9 + $0x68] ss:$12 sps:$4 sm:$0xff]  }
 0x5db   : > { %2707 = vmatpush1.bf16.msra.mxu0 %v6499_v34  ;;  %6327 = vmatprep.subr.bf16.mxu1 %v6502_v35 }
 0x5dc   : > { %v2426_v46 = vmul.f32 %v2424_v45, %v2424_v45  ;;  %6328 = vmatpush3.bf16.msra.mxu1 %v6502_v35  ;;  %2708 = vmatprep.subr.bf16.mxu0 %v6505_v37 }
 0x5de   : > { %2429 = vadd.xlane.f32.xlu0 %v2426_v46  ;;  %v6511_v46 = vld [vmem:[%s8204_s9 + $0x78] ss:$12 sps:$4 sm:$0xff]  }
 0x5df   : > { %2709 = vmatpush1.bf16.msra.mxu0 %v6503_v38 }
 0x5e0   : > { %2710 = vmatprep.subr.bf16.mxu0 %v6509_v14 }
 0x5e3   : > { %2711 = vmatpush1.bf16.msra.mxu0 %v6507_v40 }
 0x666   : > { %v2428_v47 = vpop.xlane.xlu0 %2427 }
 0x667   : > { %v2431_v39 = vmul.f32 0.0078125, %v2428_v47  ;;  %v6514_v47 = vld [vmem:[%s8204_s9 + $0x80] ss:$12 sps:$4 sm:$0xff]  }
 0x669   : > { %v2433_v44 = vadd.f32 1e-05, %v2431_v39  ;;  %v6515_v39 = vld [vmem:[%s8204_s9 + $0x90] ss:$12 sps:$4 sm:$0xff]  }
 0x66b   : > { %6643 = vrsqrt.f32 %v2433_v44  ;;  %v2430_v48 = vpop.xlane.xlu0 %2429  ;;  %v6517_v44 = vld [vmem:[%s8204_s9 + $0x94] ss:$12 sps:$4 sm:$0xff]  }
 0x66c   : > { %v2432_v49 = vmul.f32 0.0078125, %v2430_v48  ;;  %v6518_v48 = vld [vmem:[%s8204_s9 + $0x98] ss:$12 sps:$4 sm:$0xff]  }
 0x66e   : > { %v2434_v50 = vadd.f32 1e-05, %v2432_v49  ;;  %v6521_v49 = vld [vmem:[%s8204_s9 + $0xac] ss:$12 sps:$4 sm:$0xff]  }
 0x670   : > { %6645 = vrsqrt.f32 %v2434_v50  ;;  %v6522_v50 = vld [vmem:[%s8204_s9 + $0xb0] ss:$12 sps:$4 sm:$0xff]  }
 0x675   : > { %v6644_v51 = vpop.eup %6643 }
 0x676   : > { %v2437_v53 = vmul.f32 %v6644_v51, %v2423_v27  ;;  %v6506_v27 = vld [vmem:[%s8204_s9 + $0x50] ss:$12 sps:$4 sm:$0xff]   ;;  %v6519_v51 = vld [vmem:[%s8204_s9 + $0xa8] ss:$12 sps:$4 sm:$0xff]  }
 0x677   : > { %6329 = vmatprep.subr.bf16.mxu1 %v6506_v27 }
 0x678   : > { %v2445_v55 = vmul.f32 %v6009_v52, %v2437_v53  ;;  %6330 = vmatpush3.bf16.msra.mxu1 %v6506_v27 }
 0x679   : > { %6331 = vmatprep.subr.bf16.mxu1 %v6510_v42 }
 0x67a   : > { %v6646_v59 = vpop.eup %6645  ;;  %v2453_v57 = vadd.f32 %v6010_v54, %v2445_v55 }
 0x67b   : > { %v2438_v58 = vmul.f32 %v6646_v59, %v2424_v45  ;;  %v6513_v45 = vld [vmem:[%s8204_s9 + $0x7c] ss:$12 sps:$4 sm:$0xff]  }
 0x67c   : > { %v2458_v61 = vrot.slane %v2453_v57, 7  ;;  %6332 = vmatpush3.bf16.msra.mxu1 %v6510_v42  ;;  %2712 = vmatprep.subr.bf16.mxu0 %v6513_v45 }
 0x67d   : > { %v2446_v0 = vmul.f32 %v6009_v52, %v2438_v58  ;;  %2713 = vmatpush1.bf16.msra.mxu0 %v6511_v46  ;;  %6333 = vmatprep.subr.bf16.mxu1 %v6514_v47 }
 0x67e   : > { %v2464_v1 = vsel %vm2457_vm5, 0.0, %v2458_v61  ;;  %2714 = vmatprep.subr.bf16.mxu0 %v6517_v44 }
 0x67f   : > { %v2454_v30 = vadd.f32 %v6010_v54, %v2446_v0  ;;  %v7201_v9 = vadd.f32 %v6144_v60, %v2464_v1  ;;  %v6011_v0 = vld [vmem:[%s8202_s7] ss:$0 sm:$0xff] }
 0x680   : > { %6334 = vmatpush3.bf16.msra.mxu1 %v6514_v47 }
 0x681   : > { %8240 = vst [vmem:[#allocation5_spill] sm:$0xff] %v7201_v9  ;;  %2470 = vadd.xlane.f32.xlu1 %v7201_v9  ;;  %v2459_v4 = vrot.slane %v2454_v30, 7  ;;  %6335 = vmatprep.subr.bf16.mxu1 %v6518_v48 }
 0x682   : > { %2715 = vmatpush1.bf16.msra.mxu0 %v6515_v39 }
 0x683   : > { %v2460_v5 = vsel %vm2457_vm5, %v2458_v61, %v2459_v4  ;;  %v7205_v6 = vadd.f32 %v2459_v4, %v630_v3  ;;  %2716 = vmatprep.subr.bf16.mxu0 %v6521_v49  ;;  %v6012_v4 = vld [vmem:[%s8203_s8] ss:$0 sm:$0xff] }
 0x684   : > { %v7207_v7 = vadd.f32 %v6145_v20, %v2460_v5  ;;  %6336 = vmatpush3.bf16.msra.mxu1 %v6518_v48 }
 0x685   : > { %8241 = vst [vmem:[#allocation6_spill] sm:$0xff] %v7205_v6  ;;  %v2474_v8 = vsel %vm2457_vm5, %v7205_v6, 0.0  ;;  %6337 = vmatprep.subr.bf16.mxu1 %v6522_v50 }
 0x686   : > { %8242 = vst [vmem:[#allocation7_spill] sm:$0xff] %v7207_v7  ;;  %2472 = vadd.xlane.f32.xlu0 %v7207_v7  ;;  %2475 = vadd.xlane.f32.xlu1 %v2474_v8 }
 0x687   : > { %2717 = vmatpush1.bf16.msra.mxu0 %v6519_v51 }
 0x688   : > { %6338 = vmatpush3.bf16.msra.mxu1 %v6522_v50 }
 0x70e   : > { %v2471_v15 = vpop.xlane.xlu1 %2470 }
 0x70f   : > { %v2477_v16 = vmul.f32 0.0078125, %v2471_v15 }
 0x711   : > { %v7222_v17 = vsub.f32 %v7201_v9, %v2477_v16 }
 0x713   : > { %v2473_v18 = vpop.xlane.xlu0 %2472  ;;  %v2476_v19 = vpop.xlane.xlu1 %2475  ;;  %v2483_v21 = vmul.f32 %v7222_v17, %v7222_v17 }
 0x714   : > { %v2478_v22 = vmul.f32 0.0078125, %v2473_v18  ;;  %v2479_v13 = vmul.f32 0.0078125, %v2476_v19  ;;  %v8219_v18 = vsub.s32 2, %v6942_v36  ;;  %v2557_v19 = vld [vmem:[%s8205_s10] sm:$0x7] }
 0x715   : > { %2486 = vadd.xlane.f32.xlu0 %v2483_v21  ;;  %v8220_v21 = vsub.s32 0, %v6942_v36 }
 0x716   : > { %v7227_v23 = vsub.f32 %v7207_v7, %v2478_v22  ;;  %v7230_v41 = vsub.f32 %v7205_v6, %v2479_v13  ;;  %v8218_v22 = vsub.s32 1, %v6942_v36  ;;  %v2570_v13 = vrot.slane %v2557_v19, %v8219_v18 }
 0x718   : > { %v2484_v24 = vmul.f32 %v7227_v23, %v7227_v23  ;;  %v2485_v25 = vmul.f32 %v7230_v41, %v7230_v41 }
 0x71a   : > { %2488 = vadd.xlane.f32.xlu1 %v2484_v24  ;;  %v2490_v26 = vsel %vm2457_vm5, %v2485_v25, 0.0  ;;  %v2566_v24 = vrot.slane %v2557_v19, %v8218_v22 }
 0x71b   : > { %2491 = vadd.xlane.f32.xlu0 %v2490_v26 }
 0x7a2   : > { %v2487_v52 = vpop.xlane.xlu0 %2486 }
 0x7a3   : > { %v2493_v53 = vmul.f32 0.0078125, %v2487_v52 }
 0x7a5   : > { %v2496_v54 = vadd.f32 1e-06, %v2493_v53 }
 0x7a7   : > { %6647 = vrsqrt.f32 %v2496_v54  ;;  %v2489_v56 = vpop.xlane.xlu1 %2488 }
 0x7a8   : > { %v2494_v55 = vmul.f32 0.0078125, %v2489_v56  ;;  %v2492_v59 = vpop.xlane.xlu0 %2491 }
 0x7a9   : > { %v2495_v57 = vmul.f32 0.0078125, %v2492_v59 }
 0x7aa   : > { %v2497_v58 = vadd.f32 1e-06, %v2494_v55 }
 0x7ab   : > { %v2498_v60 = vadd.f32 1e-06, %v2495_v57 }
 0x7ac   : > { %6649 = vrsqrt.f32 %v2497_v58 }
 0x7ad   : > { %6651 = vrsqrt.f32 %v2498_v60 }
 0x7b1   : > { %v6648_v61 = vpop.eup %6647 }
 0x7b2   : > { %v2502_v63 = vmul.f32 %v6648_v61, %v7222_v17 }
 0x7b4   : > { %v2511_v20 = vmul.f32 %v6011_v0, %v2502_v63 }
 0x7b6   : > { %v6650_v1 = vpop.eup %6649  ;;  %v2520_v11 = vadd.f32 %v6012_v4, %v2511_v20 }
 0x7b7   : > { %v6652_v30 = vpop.eup %6651  ;;  %v2503_v3 = vmul.f32 %v6650_v1, %v7227_v23  ;;  %v2562_v23 = vrot.slane %v2557_v19, %v8220_v21 }
 0x7b8   : > { %v2504_v5 = vmul.f32 %v6652_v30, %v7230_v41 }
 0x7b9   : > { %v2512_v8 = vmul.f32 %v6011_v0, %v2503_v3 }
 0x7ba   : > { %v2513_v10 = vmul.f32 %v6011_v0, %v2504_v5 }
 0x7bb   : > { %v2521_v12 = vadd.f32 %v6012_v4, %v2512_v8 }
 0x7bc   : > { %v2522_v15 = vadd.f32 %v6012_v4, %v2513_v10 }
 0x7bd   : > { %v2523_v16 = vpack.c.bf16 %v2521_v12, %v2520_v11 }
 0x7be   : > { %v2524_v17 = vpack.c.bf16 %v2522_v15, %v2522_v15 }
 0x7bf   : > { %2735 = vmatmul.mubr.bf16.vlgmr.msra.gmra.mrb[12].mxu0 %v2523_v16  ;;  %6339 = vmatprep.mubr.bf16.mxu1 %v2523_v16 }
 0x7c0   : > { %6340 = vmatmul.mubr.bf16.vlgmr.msra.gmra.mrb[24].mxu1 %v2524_v17  ;;  %2744 = vmatprep.mubr.bf16.mxu0 %v8227_v2 }
 0x7c7   : > { %2745 = vmatmul.mubr.bf16.gmra.mrb[16].mxu0 %v2524_v17 }
 0x892   : > { %v2736_v41 = vpop.f32.mrb[12].mxu0 }
 0x893   : > { %v2738_v25 = vpop.f32.mrb[13].mxu0  ;;  %v6341_v26 = vpop.f32.mrb[24].mxu1  ;;  %v2737_v33 = vadd.f32 %v2736_v41, %v2562_v23 }
 0x894   : > { %v7322_v28 = vadd.f32 %v6341_v26, %v2570_v13  ;;  %v2740_v29 = vpop.f32.mrb[14].mxu0  ;;  %v2787_v32 = vpop.f32.mrb[25].mxu1  ;;  %v2739_v38 = vadd.f32 %v2738_v25, %v2566_v24 }
 0x895   : > { %v2741_v34 = vadd.f32 %v2740_v29, %v2562_v23  ;;  %v2742_v35 = vpop.f32.mrb[15].mxu0  ;;  %v6342_v37 = vpop.f32.mrb[26].mxu1  ;;  %v2788_v42 = vadd.f32 %v2787_v32, %v2570_v13 }
 0x896   : > { %v2743_v27 = vadd.f32 %v2742_v35, %v2566_v24  ;;  %v2790_v14 = vpop.f32.mrb[27].mxu1 }
 0x897   : > { %v2801_v40 = vpack.c.bf16 %v2741_v34, %v2737_v33  ;;  %v2791_v45 = vadd.f32 %v2790_v14, %v2570_v13 }
 0x898   : > { %v3167_v46 = vpack.c.bf16 %v2743_v27, %v2739_v38 }
 0x899   : > { %v7324_v47 = vpack.c.bf16 %v2791_v45, %v2788_v42  ;;  %v2820_v17 = vcombine.high %v2801_v40, %v8227_v2  ;;  %v2827_v37 = vrot.slane %v2801_v40, %v6949_v43 }
 0x89a   : > { %v2746_v39 = vpop.f32.mrb[16].mxu0  ;;  %3176 = vrot.lane.b32.xlu0 %v3167_v46, %s6742_s24  ;;  %3171 = vrot.lane.b32.xlu1 %v3167_v46, %s6741_s2  ;;  %v3186_v56 = vcombine.high %v3167_v46, %v8227_v2  ;;  %v3193_v58 = vrot.slane %v3167_v46, %v6949_v43 }
 0x89b   : > { %v2748_v44 = vpop.f32.mrb[17].mxu0  ;;  %v2747_v52 = vadd.f32 %v2746_v39, %v2562_v23  ;;  %v7384_v42 = vrot.slane %v2820_v17, %v6949_v43 }
 0x89c   : > { %v2749_v48 = vadd.f32 %v2748_v44, %v2566_v24  ;;  %v2750_v49 = vpop.f32.mrb[18].mxu0  ;;  %v3200_v61 = vrot.slane %v3186_v56, %v6949_v43 }
 0x89d   : > { %v2751_v50 = vpop.f32.mrb[19].mxu0  ;;  %v7338_v53 = vpack.c.bf16 %v2747_v52, %v2747_v52 }
 0x89e   : > { %3181 = vrot.lane.b32.xlu1 %v3167_v46, %s6740_s22  ;;  %2810 = vrot.lane.b32.xlu0 %v2801_v40, %s6742_s24  ;;  %v7330_v51 = vpack.c.bf16 %v2749_v48, %v2749_v48 }
 0x8a2   : > { %3173 = vrot.lane.b32.xlu0 %v7330_v51, %s6741_s2  ;;  %2805 = vrot.lane.b32.xlu1 %v2801_v40, %s6741_s2 }
 0x8a6   : > { %3183 = vrot.lane.b32.xlu0 %v7330_v51, %s6740_s22  ;;  %2815 = vrot.lane.b32.xlu1 %v2801_v40, %s6740_s22 }
 0x8aa   : > { %2812 = vrot.lane.b32.xlu0 %v7338_v53, %s6742_s24  ;;  %3178 = vrot.lane.b32.xlu1 %v7330_v51, %s6742_s24 }
 0x8ae   : > { %2807 = vrot.lane.b32.xlu1 %v7338_v53, %s6741_s2 }
 0x8b2   : > { %2817 = vrot.lane.b32.xlu1 %v7338_v53, %s6740_s22 }
 0x8b6   : > { %3537 = vrot.lane.b32.xlu1 %v7324_v47, %s6741_s2 }
 0x90c   : > { %v3177_v54 = vpop.permute.xlu0 %3176  ;;  %v3172_v55 = vpop.permute.xlu1 %3171 }
 0x90d   : > { %v3201_v59 = vcombine.high %v3177_v54, %v8227_v2  ;;  %v3208_v57 = vrot.slane %v3177_v54, %v6949_v43  ;;  %v3252_v30 = vcombine.high %v3172_v55, %v8227_v2  ;;  %v3259_v3 = vrot.slane %v3172_v55, %v6949_v43 }
 0x90f   : > { %v3215_v60 = vrot.slane %v3201_v59, %v6949_v43  ;;  %v3216_v63 = vcombine.low %v3193_v58, %v3208_v57  ;;  %v3217_v0 = vcombine.high %v3193_v58, %v3208_v57  ;;  %v3266_v16 = vrot.slane %v3252_v30, %v6949_v43 }
 0x910   : > { %v3182_v1 = vpop.permute.xlu1 %3181  ;;  %v2811_v33 = vpop.permute.xlu0 %2810 }
 0x911   : > { %v3232_v20 = vcombine.low %v3200_v61, %v3215_v60  ;;  %v3233_v4 = vcombine.high %v3200_v61, %v3215_v60  ;;  %v3267_v5 = vcombine.high %v3182_v1, %v8227_v2  ;;  %v3274_v8 = vrot.slane %v3182_v1, %v6949_v43 }
 0x912   : > { %v3224_v10 = vrot.slane %v3216_v63, %v6957_v62  ;;  %v3231_v11 = vrot.slane %v3217_v0, %v6957_v62  ;;  %v2835_v39 = vcombine.high %v2811_v33, %v8227_v2  ;;  %v2842_v44 = vrot.slane %v2811_v33, %v6949_v43 }
 0x913   : > { %v3281_v12 = vrot.slane %v3267_v5, %v6949_v43  ;;  %v3282_v15 = vcombine.low %v3259_v3, %v3274_v8  ;;  %v7366_v19 = vrot.slane %v3232_v20, %v6957_v62  ;;  %v7369_v13 = vrot.slane %v3233_v4, %v6957_v62 }
 0x914   : > { %v3283_v23 = vcombine.high %v3259_v3, %v3274_v8  ;;  %v3248_v26 = vcombine.high %v3224_v10, %v8227_v2  ;;  %v3249_v29 = vcombine.high %v3231_v11, %v8227_v2  ;;  %v3341_v45 = vshrl.u32 %v3224_v10, 16  ;;  %v2806_v52 = vpop.permute.xlu1 %2805  ;;  %v3174_v17 = vpop.permute.xlu0 %3173 }
 0x915   : > { %v3290_v41 = vrot.slane %v3282_v15, %v6957_v62  ;;  %v3298_v24 = vcombine.low %v3266_v16, %v3281_v12  ;;  %v3299_v25 = vcombine.high %v3266_v16, %v3281_v12  ;;  %v3250_v38 = vcombine.high %v7366_v19, %v8227_v2 }
 0x916   : > { %v3297_v32 = vrot.slane %v3283_v23, %v6957_v62  ;;  %v3251_v27 = vcombine.high %v7369_v13, %v8227_v2  ;;  %v3349_v48 = vshrl.u32 %v3248_v26, 16  ;;  %v3357_v40 = vshrl.u32 %v3231_v11, 16 }
 0x917   : > { %v3306_v34 = vrot.slane %v3298_v24, %v6957_v62  ;;  %v3314_v35 = vcombine.high %v3290_v41, %v8227_v2  ;;  %v3313_v14 = vrot.slane %v3299_v25, %v6957_v62  ;;  %v3365_v49 = vshrl.u32 %v3249_v29, 16 }
 0x918   : > { %v3315_v46 = vcombine.high %v3297_v32, %v8227_v2  ;;  %v3342_v50 = vshrl.u32 %v3290_v41, 16  ;;  %v3373_v54 = vshrl.u32 %v7366_v19, 16  ;;  %v3389_v56 = vshrl.u32 %v7369_v13, 16 }
 0x919   : > { %v3316_v55 = vcombine.high %v3306_v34, %v8227_v2  ;;  %v3350_v59 = vshrl.u32 %v3314_v35, 16  ;;  %v3381_v57 = vshrl.u32 %v3250_v38, 16  ;;  %v3397_v58 = vshrl.u32 %v3251_v27, 16 }
 0x91a   : > { %v3317_v60 = vcombine.high %v3313_v14, %v8227_v2  ;;  %v3339_v61 = vpack.i.b16 %v3290_v41, %v3224_v10  ;;  %v3355_v63 = vpack.i.b16 %v3297_v32, %v3231_v11  ;;  %v3358_v0 = vshrl.u32 %v3297_v32, 16  ;;  %v2816_v41 = vpop.permute.xlu1 %2815 }
 0x91b   : > { %v3366_v1 = vshrl.u32 %v3315_v46, 16  ;;  %v2849_v30 = vrot.slane %v2835_v39, %v6949_v43  ;;  %v7394_v3 = vpack.i.b16 %v3342_v50, %v3341_v45  ;;  %v3347_v20 = vpack.i.b16 %v3314_v35, %v3248_v26 }
 0x91c   : > { %v3374_v4 = vshrl.u32 %v3306_v34, 16  ;;  %v2850_v5 = vcombine.low %v2827_v37, %v2842_v44  ;;  %v7396_v8 = vpack.i.b16 %v3350_v59, %v3349_v48  ;;  %v3363_v12 = vpack.i.b16 %v3315_v46, %v3249_v29 }
 0x91d   : > { %v3382_v15 = vshrl.u32 %v3316_v55, 16  ;;  %v3390_v16 = vshrl.u32 %v3313_v14, 16  ;;  %v3371_v23 = vpack.i.b16 %v3306_v34, %v7366_v19  ;;  %v3379_v24 = vpack.i.b16 %v3316_v55, %v3250_v38 }
 0x91e   : > { %v3387_v10 = vpack.i.b16 %v3313_v14, %v7369_v13  ;;  %v3395_v11 = vpack.i.b16 %v3317_v60, %v3251_v27  ;;  %v7400_v25 = vpack.i.b16 %v3358_v0, %v3357_v40  ;;  %v7402_v32 = vpack.i.b16 %v3366_v1, %v3365_v49  ;;  %v3184_v49 = vpop.permute.xlu0 %3183  ;;  %v3179_v1 = vpop.permute.xlu1 %3178 }
 0x91f   : > { %v3398_v26 = vshrl.u32 %v3317_v60, 16  ;;  %v7404_v33 = vcombine.low %v3339_v61, %v3355_v63  ;;  %v7406_v35 = vpack.i.b16 %v3374_v4, %v3373_v54  ;;  %v2851_v29 = vcombine.high %v2827_v37, %v2842_v44 }
 0x920   : > { %v2866_v45 = vcombine.low %v7384_v42, %v2849_v30  ;;  %v2886_v46 = vcombine.high %v2806_v52, %v8227_v2  ;;  %v7410_v19 = vpack.i.b16 %v3382_v15, %v3381_v57  ;;  %v7412_v34 = vpack.i.b16 %v3390_v16, %v3389_v56 }
 0x921   : > { %v2867_v13 = vcombine.high %v7384_v42, %v2849_v30  ;;  %v2901_v38 = vcombine.high %v2816_v41, %v8227_v2  ;;  %v7416_v27 = vcombine.low %v3347_v20, %v3363_v12  ;;  %v7418_v14 = vcombine.low %v3371_v23, %v3387_v10 }
 0x922   : > { %v7420_v39 = vcombine.low %v3379_v24, %v3395_v11  ;;  %v7423_v37 = vrot.slane %v2850_v5, %v6957_v62  ;;  %v7425_v44 = vpack.i.b16 %v3398_v26, %v3397_v58  ;;  %v2893_v40 = vrot.slane %v2806_v52, %v6949_v43  ;;  %v2808_v36 = vpop.permute.xlu1 %2807 }
 0x923   : > { %v2908_v42 = vrot.slane %v2816_v41, %v6949_v43  ;;  %v7432_v50 = vrot.slane %v2851_v29, %v6957_v62  ;;  %v7435_v54 = vrot.slane %v2866_v45, %v6957_v62  ;;  %v2900_v56 = vrot.slane %v2886_v46, %v6949_v43 }
 0x924   : > { %v2915_v55 = vrot.slane %v2901_v38, %v6949_v43  ;;  %v7442_v57 = vrot.slane %v2867_v13, %v6957_v62  ;;  %v2882_v60 = vcombine.high %v7423_v37, %v8227_v2  ;;  %v3329_v61 = vcombine.low %v3174_v17, %v3184_v49 }
 0x925   : > { %v2916_v52 = vcombine.low %v2893_v40, %v2908_v42  ;;  %v2917_v58 = vcombine.high %v2893_v40, %v2908_v42  ;;  %v3462_v30 = vcombine.low %v7396_v8, %v7402_v32  ;;  %v2883_v12 = vcombine.high %v7432_v50, %v8227_v2 }
 0x926   : > { %v2932_v63 = vcombine.low %v2900_v56, %v2915_v55  ;;  %v2933_v0 = vcombine.high %v2900_v56, %v2915_v55  ;;  %v2884_v15 = vcombine.high %v7435_v54, %v8227_v2  ;;  %v2975_v16 = vshrl.u32 %v7423_v37, 16 }
 0x927   : > { %v2924_v4 = vrot.slane %v2916_v52, %v6957_v62  ;;  %v2931_v5 = vrot.slane %v2917_v58, %v6957_v62  ;;  %v2885_v8 = vcombine.high %v7442_v57, %v8227_v2  ;;  %v3319_v10 = vcombine.low %v7330_v51, %v3179_v1 }
 0x928   : > { %v2940_v17 = vrot.slane %v2932_v63, %v6957_v62  ;;  %v2983_v11 = vshrl.u32 %v2882_v60, 16  ;;  %v3336_v41 = vrot.slane %v3329_v61, %v6957_v62  ;;  %v2947_v32 = vrot.slane %v2933_v0, %v6957_v62 }
 0x929   : > { %v2948_v23 = vcombine.high %v2924_v4, %v8227_v2  ;;  %v2949_v24 = vcombine.high %v2931_v5, %v8227_v2  ;;  %v2991_v29 = vshrl.u32 %v7432_v50, 16  ;;  %v3007_v45 = vshrl.u32 %v7435_v54, 16 }
 0x92a   : > { %v2950_v26 = vcombine.high %v2940_v17, %v8227_v2  ;;  %v2976_v46 = vshrl.u32 %v2924_v4, 16  ;;  %v2992_v13 = vshrl.u32 %v2931_v5, 16  ;;  %v2999_v38 = vshrl.u32 %v2883_v12, 16 }
 0x92b   : > { %v3015_v40 = vshrl.u32 %v2884_v15, 16  ;;  %v3023_v49 = vshrl.u32 %v7442_v57, 16  ;;  %v2984_v42 = vshrl.u32 %v2948_v23, 16  ;;  %v3031_v56 = vshrl.u32 %v2885_v8, 16 }
 0x92c   : > { %v3000_v51 = vshrl.u32 %v2949_v24, 16  ;;  %v3008_v55 = vshrl.u32 %v2940_v17, 16  ;;  %v3326_v52 = vrot.slane %v3319_v10, %v6957_v62  ;;  %v2951_v58 = vcombine.high %v2947_v32, %v8227_v2 }
 0x92d   : > { %v2973_v61 = vpack.i.b16 %v2924_v4, %v7423_v37  ;;  %v2989_v63 = vpack.i.b16 %v2931_v5, %v7432_v50  ;;  %v3016_v0 = vshrl.u32 %v2950_v26, 16  ;;  %v2977_v1 = vpack.i.b16 %v2976_v46, %v2975_v16 }
 0x92e   : > { %v2981_v22 = vpack.i.b16 %v2948_v23, %v2882_v60  ;;  %v2993_v18 = vpack.i.b16 %v2992_v13, %v2991_v29  ;;  %v2997_v21 = vpack.i.b16 %v2949_v24, %v2883_v12  ;;  %v2985_v31 = vpack.i.b16 %v2984_v42, %v2983_v11  ;;  %v2813_v23 = vpop.permute.xlu0 %2812 }
 0x92f   : > { %v3005_v20 = vpack.i.b16 %v2940_v17, %v7435_v54  ;;  %v3021_v59 = vpack.i.b16 %v2947_v32, %v7442_v57  ;;  %v3024_v48 = vshrl.u32 %v2947_v32, 16  ;;  %v3001_v7 = vpack.i.b16 %v3000_v51, %v2999_v38 }
 0x930   : > { %v3009_v10 = vpack.i.b16 %v3008_v55, %v3007_v45  ;;  %v3013_v6 = vpack.i.b16 %v2950_v26, %v2884_v15  ;;  %v3403_v2 = vpack.i.b16 %v3336_v41, %v3326_v52  ;;  %v3017_v9 = vpack.i.b16 %v3016_v0, %v3015_v40 }
 0x931   : > { %v3029_v37 = vpack.i.b16 %v2951_v58, %v2885_v8  ;;  %v3032_v4 = vshrl.u32 %v2951_v58, 16  ;;  %v3419_v50 = vrot.slane %v7416_v27, %v6949_v43  ;;  %v3038_v60 = vcombine.low %v2973_v61, %v2989_v63 }
 0x932   : > { %v3046_v5 = vcombine.low %v2981_v22, %v2997_v21  ;;  %v3427_v12 = vrot.slane %v7418_v14, %v6949_v43  ;;  %v3435_v54 = vrot.slane %v7420_v39, %v6949_v43  ;;  %v3025_v57 = vpack.i.b16 %v3024_v48, %v3023_v49 }
 0x933   : > { %v3054_v16 = vcombine.low %v3005_v20, %v3021_v59  ;;  %v8243_v15 = vrot.slane %v7404_v33, %v6949_v43  ;;  %v3469_v8 = vrot.slane %v3462_v30, %v6949_v43  ;;  %v7486_v24 = vrot.slane %v3403_v2, %v6957_v62  ;;  %v2818_v20 = vpop.permute.xlu1 %2817 }
 0x934   : > { %v3444_v27 = vcombine.low %v3427_v12, %v3435_v54  ;;  %v8244_v21 = vcombine.low %v7394_v3, %v7400_v25  ;;  %v3478_v14 = vcombine.low %v7410_v19, %v7425_v44  ;;  %v3033_v39 = vpack.i.b16 %v3032_v4, %v3031_v56 }
 0x935   : > { %v3436_v17 = vcombine.low %v8243_v15, %v3419_v50  ;;  %v3062_v48 = vcombine.low %v3013_v6, %v3029_v37  ;;  %v3088_v59 = vcombine.low %v2977_v1, %v2993_v18  ;;  %v3096_v33 = vcombine.low %v2985_v31, %v3001_v7 }
 0x936   : > { %v3461_v22 = vrot.slane %v8244_v21, %v6949_v43  ;;  %v3451_v30 = vrot.slane %v3444_v27, %v6957_v62  ;;  %v8245_v2 = vcombine.low %v7406_v35, %v7412_v34  ;;  %v3485_v41 = vrot.slane %v3478_v14, %v6949_v43 }
 0x937   : > { %v3104_v3 = vcombine.low %v3009_v10, %v3025_v57  ;;  %v2953_v25 = vcombine.low %v7338_v53, %v2813_v23  ;;  %v3443_v19 = vrot.slane %v3436_v17, %v6957_v62  ;;  %v3053_v6 = vrot.slane %v3046_v5, %v6949_v43 }
 0x938   : > { %v3477_v11 = vrot.slane %v8245_v2, %v6949_v43  ;;  %v3486_v32 = vcombine.low %v3461_v22, %v3469_v8  ;;  %v3045_v31 = vrot.slane %v3038_v60, %v6949_v43  ;;  %v2963_v7 = vcombine.low %v2808_v36, %v2818_v20 }
 0x939   : > { %v8246_v44 = vmov 0   ;;  %v3452_v35 = vcombine.low %v3443_v19, %v3451_v30  ;;  %v3061_v34 = vrot.slane %v3054_v16, %v6949_v43  ;;  %v3069_v29 = vrot.slane %v3062_v48, %v6949_v43 }
 0x93a   : > { %v3494_v18 = vcombine.low %v3477_v11, %v3485_v41  ;;  %v7506_v26 = vcombine.high %v7486_v24, %v8246_v44  ;;  %v3103_v45 = vrot.slane %v3096_v33, %v6949_v43  ;;  %v3493_v53 = vrot.slane %v3486_v32, %v6957_v62 }
 0x93b   : > { %v3095_v13 = vrot.slane %v3088_v59, %v6949_v43  ;;  %v3112_v38 = vcombine.low %v3017_v9, %v3033_v39  ;;  %v7514_v36 = vcombine.high %v3443_v19, %v3451_v30  ;;  %v3070_v40 = vcombine.low %v3045_v31, %v3053_v6 }
 0x93c   : > { %v3501_v46 = vrot.slane %v3494_v18, %v6957_v62  ;;  %v3078_v49 = vcombine.low %v3061_v34, %v3069_v29  ;;  %v3111_v42 = vrot.slane %v3104_v3, %v6949_v43  ;;  %v2970_v58 = vrot.slane %v2963_v7, %v6957_v62 }
 0x93d   : > { %v3119_v55 = vrot.slane %v3112_v38, %v6949_v43  ;;  %v3120_v52 = vcombine.low %v3095_v13, %v3103_v45  ;;  %v2960_v9 = vrot.slane %v2953_v25, %v6957_v62  ;;  %v3526_v10 = vpack.i.b16 %v8246_v44, %v7486_v24 }
 0x93e   : > { %v3502_v56 = vcombine.low %v3493_v53, %v3501_v46  ;;  %v3503_v51 = vcombine.high %v3493_v53, %v3501_v46  ;;  %v3085_v61 = vrot.slane %v3078_v49, %v6957_v62  ;;  %v3530_v37 = vpack.i.b16 %v8246_v44, %v7506_v26 }
 0x93f   : > { %v3128_v1 = vcombine.low %v3111_v42, %v3119_v55  ;;  %v3077_v4 = vrot.slane %v3070_v40, %v6957_v62  ;;  %v3127_v5 = vrot.slane %v3120_v52, %v6957_v62  ;;  %v3037_v54 = vpack.i.b16 %v2970_v58, %v2960_v9 }
 0x940   : > { %v3515_v63 = vpack.i.b16 %v3502_v56, %v3452_v35  ;;  %v3521_v0 = vpack.i.b16 %v3503_v51, %v7514_v36  ;;  %v3517_v27 = vshrl.u32 %v3502_v56, 16  ;;  %v3516_v22 = vshrl.u32 %v3452_v35, 16 }
 0x941   : > { %v3135_v12 = vrot.slane %v3128_v1, %v6957_v62  ;;  %v3086_v57 = vcombine.low %v3077_v4, %v3085_v61  ;;  %v3087_v15 = vcombine.high %v3077_v4, %v3085_v61  ;;  %v3145_v21 = vrot.slane %v3037_v54, %v6957_v62 }
 0x942   : > { %6427 = vmatprep.subr.msk.bf16.mxu1 %vm1626_vm1, %v3515_v63  ;;  %6431 = vmatprep.subr.msk.bf16.mxu0 %vm1626_vm1, %v3521_v0  ;;  %v3910_v50 = vsel %vm1626_vm1, %v3515_v63, 0  ;;  %v4030_v60 = vsel %vm1626_vm1, %v3521_v0, 0  ;;  %v3913_v14 = vsel %vm1626_vm1, %v3526_v10, 0  ;;  %v4033_v39 = vsel %vm1626_vm1, %v3530_v37, 0 }
 0x943   : > { %6344 = vmatpush3.bf16.xpose.msra.mxu1 %v3910_v50  ;;  %6360 = vmatpush3.bf16.xpose.msra.mxu0 %v4030_v60  ;;  %v3136_v16 = vcombine.low %v3127_v5, %v3135_v12  ;;  %v3137_v17 = vcombine.high %v3127_v5, %v3135_v12  ;;  %v3518_v48 = vpack.i.b16 %v3517_v27, %v3516_v22  ;;  %v3527_v20 = vshrl.u32 %v7486_v24, 16 }
 0x944   : > { %6428 = vmatprep.subr.msk.bf16.mxu1 %vm1626_vm1, %v3526_v10  ;;  %6432 = vmatprep.subr.msk.bf16.mxu0 %vm1626_vm1, %v3530_v37  ;;  %v3146_v59 = vcombine.high %v3145_v21, %v8246_v44  ;;  %v3150_v30 = vshrl.u32 %v3086_v57, 16  ;;  %v3160_v2 = vpack.i.b16 %v8246_v44, %v3145_v21  ;;  %v3523_v24 = vshrl.u32 %v3503_v51, 16 }
 0x945   : > { %v3149_v8 = vpack.i.b16 %v3136_v16, %v3086_v57  ;;  %v3155_v23 = vpack.i.b16 %v3137_v17, %v3087_v15  ;;  %v3151_v33 = vshrl.u32 %v3136_v16, 16  ;;  %v3970_v32 = vsel %vm1626_vm1, %v3518_v48, 0 }
 0x946   : > { %v3164_v11 = vpack.i.b16 %v8246_v44, %v3146_v59  ;;  %v3528_v3 = vpack.i.b16 %v8246_v44, %v3527_v20  ;;  %v3522_v25 = vshrl.u32 %v7514_v36, 16  ;;  %v3161_v31 = vshrl.u32 %v3145_v21, 16 }
 0x947   : > { %6347 = vmatprep.mubr.msk.bf16.mxu1 %vm1626_vm1, %v3149_v8  ;;  %6363 = vmatprep.mubr.msk.bf16.mxu0 %vm1626_vm1, %v3155_v23  ;;  %v3152_v41 = vpack.i.b16 %v3151_v33, %v3150_v30  ;;  %v3157_v7 = vshrl.u32 %v3137_v17, 16  ;;  %v3531_v18 = vshrl.u32 %v7506_v26, 16  ;;  %v3156_v35 = vshrl.u32 %v3087_v15, 16 }
 0x948   : > { %v3973_v19 = vsel %vm1626_vm1, %v3528_v3, 0  ;;  %v3524_v6 = vpack.i.b16 %v3523_v24, %v3522_v25  ;;  %v3162_v34 = vpack.i.b16 %v8246_v44, %v3161_v31  ;;  %v3165_v13 = vshrl.u32 %v3146_v59, 16 }
 0x949   : > { %v3158_v29 = vpack.i.b16 %v3157_v7, %v3156_v35  ;;  %v3532_v53 = vpack.i.b16 %v8246_v44, %v3531_v18 }
 0x94a   : > { %v4090_v45 = vsel %vm1626_vm1, %v3524_v6, 0  ;;  %v3166_v26 = vpack.i.b16 %v8246_v44, %v3165_v13 }
 0x94b   : > { %6346 = vmatpush3.bf16.xpose.msra.mxu1 %v3913_v14  ;;  %6362 = vmatpush3.bf16.xpose.msra.mxu0 %v4033_v39  ;;  %v4093_v46 = vsel %vm1626_vm1, %v3532_v53, 0 }
 0x94c   : > { %6429 = vmatprep.subr.msk.bf16.mxu1 %vm1626_vm1, %v3518_v48 }
 0x952   : > { %6348 = vmatmul.mubr.msk.bf16.vlgmr.msra.gmra.mrb[28].mxu1 %vm1626_vm1, %v3160_v2  ;;  %6364 = vmatmul.mubr.msk.bf16.vlgmr.msra.gmra.mrb[20].mxu0 %vm1626_vm1, %v3164_v11  ;;  %v7595_v11 = vpop.permute.xlu1 %3537 }
 0x953   : > { %6352 = vmatpush3.bf16.xpose.msra.mxu1 %v3970_v32  ;;  %6355 = vmatprep.mubr.msk.bf16.mxu1 %vm1626_vm1, %v3152_v41 }
 0x954   : > { %6430 = vmatprep.subr.msk.bf16.mxu1 %vm1626_vm1, %v3528_v3 }
 0x95b   : > { %6354 = vmatpush3.bf16.xpose.msra.mxu1 %v3973_v19 }
 0x95c   : > { %6433 = vmatprep.subr.msk.bf16.mxu1 %vm1626_vm1, %v3524_v6 }
 0x962   : > { %6356 = vmatmul.mubr.msk.bf16.vlgmr.msra.gmra.mrb[32].mxu1 %vm1626_vm1, %v3162_v34 }
 0x963   : > { %6368 = vmatpush3.bf16.xpose.msra.mxu1 %v4090_v45  ;;  %6371 = vmatprep.mubr.msk.bf16.mxu1 %vm1626_vm1, %v3158_v29 }
 0x964   : > { %6434 = vmatprep.subr.msk.bf16.mxu1 %vm1626_vm1, %v3532_v53 }
 0x96b   : > { %6370 = vmatpush3.bf16.xpose.msra.mxu1 %v4093_v46 }
 0x972   : > { %6372 = vmatmul.mubr.msk.bf16.vlgmr.msra.gmra.mrb[36].mxu1 %vm1626_vm1, %v3166_v26 }
 0xa25   : > { %v6349_v38 = vpop.f32.mrb[28].mxu1  ;;  %v6365_v36 = vpop.f32.mrb[20].mxu0 }
 0xa26   : > { %v4145_v40 = vmul.f32 0.17677669, %v6349_v38  ;;  %v3949_v49 = vpop.f32.mrb[29].mxu1  ;;  %v4069_v42 = vpop.f32.mrb[21].mxu0  ;;  %v4151_v52 = vmul.f32 0.17677669, %v6365_v36 }
 0xa27   : > { %v4143_v56 = vmul.f32 0.17677669, %v3949_v49  ;;  %v6350_v51 = vpop.f32.mrb[30].mxu1  ;;  %v6366_v55 = vpop.f32.mrb[22].mxu0  ;;  %v4149_v9 = vmul.f32 0.17677669, %v4069_v42 }
 0xa28   : > { %v3952_v58 = vpop.f32.mrb[31].mxu1  ;;  %v4072_v61 = vpop.f32.mrb[23].mxu0  ;;  %v4163_v63 = vsel %vm4162_vm6, %v4145_v40, -inf  ;;  %v4181_v10 = vsel %vm4162_vm6, %v4151_v52, -inf }
 0xa29   : > { %v4150_v0 = vmul.f32 0.17677669, %v4072_v61  ;;  %4164 = vmax.xlane.f32.xlu1 %v4163_v63  ;;  %v4156_v1 = vsel %vm4155_vm7, %v4143_v56, -inf  ;;  %v4144_v4 = vmul.f32 0.17677669, %v3952_v58  ;;  %v4175_v50 = vsel %vm4155_vm7, %v4149_v9, -inf }
 0xa2a   : > { %4157 = vmax.xlane.f32.xlu0 %v4156_v1 }
 0xa2b   : > { %v4178_v37 = vsel %vm4155_vm7, %v4150_v0, -inf  ;;  %v4159_v60 = vsel %vm4155_vm7, %v4144_v4, -inf }
 0xa2d   : > { %4182 = vmax.xlane.f32.xlu1 %v4181_v10 }
 0xa2e   : > { %4179 = vmax.xlane.f32.xlu0 %v4178_v37 }
 0xa31   : > { %4176 = vmax.xlane.f32.xlu1 %v4175_v50 }
 0xa35   : > { %4160 = vmax.xlane.f32.xlu1 %v4159_v60  ;;  %v6357_v5 = vpop.f32.mrb[32].mxu1 }
 0xa36   : > { %v4148_v12 = vmul.f32 0.17677669, %v6357_v5  ;;  %v4009_v54 = vpop.f32.mrb[33].mxu1 }
 0xa37   : > { %v6358_v57 = vpop.f32.mrb[34].mxu1  ;;  %v7570_v16 = vmul.f32 0.17677669, %v4009_v54 }
 0xa38   : > { %v4012_v15 = vpop.f32.mrb[35].mxu1  ;;  %v4172_v17 = vsel %vm4162_vm6, %v4148_v12, -inf }
 0xa39   : > { %4173 = vmax.xlane.f32.xlu0 %v4172_v17  ;;  %v7573_v8 = vmul.f32 0.17677669, %v4012_v15  ;;  %v4166_v23 = vsel %vm4155_vm7, %v7570_v16, -inf }
 0xa3b   : > { %v4169_v27 = vsel %vm4155_vm7, %v7573_v8, -inf }
 0xa3d   : > { %4167 = vmax.xlane.f32.xlu0 %v4166_v23  ;;  %v3618_v23 = vcombine.high %v7595_v11, %v8246_v44 }
 0xa41   : > { %4170 = vmax.xlane.f32.xlu0 %v4169_v27 }
 0xa45   : > { %v6373_v21 = vpop.f32.mrb[36].mxu1 }
 0xa46   : > { %v7579_v22 = vmul.f32 0.17677669, %v6373_v21  ;;  %v4129_v14 = vpop.f32.mrb[37].mxu1 }
 0xa47   : > { %v7581_v39 = vmul.f32 0.17677669, %v4129_v14  ;;  %v6374_v48 = vpop.f32.mrb[38].mxu1 }
 0xa48   : > { %v4132_v59 = vpop.f32.mrb[39].mxu1  ;;  %v4190_v33 = vsel %vm4162_vm6, %v7579_v22, -inf }
 0xa49   : > { %v7585_v20 = vmul.f32 0.17677669, %v4132_v59  ;;  %4191 = vmax.xlane.f32.xlu0 %v4190_v33  ;;  %v4184_v30 = vsel %vm4155_vm7, %v7581_v39, -inf }
 0xa4a   : > { %4185 = vmax.xlane.f32.xlu1 %v4184_v30 }
 0xa4b   : > { %v4187_v2 = vsel %vm4155_vm7, %v7585_v20, -inf }
 0xa4d   : > { %4188 = vmax.xlane.f32.xlu0 %v4187_v2  ;;  %v3632_v2 = vrot.slane %v3618_v23, %v6949_v43 }
 0xa5b   : > { %3547 = vrot.lane.b32.xlu1 %v7324_v47, %s6740_s22 }
 0xa63   : > { %3542 = vrot.lane.b32.xlu0 %v7324_v47, %s6742_s24 }
 0xab6   : > { %v4165_v41 = vpop.xlane.xlu1 %4164 }
 0xab7   : > { %v4195_v32 = vsub.f32 %v4145_v40, %v4165_v41  ;;  %v4158_v3 = vpop.xlane.xlu0 %4157  ;;  %v3552_v41 = vcombine.high %v7324_v47, %v8246_v44 }
 0xab8   : > { %v4193_v24 = vsub.f32 %v4143_v56, %v4158_v3 }
 0xab9   : > { %v4209_v25 = vmul.f32 1.442695, %v4195_v32 }
 0xaba   : > { %v4205_v19 = vmul.f32 1.442695, %v4193_v24  ;;  %v4183_v6 = vpop.xlane.xlu1 %4182 }
 0xabb   : > { %6653 = vpow2.f32 %v4209_v25  ;;  %v4201_v31 = vsub.f32 %v4151_v52, %v4183_v6  ;;  %v4180_v7 = vpop.xlane.xlu0 %4179 }
 0xabc   : > { %6655 = vpow2.f32 %v4205_v19  ;;  %v4200_v18 = vsub.f32 %v4150_v0, %v4180_v7  ;;  %v3559_v19 = vrot.slane %v7324_v47, %v6949_v43 }
 0xabd   : > { %v4221_v35 = vmul.f32 1.442695, %v4201_v31 }
 0xabe   : > { %v4219_v34 = vmul.f32 1.442695, %v4200_v18  ;;  %v4177_v29 = vpop.xlane.xlu1 %4176 }
 0xabf   : > { %6657 = vpow2.f32 %v4221_v35  ;;  %v4199_v45 = vsub.f32 %v4149_v9, %v4177_v29  ;;  %v3566_v29 = vrot.slane %v3552_v41, %v6949_v43 }
 0xac0   : > { %6659 = vpow2.f32 %v4219_v34 }
 0xac1   : > { %v4217_v53 = vmul.f32 1.442695, %v4199_v45 }
 0xac2   : > { %v4161_v46 = vpop.xlane.xlu1 %4160 }
 0xac3   : > { %6661 = vpow2.f32 %v4217_v53  ;;  %v4194_v13 = vsub.f32 %v4144_v4, %v4161_v46 }
 0xac5   : > { %v7597_v26 = vpop.eup %6653  ;;  %v4207_v38 = vmul.f32 1.442695, %v4194_v13 }
 0xac6   : > { %v7599_v36 = vpop.eup %6655  ;;  %v4174_v40 = vpop.xlane.xlu0 %4173  ;;  %v4235_v49 = vsel %vm4162_vm6, %v7597_v26, 0.0 }
 0xac7   : > { %6663 = vpow2.f32 %v4207_v38  ;;  %v4198_v42 = vsub.f32 %v4148_v12, %v4174_v40  ;;  %4236 = vadd.xlane.f32.xlu0 %v4235_v49  ;;  %v4229_v56 = vsel %vm4155_vm7, %v7599_v36, 0.0 }
 0xac8   : > { %4230 = vadd.xlane.f32.xlu1 %v4229_v56 }
 0xac9   : > { %v7605_v51 = vpop.eup %6657  ;;  %v4215_v55 = vmul.f32 1.442695, %v4198_v42 }
 0xaca   : > { %v7607_v52 = vpop.eup %6659  ;;  %v4168_v58 = vpop.xlane.xlu0 %4167  ;;  %v4253_v61 = vsel %vm4162_vm6, %v7605_v51, 0.0 }
 0xacb   : > { %6665 = vpow2.f32 %v4215_v55  ;;  %v4196_v63 = vsub.f32 %v7570_v16, %v4168_v58  ;;  %4254 = vadd.xlane.f32.xlu0 %v4253_v61  ;;  %v4250_v0 = vsel %vm4155_vm7, %v7607_v52, 0.0 }
 0xacc   : > { %4251 = vadd.xlane.f32.xlu1 %v4250_v0 }
 0xacd   : > { %v7614_v1 = vpop.eup %6661  ;;  %v4211_v9 = vmul.f32 1.442695, %v4196_v63 }
 0xace   : > { %v4171_v10 = vpop.xlane.xlu0 %4170  ;;  %v4247_v37 = vsel %vm4155_vm7, %v7614_v1, 0.0 }
 0xacf   : > { %6667 = vpow2.f32 %v4211_v9  ;;  %v4197_v4 = vsub.f32 %v7573_v8, %v4171_v10  ;;  %4248 = vadd.xlane.f32.xlu0 %v4247_v37 }
 0xad1   : > { %v7619_v50 = vpop.eup %6663  ;;  %v4213_v60 = vmul.f32 1.442695, %v4197_v4 }
 0xad2   : > { %v4232_v5 = vsel %vm4155_vm7, %v7619_v50, 0.0 }
 0xad3   : > { %6669 = vpow2.f32 %v4213_v60  ;;  %4233 = vadd.xlane.f32.xlu0 %v4232_v5 }
 0xad5   : > { %v7623_v12 = vpop.eup %6665 }
 0xad6   : > { %v4192_v54 = vpop.xlane.xlu0 %4191  ;;  %v4244_v57 = vsel %vm4162_vm6, %v7623_v12, 0.0 }
 0xad7   : > { %v4204_v16 = vsub.f32 %v7579_v22, %v4192_v54  ;;  %4245 = vadd.xlane.f32.xlu1 %v4244_v57  ;;  %v4186_v15 = vpop.xlane.xlu1 %4185  ;;  %v3625_v22 = vrot.slane %v7595_v11, %v6949_v43 }
 0xad8   : > { %v4202_v17 = vsub.f32 %v7581_v39, %v4186_v15 }
 0xad9   : > { %v7629_v8 = vpop.eup %6667  ;;  %v4227_v27 = vmul.f32 1.442695, %v4204_v16 }
 0xada   : > { %v7633_v21 = vpop.xlane.xlu0 %4188  ;;  %v4238_v14 = vsel %vm4155_vm7, %v7629_v8, 0.0  ;;  %v4223_v48 = vmul.f32 1.442695, %v4202_v17 }
 0xadb   : > { %v3548_v59 = vpop.permute.xlu1 %3547  ;;  %4239 = vadd.xlane.f32.xlu0 %v4238_v14  ;;  %6671 = vpow2.f32 %v4227_v27 }
 0xadc   : > { %v3633_v33 = vcombine.high %v3548_v59, %v8246_v44  ;;  %v3640_v39 = vrot.slane %v3548_v59, %v6949_v43  ;;  %6673 = vpow2.f32 %v4223_v48 }
 0xadd   : > { %v7641_v30 = vpop.eup %6669 }
 0xade   : > { %v3647_v32 = vrot.slane %v3633_v33, %v6949_v43  ;;  %v3648_v3 = vcombine.low %v3625_v22, %v3640_v39  ;;  %v3649_v24 = vcombine.high %v3625_v22, %v3640_v39  ;;  %v3543_v25 = vpop.permute.xlu0 %3542  ;;  %v4241_v11 = vsel %vm4155_vm7, %v7641_v30, 0.0 }
 0xadf   : > { %v3567_v6 = vcombine.high %v3543_v25, %v8246_v44  ;;  %v3574_v31 = vrot.slane %v3543_v25, %v6949_v43  ;;  %4242 = vadd.xlane.f32.xlu1 %v4241_v11 }
 0xae0   : > { %v3656_v7 = vrot.slane %v3648_v3, %v6957_v62  ;;  %v3663_v18 = vrot.slane %v3649_v24, %v6957_v62  ;;  %v3664_v35 = vcombine.low %v3632_v2, %v3647_v32  ;;  %v3665_v34 = vcombine.high %v3632_v2, %v3647_v32 }
 0xae1   : > { %v3581_v45 = vrot.slane %v3567_v6, %v6949_v43  ;;  %v3582_v53 = vcombine.low %v3559_v19, %v3574_v31  ;;  %v3583_v46 = vcombine.high %v3559_v19, %v3574_v31 }
 0xae2   : > { %v3672_v13 = vrot.slane %v3664_v35, %v6957_v62  ;;  %v3679_v47 = vrot.slane %v3665_v34, %v6957_v62  ;;  %v3680_v38 = vcombine.high %v3656_v7, %v8246_v44  ;;  %v3681_v40 = vcombine.high %v3663_v18, %v8246_v44 }
 0xae3   : > { %v3708_v49 = vshrl.u32 %v3656_v7, 16  ;;  %v3724_v42 = vshrl.u32 %v3663_v18, 16  ;;  %v3590_v56 = vrot.slane %v3582_v53, %v6957_v62  ;;  %v3597_v55 = vrot.slane %v3583_v46, %v6957_v62 }
 0xae4   : > { %v3682_v58 = vcombine.high %v3672_v13, %v8246_v44  ;;  %v3683_v61 = vcombine.high %v3679_v47, %v8246_v44  ;;  %v3716_v63 = vshrl.u32 %v3680_v38, 16  ;;  %v3732_v0 = vshrl.u32 %v3681_v40, 16 }
 0xae5   : > { %v3740_v9 = vshrl.u32 %v3672_v13, 16  ;;  %v3756_v10 = vshrl.u32 %v3679_v47, 16  ;;  %v3598_v37 = vcombine.low %v3566_v29, %v3581_v45  ;;  %v3599_v4 = vcombine.high %v3566_v29, %v3581_v45  ;;  %v7667_v16 = vpop.eup %6671 }
 0xae6   : > { %v3748_v60 = vshrl.u32 %v3682_v58, 16  ;;  %v3764_v5 = vshrl.u32 %v3683_v61, 16  ;;  %v3614_v54 = vcombine.high %v3590_v56, %v8246_v44  ;;  %v3615_v57 = vcombine.high %v3597_v55, %v8246_v44  ;;  %v7671_v33 = vpop.eup %6673 }
 0xae7   : > { %v3606_v15 = vrot.slane %v3598_v37, %v6957_v62  ;;  %v3613_v17 = vrot.slane %v3599_v4, %v6957_v62  ;;  %v3705_v23 = vpack.i.b16 %v3656_v7, %v3590_v56  ;;  %v3707_v27 = vshrl.u32 %v3590_v56, 16 }
 0xae8   : > { %v3713_v14 = vpack.i.b16 %v3680_v38, %v3614_v54  ;;  %v3715_v48 = vshrl.u32 %v3614_v54, 16  ;;  %v3721_v59 = vpack.i.b16 %v3663_v18, %v3597_v55  ;;  %v3723_v22 = vshrl.u32 %v3597_v55, 16 }
 0xae9   : > { %v3616_v39 = vcombine.high %v3606_v15, %v8246_v44  ;;  %v3617_v2 = vcombine.high %v3613_v17, %v8246_v44  ;;  %v3709_v41 = vpack.i.b16 %v3708_v49, %v3707_v27  ;;  %v3729_v32 = vpack.i.b16 %v3681_v40, %v3615_v57 }
 0xaea   : > { %v3717_v3 = vpack.i.b16 %v3716_v63, %v3715_v48  ;;  %v3725_v24 = vpack.i.b16 %v3724_v42, %v3723_v22  ;;  %v3731_v25 = vshrl.u32 %v3615_v57, 16  ;;  %v3737_v11 = vpack.i.b16 %v3672_v13, %v3606_v15 }
 0xaeb   : > { %v3739_v19 = vshrl.u32 %v3606_v15, 16  ;;  %v3745_v6 = vpack.i.b16 %v3682_v58, %v3616_v39  ;;  %v3747_v31 = vshrl.u32 %v3616_v39, 16  ;;  %v3753_v7 = vpack.i.b16 %v3679_v47, %v3613_v17 }
 0xaec   : > { %v3733_v35 = vpack.i.b16 %v3732_v0, %v3731_v25  ;;  %v3755_v34 = vshrl.u32 %v3613_v17, 16  ;;  %v3761_v18 = vpack.i.b16 %v3683_v61, %v3617_v2  ;;  %v3763_v29 = vshrl.u32 %v3617_v2, 16 }
 0xaed   : > { %v3741_v45 = vpack.i.b16 %v3740_v9, %v3739_v19  ;;  %v3770_v53 = vcombine.low %v3705_v23, %v3721_v59  ;;  %v4262_v46 = vsel %vm4162_vm6, %v7667_v16, 0.0  ;;  %v4256_v38 = vsel %vm4155_vm7, %v7671_v33, 0.0 }
 0xaee   : > { %v3757_v40 = vpack.i.b16 %v3756_v10, %v3755_v34  ;;  %4263 = vadd.xlane.f32.xlu1 %v4262_v46  ;;  %4257 = vadd.xlane.f32.xlu0 %v4256_v38  ;;  %v3749_v13 = vpack.i.b16 %v3748_v60, %v3747_v31  ;;  %v3765_v49 = vpack.i.b16 %v3764_v5, %v3763_v29 }
 0xaef   : > { %v3778_v42 = vcombine.low %v3713_v14, %v3729_v32  ;;  %v3786_v56 = vcombine.low %v3737_v11, %v3753_v7  ;;  %v3794_v47 = vcombine.low %v3745_v6, %v3761_v18  ;;  %v3820_v55 = vcombine.low %v3709_v41, %v3725_v24 }
 0xaf0   : > { %v3828_v58 = vcombine.low %v3717_v3, %v3733_v35  ;;  %v3836_v61 = vcombine.low %v3741_v45, %v3757_v40  ;;  %v3844_v63 = vcombine.low %v3749_v13, %v3765_v49  ;;  %v3777_v0 = vrot.slane %v3770_v53, %v6949_v43 }
 0xaf1   : > { %v3785_v9 = vrot.slane %v3778_v42, %v6949_v43  ;;  %v3793_v37 = vrot.slane %v3786_v56, %v6949_v43  ;;  %v3801_v4 = vrot.slane %v3794_v47, %v6949_v43  ;;  %v3827_v10 = vrot.slane %v3820_v55, %v6949_v43 }
 0xaf2   : > { %v3835_v60 = vrot.slane %v3828_v58, %v6949_v43  ;;  %v3843_v5 = vrot.slane %v3836_v61, %v6949_v43  ;;  %v3851_v54 = vrot.slane %v3844_v63, %v6949_v43  ;;  %v3534_v7 = vpack.c.bf16 %v7322_v28, %v7322_v28 }
 0xaf3   : > { %v3802_v57 = vcombine.low %v3777_v0, %v3785_v9  ;;  %v3810_v15 = vcombine.low %v3793_v37, %v3801_v4  ;;  %v4203_v35 = vsub.f32 %v7585_v20, %v7633_v21 }
 0xaf4   : > { %v3852_v17 = vcombine.low %v3827_v10, %v3835_v60  ;;  %v3860_v23 = vcombine.low %v3843_v5, %v3851_v54 }
 0xaf5   : > { %v3809_v27 = vrot.slane %v3802_v57, %v6957_v62  ;;  %v3817_v14 = vrot.slane %v3810_v15, %v6957_v62  ;;  %v4225_v34 = vmul.f32 1.442695, %v4203_v35 }
 0xaf6   : > { %v3859_v48 = vrot.slane %v3852_v17, %v6957_v62  ;;  %v3867_v59 = vrot.slane %v3860_v23, %v6957_v62 }
 0xaf7   : > { %v3818_v22 = vcombine.low %v3809_v27, %v3817_v14  ;;  %v3819_v39 = vcombine.high %v3809_v27, %v3817_v14  ;;  %6675 = vpow2.f32 %v4225_v34 }
 0xaf8   : > { %v3868_v2 = vcombine.low %v3859_v48, %v3867_v59  ;;  %v3869_v41 = vcombine.high %v3859_v48, %v3867_v59  ;;  %v4304_v48 = vsel %vm2457_vm5, 65535, %v8246_v44 }
 0xaf9   : > { %v3883_v32 = vshrl.u32 %v3818_v22, 16  ;;  %v3891_v3 = vshrl.u32 %v3819_v39, 16 }
 0xafa   : > { %v3881_v24 = vpack.i.b16 %v3868_v2, %v3818_v22  ;;  %v3884_v25 = vshrl.u32 %v3868_v2, 16  ;;  %v7691_v11 = vpack.i.b16 %v3869_v41, %v3819_v39  ;;  %v3892_v19 = vshrl.u32 %v3869_v41, 16 }
 0xafc   : > { %6375 = vmatprep.subr.bf16.mxu0 %v3881_v24  ;;  %v3885_v6 = vpack.i.b16 %v3884_v25, %v3883_v32  ;;  %v7693_v31 = vpack.i.b16 %v3892_v19, %v3891_v3 }
 0xafd   : > { %6376 = vmatpush3.bf16.msra.mxu0 %v3881_v24 }
 0xafe   : > { %6383 = vmatprep.subr.bf16.mxu1 %v3885_v6 }
 0xaff   : > { %3544 = vrot.lane.b32.xlu1 %v3534_v7, %s6742_s24  ;;  %6384 = vmatpush3.bf16.msra.mxu1 %v3885_v6 }
 0xb01   : > { %v7701_v18 = vpop.eup %6675 }
 0xb02   : > { %v4259_v29 = vsel %vm4155_vm7, %v7701_v18, 0.0 }
 0xb04   : > { %3539 = vrot.lane.b32.xlu0 %v3534_v7, %s6741_s2 }
 0xb23   : > { %4260 = vadd.xlane.f32.xlu1 %v4259_v29 }
 0xb34   : > { %3549 = vrot.lane.b32.xlu1 %v3534_v7, %s6740_s22 }
 0xb54   : > { %v4237_v28 = vpop.xlane.xlu0 %4236 }
 0xb55   : > { %v4231_v45 = vpop.xlane.xlu1 %4230 }
 0xb58   : > { %v4255_v53 = vpop.xlane.xlu0 %4254 }
 0xb59   : > { %v4252_v46 = vpop.xlane.xlu1 %4251 }
 0xb5a   : > { %6677 = vrcp.f32 %v4252_v46 }
 0xb5c   : > { %v4249_v38 = vpop.xlane.xlu0 %4248 }
 0xb5d   : > { %6679 = vrcp.f32 %v4249_v38 }
 0xb5e   : > { %6681 = vrcp.f32 %v4231_v45 }
 0xb60   : > { %v4234_v40 = vpop.xlane.xlu0 %4233 }
 0xb61   : > { %6683 = vrcp.f32 %v4234_v40 }
 0xb64   : > { %v6678_v20 = vpop.eup %6677  ;;  %v4246_v13 = vpop.xlane.xlu1 %4245 }
 0xb65   : > { %v7710_v56 = vmul.f32 %v6678_v20, %v7607_v52 }
 0xb67   : > { %v6680_v21 = vpop.eup %6679 }
 0xb68   : > { %v4240_v49 = vpop.xlane.xlu0 %4239  ;;  %v7707_v42 = vmul.f32 %v6680_v21, %v7614_v1  ;;  %v6682_v47 = vpop.eup %6681 }
 0xb69   : > { %6685 = vrcp.f32 %v4240_v49  ;;  %v4277_v63 = vmul.f32 %v6682_v47, %v7599_v36 }
 0xb6a   : > { %v4293_v55 = vpack.c.bf16 %v7710_v56, %v7707_v42 }
 0xb6b   : > { %v6684_v58 = vpop.eup %6683 }
 0xb6c   : > { %v4243_v61 = vpop.xlane.xlu1 %4242  ;;  %v4278_v0 = vmul.f32 %v6684_v58, %v7619_v50 }
 0xb6d   : > { %6687 = vrcp.f32 %v4243_v61 }
 0xb6e   : > { %v4289_v9 = vpack.c.bf16 %v4278_v0, %v4277_v63  ;;  %6689 = vrcp.f32 %v4237_v28 }
 0xb6f   : > { %6691 = vrcp.f32 %v4246_v13 }
 0xb70   : > { %6379 = vmatprep.mubr.msk.bf16.mxu0 %vm4155_vm7, %v4289_v9 }
 0xb73   : > { %v6686_v1 = vpop.eup %6685 }
 0xb74   : > { %v4280_v52 = vmul.f32 %v6686_v1, %v7629_v8 }
 0xb77   : > { %v6688_v37 = vpop.eup %6687 }
 0xb78   : > { %v4281_v4 = vmul.f32 %v6688_v37, %v7641_v30  ;;  %v6690_v14 = vpop.eup %6689 }
 0xb79   : > { %v6692_v2 = vpop.eup %6691  ;;  %v4279_v32 = vmul.f32 %v6690_v14, %v7597_v26 }
 0xb7a   : > { %v4291_v10 = vpack.c.bf16 %v4281_v4, %v4280_v52  ;;  %v4282_v6 = vmul.f32 %v6692_v2, %v7623_v12 }
 0xb7b   : > { %v4264_v60 = vpop.xlane.xlu1 %4263  ;;  %v4258_v54 = vpop.xlane.xlu0 %4257  ;;  %v4290_v29 = vpack.c.bf16 %v4279_v32, %v4279_v32 }
 0xb7c   : > { %6387 = vmatprep.mubr.msk.bf16.mxu1 %vm4155_vm7, %v4291_v10  ;;  %v4292_v12 = vpack.c.bf16 %v4282_v6, %v4282_v6 }
 0xb7f   : > { %v3545_v5 = vpop.permute.xlu1 %3544  ;;  %v3540_v50 = vpop.permute.xlu0 %3539 }
 0xb80   : > { %v3685_v36 = vcombine.low %v3534_v7, %v3545_v5 }
 0xb82   : > { %v3692_v23 = vrot.slane %v3685_v36, %v6957_v62 }
 0xbb0   : > { %v4261_v57 = vpop.xlane.xlu1 %4260 }
 0xbb1   : > { %6693 = vrcp.f32 %v4261_v57 }
 0xbb2   : > { %6695 = vrcp.f32 %v4258_v54 }
 0xbb3   : > { %6697 = vrcp.f32 %v4255_v53 }
 0xbb4   : > { %v3550_v15 = vpop.permute.xlu1 %3549  ;;  %6699 = vrcp.f32 %v4264_v60 }
 0xbb5   : > { %v3695_v17 = vcombine.low %v3540_v50, %v3550_v15 }
 0xbb7   : > { %v3702_v8 = vrot.slane %v3695_v17, %v6957_v62 }
 0xbb9   : > { %v3769_v30 = vpack.i.b16 %v3702_v8, %v3692_v23 }
 0xbbb   : > { %v3877_v27 = vrot.slane %v3769_v30, %v6957_v62  ;;  %v6694_v41 = vpop.eup %6693 }
 0xbbc   : > { %v6696_v19 = vpop.eup %6695  ;;  %v4287_v34 = vmul.f32 %v6694_v41, %v7701_v18 }
 0xbbd   : > { %v3896_v59 = vpack.i.b16 %v8246_v44, %v3877_v27  ;;  %v3897_v22 = vshrl.u32 %v3877_v27, 16  ;;  %v3878_v39 = vcombine.high %v3877_v27, %v8246_v44  ;;  %v6698_v28 = vpop.eup %6697  ;;  %v4286_v45 = vmul.f32 %v6696_v19, %v7671_v33 }
 0xbbe   : > { %v6700_v46 = vpop.eup %6699  ;;  %v4285_v38 = vmul.f32 %v6698_v28, %v7605_v51  ;;  %v6523_v51 = vld [vmem:[%s8206_s11] sm:$0xff]  }
 0xbbf   : > { %v4306_v3 = vand.u32 %v4304_v48, %v3896_v59  ;;  %v3898_v24 = vpack.i.b16 %v8246_v44, %v3897_v22  ;;  %v3901_v25 = vshrl.u32 %v3878_v39, 16  ;;  %v3900_v35 = vpack.i.b16 %v8246_v44, %v3878_v39 }
 0xbc0   : > { %v4295_v18 = vpack.c.bf16 %v4287_v34, %v4286_v45  ;;  %v4288_v40 = vmul.f32 %v6700_v46, %v7667_v16  ;;  %v6525_v16 = vld [vmem:[%s8206_s11 + $0x10] sm:$0xff]  }
 0xbc1   : > { %6377 = vmatprep.subr.bf16.mxu0 %v4306_v3  ;;  %v4363_v7 = vand.u32 %v4304_v48, %v3898_v24  ;;  %v3902_v26 = vpack.i.b16 %v8246_v44, %v3901_v25  ;;  %v4420_v53 = vand.u32 %v4304_v48, %v3900_v35 }
 0xbc2   : > { %6378 = vmatpush3.bf16.msra.mxu0 %v4306_v3  ;;  %v4296_v20 = vpack.c.bf16 %v4288_v40, %v4288_v40  ;;  %v6526_v3 = vld [vmem:[%s8206_s11 + $0x18] sm:$0xff]  }
 0xbc3   : > { %6385 = vmatprep.subr.bf16.mxu1 %v4363_v7  ;;  %6391 = vmatprep.subr.bf16.mxu0 %v7691_v11  ;;  %v4477_v33 = vand.u32 %v4304_v48, %v3902_v26 }
 0xbc4   : > { %6386 = vmatpush3.bf16.msra.mxu1 %v4363_v7 }
 0xbc5   : > { %6380 = vmatmul.mubr.msk.bf16.vlgmr.msra.gmra.mrb[24].mxu0 %vm4155_vm7, %v4290_v29  ;;  %6399 = vmatprep.subr.bf16.mxu1 %v7693_v31 }
 0xbc6   : > { %6392 = vmatpush3.bf16.msra.mxu0 %v7691_v11  ;;  %6395 = vmatprep.mubr.msk.bf16.mxu0 %vm4155_vm7, %v4293_v55  ;;  %v4294_v11 = vpack.c.bf16 %v4285_v38, %v4285_v38 }
 0xbc7   : > { %6388 = vmatmul.mubr.msk.bf16.vlgmr.msra.gmra.mrb[40].mxu1 %vm4155_vm7, %v4292_v12  ;;  %6393 = vmatprep.subr.bf16.mxu0 %v4420_v53 }
 0xbc8   : > { %6400 = vmatpush3.bf16.msra.mxu1 %v7693_v31  ;;  %6403 = vmatprep.mubr.msk.bf16.mxu1 %vm4155_vm7, %v4295_v18  ;;  %v6524_v31 = vld [vmem:[%s8206_s11 + $0x8] sm:$0xff]  }
 0xbc9   : > { %6401 = vmatprep.subr.bf16.mxu1 %v4477_v33 }
 0xbca   : > { %6394 = vmatpush3.bf16.msra.mxu0 %v4420_v53 }
 0xbcb   : > { %6407 = vmatprep.subr.bf16.mxu0 %v6523_v51 }
 0xbcc   : > { %6402 = vmatpush3.bf16.msra.mxu1 %v4477_v33  ;;  %v6527_v33 = vld [vmem:[%s8206_s11 + $0x20] sm:$0xff]  }
 0xbcd   : > { %6396 = vmatmul.mubr.msk.bf16.vlgmr.msra.gmra.mrb[28].mxu0 %vm4155_vm7, %v4294_v11 }
 0xbce   : > { %6408 = vmatpush3.bf16.msra.mxu0 %v6523_v51 }
 0xbcf   : > { %6404 = vmatmul.mubr.msk.bf16.vlgmr.msra.gmra.mrb[44].mxu1 %vm4155_vm7, %v4296_v20  ;;  %6409 = vmatprep.subr.bf16.mxu0 %v6524_v31 }
 0xbd0   : > { %5319 = vmatprep.mubr.bf16.mxu1 %v8246_v44 }
 0xbd2   : > { %6410 = vmatpush3.bf16.msra.mxu0 %v6524_v31 }
 0xbd3   : > { %6411 = vmatprep.subr.bf16.mxu0 %v6525_v16 }
 0xbd6   : > { %6412 = vmatpush3.bf16.msra.mxu0 %v6525_v16 }
 0xbd7   : > { %6413 = vmatprep.subr.bf16.mxu0 %v6526_v3 }
 0xbda   : > { %6414 = vmatpush3.bf16.msra.mxu0 %v6526_v3 }
 0xbdb   : > { %6415 = vmatprep.subr.bf16.mxu0 %v6527_v33 }
 0xbde   : > { %6416 = vmatpush3.bf16.msra.mxu0 %v6527_v33 }
 0xc98   : > { %v6381_v21 = vpop.f32.mrb[24].mxu0 }
 0xc99   : > { %v4342_v13 = vpop.f32.mrb[25].mxu0 }
 0xc9a   : > { %v6382_v49 = vpop.f32.mrb[26].mxu0  ;;  %v6389_v42 = vpop.f32.mrb[40].mxu1 }
 0xc9b   : > { %v4345_v56 = vpop.f32.mrb[27].mxu0  ;;  %v4399_v47 = vpop.f32.mrb[41].mxu1 }
 0xc9c   : > { %v6390_v55 = vpop.f32.mrb[42].mxu1 }
 0xc9d   : > { %v4402_v58 = vpop.f32.mrb[43].mxu1 }
 0xca0   : > { %v6397_v61 = vpop.f32.mrb[28].mxu0 }
 0xca1   : > { %v4663_v63 = vcombine.low %v6381_v21, %v6397_v61  ;;  %v4456_v0 = vpop.f32.mrb[29].mxu0 }
 0xca2   : > { %v4527_v9 = vcombine.low %v4342_v13, %v4456_v0  ;;  %v4528_v1 = vcombine.high %v4342_v13, %v4456_v0  ;;  %v6398_v37 = vpop.f32.mrb[30].mxu0  ;;  %v6405_v52 = vpop.f32.mrb[44].mxu1 }
 0xca3   : > { %v4671_v4 = vcombine.low %v6389_v42, %v6405_v52  ;;  %v4459_v10 = vpop.f32.mrb[31].mxu0  ;;  %v4513_v60 = vpop.f32.mrb[45].mxu1  ;;  %v4670_v36 = vrot.slane %v4663_v63, %v6949_v43  ;;  %v8247_v37 = vmov 0.0  }
 0xca4   : > { %v4595_v5 = vcombine.low %v4345_v56, %v4459_v10  ;;  %v4596_v54 = vcombine.high %v4345_v56, %v4459_v10  ;;  %v6406_v57 = vpop.f32.mrb[46].mxu1  ;;  %v4543_v15 = vcombine.low %v4399_v47, %v4513_v60  ;;  %v4544_v17 = vcombine.high %v4399_v47, %v4513_v60 }
 0xca5   : > { %v4678_v50 = vrot.slane %v4671_v4, %v6949_v43  ;;  %v4516_v23 = vpop.f32.mrb[47].mxu1  ;;  %v4535_v8 = vrot.slane %v4527_v9, %v6949_v43  ;;  %v4542_v14 = vrot.slane %v4528_v1, %v6949_v43  ;;  %v6528_v4 = vld [vmem:[%s8206_s11 + $0x28] sm:$0xff]  }
 0xca6   : > { %v4611_v30 = vcombine.low %v4402_v58, %v4516_v23  ;;  %v4612_v27 = vcombine.high %v4402_v58, %v4516_v23  ;;  %v4551_v59 = vrot.slane %v4543_v15, %v6949_v43  ;;  %v4558_v22 = vrot.slane %v4544_v17, %v6949_v43  ;;  %6417 = vmatprep.subr.bf16.mxu0 %v6528_v4 }
 0xca7   : > { %v4679_v48 = vcombine.low %v4670_v36, %v4678_v50  ;;  %v4603_v39 = vrot.slane %v4595_v5, %v6949_v43  ;;  %v4610_v2 = vrot.slane %v4596_v54, %v6949_v43  ;;  %6418 = vmatpush3.bf16.msra.mxu0 %v6528_v4  ;;  %v8248_v4 = vld [vmem:[#allocation5_spill] sm:$0xff] }
 0xca8   : > { %v4619_v41 = vrot.slane %v4611_v30, %v6949_v43  ;;  %v4626_v32 = vrot.slane %v4612_v27, %v6949_v43  ;;  %v4559_v25 = vcombine.low %v4535_v8, %v4551_v59  ;;  %v4560_v19 = vcombine.high %v4535_v8, %v4551_v59  ;;  %v6529_v8 = vld [vmem:[%s8206_s11 + $0x30] sm:$0xff]  }
 0xca9   : > { %v4822_v24 = vrot.slane %v4679_v48, %v6957_v62  ;;  %v4575_v6 = vcombine.low %v4542_v14, %v4558_v22  ;;  %v4576_v7 = vcombine.high %v4542_v14, %v4558_v22  ;;  %6419 = vmatprep.subr.bf16.mxu0 %v6529_v8 }
 0xcaa   : > { %v4627_v35 = vcombine.low %v4603_v39, %v4619_v41  ;;  %v4628_v34 = vcombine.high %v4603_v39, %v4619_v41  ;;  %v4643_v29 = vcombine.low %v4610_v2, %v4626_v32  ;;  %v4567_v26 = vrot.slane %v4559_v25, %v6957_v62 }
 0xcab   : > { %v4574_v28 = vrot.slane %v4560_v19, %v6957_v62  ;;  %v4583_v45 = vrot.slane %v4575_v6, %v6957_v62  ;;  %v4644_v12 = vcombine.high %v4610_v2, %v4626_v32  ;;  %v4590_v53 = vrot.slane %v4576_v7, %v6957_v62  ;;  %v6530_v2 = vld [vmem:[%s8206_s11 + $0x38] sm:$0xff]   ;;  %6420 = vmatpush3.bf16.msra.mxu0 %v6529_v8  ;;  %v6539_v8 = vld [vmem:[%s8210_s15 + $0x24] ss:$16 sps:$4 sm:$0xff]  }
 0xcac   : > { %v4635_v46 = vrot.slane %v4627_v35, %v6957_v62  ;;  %v4642_v18 = vrot.slane %v4628_v34, %v6957_v62  ;;  %v4651_v38 = vrot.slane %v4643_v29, %v6957_v62  ;;  %v4829_v51 = vrot.slane %v4822_v24, %v6949_v43  ;;  %6421 = vmatprep.subr.bf16.mxu0 %v6530_v2 }
 0xcad   : > { %v4680_v40 = vcombine.low %v4567_v26, %v4574_v28  ;;  %v6053_v11 = vcombine.high %v4567_v26, %v4574_v28  ;;  %v4658_v20 = vrot.slane %v4644_v12, %v6957_v62  ;;  %v4696_v31 = vcombine.low %v4583_v45, %v4590_v53 }
 0xcae   : > { %v6054_v16 = vcombine.high %v4583_v45, %v4590_v53  ;;  %v4748_v21 = vcombine.low %v4635_v46, %v4642_v18  ;;  %v6055_v13 = vcombine.high %v4635_v46, %v4642_v18  ;;  %v4837_v1 = vrot.slane %v4829_v51, %v6957_v62 }
 0xcaf   : > { %v4687_v49 = vrot.slane %v4680_v40, %v6949_v43  ;;  %v4695_v42 = vrot.slane %v6053_v11, %v6949_v43  ;;  %v4764_v56 = vcombine.low %v4651_v38, %v4658_v20  ;;  %v6056_v47 = vcombine.high %v4651_v38, %v4658_v20  ;;  %6422 = vmatpush3.bf16.msra.mxu0 %v6530_v2 }
 0xcb0   : > { %v4703_v55 = vrot.slane %v4696_v31, %v6949_v43  ;;  %v4711_v58 = vrot.slane %v6054_v16, %v6949_v43  ;;  %v4755_v61 = vrot.slane %v4748_v21, %v6949_v43  ;;  %v4763_v63 = vrot.slane %v6055_v13, %v6949_v43 }
 0xcb1   : > { %v4771_v0 = vrot.slane %v4764_v56, %v6949_v43  ;;  %v4779_v9 = vrot.slane %v6056_v47, %v6949_v43  ;;  %v4830_v52 = vcombine.high %v4829_v51, %v8247_v37  ;;  %v4712_v10 = vcombine.low %v4687_v49, %v4695_v42 }
 0xcb2   : > { %v4728_v60 = vcombine.low %v4703_v55, %v4711_v58  ;;  %v4780_v5 = vcombine.low %v4755_v61, %v4763_v63  ;;  %v4713_v54 = vcombine.high %v4687_v49, %v4695_v42  ;;  %v4845_v57 = vcombine.high %v4837_v1, %v8247_v37 }
 0xcb3   : > { %v4796_v36 = vcombine.low %v4771_v0, %v4779_v9  ;;  %v4729_v50 = vcombine.high %v4703_v55, %v4711_v58  ;;  %v4720_v15 = vrot.slane %v4712_v10, %v6957_v62  ;;  %v4781_v14 = vcombine.high %v4755_v61, %v4763_v63  ;;  %v6057_v61 = vld [vmem:[%s8207_s12] ss:$0 sm:$0xff] }
 0xcb4   : > { %v4736_v43 = vrot.slane %v4728_v60, %v6957_v62  ;;  %v4788_v17 = vrot.slane %v4780_v5, %v6957_v62  ;;  %v4727_v23 = vrot.slane %v4713_v54, %v6957_v62  ;;  %4854 = vrot.lane.b32.xlu1 %v4845_v57, %s6740_s22  ;;  %v4844_v48 = vrot.slane %v4830_v52, %v6957_v62  ;;  %v8249_v5 = vld [vmem:[#allocation6_spill] sm:$0xff]  ;;  %v8250_v57 = vld [vmem:[#allocation7_spill] sm:$0xff] }
 0xcb5   : > { %v4804_v30 = vrot.slane %v4796_v36, %v6957_v62  ;;  %v4743_v27 = vrot.slane %v4729_v50, %v6957_v62  ;;  %v4797_v39 = vcombine.high %v4771_v0, %v4779_v9  ;;  %v4795_v24 = vrot.slane %v4781_v14, %v6957_v62  ;;  %v6540_v14 = vld [vmem:[%s8210_s15 + $0x28] ss:$16 sps:$4 sm:$0xff]  }
 0xcb6   : > { %v4744_v59 = vcombine.low %v4720_v15, %v4736_v43  ;;  %v4745_v22 = vcombine.high %v4720_v15, %v4736_v43  ;;  %v4846_v34 = vcombine.high %v4844_v48, %v8247_v37  ;;  %v6531_v15 = vld [vmem:[%s8210_s15] ss:$16 sps:$4 sm:$0xff]   ;;  %v6533_v43 = vld [vmem:[%s8210_s15 + $0x4] ss:$16 sps:$4 sm:$0xff]  }
 0xcb7   : > { %v4813_v41 = vcombine.high %v4788_v17, %v4804_v30  ;;  %v4812_v32 = vcombine.low %v4788_v17, %v4804_v30  ;;  %v4746_v3 = vcombine.low %v4727_v23, %v4743_v27  ;;  %v4811_v25 = vrot.slane %v4797_v39, %v6957_v62  ;;  %v6534_v17 = vld [vmem:[%s8210_s15 + $0x8] ss:$16 sps:$4 sm:$0xff]   ;;  %5287 = vmatprep.subr.bf16.mxu1 %v6533_v43  ;;  %v6542_v30 = vld [vmem:[%s8210_s15 + $0x2c] ss:$16 sps:$4 sm:$0xff]  }
 0xcb8   : > { %v4747_v19 = vcombine.high %v4727_v23, %v4743_v27  ;;  %4866 = vrot.lane.b32.xlu1 %v4844_v48, %s6742_s24  ;;  %v6536_v23 = vld [vmem:[%s8210_s15 + $0xc] ss:$16 sps:$4 sm:$0xff]   ;;  %5288 = vmatpush1.bf16.msra.mxu1 %v6531_v15  ;;  %v6537_v27 = vld [vmem:[%s8210_s15 + $0x20] ss:$16 sps:$4 sm:$0xff]  }
 0xcb9   : > { %v6452_v6 = vpack.i.bf16 %v4813_v41, %v4745_v22  ;;  %v4814_v7 = vcombine.low %v4795_v24, %v4811_v25  ;;  %v4815_v35 = vcombine.high %v4795_v24, %v4811_v25  ;;  %5338 = vmatprep.subr.bf16.mxu0 %v6536_v23  ;;  %5289 = vmatprep.subr.bf16.mxu1 %v6539_v8  ;;  %v6067_v15 = vld [vmem:[%s8209_s14] ss:$0 sm:$0xff] }
 0xcbb   : > { %6453 = vrot.lane.b32.xlu0 %v6452_v6, %s6740_s22  ;;  %v6457_v29 = vpack.i.bf16 %v4814_v7, %v4746_v3  ;;  %v6462_v26 = vpack.i.bf16 %v4815_v35, %v4747_v19  ;;  %v6545_v35 = vld [vmem:[%s8210_s15 + $0x44] ss:$16 sps:$4 sm:$0xff]  }
 0xcbc   : > { %4878 = vrot.lane.b32.xlu1 %v4846_v34, %s6741_s2  ;;  %5290 = vmatpush1.bf16.msra.mxu1 %v6537_v27  ;;  %v6548_v34 = vld [vmem:[%s8210_s15 + $0x4c] ss:$16 sps:$4 sm:$0xff]  }
 0xcbd   : > { %5291 = vmatprep.subr.bf16.mxu1 %v6545_v35  ;;  %v6591_v35 = vld [vmem:[%s8212_s17 + $0x58] sm:$0xff]  }
 0xcbf   : > { %6458 = vrot.lane.b32.xlu0 %v6457_v29, %s6742_s24  ;;  %v6543_v29 = vld [vmem:[%s8210_s15 + $0x40] ss:$16 sps:$4 sm:$0xff]  }
 0xcc0   : > { %5292 = vmatpush1.bf16.msra.mxu1 %v6543_v29  ;;  %v6593_v29 = vld [vmem:[%s8212_s17 + $0x18] sm:$0xff]  }
 0xcc3   : > { %6463 = vrot.lane.b32.xlu0 %v6462_v26, %s6741_s2  ;;  %v6546_v26 = vld [vmem:[%s8210_s15 + $0x48] ss:$16 sps:$4 sm:$0xff]  }
 0xd26   : > { %v4855_v62 = vpop.permute.xlu1 %4854 }
 0xd27   : > { %v4885_v33 = vsel %vm1626_vm1, %v4837_v1, %v4855_v62  ;;  %v6551_v62 = vld [vmem:[%s8210_s15 + $0x64] ss:$16 sps:$4 sm:$0xff]  }
 0xd28   : > { %5293 = vmatprep.subr.bf16.mxu1 %v6551_v62  ;;  %v6595_v62 = vld [vmem:[%s8212_s17 + $0x60] sm:$0xff]  }
 0xd2a   : > { %v4867_v45 = vpop.permute.xlu1 %4866 }
 0xd2b   : > { %v4888_v11 = vsel %vm2399_vm3, %v4885_v33, %v4867_v45  ;;  %v6549_v45 = vld [vmem:[%s8210_s15 + $0x60] ss:$16 sps:$4 sm:$0xff]   ;;  %v6563_v33 = vld [vmem:[%s8210_s15 + $0xa4] ss:$16 sps:$4 sm:$0xff]  }
 0xd2c   : > { %5294 = vmatpush1.bf16.msra.mxu1 %v6549_v45  ;;  %v6597_v45 = vld [vmem:[%s8212_s17 + $0x20] sm:$0xff]  }
 0xd2d   : > { %v6454_v28 = vpop.permute.xlu0 %6453 }
 0xd2e   : > { %v6456_v53 = vunpack.i.h.bf16 %v6454_v28  ;;  %v6455_v46 = vunpack.i.l.bf16 %v6454_v28  ;;  %v4879_v40 = vpop.permute.xlu1 %4878  ;;  %v6554_v28 = vld [vmem:[%s8210_s15 + $0x6c] ss:$16 sps:$4 sm:$0xff]  }
 0xd2f   : > { %v4891_v13 = vsel %vm2402_vm4, %v4888_v11, %v4879_v40  ;;  %v6566_v40 = vld [vmem:[%s8210_s15 + $0xac] ss:$16 sps:$4 sm:$0xff]   ;;  %v6561_v11 = vld [vmem:[%s8210_s15 + $0xa0] ss:$16 sps:$4 sm:$0xff]  }
 0xd30   : > { %v4883_v51 = vsel %vm1626_vm1, %v4744_v59, %v6455_v46  ;;  %v4884_v31 = vsel %vm1626_vm1, %v4812_v32, %v6456_v53  ;;  %v4893_v58 = vpack.c.bf16 %v4891_v13, %v4891_v13  ;;  %v6557_v53 = vld [vmem:[%s8210_s15 + $0x84] ss:$16 sps:$4 sm:$0xff]   ;;  %v6560_v46 = vld [vmem:[%s8210_s15 + $0x8c] ss:$16 sps:$4 sm:$0xff]  }
 0xd31   : > { %v6459_v12 = vpop.permute.xlu0 %6458  ;;  %5295 = vmatprep.subr.bf16.mxu1 %v6557_v53  ;;  %v6575_v13 = vld [vmem:[%s8210_s15 + $0xe4] ss:$16 sps:$4 sm:$0xff]   ;;  %v6599_v53 = vld [vmem:[%s8212_s17 + $0x68] sm:$0xff]  }
 0xd32   : > { %v6461_v18 = vunpack.i.h.bf16 %v6459_v12  ;;  %v6460_v38 = vunpack.i.l.bf16 %v6459_v12  ;;  %v6552_v12 = vld [vmem:[%s8210_s15 + $0x68] ss:$16 sps:$4 sm:$0xff]  }
 0xd34   : > { %v4886_v49 = vsel %vm2399_vm3, %v4883_v51, %v6460_v38  ;;  %v4887_v42 = vsel %vm2399_vm3, %v4884_v31, %v6461_v18  ;;  %v6555_v18 = vld [vmem:[%s8210_s15 + $0x80] ss:$16 sps:$4 sm:$0xff]   ;;  %v6558_v38 = vld [vmem:[%s8210_s15 + $0x88] ss:$16 sps:$4 sm:$0xff]   ;;  %v6569_v31 = vld [vmem:[%s8210_s15 + $0xc4] ss:$16 sps:$4 sm:$0xff]  }
 0xd35   : > { %v6464_v20 = vpop.permute.xlu0 %6463  ;;  %5296 = vmatpush1.bf16.msra.mxu1 %v6555_v18  ;;  %v6567_v51 = vld [vmem:[%s8210_s15 + $0xc0] ss:$16 sps:$4 sm:$0xff]   ;;  %v6601_v18 = vld [vmem:[%s8212_s17 + $0x28] sm:$0xff]  }
 0xd36   : > { %v6466_v16 = vunpack.i.h.bf16 %v6464_v20  ;;  %v6465_v21 = vunpack.i.l.bf16 %v6464_v20  ;;  %v6564_v20 = vld [vmem:[%s8210_s15 + $0xa8] ss:$16 sps:$4 sm:$0xff]   ;;  %5297 = vmatprep.subr.bf16.mxu1 %v6563_v33  ;;  %v6603_v33 = vld [vmem:[%s8212_s17 + $0x70] sm:$0xff]  }
 0xd38   : > { %v4889_v56 = vsel %vm2402_vm4, %v4886_v49, %v6465_v21  ;;  %v4890_v47 = vsel %vm2402_vm4, %v4887_v42, %v6466_v16  ;;  %v6570_v16 = vld [vmem:[%s8210_s15 + $0xc8] ss:$16 sps:$4 sm:$0xff]   ;;  %v6572_v21 = vld [vmem:[%s8210_s15 + $0xcc] ss:$16 sps:$4 sm:$0xff]   ;;  %v6573_v42 = vld [vmem:[%s8210_s15 + $0xe0] ss:$16 sps:$4 sm:$0xff]  }
 0xd39   : > { %v4892_v55 = vpack.c.bf16 %v4890_v47, %v4889_v56  ;;  %5298 = vmatpush1.bf16.msra.mxu1 %v6561_v11  ;;  %v6578_v49 = vld [vmem:[%s8210_s15 + $0xec] ss:$16 sps:$4 sm:$0xff]   ;;  %v6576_v56 = vld [vmem:[%s8210_s15 + $0xe8] ss:$16 sps:$4 sm:$0xff]   ;;  %v6605_v11 = vld [vmem:[%s8212_s17 + $0x30] sm:$0xff]  }
 0xd3a   : > { %5299 = vmatprep.subr.bf16.mxu1 %v6569_v31  ;;  %v6608_v31 = vld [vmem:[%s8212_s17 + $0xf8] sm:$0xff]  }
 0xd3b   : > { %6423 = vmatprep.mubr.bf16.mxu0 %v4892_v55 }
 0xd3c   : > { %6424 = vmatmul.mubr.bf16.vlgmr.msra.gmra.mrb[32].mxu0 %v4893_v58 }
 0xd3d   : > { %5370 = vmatprep.mubr.bf16.mxu0 %v8246_v44  ;;  %5339 = vmatpush1.bf16.msra.mxu0 %v6534_v17 }
 0xd3e   : > { %5340 = vmatprep.subr.bf16.mxu0 %v6542_v30  ;;  %5300 = vmatpush1.bf16.msra.mxu1 %v6567_v51  ;;  %v6607_v51 = vld [vmem:[%s8212_s17 + $0x78] sm:$0xff]  }
 0xd3f   : > { %5301 = vmatprep.subr.bf16.mxu1 %v6575_v13  ;;  %v5105_v13 = vld [vmem:[%s8211_s16] sm:$0xf] }
 0xd41   : > { %5341 = vmatpush1.bf16.msra.mxu0 %v6540_v14 }
 0xd42   : > { %5342 = vmatprep.subr.bf16.mxu0 %v6548_v34  ;;  %5302 = vmatpush1.bf16.msra.mxu1 %v6573_v42  ;;  %v6592_v34 = vld [vmem:[%s8212_s17 + $0xd8] sm:$0xff]  }
 0xd45   : > { %5343 = vmatpush1.bf16.msra.mxu0 %v6546_v26  ;;  %v6594_v26 = vld [vmem:[%s8212_s17 + $0x98] sm:$0xff]  }
 0xd46   : > { %5344 = vmatprep.subr.bf16.mxu0 %v6554_v28  ;;  %v6596_v28 = vld [vmem:[%s8212_s17 + $0xe0] sm:$0xff]  }
 0xd49   : > { %5345 = vmatpush1.bf16.msra.mxu0 %v6552_v12  ;;  %v6598_v12 = vld [vmem:[%s8212_s17 + $0xa0] sm:$0xff]  }
 0xd4a   : > { %5346 = vmatprep.subr.bf16.mxu0 %v6560_v46  ;;  %v6600_v46 = vld [vmem:[%s8212_s17 + $0xe8] sm:$0xff]  }
 0xd4d   : > { %5347 = vmatpush1.bf16.msra.mxu0 %v6558_v38  ;;  %v6602_v38 = vld [vmem:[%s8212_s17 + $0xa8] sm:$0xff]  }
 0xd4e   : > { %5348 = vmatprep.subr.bf16.mxu0 %v6566_v40  ;;  %v6604_v40 = vld [vmem:[%s8212_s17 + $0xf0] sm:$0xff]  }
 0xd51   : > { %5349 = vmatpush1.bf16.msra.mxu0 %v6564_v20  ;;  %v6606_v20 = vld [vmem:[%s8212_s17 + $0xb0] sm:$0xff]  }
 0xd52   : > { %5350 = vmatprep.subr.bf16.mxu0 %v6572_v21  ;;  %v6610_v21 = vld [vmem:[%s8212_s17 + $0xb8] sm:$0xff]  }
 0xd55   : > { %5351 = vmatpush1.bf16.msra.mxu0 %v6570_v16  ;;  %v6609_v16 = vld [vmem:[%s8212_s17 + $0x38] sm:$0xff]  }
 0xd56   : > { %5352 = vmatprep.subr.bf16.mxu0 %v6578_v49  ;;  %v8251_v49 = vld [vmem:[#allocation4_spill] sm:$0xff] }
 0xd57   : > { %v5121_v42 = vsub.s32 3, %v8251_v49 }
 0xd59   : > { %5353 = vmatpush1.bf16.msra.mxu0 %v6576_v56  ;;  %v8252_v56 = vsub.s32 0, %v8251_v49 }
 0xe0f   : > { %v6425_v63 = vpop.f32.mrb[32].mxu0 }
 0xe10   : > { %v5008_v0 = vadd.f32 %v6425_v63, %v6057_v61  ;;  %v4999_v9 = vpop.f32.mrb[33].mxu0 }
 0xe11   : > { %v5000_v1 = vadd.f32 %v6057_v61, %v4999_v9  ;;  %v6426_v37 = vpop.f32.mrb[34].mxu0 }
 0xe12   : > { %v5002_v52 = vpop.f32.mrb[35].mxu0  ;;  %v7838_v54 = vadd.f32 %v5008_v0, %v8249_v5 }
 0xe13   : > { %v7835_v10 = vadd.f32 %v5000_v1, %v8248_v4  ;;  %v5003_v60 = vadd.f32 %v6057_v61, %v5002_v52  ;;  %v6066_v4 = vld [vmem:[%s8208_s13] ss:$0 sm:$0xff] }
 0xe14   : > { %v5022_v50 = vsel %vm2457_vm5, %v7838_v54, 0.0 }
 0xe15   : > { %v7841_v36 = vadd.f32 %v5003_v60, %v8250_v57  ;;  %5018 = vadd.xlane.f32.xlu0 %v7835_v10 }
 0xe17   : > { %5020 = vadd.xlane.f32.xlu1 %v7841_v36 }
 0xe19   : > { %5023 = vadd.xlane.f32.xlu0 %v5022_v50 }
 0xea2   : > { %v5019_v48 = vpop.xlane.xlu0 %5018 }
 0xea3   : > { %v5025_v59 = vmul.f32 0.0078125, %v5019_v48 }
 0xea4   : > { %v5021_v22 = vpop.xlane.xlu1 %5020 }
 0xea5   : > { %v7872_v39 = vsub.f32 %v7835_v10, %v5025_v59  ;;  %v5026_v2 = vmul.f32 0.0078125, %v5021_v22  ;;  %v6579_v22 = vld [vmem:[%s8212_s17 + $0x40] sm:$0xff]  }
 0xea6   : > { %v5024_v41 = vpop.xlane.xlu0 %5023  ;;  %6219 = vmatprep.subr.bf16.mxu1 %v6579_v22 }
 0xea7   : > { %v7875_v32 = vsub.f32 %v7841_v36, %v5026_v2  ;;  %v5027_v3 = vmul.f32 0.0078125, %v5024_v41  ;;  %v5031_v24 = vmul.f32 %v7872_v39, %v7872_v39  ;;  %v6581_v2 = vld [vmem:[%s8212_s17] sm:$0xff]   ;;  %v6583_v41 = vld [vmem:[%s8212_s17 + $0x48] sm:$0xff]  }
 0xea9   : > { %v7880_v25 = vsub.f32 %v7838_v54, %v5027_v3  ;;  %5034 = vadd.xlane.f32.xlu0 %v5031_v24  ;;  %v5032_v19 = vmul.f32 %v7875_v32, %v7875_v32  ;;  %v6585_v3 = vld [vmem:[%s8212_s17 + $0x8] sm:$0xff]  }
 0xeaa   : > { %v6586_v24 = vld [vmem:[%s8212_s17 + $0x88] sm:$0xff]  }
 0xeab   : > { %5036 = vadd.xlane.f32.xlu1 %v5032_v19  ;;  %v5033_v6 = vmul.f32 %v7880_v25, %v7880_v25  ;;  %v6588_v19 = vld [vmem:[%s8212_s17 + $0xd0] sm:$0xff]  }
 0xead   : > { %v5038_v7 = vsel %vm2457_vm5, %v5033_v6, 0.0  ;;  %v6589_v6 = vld [vmem:[%s8212_s17 + $0x10] sm:$0xff]  }
 0xeae   : > { %5039 = vadd.xlane.f32.xlu0 %v5038_v7  ;;  %v6590_v7 = vld [vmem:[%s8212_s17 + $0x90] sm:$0xff]  }
 0xf36   : > { %v5035_v47 = vpop.xlane.xlu0 %5034 }
 0xf37   : > { %v5041_v55 = vmul.f32 0.0078125, %v5035_v47  ;;  %v8072_v47 = vrot.slane %v5105_v13, %v8252_v56 }
 0xf38   : > { %v5037_v58 = vpop.xlane.xlu1 %5036 }
 0xf39   : > { %v5044_v61 = vadd.f32 1e-06, %v5041_v55  ;;  %v5042_v63 = vmul.f32 0.0078125, %v5037_v58  ;;  %v8253_v55 = vsub.s32 2, %v8251_v49 }
 0xf3b   : > { %6701 = vrsqrt.f32 %v5044_v61  ;;  %v5045_v0 = vadd.f32 1e-06, %v5042_v63  ;;  %v5040_v9 = vpop.xlane.xlu0 %5039  ;;  %v8076_v58 = vrot.slane %v5105_v13, %v8253_v55  ;;  %v8254_v61 = vsub.s32 1, %v8251_v49 }
 0xf3c   : > { %v5043_v1 = vmul.f32 0.0078125, %v5040_v9 }
 0xf3d   : > { %6703 = vrsqrt.f32 %v5045_v0  ;;  %v8080_v63 = vrot.slane %v5105_v13, %v8254_v61  ;;  %v8082_v0 = vrot.slane %v5105_v13, %v5121_v42 }
 0xf3e   : > { %v5046_v37 = vadd.f32 1e-06, %v5043_v1 }
 0xf40   : > { %6705 = vrsqrt.f32 %v5046_v37 }
 0xf45   : > { %v6702_v52 = vpop.eup %6701 }
 0xf46   : > { %v5050_v60 = vmul.f32 %v6702_v52, %v7872_v39  ;;  %v6580_v39 = vld [vmem:[%s8212_s17 + $0xc0] sm:$0xff]  }
 0xf47   : > { %v6704_v5 = vpop.eup %6703  ;;  %6247 = vmatprep.subr.bf16.mxu0 %v6580_v39 }
 0xf48   : > { %v5051_v57 = vmul.f32 %v6704_v5, %v7875_v32  ;;  %v5059_v50 = vmul.f32 %v6066_v4, %v5050_v60  ;;  %v6584_v32 = vld [vmem:[%s8212_s17 + $0xc8] sm:$0xff]  }
 0xf4a   : > { %v6706_v43 = vpop.eup %6705  ;;  %v5060_v17 = vmul.f32 %v6066_v4, %v5051_v57  ;;  %v5068_v8 = vadd.f32 %v6067_v15, %v5059_v50 }
 0xf4b   : > { %v5052_v23 = vmul.f32 %v6706_v43, %v7880_v25  ;;  %v6587_v25 = vld [vmem:[%s8212_s17 + $0x50] sm:$0xff]  }
 0xf4c   : > { %v5069_v30 = vadd.f32 %v6067_v15, %v5060_v17 }
 0xf4d   : > { %v5061_v14 = vmul.f32 %v6066_v4, %v5052_v23 }
 0xf4e   : > { %v5071_v27 = vpack.c.bf16 %v5069_v30, %v5068_v8 }
 0xf4f   : > { %v5070_v48 = vadd.f32 %v6067_v15, %v5061_v14 }
 0xf50   : > { %5320 = vmatmul.mubr.bf16.vlgmr.msra.gmra.mrb[48].mxu1 %v5071_v27  ;;  %5371 = vmatmul.mubr.bf16.vlgmr.msra.gmra.mrb[36].mxu0 %v5071_v27 }
 0xf51   : > { %5329 = vmatprep.mubr.bf16.mxu1 %v8246_v44  ;;  %5380 = vmatprep.mubr.bf16.mxu0 %v8246_v44  ;;  %v5072_v59 = vpack.c.bf16 %v5070_v48, %v5070_v48  ;;  %v6582_v44 = vld [vmem:[%s8212_s17 + $0x80] sm:$0xff]  }
 0xf52   : > { %6220 = vmatpush3.bf16.msra.mxu1 %v6581_v2  ;;  %6248 = vmatpush3.bf16.msra.mxu0 %v6582_v44 }
 0xf53   : > { %6221 = vmatprep.subr.bf16.mxu1 %v6583_v41  ;;  %6249 = vmatprep.subr.bf16.mxu0 %v6584_v32 }
 0xf56   : > { %6222 = vmatpush3.bf16.msra.mxu1 %v6585_v3  ;;  %6250 = vmatpush3.bf16.msra.mxu0 %v6586_v24 }
 0xf57   : > { %6223 = vmatprep.subr.bf16.mxu1 %v6587_v25  ;;  %6251 = vmatprep.subr.bf16.mxu0 %v6588_v19 }
 0xf58   : > { %5330 = vmatmul.mubr.bf16.gmra.mrb[52].mxu1 %v5072_v59  ;;  %5381 = vmatmul.mubr.bf16.gmra.mrb[40].mxu0 %v5072_v59 }
 0xf5a   : > { %6224 = vmatpush3.bf16.msra.mxu1 %v6589_v6  ;;  %6252 = vmatpush3.bf16.msra.mxu0 %v6590_v7 }
 0xf5b   : > { %6225 = vmatprep.subr.bf16.mxu1 %v6591_v35  ;;  %6253 = vmatprep.subr.bf16.mxu0 %v6592_v34 }
 0xf5e   : > { %6226 = vmatpush3.bf16.msra.mxu1 %v6593_v29  ;;  %6254 = vmatpush3.bf16.msra.mxu0 %v6594_v26 }
 0xf5f   : > { %6227 = vmatprep.subr.bf16.mxu1 %v6595_v62  ;;  %6255 = vmatprep.subr.bf16.mxu0 %v6596_v28 }
 0xf62   : > { %6228 = vmatpush3.bf16.msra.mxu1 %v6597_v45  ;;  %6256 = vmatpush3.bf16.msra.mxu0 %v6598_v12 }
 0xf63   : > { %6229 = vmatprep.subr.bf16.mxu1 %v6599_v53  ;;  %6257 = vmatprep.subr.bf16.mxu0 %v6600_v46 }
 0xf66   : > { %6230 = vmatpush3.bf16.msra.mxu1 %v6601_v18  ;;  %6258 = vmatpush3.bf16.msra.mxu0 %v6602_v38 }
 0xf67   : > { %6231 = vmatprep.subr.bf16.mxu1 %v6603_v33  ;;  %6259 = vmatprep.subr.bf16.mxu0 %v6604_v40 }
 0xf6a   : > { %6232 = vmatpush3.bf16.msra.mxu1 %v6605_v11  ;;  %6260 = vmatpush3.bf16.msra.mxu0 %v6606_v20 }
 0xf6b   : > { %6233 = vmatprep.subr.bf16.mxu1 %v6607_v51  ;;  %6261 = vmatprep.subr.bf16.mxu0 %v6608_v31 }
 0xf6e   : > { %6234 = vmatpush3.bf16.msra.mxu1 %v6609_v16  ;;  %6262 = vmatpush3.bf16.msra.mxu0 %v6610_v21 }
0x1023   : > { %v5321_v9 = vpop.f32.mrb[48].mxu1  ;;  %v5372_v1 = vpop.f32.mrb[36].mxu0 }
0x1024   : > { %v8085_v37 = vadd.f32 %v5321_v9, %v8072_v47  ;;  %v8088_v52 = vadd.f32 %v5372_v1, %v8076_v58  ;;  %v5323_v4 = vpop.f32.mrb[49].mxu1  ;;  %v5374_v60 = vpop.f32.mrb[37].mxu0 }
0x1025   : > { %v8091_v5 = vadd.f32 %v5323_v4, %v8080_v63  ;;  %v8094_v57 = vadd.f32 %v5374_v60, %v8082_v0  ;;  %v5325_v50 = vpop.f32.mrb[50].mxu1  ;;  %v5376_v15 = vpop.f32.mrb[38].mxu0 }
0x1026   : > { %v5389_v43 = vmul.f32 %v8085_v37, %v8085_v37  ;;  %v5391_v17 = vmul.f32 %v8088_v52, %v8088_v52  ;;  %v8101_v23 = vadd.f32 %v5325_v50, %v8072_v47  ;;  %v8104_v8 = vadd.f32 %v5376_v15, %v8076_v58  ;;  %v5327_v30 = vpop.f32.mrb[51].mxu1  ;;  %v5378_v27 = vpop.f32.mrb[39].mxu0 }
0x1027   : > { %v5390_v14 = vmul.f32 %v8091_v5, %v8091_v5  ;;  %v5392_v48 = vmul.f32 %v8094_v57, %v8094_v57  ;;  %v8111_v59 = vadd.f32 %v5327_v30, %v8080_v63  ;;  %v8114_v22 = vadd.f32 %v5378_v27, %v8082_v0 }
0x1028   : > { %v5401_v39 = vmul.f32 %v5389_v43, %v8085_v37  ;;  %v5403_v2 = vmul.f32 %v5391_v17, %v8088_v52  ;;  %v5393_v44 = vmul.f32 %v8101_v23, %v8101_v23  ;;  %v5395_v41 = vmul.f32 %v8104_v8, %v8104_v8 }
0x1029   : > { %v5402_v32 = vmul.f32 %v5390_v14, %v8091_v5  ;;  %v5404_v3 = vmul.f32 %v5392_v48, %v8094_v57  ;;  %v5394_v24 = vmul.f32 %v8111_v59, %v8111_v59  ;;  %v5396_v25 = vmul.f32 %v8114_v22, %v8114_v22 }
0x102a   : > { %v5413_v19 = vmul.f32 0.044715, %v5401_v39  ;;  %v5415_v6 = vmul.f32 0.044715, %v5403_v2  ;;  %v5405_v7 = vmul.f32 %v5393_v44, %v8101_v23  ;;  %v5407_v35 = vmul.f32 %v5395_v41, %v8104_v8 }
0x102b   : > { %v5414_v34 = vmul.f32 0.044715, %v5402_v32  ;;  %v5416_v29 = vmul.f32 0.044715, %v5404_v3  ;;  %v5406_v26 = vmul.f32 %v5394_v24, %v8111_v59  ;;  %v5408_v62 = vmul.f32 %v5396_v25, %v8114_v22  ;;  %v5331_v28 = vpop.f32.mrb[52].mxu1  ;;  %v5382_v45 = vpop.f32.mrb[40].mxu0 }
0x102c   : > { %v5425_v12 = vadd.f32 %v5413_v19, %v8085_v37  ;;  %v5427_v53 = vadd.f32 %v5415_v6, %v8088_v52  ;;  %v5417_v46 = vmul.f32 0.044715, %v5405_v7  ;;  %v5419_v18 = vmul.f32 0.044715, %v5407_v35  ;;  %v5333_v38 = vpop.f32.mrb[53].mxu1  ;;  %v5384_v33 = vpop.f32.mrb[41].mxu0 }
0x102d   : > { %v5426_v40 = vadd.f32 %v5414_v34, %v8091_v5  ;;  %v5428_v11 = vadd.f32 %v5416_v29, %v8094_v57  ;;  %v5418_v20 = vmul.f32 0.044715, %v5406_v26  ;;  %v5420_v51 = vmul.f32 0.044715, %v5408_v62  ;;  %v5335_v31 = vpop.f32.mrb[54].mxu1  ;;  %v5386_v16 = vpop.f32.mrb[42].mxu0 }
0x102e   : > { %v5437_v21 = vmul.f32 0.7978846, %v5425_v12  ;;  %v5439_v13 = vmul.f32 0.7978846, %v5427_v53  ;;  %v5429_v49 = vadd.f32 %v5417_v46, %v8101_v23  ;;  %v5431_v42 = vadd.f32 %v5419_v18, %v8104_v8  ;;  %v5336_v56 = vpop.f32.mrb[55].mxu1  ;;  %v5387_v55 = vpop.f32.mrb[43].mxu0 }
0x102f   : > { %v5438_v61 = vmul.f32 0.7978846, %v5426_v40  ;;  %v5440_v9 = vmul.f32 0.7978846, %v5428_v11  ;;  %v5430_v1 = vadd.f32 %v5418_v20, %v8111_v59  ;;  %v5432_v4 = vadd.f32 %v5420_v51, %v8114_v22 }
0x1030   : > { %6707 = vtanh.f32 %v5437_v21  ;;  %v5441_v60 = vmul.f32 0.7978846, %v5429_v49  ;;  %v8141_v50 = vadd.f32 %v5331_v28, %v8072_v47  ;;  %v5443_v15 = vmul.f32 0.7978846, %v5431_v42 }
0x1031   : > { %6709 = vtanh.f32 %v5439_v13  ;;  %v5442_v43 = vmul.f32 0.7978846, %v5430_v1  ;;  %v8144_v17 = vadd.f32 %v5382_v45, %v8076_v58  ;;  %v8149_v27 = vadd.f32 %v5333_v38, %v8080_v63 }
0x1032   : > { %6711 = vtanh.f32 %v5438_v61  ;;  %v5397_v30 = vmul.f32 %v8141_v50, %v8141_v50  ;;  %v8152_v14 = vadd.f32 %v5384_v33, %v8082_v0  ;;  %v5444_v48 = vmul.f32 0.7978846, %v5432_v4 }
0x1033   : > { %6713 = vtanh.f32 %v5440_v9  ;;  %v5399_v47 = vmul.f32 %v8144_v17, %v8144_v17  ;;  %v5398_v58 = vmul.f32 %v8149_v27, %v8149_v27 }
0x1034   : > { %6715 = vtanh.f32 %v5441_v60  ;;  %v5409_v39 = vmul.f32 %v5397_v30, %v8141_v50  ;;  %v5400_v2 = vmul.f32 %v8152_v14, %v8152_v14 }
0x1035   : > { %6717 = vtanh.f32 %v5443_v15  ;;  %v5411_v63 = vmul.f32 %v5399_v47, %v8144_v17  ;;  %v5410_v44 = vmul.f32 %v5398_v58, %v8149_v27 }
0x1036   : > { %6719 = vtanh.f32 %v5442_v43  ;;  %v5421_v0 = vmul.f32 0.044715, %v5409_v39  ;;  %v5412_v41 = vmul.f32 %v5400_v2, %v8152_v14 }
0x1037   : > { %6721 = vtanh.f32 %v5444_v48  ;;  %v5423_v32 = vmul.f32 0.044715, %v5411_v63  ;;  %v5422_v24 = vmul.f32 0.044715, %v5410_v44 }
0x1038   : > { %v5433_v3 = vadd.f32 %v5421_v0, %v8141_v50  ;;  %v5424_v25 = vmul.f32 0.044715, %v5412_v41 }
0x1039   : > { %v5435_v19 = vadd.f32 %v5423_v32, %v8144_v17  ;;  %v5434_v35 = vadd.f32 %v5422_v24, %v8149_v27 }
0x103a   : > { %v6708_v6 = vpop.eup %6707  ;;  %v5445_v7 = vmul.f32 0.7978846, %v5433_v3  ;;  %v5436_v34 = vadd.f32 %v5424_v25, %v8152_v14 }
0x103b   : > { %v6710_v29 = vpop.eup %6709  ;;  %v5461_v26 = vadd.f32 1.0, %v6708_v6  ;;  %v5447_v62 = vmul.f32 0.7978846, %v5435_v19  ;;  %v5446_v12 = vmul.f32 0.7978846, %v5434_v35 }
0x103c   : > { %v6712_v28 = vpop.eup %6711  ;;  %v5463_v45 = vadd.f32 1.0, %v6710_v29  ;;  %6723 = vtanh.f32 %v5445_v7  ;;  %v5448_v53 = vmul.f32 0.7978846, %v5436_v34 }
0x103d   : > { %v6714_v46 = vpop.eup %6713  ;;  %6725 = vtanh.f32 %v5447_v62  ;;  %v5462_v18 = vadd.f32 1.0, %v6712_v28  ;;  %v5473_v11 = vmul.f32 0.5, %v5461_v26 }
0x103e   : > { %v6716_v38 = vpop.eup %6715  ;;  %6727 = vtanh.f32 %v5446_v12  ;;  %v5464_v33 = vadd.f32 1.0, %v6714_v46  ;;  %v5475_v31 = vmul.f32 0.5, %v5463_v45 }
0x103f   : > { %v6718_v40 = vpop.eup %6717  ;;  %v5465_v20 = vadd.f32 1.0, %v6716_v38  ;;  %6729 = vtanh.f32 %v5448_v53  ;;  %v5474_v42 = vmul.f32 0.5, %v5462_v18  ;;  %v5485_v9 = vmul.f32 %v5473_v11, %v8085_v37 }
0x1040   : > { %v6720_v51 = vpop.eup %6719  ;;  %v5467_v16 = vadd.f32 1.0, %v6718_v40  ;;  %v5476_v61 = vmul.f32 0.5, %v5464_v33  ;;  %v5487_v60 = vmul.f32 %v5475_v31, %v8088_v52 }
0x1041   : > { %v6722_v21 = vpop.eup %6721  ;;  %v5477_v13 = vmul.f32 0.5, %v5465_v20  ;;  %v5466_v49 = vadd.f32 1.0, %v6720_v51  ;;  %v5486_v48 = vmul.f32 %v5474_v42, %v8091_v5 }
0x1042   : > { %v5479_v56 = vmul.f32 0.5, %v5467_v16  ;;  %v5468_v55 = vadd.f32 1.0, %v6722_v21  ;;  %v5488_v2 = vmul.f32 %v5476_v61, %v8094_v57 }
0x1043   : > { %v5489_v1 = vmul.f32 %v5477_v13, %v8101_v23  ;;  %v5478_v4 = vmul.f32 0.5, %v5466_v49 }
0x1044   : > { %v5491_v15 = vmul.f32 %v5479_v56, %v8104_v8  ;;  %v5480_v43 = vmul.f32 0.5, %v5468_v55 }
0x1045   : > { %v5497_v30 = vpack.c.bf16 %v5489_v1, %v5485_v9  ;;  %v5490_v47 = vmul.f32 %v5478_v4, %v8111_v59 }
0x1046   : > { %v6724_v39 = vpop.eup %6723  ;;  %v5499_v58 = vpack.c.bf16 %v5491_v15, %v5487_v60  ;;  %v5492_v63 = vmul.f32 %v5480_v43, %v8114_v22 }
0x1047   : > { %v6726_v37 = vpop.eup %6725  ;;  %v5498_v0 = vpack.c.bf16 %v5490_v47, %v5486_v48  ;;  %v5469_v23 = vadd.f32 1.0, %v6724_v39 }
0x1048   : > { %v6728_v44 = vpop.eup %6727  ;;  %v5500_v41 = vpack.c.bf16 %v5492_v63, %v5488_v2  ;;  %v5471_v52 = vadd.f32 1.0, %v6726_v37 }
0x1049   : > { %v6730_v32 = vpop.eup %6729  ;;  %5800 = vmatprep.mubr.bf16.mxu1 %v5498_v0  ;;  %v5470_v8 = vadd.f32 1.0, %v6728_v44  ;;  %v5481_v3 = vmul.f32 0.5, %v5469_v23 }
0x104a   : > { %5848 = vmatprep.mubr.bf16.mxu0 %v5500_v41  ;;  %5801 = vmatmul.mubr.bf16.vlgmr.msra.gmra.mrb[56].mxu1 %v5497_v30  ;;  %v5472_v5 = vadd.f32 1.0, %v6730_v32  ;;  %v5483_v59 = vmul.f32 0.5, %v5471_v52 }
0x104b   : > { %5849 = vmatmul.mubr.bf16.vlgmr.msra.gmra.mrb[44].mxu0 %v5499_v58  ;;  %v5482_v24 = vmul.f32 0.5, %v5470_v8  ;;  %v5493_v57 = vmul.f32 %v5481_v3, %v8141_v50  ;;  %v6100_v50 = vld [vmem:[%s8213_s18] ss:$0 sm:$0xff] }
0x104c   : > { %v5484_v25 = vmul.f32 0.5, %v5472_v5  ;;  %v5495_v19 = vmul.f32 %v5483_v59, %v8144_v17 }
0x104d   : > { %v5494_v22 = vmul.f32 %v5482_v24, %v8149_v27  ;;  %v5501_v34 = vpack.c.bf16 %v5493_v57, %v5493_v57 }
0x104e   : > { %v5496_v6 = vmul.f32 %v5484_v25, %v8152_v14  ;;  %v5503_v29 = vpack.c.bf16 %v5495_v19, %v5495_v19 }
0x104f   : > { %v5502_v7 = vpack.c.bf16 %v5494_v22, %v5494_v22 }
0x1050   : > { %v5504_v35 = vpack.c.bf16 %v5496_v6, %v5496_v6 }
0x1051   : > { %5808 = vmatprep.mubr.bf16.mxu1 %v5502_v7 }
0x1052   : > { %5856 = vmatprep.mubr.bf16.mxu0 %v5504_v35  ;;  %5809 = vmatmul.mubr.bf16.gmra.mrb[60].mxu1 %v5501_v34 }
0x1053   : > { %5857 = vmatmul.mubr.bf16.gmra.mrb[48].mxu0 %v5503_v29 }
0x111d   : > { %v6235_v26 = vpop.f32.mrb[56].mxu1 }
0x111e   : > { %v6263_v62 = vpop.f32.mrb[44].mxu0  ;;  %v6236_v28 = vpop.f32.mrb[57].mxu1 }
0x111f   : > { %v6237_v27 = vadd.f32 %v6236_v28, %v6235_v26  ;;  %v6264_v45 = vpop.f32.mrb[45].mxu0  ;;  %v6238_v17 = vpop.f32.mrb[58].mxu1 }
0x1120   : > { %v6265_v12 = vadd.f32 %v6264_v45, %v6263_v62  ;;  %v6266_v14 = vpop.f32.mrb[46].mxu0  ;;  %v6239_v53 = vpop.f32.mrb[59].mxu1 }
0x1121   : > { %v5803_v46 = vadd.f32 %v6237_v27, %v6100_v50  ;;  %v6240_v18 = vadd.f32 %v6239_v53, %v6238_v17  ;;  %v6267_v38 = vpop.f32.mrb[47].mxu0 }
0x1122   : > { %v6268_v33 = vadd.f32 %v6267_v38, %v6266_v14 }
0x1123   : > { %v5851_v40 = vadd.f32 %v6265_v12, %v5803_v46  ;;  %v5806_v11 = vadd.f32 %v6240_v18, %v6100_v50 }
0x1125   : > { %v5854_v20 = vadd.f32 %v6268_v33, %v5806_v11  ;;  %v6241_v51 = vpop.f32.mrb[60].mxu1  ;;  %v5864_v21 = vadd.f32 %v5851_v40, %v7835_v10 }
0x1126   : > { %v6269_v31 = vpop.f32.mrb[48].mxu0  ;;  %v6242_v16 = vpop.f32.mrb[61].mxu1 }
0x1127   : > { %v5865_v13 = vadd.f32 %v5854_v20, %v7841_v36  ;;  %v6243_v49 = vadd.f32 %v6242_v16, %v6241_v51  ;;  %v6270_v42 = vpop.f32.mrb[49].mxu0  ;;  %v6244_v56 = vpop.f32.mrb[62].mxu1  ;;  %v5885_v36 = vld [vmem:[%s623_s25 + $0x8] sm:$0x1] }
0x1128   : > { %v6271_v55 = vadd.f32 %v6270_v42, %v6269_v31  ;;  %v6272_v61 = vpop.f32.mrb[50].mxu0  ;;  %v6245_v9 = vpop.f32.mrb[63].mxu1 }
0x1129   : > { %v6149_v1 = vpack.c.bf16 %v5865_v13, %v5864_v21  ;;  %v5811_v4 = vadd.f32 %v6243_v49, %v6100_v50  ;;  %v6273_v60 = vpop.f32.mrb[51].mxu0 }
0x112b   : > { %6150 = vst [vmem:[%s623_s25] sm:$0xff] %v6149_v1   ;;  %v5859_v15 = vadd.f32 %v6271_v55, %v5811_v4 }
0x112d   : > { %v5866_v10 = vadd.f32 %v5859_v15, %v7838_v54 }
0x112f   : > { %v6141_v43 = vpack.c.bf16 %v5866_v10, %v5866_v10 }
0x1131   : > { %v5886_v30 = vsel %vm5884_vm9, %v6141_v43, %v5885_v36 }
0x1132   : > { %5887 = vst [vmem:[%s623_s25 + $0x8] sm:$0x1] %v5886_v30 }
0x1133 PF: > { %s8256_s1 = sld [smem:[#allocation3_spill]] }
0x1139   : > { %s30_s21 = sadd.s32 1, %s8256_s1  }
0x113a   : > { %p27_p4 = scmp.ge.s32.totalorder %s30_s21, 4  }
0x113c   :  { %29 = sbr.rel (!%p27_p4) target bundleno = 9 (0x9), region = 129 }

// kernel: forward.10
= control target key start
LH: loop header
LB: loop body
LE: loop exit
PB: predicated region body
PF: predicated region fallthrough
CT: control target
= control target key end

     0   :  { %s8357_s0 = inlined_call_operand.vmem [shape: f32[2], index: 0, kind: input, shape index: {}]   ;;  %s8358_s1 = inlined_call_operand.vmem [shape: bf16[2,17,128], index: 1, kind: input, shape index: {}]   ;;  %s8359_s2 = inlined_call_operand.vmem [shape: bf16[2,16,128], index: 2, kind: input, shape index: {}]   ;;  %s8360_s3 = inlined_call_operand.vmem [shape: bf16[2,16,128], index: 3, kind: input, shape index: {}]   ;;  %s8361_s4 = inlined_call_operand.vmem [shape: bf16[128,256], index: 4, kind: input, shape index: {}]   ;;  %s8362_s5 = inlined_call_operand.vmem [shape: f32[1,128], index: 5, kind: input, shape index: {}]   ;;  %s8363_s6 = inlined_call_operand.vmem [shape: f32[1,128], index: 6, kind: input, shape index: {}]   ;;  %s8364_s7 = inlined_call_operand.vmem [shape: f32[1,128], index: 7, kind: input, shape index: {}]   ;;  %s8365_s8 = inlined_call_operand.vmem [shape: f32[1,128], index: 8, kind: input, shape index: {}]   ;;  %s8366_s9 = inlined_call_operand.vmem [shape: f32[1,128], index: 9, kind: input, shape index: {}]   ;;  %s8367_s10 = inlined_call_operand.vmem [shape: bf16[128,384], index: 10, kind: input, shape index: {}]   ;;  %s8368_s11 = inlined_call_operand.vmem [shape: f32[1,384], index: 11, kind: input, shape index: {}]   ;;  %s8369_s12 = inlined_call_operand.vmem [shape: bf16[128,128], index: 12, kind: input, shape index: {}]   ;;  %s8370_s13 = inlined_call_operand.vmem [shape: f32[1,128], index: 13, kind: input, shape index: {}]   ;;  %s8371_s14 = inlined_call_operand.vmem [shape: f32[1,128], index: 14, kind: input, shape index: {}]   ;;  %s8372_s15 = inlined_call_operand.vmem [shape: f32[1,128], index: 15, kind: input, shape index: {}]   ;;  %s8373_s16 = inlined_call_operand.vmem [shape: bf16[128,512], index: 16, kind: input, shape index: {}]   ;;  %s8374_s17 = inlined_call_operand.vmem [shape: f32[1,512], index: 17, kind: input, shape index: {}]   ;;  %s8375_s18 = inlined_call_operand.vmem [shape: bf16[512,128], index: 18, kind: input, shape index: {}]   ;;  %s8376_s19 = inlined_call_operand.vmem [shape: f32[1,128], index: 19, kind: input, shape index: {}]   ;;  %s8377_s20 = inlined_call_operand.vmem [shape: bf16[2,17,128], index: 20, kind: output, shape index: {}]  }
   0x1   :  { %8393 = sst [smem:[#allocation10_spill]] %s8357_s0 }
   0x2   :  { %8394 = sst [smem:[#allocation11_spill]] %s8358_s1 }
   0x3   :  { %8395 = sst [smem:[#allocation12_spill]] %s8359_s2 }
   0x4   :  { %8396 = sst [smem:[#allocation13_spill]] %s8360_s3 }
   0x5   :  { %8397 = sst [smem:[#allocation14_spill]] %s8361_s4 }
   0x6   :  { %8398 = sst [smem:[#allocation15_spill]] %s8374_s17 }
   0x7   :  { %8399 = sst [smem:[#allocation16_spill]] %s8375_s18 }
   0x8   :  { %8400 = sst [smem:[#allocation17_spill]] %s8376_s19 }
   0x9   :  { %8401 = sst [smem:[#allocation18_spill]] %s8377_s20 }
   0xa   :  { %25 = vsyncpa [#allocation3], 0  ;;  %s6987_s1 = smov 0  }
   0xb LB: > { %8402 = sst [smem:[#allocation5_spill]] %s6871_s1  ;;  %s6993_s22 = sadd.s32 4294967295, %s6871_s1   ;;  %s6871_s1 = sphi %s6987_s1, %s31_s1  }
   0xc   : > { %p6051_p0 = scmp.ge.s32.totalorder %s6871_s1, 1  ;;  %p497_p1 = scmp.lt.s32.totalorder %s6871_s1, 3 }
   0xd   : > { %s8403_s2 = sld [smem:[#allocation10_spill]]  ;;  %p6548_p3 = scmp.eq.s32.totalorder %s6993_s22, 0 }
   0xe   : > { %p7000_p2 = pnand %p6051_p0, %p497_p1 }
  0x10   : > { %p6544_p4 = pneg %p7000_p2 }
  0x12   : > { %p6545_p5 = pnand %p6548_p3, %p6544_p4 }
  0x13   : > { %s510_s25 = sshll.u32 %s8403_s2, 4  ;;  %s511_s25 = int_to_ptr.vmem [resolvable:$true] %s510_s25 }
  0x14   : > { %s6846_s26 = scalar_lea.vmem %s511_s25, 16  ;;  %p6848_p7 = pneg %p6545_p5 }
  0x15   : > { %p6847_p6 = scmp.ne.s32.totalorder %s511_s25, %s6846_s26  ;;  %p6854_p10 = scmp.lt.s32.totalorder %s511_s25, %s511_s25 }
  0x16   : > { %p6855_p11 = scmp.lt.s32.totalorder %s6846_s26, %s6846_s26 }
  0x17   : > { %p6849_p8 = pnand %p6848_p7, %p6847_p6 }
  0x18   : > { %p6856_p12 = por %p6855_p11, %p6854_p10 }
  0x19   : > { %p6850_p9 = pneg %p6849_p8 }
  0x1b   : > { %p6857_p13 = pnand %p6856_p12, %p6850_p9 }
  0x1d   : > { %6860 = shalt.err (!%p6857_p13)
}
  0x1e   : > { %s6873_s27 = smov [#allocation2]   ;;  %595 = sbr.rel (%p7000_p2) target bundleno = 4422 (0x1146), region = 100 }
  0x1f   : > { %6547 = dma.vmem_to_smem (!%p6545_p5), %s511_s25, 16, %s6873_s27, [#allocation3]  }
  0x25   : > { %6866 = dma.done.wait (%p6548_p3), [#allocation3], 16  }
  0x26   : > { %6868 = vsyncadd (%p6548_p3), [#allocation3], 4294967280 }
  0x27   : > { %601 = sfence }
  0x28   : > { %s8405_s29 = sld [smem:[#allocation14_spill]]  ;;  %p664_p0 = scmp.lt.s32.totalorder %s6993_s22, 1  ;;  %v8390_v2 = vmov 0   ;;  %v8384_v39 = vmov 0.0   ;;  %vm6879_vm0 = vmmov 0   ;;  %v891_v42 = vlaneseq }
  0x29   : > { %838 = vmatprep.mubr.bf16.mxu0 %v8390_v2  ;;  %s693_s0 = sld [smem:[#allocation2]]  ;;  %s8406_s25 = sld [smem:[#allocation12_spill]]  ;;  %6379 = vmatprep.subr.bf16.mxu1 %v8384_v39  ;;  %v6880_v40 = vmov 1983009808   ;;  %v6881_v47 = vmov 1934713408   ;;  %v7108_v49 = vpack.i.b16 %v8390_v2, %v8390_v2 }
  0x2a   : > { %s8431_s22 = smov (!%p664_p0, %s6993_s22), 1  ;;  %s8407_s19 = sld [smem:[#allocation13_spill]]  ;;  %6381 = vmatprep.mubr.msk.bf16.mxu1 %vm6879_vm0, %v8384_v39  ;;  %v889_v41 = vunpack.c.l.s4 %v6880_v40  ;;  %v7104_v44 = vshrl.u32 %v891_v42, 7  ;;  %v906_v48 = vunpack.c.l.s4 %v6881_v47  ;;  %vm1696_vm1 = vcmask 261120  }
  0x2b   : > { %s6237_s28 = sshll.u32 %s8431_s22, 3  ;;  %s6062_s4 = sld [smem:[#allocation2 + $0x1]]  ;;  %vm1902_vm2 = vcmask 130048   ;;  %vm2469_vm3 = vcmask 523264   ;;  %vm2472_vm4 = vcmask 785408   ;;  %vm2527_vm5 = vcmask 1040384  }
  0x2c   : > { %s6877_s27 = smov 64   ;;  %v890_v43 = vunpack.c.0.s8 %v889_v41  ;;  %8408 = vst [vmem:[#allocation6_spill] sm:$0xff] %v7104_v44  ;;  %v907_v56 = vunpack.c.0.s8 %v906_v48  ;;  %s6539_s21 = smul.u32 12, %s8431_s22  ;;  %vm4232_vm6 = vcmask 131072   ;;  %vm4225_vm7 = vcmask 138240  }
  0x2d   : > { %s8409_s17 = sld [smem:[#allocation11_spill]]  ;;  %s8421_s18 = sld [smem:[#allocation16_spill]]  ;;  %vm5953_vm8 = vsmask.f32 256 }
  0x2e   : > { %v6582_v0 = vld [vmem:[%s8405_s29 + $0x4] ss:$8 sps:$4 sm:$0xff]   ;;  %v6584_v1 = vld [vmem:[%s8405_s29] ss:$8 sps:$4 sm:$0xff]   ;;  %v6585_v3 = vld [vmem:[%s8405_s29 + $0x14] ss:$8 sps:$4 sm:$0xff]   ;;  %v7111_v51 = vsub.s32 %v890_v43, %v7104_v44 }
  0x2f   : > { %806 = vmatprep.subr.bf16.mxu0 %v6582_v0  ;;  %v6587_v4 = vld [vmem:[%s8405_s29 + $0x10] ss:$8 sps:$4 sm:$0xff]   ;;  %v6588_v5 = vld [vmem:[%s8405_s29 + $0x24] ss:$8 sps:$4 sm:$0xff]   ;;  %v6590_v6 = vld [vmem:[%s8405_s29 + $0x20] ss:$8 sps:$4 sm:$0xff]   ;;  %s673_s3 = scalar_lea.vmem %s8406_s25, %s6237_s28  ;;  %v696_v16 = vstv %s693_s0 }
  0x30   : > { %807 = vmatpush1.bf16.msra.mxu0 %v6584_v1  ;;  %v6591_v7 = vld [vmem:[%s8405_s29 + $0x34] ss:$8 sps:$4 sm:$0xff]   ;;  %v6593_v8 = vld [vmem:[%s8405_s29 + $0x30] ss:$8 sps:$4 sm:$0xff]   ;;  %s678_s26 = scalar_lea.vmem %s8407_s19, %s6237_s28  ;;  %v6594_v9 = vld [vmem:[%s8405_s29 + $0x44] ss:$8 sps:$4 sm:$0xff]  }
  0x31   : > { %808 = vmatprep.subr.bf16.mxu0 %v6585_v3  ;;  %v6596_v10 = vld [vmem:[%s8405_s29 + $0x40] ss:$8 sps:$4 sm:$0xff]   ;;  %v7059_v12 = vld [vmem:[%s673_s3 + $0x4] sm:$0xf]  ;;  %v6597_v14 = vld [vmem:[%s8405_s29 + $0x54] ss:$8 sps:$4 sm:$0xff]   ;;  %v704_v22 = vstv %s6062_s4 }
  0x32   : > { %v7057_v11 = vld [vmem:[%s673_s3] sm:$0xf]  ;;  %v6599_v15 = vld [vmem:[%s8405_s29 + $0x50] ss:$8 sps:$4 sm:$0xff]   ;;  %v6600_v17 = vld [vmem:[%s8405_s29 + $0x64] ss:$8 sps:$4 sm:$0xff]   ;;  %v695_v19 = vunpack.c.l.bf16 %v7059_v12 }
  0x33   : > { %v6247_v13 = vld [vmem:[%s678_s26] sm:$0xff]   ;;  %v694_v18 = vunpack.c.l.bf16 %v7057_v11  ;;  %v6603_v24 = vld [vmem:[%s8405_s29 + $0x74] ss:$8 sps:$4 sm:$0xff]   ;;  %v6605_v29 = vld [vmem:[%s8405_s29 + $0x70] ss:$8 sps:$4 sm:$0xff]   ;;  %s6875_s3 = smov 32   ;;  %s668_s20 = scalar_lea.vmem %s8409_s17, %s6539_s21 }
  0x34   : > { %809 = vmatpush1.bf16.msra.mxu0 %v6587_v4  ;;  %v6248_v20 = vunpack.c.l.bf16 %v6247_v13  ;;  %v6249_v21 = vunpack.c.h.bf16 %v6247_v13  ;;  %v6602_v23 = vld [vmem:[%s8405_s29 + $0x60] ss:$8 sps:$4 sm:$0xff]   ;;  %v698_v26 = vmul.f32 %v696_v16, %v695_v19  ;;  %s6876_s26 = smov 96   ;;  %v866_v63 = vshrl.u32 %v7057_v11, 16  ;;  %s8422_s25 = sld [smem:[#allocation15_spill]]  ;;  %vm5954_vm9 = vmand %vm2527_vm5, %vm5953_vm8 }
  0x35   : > { %810 = vmatprep.subr.bf16.mxu0 %v6588_v5  ;;  %v697_v25 = vmul.f32 %v696_v16, %v694_v18  ;;  %s8428_s23 = sld [smem:[#allocation18_spill]] }
  0x36   : > { %v705_v27 = vmul.f32 %v6248_v20, %v704_v22  ;;  %v706_v28 = vmul.f32 %v6249_v21, %v704_v22 }
  0x38   : > { %811 = vmatpush1.bf16.msra.mxu0 %v6590_v6  ;;  %v707_v30 = vadd.f32 %v705_v27, %v697_v25  ;;  %v708_v31 = vadd.f32 %v706_v28, %v698_v26 }
  0x39   : > { %812 = vmatprep.subr.bf16.mxu0 %v6591_v7  ;;  %v7119_v7 = vsub.s32 %v907_v56, %v7104_v44 }
  0x3a   : > { %v709_v32 = vpack.c.bf16 %v708_v31, %v707_v30 }
  0x3b   : > { %s683_s19 = scalar_lea.vmem %s8428_s23, %s6539_s21 }
  0x3c   : > { %813 = vmatpush1.bf16.msra.mxu0 %v6593_v8  ;;  %v878_v8 = vshrl.u32 %v7059_v12, 16 }
  0x3d   : > { %814 = vmatprep.subr.bf16.mxu0 %v6594_v9 }
  0x40   : > { %815 = vmatpush1.bf16.msra.mxu0 %v6596_v10 }
  0x41   : > { %816 = vmatprep.subr.bf16.mxu0 %v6597_v14 }
  0x44   : > { %817 = vmatpush1.bf16.msra.mxu0 %v6599_v15 }
  0x45   : > { %818 = vmatprep.subr.bf16.mxu0 %v6600_v17 }
  0x48   : > { %819 = vmatpush1.bf16.msra.mxu0 %v6602_v23 }
  0x49   : > { %820 = vmatprep.subr.bf16.mxu0 %v6603_v24 }
  0x4c   : > { %821 = vmatpush1.bf16.msra.mxu0 %v6605_v29 }
  0x4d   : > { %6403 = vmatprep.subr.bf16.mxu0 %v8384_v39 }
  0x4f   : > { %839 = vmatmul.mubr.bf16.vlgmr.msra.gmra.mrb[0].mxu0 %v709_v32 }
  0x50   : > { %6405 = vmatprep.mubr.msk.bf16.mxu0 %vm6879_vm0, %v8384_v39 }
 0x122   : > { %v840_v33 = vpop.f32.mrb[0].mxu0 }
 0x123   : > { %v842_v34 = vpop.f32.mrb[1].mxu0 }
 0x124   : > { %v844_v35 = vpop.f32.mrb[2].mxu0 }
 0x125   : > { %v1147_v36 = vpack.c.bf16 %v844_v35, %v840_v33  ;;  %v846_v37 = vpop.f32.mrb[3].mxu0 }
 0x126   : > { %v7081_v38 = vpack.c.bf16 %v846_v37, %v842_v34 }
 0x127   : > { %1153 = vrot.lane.b32.xlu1 %v1147_v36, %s6875_s3  ;;  %1149 = vrot.lane.b32.xlu0 %v1147_v36, %s6876_s26  ;;  %v1159_v55 = vshrl.u32 %v1147_v36, 16 }
 0x12b   : > { %851 = vrot.lane.b32.xlu1 %v7057_v11, %s6876_s26  ;;  %1151 = vrot.lane.b32.xlu0 %v1147_v36, %s6877_s27 }
 0x12f   : > { %855 = vrot.lane.b32.xlu1 %v7057_v11, %s6877_s27  ;;  %853 = vrot.lane.b32.xlu0 %v7059_v12, %s6876_s26 }
 0x133   : > { %859 = vrot.lane.b32.xlu1 %v7057_v11, %s6875_s3  ;;  %857 = vrot.lane.b32.xlu0 %v7059_v12, %s6877_s27 }
 0x137   : > { %861 = vrot.lane.b32.xlu0 %v7059_v12, %s6875_s3 }
 0x199   : > { %v1154_v45 = vpop.permute.xlu1 %1153  ;;  %v1150_v46 = vpop.permute.xlu0 %1149 }
 0x19a   : > { %v1157_v50 = vpack.i.b16 %v1150_v46, %v1147_v36  ;;  %v1160_v52 = vshrl.u32 %v1150_v46, 16  ;;  %v1168_v57 = vshrl.u32 %v1154_v45, 16 }
 0x19c   : > { %v1177_v58 = vcombine.high %v1157_v50, %v7108_v49  ;;  %v1161_v61 = vpack.i.b16 %v1160_v52, %v1159_v55  ;;  %v1184_v62 = vrot.slane %v1157_v50, %v7111_v51 }
 0x19d   : > { %v852_v53 = vpop.permute.xlu1 %851  ;;  %v1152_v54 = vpop.permute.xlu0 %1151 }
 0x19e   : > { %v1165_v59 = vpack.i.b16 %v1154_v45, %v1152_v54  ;;  %v1167_v60 = vshrl.u32 %v1152_v54, 16  ;;  %v867_v0 = vshrl.u32 %v852_v53, 16  ;;  %v1191_v10 = vrot.slane %v1177_v58, %v7111_v51 }
 0x19f   : > { %v1243_v16 = vcombine.high %v1161_v61, %v7108_v49  ;;  %v865_v17 = vpack.i.b16 %v852_v53, %v7057_v11  ;;  %v1250_v20 = vrot.slane %v1161_v61, %v7111_v51 }
 0x1a0   : > { %v1169_v1 = vpack.i.b16 %v1168_v57, %v1167_v60  ;;  %v1192_v3 = vcombine.high %v1165_v59, %v7108_v49  ;;  %v1199_v4 = vrot.slane %v1165_v59, %v7111_v51  ;;  %v868_v21 = vpack.i.b16 %v867_v0, %v866_v63 }
 0x1a1   : > { %v856_v5 = vpop.permute.xlu1 %855  ;;  %v854_v6 = vpop.permute.xlu0 %853  ;;  %v1257_v11 = vrot.slane %v1243_v16, %v7111_v51  ;;  %v894_v31 = vrot.slane %v865_v17, %v7111_v51 }
 0x1a2   : > { %v879_v9 = vshrl.u32 %v854_v6, 16  ;;  %v1206_v13 = vrot.slane %v1192_v3, %v7111_v51  ;;  %v1207_v14 = vcombine.low %v1184_v62, %v1199_v4  ;;  %v1208_v15 = vcombine.high %v1184_v62, %v1199_v4 }
 0x1a3   : > { %v1258_v18 = vcombine.high %v1169_v1, %v7108_v49  ;;  %v1265_v19 = vrot.slane %v1169_v1, %v7111_v51  ;;  %v877_v25 = vpack.i.b16 %v854_v6, %v7059_v12  ;;  %v872_v30 = vshrl.u32 %v856_v5, 16 }
 0x1a4   : > { %v1223_v23 = vcombine.low %v1191_v10, %v1206_v13  ;;  %v1224_v24 = vcombine.high %v1191_v10, %v1206_v13  ;;  %v880_v26 = vpack.i.b16 %v879_v9, %v878_v8  ;;  %v1215_v28 = vrot.slane %v1207_v14, %v7119_v7 }
 0x1a5   : > { %v858_v22 = vpop.permute.xlu0 %857  ;;  %v860_v27 = vpop.permute.xlu1 %859  ;;  %v1222_v29 = vrot.slane %v1208_v15, %v7119_v7  ;;  %v1272_v32 = vrot.slane %v1258_v18, %v7111_v51  ;;  %v1273_v33 = vcombine.low %v1250_v20, %v1265_v19  ;;  %v928_v34 = vrot.slane %v868_v21, %v7111_v51 }
 0x1a6   : > { %v1274_v35 = vcombine.high %v1250_v20, %v1265_v19  ;;  %v871_v36 = vpack.i.b16 %v860_v27, %v856_v5  ;;  %v873_v37 = vshrl.u32 %v860_v27, 16  ;;  %v1231_v40 = vrot.slane %v1223_v23, %v7119_v7 }
 0x1a7   : > { %v1238_v41 = vrot.slane %v1224_v24, %v7119_v7  ;;  %v962_v42 = vrot.slane %v877_v25, %v7111_v51  ;;  %v996_v43 = vrot.slane %v880_v26, %v7111_v51  ;;  %v1309_v45 = vcombine.low %v1215_v28, %v1222_v29 }
 0x1a8   : > { %v874_v46 = vpack.i.b16 %v873_v37, %v872_v30  ;;  %v902_v47 = vrot.slane %v871_v36, %v7111_v51  ;;  %v1281_v50 = vrot.slane %v1273_v33, %v7119_v7  ;;  %v1289_v52 = vcombine.low %v1257_v11, %v1272_v32 }
 0x1a9   : > { %v862_v12 = vpop.permute.xlu0 %861  ;;  %v884_v53 = vshrl.u32 %v858_v22, 16  ;;  %v1288_v55 = vrot.slane %v1274_v35, %v7119_v7  ;;  %v1290_v56 = vcombine.high %v1257_v11, %v1272_v32  ;;  %v6083_v59 = vcombine.high %v1215_v28, %v1222_v29 }
 0x1aa   : > { %v883_v48 = vpack.i.b16 %v862_v12, %v858_v22  ;;  %v885_v54 = vshrl.u32 %v862_v12, 16  ;;  %v936_v57 = vrot.slane %v874_v46, %v7111_v51  ;;  %v1325_v60 = vcombine.low %v1231_v40, %v1238_v41 }
 0x1ab   : > { %v6084_v61 = vcombine.high %v1231_v40, %v1238_v41  ;;  %v903_v63 = vcombine.low %v894_v31, %v902_v47  ;;  %v904_v0 = vcombine.high %v894_v31, %v902_v47  ;;  %v1297_v4 = vrot.slane %v1289_v52, %v7119_v7 }
 0x1ac   : > { %v970_v58 = vrot.slane %v883_v48, %v7111_v51  ;;  %v886_v62 = vpack.i.b16 %v885_v54, %v884_v53  ;;  %v937_v1 = vcombine.low %v928_v34, %v936_v57  ;;  %v938_v3 = vcombine.high %v928_v34, %v936_v57 }
 0x1ad   : > { %v1304_v9 = vrot.slane %v1290_v56, %v7119_v7  ;;  %v1359_v10 = vcombine.low %v1281_v50, %v1288_v55  ;;  %v6085_v19 = vcombine.high %v1281_v50, %v1288_v55  ;;  %v911_v20 = vrot.slane %v903_v63, %v7119_v7 }
 0x1ae   : > { %v971_v5 = vcombine.low %v962_v42, %v970_v58  ;;  %v972_v6 = vcombine.high %v962_v42, %v970_v58  ;;  %v1004_v8 = vrot.slane %v886_v62, %v7111_v51  ;;  %v945_v13 = vrot.slane %v937_v1, %v7119_v7 }
 0x1af   : > { %v952_v14 = vrot.slane %v938_v3, %v7119_v7  ;;  %v918_v21 = vrot.slane %v904_v0, %v7119_v7  ;;  %v1316_v22 = vrot.slane %v1309_v45, %v7111_v51  ;;  %v1332_v25 = vrot.slane %v1325_v60, %v7111_v51 }
 0x1b0   : > { %v979_v15 = vrot.slane %v971_v5, %v7119_v7  ;;  %v986_v16 = vrot.slane %v972_v6, %v7119_v7  ;;  %v1005_v17 = vcombine.low %v996_v43, %v1004_v8  ;;  %v1006_v18 = vcombine.high %v996_v43, %v1004_v8 }
 0x1b1   : > { %v1340_v26 = vrot.slane %v6084_v61, %v7111_v51  ;;  %v1048_v27 = vcombine.low %v945_v13, %v952_v14  ;;  %v6080_v28 = vcombine.high %v945_v13, %v952_v14  ;;  %v1324_v29 = vrot.slane %v6083_v59, %v7111_v51 }
 0x1b2   : > { %v1013_v23 = vrot.slane %v1005_v17, %v7119_v7  ;;  %v1020_v24 = vrot.slane %v1006_v18, %v7119_v7  ;;  %v1366_v30 = vrot.slane %v1359_v10, %v7111_v51  ;;  %v1073_v11 = vcombine.low %v979_v15, %v986_v16 }
 0x1b3   : > { %v6081_v31 = vcombine.high %v979_v15, %v986_v16  ;;  %v1023_v34 = vcombine.low %v911_v20, %v918_v21  ;;  %v6079_v35 = vcombine.high %v911_v20, %v918_v21  ;;  %v1374_v36 = vrot.slane %v6085_v19, %v7111_v51 }
 0x1b4   : > { %v1098_v32 = vcombine.low %v1013_v23, %v1020_v24  ;;  %v6082_v33 = vcombine.high %v1013_v23, %v1020_v24  ;;  %v1375_v37 = vcombine.low %v1297_v4, %v1304_v9  ;;  %v1349_v41 = vcombine.low %v1332_v25, %v1340_v26 }
 0x1b5   : > { %v6086_v42 = vcombine.high %v1297_v4, %v1304_v9  ;;  %v1055_v43 = vrot.slane %v1048_v27, %v7111_v51  ;;  %v1063_v45 = vrot.slane %v6080_v28, %v7111_v51  ;;  %v1341_v46 = vcombine.low %v1316_v22, %v1324_v29 }
 0x1b6   : > { %v1105_v12 = vrot.slane %v1098_v32, %v7111_v51  ;;  %v1113_v40 = vrot.slane %v6082_v33, %v7111_v51  ;;  %v1382_v47 = vrot.slane %v1375_v37, %v7111_v51  ;;  %v1080_v48 = vrot.slane %v1073_v11, %v7111_v51 }
 0x1b7   : > { %v1088_v50 = vrot.slane %v6081_v31, %v7111_v51  ;;  %v1390_v52 = vrot.slane %v6086_v42, %v7111_v51  ;;  %v1391_v53 = vcombine.low %v1366_v30, %v1374_v36  ;;  %v1030_v54 = vrot.slane %v1023_v34, %v7111_v51 }
 0x1b8   : > { %v1038_v55 = vrot.slane %v6079_v35, %v7111_v51  ;;  %v1114_v56 = vcombine.low %v1105_v12, %v1113_v40  ;;  %v1356_v57 = vrot.slane %v1349_v41, %v7119_v7  ;;  %v1348_v59 = vrot.slane %v1341_v46, %v7119_v7 }
 0x1b9   : > { %v1399_v58 = vcombine.low %v1382_v47, %v1390_v52  ;;  %v1064_v60 = vcombine.low %v1055_v43, %v1063_v45  ;;  %v1089_v61 = vcombine.low %v1080_v48, %v1088_v50  ;;  %v1398_v62 = vrot.slane %v1391_v53, %v7119_v7 }
 0x1ba   : > { %v1039_v0 = vcombine.low %v1030_v54, %v1038_v55  ;;  %v1357_v1 = vcombine.low %v1348_v59, %v1356_v57  ;;  %v1121_v4 = vrot.slane %v1114_v56, %v7119_v7  ;;  %v1358_v26 = vcombine.high %v1348_v59, %v1356_v57 }
 0x1bb   : > { %v1406_v63 = vrot.slane %v1399_v58, %v7119_v7  ;;  %v1071_v6 = vrot.slane %v1064_v60, %v7119_v7  ;;  %v1096_v8 = vrot.slane %v1089_v61, %v7119_v7 }
 0x1bc   : > { %v1046_v13 = vrot.slane %v1039_v0, %v7119_v7  ;;  %v1412_v15 = vshrl.u32 %v1357_v1, 16  ;;  %v1139_v19 = vshrl.u32 %v1121_v4, 16  ;;  %v1122_v30 = vcombine.high %v1121_v4, %v8390_v2 }
 0x1bd   : > { %v1407_v3 = vcombine.low %v1398_v62, %v1406_v63  ;;  %v1137_v14 = vpack.i.b16 %v1121_v4, %v1096_v8  ;;  %v1127_v21 = vshrl.u32 %v1071_v6, 16  ;;  %v1138_v22 = vshrl.u32 %v1096_v8, 16 }
 0x1be   : > { %v1125_v16 = vpack.i.b16 %v1071_v6, %v1046_v13  ;;  %v1408_v23 = vcombine.high %v1398_v62, %v1406_v63  ;;  %v1126_v24 = vshrl.u32 %v1046_v13, 16  ;;  %v1072_v31 = vcombine.high %v1071_v6, %v8390_v2 }
 0x1bf   : > { %v1411_v5 = vpack.i.b16 %v1407_v3, %v1357_v1  ;;  %v1413_v9 = vshrl.u32 %v1407_v3, 16  ;;  %v1140_v25 = vpack.i.b16 %v1139_v19, %v1138_v22  ;;  %v1097_v32 = vcombine.high %v1096_v8, %v8390_v2 }
 0x1c0   : > { %v6091_v17 = vcombine.low %v1125_v16, %v1137_v14  ;;  %v1128_v27 = vpack.i.b16 %v1127_v21, %v1126_v24  ;;  %v1417_v28 = vpack.i.b16 %v1408_v23, %v1358_v26  ;;  %v1419_v33 = vshrl.u32 %v1408_v23, 16 }
 0x1c1   : > { %v1701_v10 = vsel %vm1696_vm1, %v1411_v5, 0  ;;  %v1414_v18 = vpack.i.b16 %v1413_v9, %v1412_v15  ;;  %v1047_v34 = vcombine.high %v1046_v13, %v8390_v2  ;;  %v1143_v35 = vpack.i.b16 %v1122_v30, %v1097_v32 }
 0x1c2   : > { %6380 = vmatpush3.bf16.xpose.msra.mxu1 %v1701_v10  ;;  %v6093_v29 = vcombine.low %v1128_v27, %v1140_v25  ;;  %v1801_v11 = vsel %vm1696_vm1, %v1417_v28, 0  ;;  %v1418_v36 = vshrl.u32 %v1358_v26, 16  ;;  %v1145_v41 = vshrl.u32 %v1122_v30, 16 }
 0x1c3   : > { %6385 = vmatprep.subr.bf16.mxu1 %v8384_v39  ;;  %v1751_v20 = vsel %vm1696_vm1, %v1414_v18, 0  ;;  %v1131_v37 = vpack.i.b16 %v1072_v31, %v1047_v34  ;;  %v1133_v43 = vshrl.u32 %v1072_v31, 16  ;;  %v1144_v45 = vshrl.u32 %v1097_v32, 16 }
 0x1c4   : > { %v1420_v12 = vpack.i.b16 %v1419_v33, %v1418_v36  ;;  %v1132_v46 = vshrl.u32 %v1047_v34, 16 }
 0x1c5   : > { %v6095_v40 = vcombine.low %v1131_v37, %v1143_v35  ;;  %v1146_v47 = vpack.i.b16 %v1145_v41, %v1144_v45 }
 0x1c6   : > { %v1851_v42 = vsel %vm1696_vm1, %v1420_v12, 0  ;;  %v1134_v48 = vpack.i.b16 %v1133_v43, %v1132_v46 }
 0x1c8   : > { %v6097_v50 = vcombine.low %v1134_v48, %v1146_v47 }
 0x1c9   : > { %6382 = vmatmul.mubr.msk.bf16.vlgmr.msra.gmra.mrb[0].mxu1 %vm1696_vm1, %v6091_v17 }
 0x1ca   : > { %6386 = vmatpush3.bf16.xpose.msra.mxu1 %v1751_v20  ;;  %6387 = vmatprep.mubr.msk.bf16.mxu1 %vm6879_vm0, %v8384_v39 }
 0x1cb   : > { %6391 = vmatprep.subr.bf16.mxu1 %v8384_v39 }
 0x1d1   : > { %6388 = vmatmul.mubr.msk.bf16.vlgmr.msra.gmra.mrb[4].mxu1 %vm1696_vm1, %v6093_v29 }
 0x1d2   : > { %6392 = vmatpush3.bf16.xpose.msra.mxu1 %v1801_v11  ;;  %6393 = vmatprep.mubr.msk.bf16.mxu1 %vm6879_vm0, %v8384_v39 }
 0x1d3   : > { %6397 = vmatprep.subr.bf16.mxu1 %v8384_v39 }
 0x1d9   : > { %6394 = vmatmul.mubr.msk.bf16.vlgmr.msra.gmra.mrb[8].mxu1 %vm1696_vm1, %v6095_v40 }
 0x1da   : > { %6398 = vmatpush3.bf16.xpose.msra.mxu1 %v1851_v42  ;;  %6399 = vmatprep.mubr.msk.bf16.mxu1 %vm6879_vm0, %v8384_v39 }
 0x1db   : > { %6409 = vmatprep.subr.bf16.mxu1 %v8384_v39 }
 0x1e1   : > { %6400 = vmatmul.mubr.msk.bf16.vlgmr.msra.gmra.mrb[12].mxu1 %vm1696_vm1, %v6097_v50 }
 0x1e2   : > { %6411 = vmatprep.mubr.msk.bf16.mxu1 %vm6879_vm0, %v8384_v39 }
 0x29c   : > { %v1737_v52 = vpop.f32.mrb[0].mxu1 }
 0x29d   : > { %v1894_v53 = vmul.f32 0.17677669, %v1737_v52  ;;  %v6383_v54 = vpop.f32.mrb[1].mxu1 }
 0x29e   : > { %v1740_v55 = vpop.f32.mrb[2].mxu1 }
 0x29f   : > { %v1895_v56 = vmul.f32 0.17677669, %v1740_v55  ;;  %v6384_v57 = vpop.f32.mrb[3].mxu1  ;;  %v1903_v58 = vsel %vm1902_vm2, %v1894_v53, -inf }
 0x2a0   : > { %1904 = vmax.xlane.f32.xlu1 %v1903_v58 }
 0x2a1   : > { %v1906_v59 = vsel %vm1902_vm2, %v1895_v56, -inf }
 0x2a2   : > { %1907 = vmax.xlane.f32.xlu0 %v1906_v59 }
 0x2a4   : > { %v1787_v60 = vpop.f32.mrb[4].mxu1 }
 0x2a5   : > { %v1896_v61 = vmul.f32 0.17677669, %v1787_v60  ;;  %v6389_v62 = vpop.f32.mrb[5].mxu1 }
 0x2a6   : > { %v1790_v63 = vpop.f32.mrb[6].mxu1  ;;  %v1433_v62 = vshrl.u32 %v7081_v38, 16 }
 0x2a7   : > { %v1897_v0 = vmul.f32 0.17677669, %v1790_v63  ;;  %v6390_v1 = vpop.f32.mrb[7].mxu1  ;;  %v1909_v3 = vsel %vm1902_vm2, %v1896_v61, -inf }
 0x2a8   : > { %1910 = vmax.xlane.f32.xlu0 %v1909_v3 }
 0x2a9   : > { %v1912_v4 = vsel %vm1902_vm2, %v1897_v0, -inf }
 0x2aa   : > { %1913 = vmax.xlane.f32.xlu1 %v1912_v4 }
 0x2ac   : > { %v1837_v5 = vpop.f32.mrb[8].mxu1 }
 0x2ad   : > { %v1898_v6 = vmul.f32 0.17677669, %v1837_v5  ;;  %v6395_v8 = vpop.f32.mrb[9].mxu1 }
 0x2ae   : > { %v1840_v9 = vpop.f32.mrb[10].mxu1 }
 0x2af   : > { %v1899_v10 = vmul.f32 0.17677669, %v1840_v9  ;;  %v6396_v13 = vpop.f32.mrb[11].mxu1  ;;  %v1915_v14 = vsel %vm1902_vm2, %v1898_v6, -inf }
 0x2b0   : > { %1916 = vmax.xlane.f32.xlu0 %v1915_v14 }
 0x2b1   : > { %v1918_v15 = vsel %vm1902_vm2, %v1899_v10, -inf }
 0x2b2   : > { %1919 = vmax.xlane.f32.xlu1 %v1918_v15 }
 0x2b4   : > { %v1887_v16 = vpop.f32.mrb[12].mxu1 }
 0x2b5   : > { %v1900_v17 = vmul.f32 0.17677669, %v1887_v16  ;;  %v6401_v18 = vpop.f32.mrb[13].mxu1 }
 0x2b6   : > { %v1890_v19 = vpop.f32.mrb[14].mxu1 }
 0x2b7   : > { %v1901_v20 = vmul.f32 0.17677669, %v1890_v19  ;;  %v6402_v21 = vpop.f32.mrb[15].mxu1  ;;  %v1921_v22 = vsel %vm1902_vm2, %v1900_v17, -inf }
 0x2b8   : > { %1922 = vmax.xlane.f32.xlu0 %v1921_v22 }
 0x2b9   : > { %v1924_v23 = vsel %vm1902_vm2, %v1901_v20, -inf }
 0x2ba   : > { %1925 = vmax.xlane.f32.xlu1 %v1924_v23 }
 0x2cb   : > { %1425 = vrot.lane.b32.xlu1 %v7081_v38, %s6877_s27 }
 0x2ce   : > { %1423 = vrot.lane.b32.xlu0 %v7081_v38, %s6876_s26 }
 0x2cf   : > { %1427 = vrot.lane.b32.xlu1 %v7081_v38, %s6875_s3 }
 0x32d   : > { %v1905_v24 = vpop.xlane.xlu1 %1904 }
 0x32e   : > { %v1927_v25 = vsub.f32 %v1894_v53, %v1905_v24 }
 0x32f   : > { %v1908_v26 = vpop.xlane.xlu0 %1907 }
 0x330   : > { %v1935_v27 = vmul.f32 1.442695, %v1927_v25  ;;  %v1928_v28 = vsub.f32 %v1895_v56, %v1908_v26 }
 0x332   : > { %6726 = vpow2.f32 %v1935_v27  ;;  %v1937_v29 = vmul.f32 1.442695, %v1928_v28 }
 0x334   : > { %6728 = vpow2.f32 %v1937_v29 }
 0x335   : > { %v1911_v30 = vpop.xlane.xlu0 %1910 }
 0x336   : > { %v1929_v11 = vsub.f32 %v1896_v61, %v1911_v30 }
 0x337   : > { %v1914_v31 = vpop.xlane.xlu1 %1913 }
 0x338   : > { %v1939_v32 = vmul.f32 1.442695, %v1929_v11  ;;  %v1930_v33 = vsub.f32 %v1897_v0, %v1914_v31 }
 0x33a   : > { %6730 = vpow2.f32 %v1939_v32  ;;  %v1941_v34 = vmul.f32 1.442695, %v1930_v33 }
 0x33c   : > { %v7218_v35 = vpop.eup %6726  ;;  %6732 = vpow2.f32 %v1941_v34 }
 0x33d   : > { %v1917_v36 = vpop.xlane.xlu0 %1916  ;;  %v1951_v37 = vsel %vm1902_vm2, %v7218_v35, 0.0 }
 0x33e   : > { %v7222_v12 = vpop.eup %6728  ;;  %v1931_v40 = vsub.f32 %v1898_v6, %v1917_v36  ;;  %1952 = vadd.xlane.f32.xlu0 %v1951_v37 }
 0x33f   : > { %v1920_v41 = vpop.xlane.xlu1 %1919  ;;  %v1954_v42 = vsel %vm1902_vm2, %v7222_v12, 0.0 }
 0x340   : > { %v1943_v43 = vmul.f32 1.442695, %v1931_v40  ;;  %v1932_v45 = vsub.f32 %v1899_v10, %v1920_v41  ;;  %1955 = vadd.xlane.f32.xlu1 %v1954_v42 }
 0x342   : > { %6734 = vpow2.f32 %v1943_v43  ;;  %v1945_v46 = vmul.f32 1.442695, %v1932_v45 }
 0x344   : > { %v7226_v47 = vpop.eup %6730  ;;  %6736 = vpow2.f32 %v1945_v46 }
 0x345   : > { %v1923_v48 = vpop.xlane.xlu0 %1922  ;;  %v1957_v50 = vsel %vm1902_vm2, %v7226_v47, 0.0 }
 0x346   : > { %v7230_v52 = vpop.eup %6732  ;;  %v1933_v53 = vsub.f32 %v1900_v17, %v1923_v48  ;;  %1958 = vadd.xlane.f32.xlu0 %v1957_v50 }
 0x347   : > { %v1926_v54 = vpop.xlane.xlu1 %1925  ;;  %v1960_v58 = vsel %vm1902_vm2, %v7230_v52, 0.0 }
 0x348   : > { %v1947_v55 = vmul.f32 1.442695, %v1933_v53  ;;  %v1934_v56 = vsub.f32 %v1901_v20, %v1926_v54 }
 0x349   : > { %v1424_v57 = vpop.permute.xlu0 %1423 }
 0x34a   : > { %6738 = vpow2.f32 %v1947_v55  ;;  %v1949_v59 = vmul.f32 1.442695, %v1934_v56  ;;  %v1434_v60 = vshrl.u32 %v1424_v57, 16  ;;  %1961 = vadd.xlane.f32.xlu0 %v1960_v58  ;;  %v1431_v61 = vpack.i.b16 %v1424_v57, %v7081_v38 }
 0x34b   : > { %v1426_v63 = vpop.permute.xlu1 %1425 }
 0x34c   : > { %v7236_v0 = vpop.eup %6734  ;;  %6740 = vpow2.f32 %v1949_v59  ;;  %v1435_v1 = vpack.i.b16 %v1434_v60, %v1433_v62  ;;  %v1445_v5 = vcombine.high %v1431_v61, %v7108_v49  ;;  %v1441_v9 = vshrl.u32 %v1426_v63, 16 }
 0x34d   : > { %v1963_v3 = vsel %vm1902_vm2, %v7236_v0, 0.0  ;;  %v1452_v14 = vrot.slane %v1431_v61, %v7111_v51 }
 0x34e   : > { %v7240_v4 = vpop.eup %6736  ;;  %1964 = vadd.xlane.f32.xlu1 %v1963_v3  ;;  %v1511_v13 = vcombine.high %v1435_v1, %v7108_v49  ;;  %v1459_v18 = vrot.slane %v1445_v5, %v7111_v51  ;;  %v1518_v24 = vrot.slane %v1435_v1, %v7111_v51 }
 0x34f   : > { %v1428_v6 = vpop.permute.xlu1 %1427  ;;  %v1966_v8 = vsel %vm1902_vm2, %v7240_v4, 0.0 }
 0x350   : > { %v1439_v10 = vpack.i.b16 %v1428_v6, %v1426_v63  ;;  %v1442_v38 = vshrl.u32 %v1428_v6, 16  ;;  %1967 = vadd.xlane.f32.xlu0 %v1966_v8  ;;  %v1525_v25 = vrot.slane %v1511_v13, %v7111_v51 }
 0x352   : > { %v1443_v15 = vpack.i.b16 %v1442_v38, %v1441_v9  ;;  %v1460_v16 = vcombine.high %v1439_v10, %v7108_v49  ;;  %v1467_v17 = vrot.slane %v1439_v10, %v7111_v51 }
 0x354   : > { %v7250_v19 = vpop.eup %6738  ;;  %v1474_v20 = vrot.slane %v1460_v16, %v7111_v51  ;;  %v1475_v21 = vcombine.low %v1452_v14, %v1467_v17  ;;  %v1476_v22 = vcombine.high %v1452_v14, %v1467_v17  ;;  %v1526_v23 = vcombine.high %v1443_v15, %v7108_v49 }
 0x355   : > { %v1533_v26 = vrot.slane %v1443_v15, %v7111_v51  ;;  %v1969_v27 = vsel %vm1902_vm2, %v7250_v19, 0.0 }
 0x356   : > { %v7259_v28 = vpop.eup %6740  ;;  %v1483_v29 = vrot.slane %v1475_v21, %v7119_v7  ;;  %v1490_v30 = vrot.slane %v1476_v22, %v7119_v7  ;;  %v1491_v11 = vcombine.low %v1459_v18, %v1474_v20  ;;  %v1492_v31 = vcombine.high %v1459_v18, %v1474_v20  ;;  %1970 = vadd.xlane.f32.xlu1 %v1969_v27 }
 0x357   : > { %v1540_v49 = vrot.slane %v1526_v23, %v7111_v51  ;;  %v1541_v32 = vcombine.low %v1518_v24, %v1533_v26  ;;  %v1542_v33 = vcombine.high %v1518_v24, %v1533_v26  ;;  %v1972_v34 = vsel %vm1902_vm2, %v7259_v28, 0.0 }
 0x358   : > { %v1499_v36 = vrot.slane %v1491_v11, %v7119_v7  ;;  %v1506_v37 = vrot.slane %v1492_v31, %v7119_v7  ;;  %v1577_v40 = vcombine.low %v1483_v29, %v1490_v30  ;;  %v6087_v41 = vcombine.high %v1483_v29, %v1490_v30  ;;  %1973 = vadd.xlane.f32.xlu0 %v1972_v34 }
 0x359   : > { %v1549_v42 = vrot.slane %v1541_v32, %v7119_v7  ;;  %v1556_v43 = vrot.slane %v1542_v33, %v7119_v7  ;;  %v1557_v45 = vcombine.low %v1525_v25, %v1540_v49  ;;  %v1558_v46 = vcombine.high %v1525_v25, %v1540_v49 }
 0x35a   : > { %v1584_v48 = vrot.slane %v1577_v40, %v7111_v51  ;;  %v1592_v50 = vrot.slane %v6087_v41, %v7111_v51  ;;  %v1593_v53 = vcombine.low %v1499_v36, %v1506_v37  ;;  %v6088_v54 = vcombine.high %v1499_v36, %v1506_v37 }
 0x35b   : > { %v1565_v55 = vrot.slane %v1557_v45, %v7119_v7  ;;  %v1572_v56 = vrot.slane %v1558_v46, %v7119_v7  ;;  %v1627_v57 = vcombine.low %v1549_v42, %v1556_v43  ;;  %v6089_v58 = vcombine.high %v1549_v42, %v1556_v43 }
 0x35c   : > { %v1600_v59 = vrot.slane %v1593_v53, %v7111_v51  ;;  %v1608_v60 = vrot.slane %v6088_v54, %v7111_v51  ;;  %v1609_v61 = vcombine.low %v1584_v48, %v1592_v50 }
 0x35d   : > { %v1634_v62 = vrot.slane %v1627_v57, %v7111_v51  ;;  %v1642_v63 = vrot.slane %v6089_v58, %v7111_v51  ;;  %v1643_v1 = vcombine.low %v1565_v55, %v1572_v56  ;;  %v6090_v3 = vcombine.high %v1565_v55, %v1572_v56 }
 0x35e   : > { %v1617_v5 = vcombine.low %v1600_v59, %v1608_v60  ;;  %v1616_v10 = vrot.slane %v1609_v61, %v7119_v7 }
 0x35f   : > { %v1650_v6 = vrot.slane %v1643_v1, %v7111_v51  ;;  %v1658_v8 = vrot.slane %v6090_v3, %v7111_v51  ;;  %v1659_v9 = vcombine.low %v1634_v62, %v1642_v63 }
 0x360   : > { %v1624_v38 = vrot.slane %v1617_v5, %v7119_v7 }
 0x361   : > { %v1667_v13 = vcombine.low %v1650_v6, %v1658_v8  ;;  %v1666_v16 = vrot.slane %v1659_v9, %v7119_v7 }
 0x362   : > { %v1625_v14 = vcombine.low %v1616_v10, %v1624_v38  ;;  %v1626_v15 = vcombine.high %v1616_v10, %v1624_v38 }
 0x363   : > { %v1674_v17 = vrot.slane %v1667_v13, %v7119_v7 }
 0x364   : > { %v1681_v21 = vshrl.u32 %v1625_v14, 16  ;;  %v1689_v22 = vshrl.u32 %v1626_v15, 16 }
 0x365   : > { %v1675_v18 = vcombine.low %v1666_v16, %v1674_v17  ;;  %v1676_v20 = vcombine.high %v1666_v16, %v1674_v17 }
 0x367   : > { %v1679_v23 = vpack.i.b16 %v1675_v18, %v1625_v14  ;;  %v1682_v24 = vshrl.u32 %v1675_v18, 16  ;;  %v1687_v25 = vpack.i.b16 %v1676_v20, %v1626_v15  ;;  %v1690_v26 = vshrl.u32 %v1676_v20, 16 }
 0x369   : > { %6404 = vmatpush3.bf16.msra.mxu0 %v1679_v23  ;;  %v1683_v27 = vpack.i.b16 %v1682_v24, %v1681_v21  ;;  %v1691_v29 = vpack.i.b16 %v1690_v26, %v1689_v22 }
 0x36a   : > { %6415 = vmatprep.subr.bf16.mxu0 %v8384_v39 }
 0x36b   : > { %6410 = vmatpush3.bf16.msra.mxu1 %v1683_v27 }
 0x36c   : > { %6421 = vmatprep.subr.bf16.mxu1 %v8384_v39 }
 0x3cb   : > { %v1953_v30 = vpop.xlane.xlu0 %1952 }
 0x3cc   : > { %6742 = vrcp.f32 %v1953_v30 }
 0x3cd   : > { %v1956_v11 = vpop.xlane.xlu1 %1955 }
 0x3ce   : > { %6744 = vrcp.f32 %v1956_v11 }
 0x3d3   : > { %v1959_v31 = vpop.xlane.xlu0 %1958 }
 0x3d4   : > { %6746 = vrcp.f32 %v1959_v31 }
 0x3d6   : > { %v6743_v49 = vpop.eup %6742 }
 0x3d7   : > { %v1962_v32 = vpop.xlane.xlu0 %1961  ;;  %v1983_v34 = vmul.f32 %v6743_v49, %v7218_v35 }
 0x3d8   : > { %v6745_v33 = vpop.eup %6744  ;;  %6748 = vrcp.f32 %v1962_v32 }
 0x3d9   : > { %v1984_v36 = vmul.f32 %v6745_v33, %v7222_v12 }
 0x3db   : > { %v1965_v37 = vpop.xlane.xlu1 %1964  ;;  %v1991_v40 = vpack.c.bf16 %v1984_v36, %v1983_v34 }
 0x3dc   : > { %6750 = vrcp.f32 %v1965_v37 }
 0x3dd   : > { %v1968_v41 = vpop.xlane.xlu0 %1967  ;;  %6406 = vmatmul.mubr.msk.bf16.vlgmr.msra.gmra.mrb[4].mxu0 %vm1902_vm2, %v1991_v40 }
 0x3de   : > { %6752 = vrcp.f32 %v1968_v41  ;;  %6416 = vmatpush3.bf16.msra.mxu0 %v1687_v25  ;;  %6417 = vmatprep.mubr.msk.bf16.mxu0 %vm6879_vm0, %v8384_v39  ;;  %v6747_v42 = vpop.eup %6746 }
 0x3df   : > { %v1985_v45 = vmul.f32 %v6747_v42, %v7226_v47 }
 0x3e2   : > { %v6749_v43 = vpop.eup %6748 }
 0x3e3   : > { %v1986_v46 = vmul.f32 %v6749_v43, %v7230_v52  ;;  %v1971_v35 = vpop.xlane.xlu1 %1970 }
 0x3e4   : > { %6754 = vrcp.f32 %v1971_v35 }
 0x3e5   : > { %v1974_v12 = vpop.xlane.xlu0 %1973  ;;  %v1992_v48 = vpack.c.bf16 %v1986_v46, %v1985_v45 }
 0x3e6   : > { %v6751_v50 = vpop.eup %6750  ;;  %6756 = vrcp.f32 %v1974_v12 }
 0x3e7   : > { %6412 = vmatmul.mubr.msk.bf16.vlgmr.msra.gmra.mrb[16].mxu1 %vm1902_vm2, %v1992_v48  ;;  %v1987_v54 = vmul.f32 %v6751_v50, %v7236_v0 }
 0x3e8   : > { %v6753_v53 = vpop.eup %6752  ;;  %6422 = vmatpush3.bf16.msra.mxu1 %v1691_v29  ;;  %6423 = vmatprep.mubr.msk.bf16.mxu1 %vm6879_vm0, %v8384_v39 }
 0x3e9   : > { %v1988_v55 = vmul.f32 %v6753_v53, %v7240_v4 }
 0x3eb   : > { %v1993_v47 = vpack.c.bf16 %v1988_v55, %v1987_v54 }
 0x3ed   : > { %6418 = vmatmul.mubr.msk.bf16.vlgmr.msra.gmra.mrb[8].mxu0 %vm1902_vm2, %v1993_v47 }
 0x3ee   : > { %v6755_v52 = vpop.eup %6754  ;;  %2804 = vmatprep.mubr.bf16.mxu0 %v8390_v2 }
 0x3ef   : > { %v1989_v57 = vmul.f32 %v6755_v52, %v7250_v19 }
 0x3f0   : > { %v6757_v56 = vpop.eup %6756 }
 0x3f1   : > { %v1990_v58 = vmul.f32 %v6757_v56, %v7259_v28 }
 0x3f3   : > { %v1994_v59 = vpack.c.bf16 %v1990_v58, %v1989_v57 }
 0x3f5   : > { %6424 = vmatmul.mubr.msk.bf16.vlgmr.msra.gmra.mrb[20].mxu1 %vm1902_vm2, %v1994_v59 }
 0x4b0   : > { %v2032_v60 = vpop.f32.mrb[4].mxu0 }
 0x4b1   : > { %v6407_v61 = vpop.f32.mrb[5].mxu0 }
 0x4b2   : > { %v2035_v62 = vpop.f32.mrb[6].mxu0 }
 0x4b3   : > { %v6408_v0 = vpop.f32.mrb[7].mxu0 }
 0x4ba   : > { %v2076_v63 = vpop.f32.mrb[16].mxu1 }
 0x4bb   : > { %v6413_v4 = vpop.f32.mrb[17].mxu1 }
 0x4bc   : > { %v2079_v1 = vpop.f32.mrb[18].mxu1 }
 0x4bd   : > { %v6414_v3 = vpop.f32.mrb[19].mxu1 }
 0x4c0   : > { %v2120_v5 = vpop.f32.mrb[8].mxu0 }
 0x4c1   : > { %v2171_v6 = vcombine.low %v2032_v60, %v2120_v5  ;;  %v2172_v8 = vcombine.high %v2032_v60, %v2120_v5  ;;  %v6419_v9 = vpop.f32.mrb[9].mxu0 }
 0x4c2   : > { %v2123_v10 = vpop.f32.mrb[10].mxu0 }
 0x4c3   : > { %v2239_v38 = vcombine.low %v2035_v62, %v2123_v10  ;;  %v2240_v19 = vcombine.high %v2035_v62, %v2123_v10  ;;  %v6420_v13 = vpop.f32.mrb[11].mxu0  ;;  %v2179_v17 = vrot.slane %v2171_v6, %v7111_v51  ;;  %v2186_v18 = vrot.slane %v2172_v8, %v7111_v51 }
 0x4c5   : > { %v2247_v11 = vrot.slane %v2239_v38, %v7111_v51  ;;  %v2254_v31 = vrot.slane %v2240_v19, %v7111_v51 }
 0x4c8   : > { %v2164_v28 = vpop.f32.mrb[20].mxu1 }
 0x4c9   : > { %v2187_v14 = vcombine.low %v2076_v63, %v2164_v28  ;;  %v2188_v15 = vcombine.high %v2076_v63, %v2164_v28  ;;  %v6425_v16 = vpop.f32.mrb[21].mxu1 }
 0x4ca   : > { %v2167_v20 = vpop.f32.mrb[22].mxu1 }
 0x4cb   : > { %v2195_v21 = vrot.slane %v2187_v14, %v7111_v51  ;;  %v2202_v22 = vrot.slane %v2188_v15, %v7111_v51  ;;  %v2255_v23 = vcombine.low %v2079_v1, %v2167_v20  ;;  %v2256_v24 = vcombine.high %v2079_v1, %v2167_v20  ;;  %v6426_v25 = vpop.f32.mrb[23].mxu1 }
 0x4cd   : > { %v2203_v26 = vcombine.low %v2179_v17, %v2195_v21  ;;  %v2204_v27 = vcombine.high %v2179_v17, %v2195_v21  ;;  %v2219_v29 = vcombine.low %v2186_v18, %v2202_v22  ;;  %v2220_v30 = vcombine.high %v2186_v18, %v2202_v22 }
 0x4ce   : > { %v2263_v49 = vrot.slane %v2255_v23, %v7111_v51  ;;  %v2270_v32 = vrot.slane %v2256_v24, %v7111_v51 }
 0x4cf   : > { %v2211_v33 = vrot.slane %v2203_v26, %v7119_v7  ;;  %v2218_v34 = vrot.slane %v2204_v27, %v7119_v7  ;;  %v2227_v36 = vrot.slane %v2219_v29, %v7119_v7  ;;  %v2234_v37 = vrot.slane %v2220_v30, %v7119_v7 }
 0x4d0   : > { %v2271_v40 = vcombine.low %v2247_v11, %v2263_v49  ;;  %v2272_v41 = vcombine.high %v2247_v11, %v2263_v49  ;;  %v2287_v42 = vcombine.low %v2254_v31, %v2270_v32  ;;  %v2288_v43 = vcombine.high %v2254_v31, %v2270_v32  ;;  %v6107_v49 = vld [vmem:[%s8362_s5] ss:$0 sm:$0xff] }
 0x4d1   : > { %v2307_v45 = vcombine.low %v2211_v33, %v2218_v34  ;;  %v6103_v46 = vcombine.high %v2211_v33, %v2218_v34  ;;  %v2323_v35 = vcombine.low %v2227_v36, %v2234_v37  ;;  %v6104_v12 = vcombine.high %v2227_v36, %v2234_v37 }
 0x4d2   : > { %v2279_v48 = vrot.slane %v2271_v40, %v7119_v7  ;;  %v2286_v50 = vrot.slane %v2272_v41, %v7119_v7  ;;  %v2295_v53 = vrot.slane %v2287_v42, %v7119_v7  ;;  %v2302_v54 = vrot.slane %v2288_v43, %v7119_v7 }
 0x4d3   : > { %v2314_v55 = vrot.slane %v2307_v45, %v7111_v51  ;;  %v2322_v47 = vrot.slane %v6103_v46, %v7111_v51  ;;  %v2330_v52 = vrot.slane %v2323_v35, %v7111_v51  ;;  %v2338_v56 = vrot.slane %v6104_v12, %v7111_v51 }
 0x4d4   : > { %v2375_v57 = vcombine.low %v2279_v48, %v2286_v50  ;;  %v6105_v58 = vcombine.high %v2279_v48, %v2286_v50  ;;  %v2391_v59 = vcombine.low %v2295_v53, %v2302_v54  ;;  %v6106_v60 = vcombine.high %v2295_v53, %v2302_v54 }
 0x4d5   : > { %v2339_v61 = vcombine.low %v2314_v55, %v2322_v47  ;;  %v2355_v62 = vcombine.low %v2330_v52, %v2338_v56  ;;  %v2340_v0 = vcombine.high %v2314_v55, %v2322_v47  ;;  %v2356_v63 = vcombine.high %v2330_v52, %v2338_v56 }
 0x4d6   : > { %v2382_v4 = vrot.slane %v2375_v57, %v7111_v51  ;;  %v2390_v1 = vrot.slane %v6105_v58, %v7111_v51  ;;  %v2398_v3 = vrot.slane %v2391_v59, %v7111_v51  ;;  %v2406_v5 = vrot.slane %v6106_v60, %v7111_v51  ;;  %v6108_v60 = vld [vmem:[%s8363_s6] ss:$0 sm:$0xff] }
 0x4d7   : > { %v2347_v6 = vrot.slane %v2339_v61, %v7119_v7  ;;  %v2363_v8 = vrot.slane %v2355_v62, %v7119_v7  ;;  %v2354_v9 = vrot.slane %v2340_v0, %v7119_v7  ;;  %v2370_v10 = vrot.slane %v2356_v63, %v7119_v7  ;;  %v6109_v62 = vld [vmem:[%s8364_s7] ss:$0 sm:$0xff] }
 0x4d8   : > { %v2407_v38 = vcombine.low %v2382_v4, %v2390_v1  ;;  %v2423_v19 = vcombine.low %v2398_v3, %v2406_v5  ;;  %v2408_v13 = vcombine.high %v2382_v4, %v2390_v1  ;;  %v2424_v28 = vcombine.high %v2398_v3, %v2406_v5  ;;  %v6243_v0 = vld [vmem:[%s668_s20] sm:$0xff]  }
 0x4d9   : > { %v2372_v14 = vcombine.high %v2347_v6, %v2363_v8  ;;  %v2373_v15 = vcombine.low %v2354_v9, %v2370_v10  ;;  %v2374_v16 = vcombine.high %v2354_v9, %v2370_v10  ;;  %v2371_v17 = vcombine.low %v2347_v6, %v2363_v8  ;;  %v687_v8 = vld [vmem:[%s668_s20 + $0x8] sm:$0x1] }
 0x4da   : > { %v2415_v18 = vrot.slane %v2407_v38, %v7119_v7  ;;  %v2431_v20 = vrot.slane %v2423_v19, %v7119_v7  ;;  %v2422_v21 = vrot.slane %v2408_v13, %v7119_v7  ;;  %v2438_v22 = vrot.slane %v2424_v28, %v7119_v7 }
 0x4db   : > { %2445 = vrot.lane.b32.xlu1 %v2372_v14, %s6875_s3  ;;  %v6244_v5 = vunpack.c.l.bf16 %v6243_v0  ;;  %v690_v13 = vunpack.c.l.bf16 %v687_v8  ;;  %v6245_v28 = vunpack.c.h.bf16 %v6243_v0 }
 0x4dc   : > { %v2440_v23 = vcombine.high %v2415_v18, %v2431_v20  ;;  %v2441_v24 = vcombine.low %v2422_v21, %v2438_v22  ;;  %v2442_v25 = vcombine.high %v2422_v21, %v2438_v22  ;;  %v2439_v26 = vcombine.low %v2415_v18, %v2431_v20  ;;  %v6606_v20 = vld [vmem:[%s8367_s10] ss:$12 sps:$4 sm:$0xff]   ;;  %v6608_v21 = vld [vmem:[%s8367_s10 + $0x4] ss:$12 sps:$4 sm:$0xff]   ;;  %v6609_v22 = vld [vmem:[%s8367_s10 + $0x8] ss:$12 sps:$4 sm:$0xff]  }
 0x4dd   : > { %2772 = vmatprep.subr.bf16.mxu0 %v6608_v21  ;;  %6427 = vmatprep.subr.bf16.mxu1 %v6609_v22 }
 0x4de   : > { %2447 = vrot.lane.b32.xlu0 %v2440_v23, %s6875_s3  ;;  %2773 = vmatpush1.bf16.msra.mxu0 %v6606_v20 }
 0x4df   : > { %2453 = vrot.lane.b32.xlu1 %v2373_v15, %s6877_s27  ;;  %6428 = vmatpush3.bf16.msra.mxu1 %v6609_v22 }
 0x4e2   : > { %2461 = vrot.lane.b32.xlu0 %v2374_v16, %s6876_s26 }
 0x4e3   : > { %2455 = vrot.lane.b32.xlu1 %v2441_v24, %s6877_s27 }
 0x4e7   : > { %2463 = vrot.lane.b32.xlu1 %v2442_v25, %s6876_s26 }
 0x54d   : > { %v2446_v27 = vpop.permute.xlu1 %2445 }
 0x54e   : > { %v2467_v30 = vsel %vm1696_vm1, %v2371_v17, %v2446_v27 }
 0x550   : > { %v2448_v29 = vpop.permute.xlu0 %2447 }
 0x551   : > { %v2454_v11 = vpop.permute.xlu1 %2453  ;;  %v2468_v37 = vsel %vm1696_vm1, %v2439_v26, %v2448_v29 }
 0x552   : > { %v2470_v31 = vsel %vm2469_vm3, %v2467_v30, %v2454_v11 }
 0x554   : > { %v2462_v32 = vpop.permute.xlu0 %2461 }
 0x555   : > { %v2473_v33 = vsel %vm2472_vm4, %v2470_v31, %v2462_v32  ;;  %v2456_v34 = vpop.permute.xlu1 %2455 }
 0x556   : > { %v2482_v36 = vmul.f32 %v6107_v49, %v2473_v33  ;;  %v2471_v40 = vsel %vm2469_vm3, %v2468_v37, %v2456_v34  ;;  %v6610_v37 = vld [vmem:[%s8367_s10 + $0x18] ss:$12 sps:$4 sm:$0xff]  }
 0x558   : > { %2486 = vadd.xlane.f32.xlu0 %v2482_v36 }
 0x559   : > { %v2464_v41 = vpop.permute.xlu1 %2463 }
 0x55a   : > { %v2474_v42 = vsel %vm2472_vm4, %v2471_v40, %v2464_v41  ;;  %v6613_v40 = vld [vmem:[%s8367_s10 + $0x20] ss:$12 sps:$4 sm:$0xff]  }
 0x55b   : > { %v2483_v43 = vmul.f32 %v6107_v49, %v2474_v42  ;;  %6429 = vmatprep.subr.bf16.mxu1 %v6613_v40  ;;  %v6616_v41 = vld [vmem:[%s8367_s10 + $0x34] ss:$12 sps:$4 sm:$0xff]   ;;  %v6614_v42 = vld [vmem:[%s8367_s10 + $0x30] ss:$12 sps:$4 sm:$0xff]  }
 0x55c   : > { %6430 = vmatpush3.bf16.msra.mxu1 %v6613_v40 }
 0x55d   : > { %2488 = vadd.xlane.f32.xlu1 %v2483_v43 }
 0x5e5   : > { %v2487_v45 = vpop.xlane.xlu0 %2486 }
 0x5e6   : > { %v2491_v46 = vmul.f32 0.0078125, %v2487_v45  ;;  %v6620_v45 = vld [vmem:[%s8367_s10 + $0x4c] ss:$12 sps:$4 sm:$0xff]  }
 0x5e8   : > { %v2493_v35 = vsub.f32 %v2482_v36, %v2491_v46  ;;  %v6612_v36 = vld [vmem:[%s8367_s10 + $0x1c] ss:$12 sps:$4 sm:$0xff]  }
 0x5e9   : > { %2774 = vmatprep.subr.bf16.mxu0 %v6612_v36  ;;  %v6618_v46 = vld [vmem:[%s8367_s10 + $0x48] ss:$12 sps:$4 sm:$0xff]  }
 0x5ea   : > { %v2489_v12 = vpop.xlane.xlu1 %2488  ;;  %v2495_v48 = vmul.f32 %v2493_v35, %v2493_v35  ;;  %2775 = vmatpush1.bf16.msra.mxu0 %v6610_v37 }
 0x5eb   : > { %v2492_v50 = vmul.f32 0.0078125, %v2489_v12  ;;  %2776 = vmatprep.subr.bf16.mxu0 %v6616_v41  ;;  %v6624_v12 = vld [vmem:[%s8367_s10 + $0x64] ss:$12 sps:$4 sm:$0xff]  }
 0x5ec   : > { %2497 = vadd.xlane.f32.xlu0 %v2495_v48  ;;  %v6622_v48 = vld [vmem:[%s8367_s10 + $0x60] ss:$12 sps:$4 sm:$0xff]  }
 0x5ed   : > { %v2494_v53 = vsub.f32 %v2483_v43, %v2492_v50  ;;  %v6617_v43 = vld [vmem:[%s8367_s10 + $0x38] ss:$12 sps:$4 sm:$0xff]   ;;  %v6625_v50 = vld [vmem:[%s8367_s10 + $0x68] ss:$12 sps:$4 sm:$0xff]  }
 0x5ee   : > { %2777 = vmatpush1.bf16.msra.mxu0 %v6614_v42  ;;  %6431 = vmatprep.subr.bf16.mxu1 %v6617_v43 }
 0x5ef   : > { %v2496_v54 = vmul.f32 %v2494_v53, %v2494_v53  ;;  %6432 = vmatpush3.bf16.msra.mxu1 %v6617_v43  ;;  %2778 = vmatprep.subr.bf16.mxu0 %v6620_v45 }
 0x5f1   : > { %2499 = vadd.xlane.f32.xlu0 %v2496_v54  ;;  %v6626_v54 = vld [vmem:[%s8367_s10 + $0x78] ss:$12 sps:$4 sm:$0xff]  }
 0x5f2   : > { %2779 = vmatpush1.bf16.msra.mxu0 %v6618_v46 }
 0x5f3   : > { %2780 = vmatprep.subr.bf16.mxu0 %v6624_v12 }
 0x5f6   : > { %2781 = vmatpush1.bf16.msra.mxu0 %v6622_v48 }
 0x679   : > { %v2498_v55 = vpop.xlane.xlu0 %2497 }
 0x67a   : > { %v2501_v47 = vmul.f32 0.0078125, %v2498_v55  ;;  %v6629_v55 = vld [vmem:[%s8367_s10 + $0x80] ss:$12 sps:$4 sm:$0xff]  }
 0x67c   : > { %v2503_v52 = vadd.f32 1e-05, %v2501_v47  ;;  %v6630_v47 = vld [vmem:[%s8367_s10 + $0x90] ss:$12 sps:$4 sm:$0xff]  }
 0x67e   : > { %6758 = vrsqrt.f32 %v2503_v52  ;;  %v2500_v56 = vpop.xlane.xlu0 %2499  ;;  %v6632_v52 = vld [vmem:[%s8367_s10 + $0x94] ss:$12 sps:$4 sm:$0xff]  }
 0x67f   : > { %v2502_v57 = vmul.f32 0.0078125, %v2500_v56  ;;  %v6633_v56 = vld [vmem:[%s8367_s10 + $0x98] ss:$12 sps:$4 sm:$0xff]  }
 0x681   : > { %v2504_v58 = vadd.f32 1e-05, %v2502_v57  ;;  %v6636_v57 = vld [vmem:[%s8367_s10 + $0xac] ss:$12 sps:$4 sm:$0xff]  }
 0x683   : > { %6760 = vrsqrt.f32 %v2504_v58  ;;  %v6637_v58 = vld [vmem:[%s8367_s10 + $0xb0] ss:$12 sps:$4 sm:$0xff]  }
 0x688   : > { %v6759_v59 = vpop.eup %6758 }
 0x689   : > { %v2507_v61 = vmul.f32 %v6759_v59, %v2493_v35  ;;  %v6621_v35 = vld [vmem:[%s8367_s10 + $0x50] ss:$12 sps:$4 sm:$0xff]   ;;  %v6634_v59 = vld [vmem:[%s8367_s10 + $0xa8] ss:$12 sps:$4 sm:$0xff]  }
 0x68a   : > { %6433 = vmatprep.subr.bf16.mxu1 %v6621_v35 }
 0x68b   : > { %v2515_v63 = vmul.f32 %v6108_v60, %v2507_v61  ;;  %6434 = vmatpush3.bf16.msra.mxu1 %v6621_v35 }
 0x68c   : > { %6435 = vmatprep.subr.bf16.mxu1 %v6625_v50 }
 0x68d   : > { %v6761_v4 = vpop.eup %6760  ;;  %v2523_v1 = vadd.f32 %v6109_v62, %v2515_v63 }
 0x68e   : > { %v2508_v3 = vmul.f32 %v6761_v4, %v2494_v53  ;;  %v6628_v53 = vld [vmem:[%s8367_s10 + $0x7c] ss:$12 sps:$4 sm:$0xff]  }
 0x68f   : > { %v2528_v6 = vrot.slane %v2523_v1, 7  ;;  %6436 = vmatpush3.bf16.msra.mxu1 %v6625_v50  ;;  %2782 = vmatprep.subr.bf16.mxu0 %v6628_v53 }
 0x690   : > { %v2516_v9 = vmul.f32 %v6108_v60, %v2508_v3  ;;  %2783 = vmatpush1.bf16.msra.mxu0 %v6626_v54  ;;  %6437 = vmatprep.subr.bf16.mxu1 %v6629_v55 }
 0x691   : > { %v2534_v10 = vsel %vm2527_vm5, 0.0, %v2528_v6  ;;  %2784 = vmatprep.subr.bf16.mxu0 %v6632_v52 }
 0x692   : > { %v2524_v38 = vadd.f32 %v6109_v62, %v2516_v9  ;;  %v7363_v19 = vadd.f32 %v6244_v5, %v2534_v10  ;;  %v6110_v9 = vld [vmem:[%s8365_s8] ss:$0 sm:$0xff] }
 0x693   : > { %6438 = vmatpush3.bf16.msra.mxu1 %v6629_v55 }
 0x694   : > { %8410 = vst [vmem:[#allocation7_spill] sm:$0xff] %v7363_v19  ;;  %2540 = vadd.xlane.f32.xlu1 %v7363_v19  ;;  %v2529_v14 = vrot.slane %v2524_v38, 7  ;;  %6439 = vmatprep.subr.bf16.mxu1 %v6633_v56 }
 0x695   : > { %2785 = vmatpush1.bf16.msra.mxu0 %v6630_v47 }
 0x696   : > { %v2530_v15 = vsel %vm2527_vm5, %v2528_v6, %v2529_v14  ;;  %v7367_v16 = vadd.f32 %v2529_v14, %v690_v13  ;;  %2786 = vmatprep.subr.bf16.mxu0 %v6636_v57  ;;  %v6111_v14 = vld [vmem:[%s8366_s9] ss:$0 sm:$0xff] }
 0x697   : > { %v7369_v17 = vadd.f32 %v6245_v28, %v2530_v15  ;;  %6440 = vmatpush3.bf16.msra.mxu1 %v6633_v56 }
 0x698   : > { %8411 = vst [vmem:[#allocation8_spill] sm:$0xff] %v7367_v16  ;;  %v2544_v18 = vsel %vm2527_vm5, %v7367_v16, 0.0  ;;  %6441 = vmatprep.subr.bf16.mxu1 %v6637_v58 }
 0x699   : > { %8412 = vst [vmem:[#allocation9_spill] sm:$0xff] %v7369_v17  ;;  %2542 = vadd.xlane.f32.xlu0 %v7369_v17  ;;  %2545 = vadd.xlane.f32.xlu1 %v2544_v18 }
 0x69a   : > { %2787 = vmatpush1.bf16.msra.mxu0 %v6634_v59 }
 0x69b   : > { %6442 = vmatpush3.bf16.msra.mxu1 %v6637_v58 }
 0x721   : > { %v2541_v23 = vpop.xlane.xlu1 %2540 }
 0x722   : > { %v2547_v24 = vmul.f32 0.0078125, %v2541_v23 }
 0x724   : > { %v7384_v25 = vsub.f32 %v7363_v19, %v2547_v24 }
 0x726   : > { %v2543_v26 = vpop.xlane.xlu0 %2542  ;;  %v2546_v27 = vpop.xlane.xlu1 %2545  ;;  %v2553_v29 = vmul.f32 %v7384_v25, %v7384_v25 }
 0x727   : > { %v2548_v30 = vmul.f32 0.0078125, %v2543_v26  ;;  %v2549_v11 = vmul.f32 0.0078125, %v2546_v27  ;;  %v8382_v26 = vsub.s32 2, %v7104_v44  ;;  %v2627_v27 = vld [vmem:[%s8368_s11] sm:$0x7] }
 0x728   : > { %2556 = vadd.xlane.f32.xlu0 %v2553_v29  ;;  %v8383_v29 = vsub.s32 0, %v7104_v44 }
 0x729   : > { %v7389_v31 = vsub.f32 %v7369_v17, %v2548_v30  ;;  %v7392_v49 = vsub.f32 %v7367_v16, %v2549_v11  ;;  %v8381_v30 = vsub.s32 1, %v7104_v44  ;;  %v2640_v11 = vrot.slane %v2627_v27, %v8382_v26 }
 0x72b   : > { %v2554_v32 = vmul.f32 %v7389_v31, %v7389_v31  ;;  %v2555_v33 = vmul.f32 %v7392_v49, %v7392_v49 }
 0x72d   : > { %2558 = vadd.xlane.f32.xlu1 %v2554_v32  ;;  %v2560_v34 = vsel %vm2527_vm5, %v2555_v33, 0.0  ;;  %v2636_v32 = vrot.slane %v2627_v27, %v8381_v30 }
 0x72e   : > { %2561 = vadd.xlane.f32.xlu0 %v2560_v34 }
 0x7b5   : > { %v2557_v60 = vpop.xlane.xlu0 %2556 }
 0x7b6   : > { %v2563_v61 = vmul.f32 0.0078125, %v2557_v60 }
 0x7b8   : > { %v2566_v62 = vadd.f32 1e-06, %v2563_v61 }
 0x7ba   : > { %6762 = vrsqrt.f32 %v2566_v62  ;;  %v2559_v0 = vpop.xlane.xlu1 %2558 }
 0x7bb   : > { %v2564_v63 = vmul.f32 0.0078125, %v2559_v0  ;;  %v2562_v4 = vpop.xlane.xlu0 %2561 }
 0x7bc   : > { %v2565_v1 = vmul.f32 0.0078125, %v2562_v4 }
 0x7bd   : > { %v2567_v3 = vadd.f32 1e-06, %v2564_v63 }
 0x7be   : > { %v2568_v5 = vadd.f32 1e-06, %v2565_v1 }
 0x7bf   : > { %6764 = vrsqrt.f32 %v2567_v3 }
 0x7c0   : > { %6766 = vrsqrt.f32 %v2568_v5 }
 0x7c4   : > { %v6763_v6 = vpop.eup %6762 }
 0x7c5   : > { %v2572_v8 = vmul.f32 %v6763_v6, %v7384_v25 }
 0x7c7   : > { %v2581_v28 = vmul.f32 %v6110_v9, %v2572_v8 }
 0x7c9   : > { %v6765_v10 = vpop.eup %6764  ;;  %v2590_v21 = vadd.f32 %v6111_v14, %v2581_v28 }
 0x7ca   : > { %v6767_v38 = vpop.eup %6766  ;;  %v2573_v13 = vmul.f32 %v6765_v10, %v7389_v31  ;;  %v2632_v31 = vrot.slane %v2627_v27, %v8383_v29 }
 0x7cb   : > { %v2574_v15 = vmul.f32 %v6767_v38, %v7392_v49 }
 0x7cc   : > { %v2582_v18 = vmul.f32 %v6110_v9, %v2573_v13 }
 0x7cd   : > { %v2583_v20 = vmul.f32 %v6110_v9, %v2574_v15 }
 0x7ce   : > { %v2591_v22 = vadd.f32 %v6111_v14, %v2582_v18 }
 0x7cf   : > { %v2592_v23 = vadd.f32 %v6111_v14, %v2583_v20 }
 0x7d0   : > { %v2593_v24 = vpack.c.bf16 %v2591_v22, %v2590_v21 }
 0x7d1   : > { %v2594_v25 = vpack.c.bf16 %v2592_v23, %v2592_v23 }
 0x7d2   : > { %2805 = vmatmul.mubr.bf16.vlgmr.msra.gmra.mrb[12].mxu0 %v2593_v24  ;;  %6443 = vmatprep.mubr.bf16.mxu1 %v2593_v24 }
 0x7d3   : > { %6444 = vmatmul.mubr.bf16.vlgmr.msra.gmra.mrb[24].mxu1 %v2594_v25  ;;  %2814 = vmatprep.mubr.bf16.mxu0 %v8390_v2 }
 0x7da   : > { %2815 = vmatmul.mubr.bf16.gmra.mrb[16].mxu0 %v2594_v25 }
 0x8a5   : > { %v2806_v49 = vpop.f32.mrb[12].mxu0 }
 0x8a6   : > { %v2808_v33 = vpop.f32.mrb[13].mxu0  ;;  %v6445_v34 = vpop.f32.mrb[24].mxu1  ;;  %v2807_v41 = vadd.f32 %v2806_v49, %v2632_v31 }
 0x8a7   : > { %v7484_v36 = vadd.f32 %v6445_v34, %v2640_v11  ;;  %v2810_v37 = vpop.f32.mrb[14].mxu0  ;;  %v2857_v40 = vpop.f32.mrb[25].mxu1  ;;  %v2809_v46 = vadd.f32 %v2808_v33, %v2636_v32 }
 0x8a8   : > { %v2811_v42 = vadd.f32 %v2810_v37, %v2632_v31  ;;  %v2812_v43 = vpop.f32.mrb[15].mxu0  ;;  %v6446_v45 = vpop.f32.mrb[26].mxu1  ;;  %v2858_v50 = vadd.f32 %v2857_v40, %v2640_v11 }
 0x8a9   : > { %v2813_v35 = vadd.f32 %v2812_v43, %v2636_v32  ;;  %v2860_v12 = vpop.f32.mrb[27].mxu1 }
 0x8aa   : > { %v2871_v48 = vpack.c.bf16 %v2811_v42, %v2807_v41  ;;  %v2861_v53 = vadd.f32 %v2860_v12, %v2640_v11 }
 0x8ab   : > { %v3237_v54 = vpack.c.bf16 %v2813_v35, %v2809_v46 }
 0x8ac   : > { %v7486_v55 = vpack.c.bf16 %v2861_v53, %v2858_v50  ;;  %v2890_v25 = vcombine.high %v2871_v48, %v8390_v2  ;;  %v2897_v45 = vrot.slane %v2871_v48, %v7111_v51 }
 0x8ad   : > { %v2816_v47 = vpop.f32.mrb[16].mxu0  ;;  %3246 = vrot.lane.b32.xlu0 %v3237_v54, %s6877_s27  ;;  %3241 = vrot.lane.b32.xlu1 %v3237_v54, %s6876_s26  ;;  %v3256_v0 = vcombine.high %v3237_v54, %v8390_v2  ;;  %v3263_v3 = vrot.slane %v3237_v54, %v7111_v51 }
 0x8ae   : > { %v2818_v52 = vpop.f32.mrb[17].mxu0  ;;  %v2817_v60 = vadd.f32 %v2816_v47, %v2632_v31  ;;  %v7546_v50 = vrot.slane %v2890_v25, %v7111_v51 }
 0x8af   : > { %v2819_v56 = vadd.f32 %v2818_v52, %v2636_v32  ;;  %v2820_v57 = vpop.f32.mrb[18].mxu0  ;;  %v3270_v6 = vrot.slane %v3256_v0, %v7111_v51 }
 0x8b0   : > { %v2821_v58 = vpop.f32.mrb[19].mxu0  ;;  %v7500_v61 = vpack.c.bf16 %v2817_v60, %v2817_v60 }
 0x8b1   : > { %3251 = vrot.lane.b32.xlu1 %v3237_v54, %s6875_s3  ;;  %2880 = vrot.lane.b32.xlu0 %v2871_v48, %s6877_s27  ;;  %v7492_v59 = vpack.c.bf16 %v2819_v56, %v2819_v56 }
 0x8b5   : > { %3243 = vrot.lane.b32.xlu0 %v7492_v59, %s6876_s26  ;;  %2875 = vrot.lane.b32.xlu1 %v2871_v48, %s6876_s26 }
 0x8b9   : > { %3253 = vrot.lane.b32.xlu0 %v7492_v59, %s6875_s3  ;;  %2885 = vrot.lane.b32.xlu1 %v2871_v48, %s6875_s3 }
 0x8bd   : > { %2882 = vrot.lane.b32.xlu0 %v7500_v61, %s6877_s27  ;;  %3248 = vrot.lane.b32.xlu1 %v7492_v59, %s6877_s27 }
 0x8c1   : > { %2877 = vrot.lane.b32.xlu1 %v7500_v61, %s6876_s26 }
 0x8c5   : > { %2887 = vrot.lane.b32.xlu1 %v7500_v61, %s6875_s3 }
 0x8c9   : > { %3607 = vrot.lane.b32.xlu1 %v7486_v55, %s6876_s26 }
 0x91f   : > { %v3247_v62 = vpop.permute.xlu0 %3246  ;;  %v3242_v63 = vpop.permute.xlu1 %3241 }
 0x920   : > { %v3271_v4 = vcombine.high %v3247_v62, %v8390_v2  ;;  %v3278_v1 = vrot.slane %v3247_v62, %v7111_v51  ;;  %v3322_v38 = vcombine.high %v3242_v63, %v8390_v2  ;;  %v3329_v13 = vrot.slane %v3242_v63, %v7111_v51 }
 0x922   : > { %v3285_v5 = vrot.slane %v3271_v4, %v7111_v51  ;;  %v3286_v8 = vcombine.low %v3263_v3, %v3278_v1  ;;  %v3287_v9 = vcombine.high %v3263_v3, %v3278_v1  ;;  %v3336_v24 = vrot.slane %v3322_v38, %v7111_v51 }
 0x923   : > { %v3252_v10 = vpop.permute.xlu1 %3251  ;;  %v2881_v41 = vpop.permute.xlu0 %2880 }
 0x924   : > { %v3302_v28 = vcombine.low %v3270_v6, %v3285_v5  ;;  %v3303_v14 = vcombine.high %v3270_v6, %v3285_v5  ;;  %v3337_v15 = vcombine.high %v3252_v10, %v8390_v2  ;;  %v3344_v18 = vrot.slane %v3252_v10, %v7111_v51 }
 0x925   : > { %v3294_v20 = vrot.slane %v3286_v8, %v7119_v7  ;;  %v3301_v21 = vrot.slane %v3287_v9, %v7119_v7  ;;  %v2905_v47 = vcombine.high %v2881_v41, %v8390_v2  ;;  %v2912_v52 = vrot.slane %v2881_v41, %v7111_v51 }
 0x926   : > { %v3351_v22 = vrot.slane %v3337_v15, %v7111_v51  ;;  %v3352_v23 = vcombine.low %v3329_v13, %v3344_v18  ;;  %v7528_v27 = vrot.slane %v3302_v28, %v7119_v7  ;;  %v7531_v11 = vrot.slane %v3303_v14, %v7119_v7 }
 0x927   : > { %v3353_v31 = vcombine.high %v3329_v13, %v3344_v18  ;;  %v3318_v34 = vcombine.high %v3294_v20, %v8390_v2  ;;  %v3319_v37 = vcombine.high %v3301_v21, %v8390_v2  ;;  %v3411_v53 = vshrl.u32 %v3294_v20, 16  ;;  %v2876_v60 = vpop.permute.xlu1 %2875  ;;  %v3244_v25 = vpop.permute.xlu0 %3243 }
 0x928   : > { %v3360_v49 = vrot.slane %v3352_v23, %v7119_v7  ;;  %v3368_v32 = vcombine.low %v3336_v24, %v3351_v22  ;;  %v3369_v33 = vcombine.high %v3336_v24, %v3351_v22  ;;  %v3320_v46 = vcombine.high %v7528_v27, %v8390_v2 }
 0x929   : > { %v3367_v40 = vrot.slane %v3353_v31, %v7119_v7  ;;  %v3321_v35 = vcombine.high %v7531_v11, %v8390_v2  ;;  %v3419_v56 = vshrl.u32 %v3318_v34, 16  ;;  %v3427_v48 = vshrl.u32 %v3301_v21, 16 }
 0x92a   : > { %v3376_v42 = vrot.slane %v3368_v32, %v7119_v7  ;;  %v3384_v43 = vcombine.high %v3360_v49, %v8390_v2  ;;  %v3383_v12 = vrot.slane %v3369_v33, %v7119_v7  ;;  %v3435_v57 = vshrl.u32 %v3319_v37, 16 }
 0x92b   : > { %v3385_v54 = vcombine.high %v3367_v40, %v8390_v2  ;;  %v3412_v58 = vshrl.u32 %v3360_v49, 16  ;;  %v3443_v62 = vshrl.u32 %v7528_v27, 16  ;;  %v3459_v0 = vshrl.u32 %v7531_v11, 16 }
 0x92c   : > { %v3386_v63 = vcombine.high %v3376_v42, %v8390_v2  ;;  %v3420_v4 = vshrl.u32 %v3384_v43, 16  ;;  %v3451_v1 = vshrl.u32 %v3320_v46, 16  ;;  %v3467_v3 = vshrl.u32 %v3321_v35, 16 }
 0x92d   : > { %v3387_v5 = vcombine.high %v3383_v12, %v8390_v2  ;;  %v3409_v6 = vpack.i.b16 %v3360_v49, %v3294_v20  ;;  %v3425_v8 = vpack.i.b16 %v3367_v40, %v3301_v21  ;;  %v3428_v9 = vshrl.u32 %v3367_v40, 16  ;;  %v2886_v49 = vpop.permute.xlu1 %2885 }
 0x92e   : > { %v3436_v10 = vshrl.u32 %v3385_v54, 16  ;;  %v2919_v38 = vrot.slane %v2905_v47, %v7111_v51  ;;  %v7556_v13 = vpack.i.b16 %v3412_v58, %v3411_v53  ;;  %v3417_v28 = vpack.i.b16 %v3384_v43, %v3318_v34 }
 0x92f   : > { %v3444_v14 = vshrl.u32 %v3376_v42, 16  ;;  %v2920_v15 = vcombine.low %v2897_v45, %v2912_v52  ;;  %v7558_v18 = vpack.i.b16 %v3420_v4, %v3419_v56  ;;  %v3433_v22 = vpack.i.b16 %v3385_v54, %v3319_v37 }
 0x930   : > { %v3452_v23 = vshrl.u32 %v3386_v63, 16  ;;  %v3460_v24 = vshrl.u32 %v3383_v12, 16  ;;  %v3441_v31 = vpack.i.b16 %v3376_v42, %v7528_v27  ;;  %v3449_v32 = vpack.i.b16 %v3386_v63, %v3320_v46 }
 0x931   : > { %v3457_v20 = vpack.i.b16 %v3383_v12, %v7531_v11  ;;  %v3465_v21 = vpack.i.b16 %v3387_v5, %v3321_v35  ;;  %v7562_v33 = vpack.i.b16 %v3428_v9, %v3427_v48  ;;  %v7564_v40 = vpack.i.b16 %v3436_v10, %v3435_v57  ;;  %v3254_v57 = vpop.permute.xlu0 %3253  ;;  %v3249_v10 = vpop.permute.xlu1 %3248 }
 0x932   : > { %v3468_v34 = vshrl.u32 %v3387_v5, 16  ;;  %v7566_v41 = vcombine.low %v3409_v6, %v3425_v8  ;;  %v7568_v43 = vpack.i.b16 %v3444_v14, %v3443_v62  ;;  %v2921_v37 = vcombine.high %v2897_v45, %v2912_v52 }
 0x933   : > { %v2936_v53 = vcombine.low %v7546_v50, %v2919_v38  ;;  %v2956_v54 = vcombine.high %v2876_v60, %v8390_v2  ;;  %v7572_v27 = vpack.i.b16 %v3452_v23, %v3451_v1  ;;  %v7574_v42 = vpack.i.b16 %v3460_v24, %v3459_v0 }
 0x934   : > { %v2937_v11 = vcombine.high %v7546_v50, %v2919_v38  ;;  %v2971_v46 = vcombine.high %v2886_v49, %v8390_v2  ;;  %v7578_v35 = vcombine.low %v3417_v28, %v3433_v22  ;;  %v7580_v12 = vcombine.low %v3441_v31, %v3457_v20 }
 0x935   : > { %v7582_v47 = vcombine.low %v3449_v32, %v3465_v21  ;;  %v7585_v45 = vrot.slane %v2920_v15, %v7119_v7  ;;  %v7587_v52 = vpack.i.b16 %v3468_v34, %v3467_v3  ;;  %v2963_v48 = vrot.slane %v2876_v60, %v7111_v51  ;;  %v2878_v44 = vpop.permute.xlu1 %2877 }
 0x936   : > { %v2978_v50 = vrot.slane %v2886_v49, %v7111_v51  ;;  %v7594_v58 = vrot.slane %v2921_v37, %v7119_v7  ;;  %v7597_v62 = vrot.slane %v2936_v53, %v7119_v7  ;;  %v2970_v0 = vrot.slane %v2956_v54, %v7111_v51 }
 0x937   : > { %v2985_v63 = vrot.slane %v2971_v46, %v7111_v51  ;;  %v7604_v1 = vrot.slane %v2937_v11, %v7119_v7  ;;  %v2952_v5 = vcombine.high %v7585_v45, %v8390_v2  ;;  %v3399_v6 = vcombine.low %v3244_v25, %v3254_v57 }
 0x938   : > { %v2986_v60 = vcombine.low %v2963_v48, %v2978_v50  ;;  %v2987_v3 = vcombine.high %v2963_v48, %v2978_v50  ;;  %v3532_v38 = vcombine.low %v7558_v18, %v7564_v40  ;;  %v2953_v22 = vcombine.high %v7594_v58, %v8390_v2 }
 0x939   : > { %v3002_v8 = vcombine.low %v2970_v0, %v2985_v63  ;;  %v3003_v9 = vcombine.high %v2970_v0, %v2985_v63  ;;  %v2954_v23 = vcombine.high %v7597_v62, %v8390_v2  ;;  %v3045_v24 = vshrl.u32 %v7585_v45, 16 }
 0x93a   : > { %v2994_v14 = vrot.slane %v2986_v60, %v7119_v7  ;;  %v3001_v15 = vrot.slane %v2987_v3, %v7119_v7  ;;  %v2955_v18 = vcombine.high %v7604_v1, %v8390_v2  ;;  %v3389_v20 = vcombine.low %v7492_v59, %v3249_v10 }
 0x93b   : > { %v3010_v25 = vrot.slane %v3002_v8, %v7119_v7  ;;  %v3053_v21 = vshrl.u32 %v2952_v5, 16  ;;  %v3406_v49 = vrot.slane %v3399_v6, %v7119_v7  ;;  %v3017_v40 = vrot.slane %v3003_v9, %v7119_v7 }
 0x93c   : > { %v3018_v31 = vcombine.high %v2994_v14, %v8390_v2  ;;  %v3019_v32 = vcombine.high %v3001_v15, %v8390_v2  ;;  %v3061_v37 = vshrl.u32 %v7594_v58, 16  ;;  %v3077_v53 = vshrl.u32 %v7597_v62, 16 }
 0x93d   : > { %v3020_v34 = vcombine.high %v3010_v25, %v8390_v2  ;;  %v3046_v54 = vshrl.u32 %v2994_v14, 16  ;;  %v3062_v11 = vshrl.u32 %v3001_v15, 16  ;;  %v3069_v46 = vshrl.u32 %v2953_v22, 16 }
 0x93e   : > { %v3085_v48 = vshrl.u32 %v2954_v23, 16  ;;  %v3093_v57 = vshrl.u32 %v7604_v1, 16  ;;  %v3054_v50 = vshrl.u32 %v3018_v31, 16  ;;  %v3101_v0 = vshrl.u32 %v2955_v18, 16 }
 0x93f   : > { %v3070_v59 = vshrl.u32 %v3019_v32, 16  ;;  %v3078_v63 = vshrl.u32 %v3010_v25, 16  ;;  %v3396_v60 = vrot.slane %v3389_v20, %v7119_v7  ;;  %v3021_v3 = vcombine.high %v3017_v40, %v8390_v2 }
 0x940   : > { %v3043_v6 = vpack.i.b16 %v2994_v14, %v7585_v45  ;;  %v3059_v8 = vpack.i.b16 %v3001_v15, %v7594_v58  ;;  %v3086_v9 = vshrl.u32 %v3020_v34, 16  ;;  %v3047_v10 = vpack.i.b16 %v3046_v54, %v3045_v24 }
 0x941   : > { %v3051_v30 = vpack.i.b16 %v3018_v31, %v2952_v5  ;;  %v3063_v26 = vpack.i.b16 %v3062_v11, %v3061_v37  ;;  %v3067_v29 = vpack.i.b16 %v3019_v32, %v2953_v22  ;;  %v3055_v39 = vpack.i.b16 %v3054_v50, %v3053_v21  ;;  %v2883_v31 = vpop.permute.xlu0 %2882 }
 0x942   : > { %v3075_v28 = vpack.i.b16 %v3010_v25, %v7597_v62  ;;  %v3091_v4 = vpack.i.b16 %v3017_v40, %v7604_v1  ;;  %v3094_v56 = vshrl.u32 %v3017_v40, 16  ;;  %v3071_v17 = vpack.i.b16 %v3070_v59, %v3069_v46 }
 0x943   : > { %v3079_v20 = vpack.i.b16 %v3078_v63, %v3077_v53  ;;  %v3083_v16 = vpack.i.b16 %v3020_v34, %v2954_v23  ;;  %v3473_v2 = vpack.i.b16 %v3406_v49, %v3396_v60  ;;  %v3087_v19 = vpack.i.b16 %v3086_v9, %v3085_v48 }
 0x944   : > { %v3099_v45 = vpack.i.b16 %v3021_v3, %v2955_v18  ;;  %v3102_v14 = vshrl.u32 %v3021_v3, 16  ;;  %v3489_v58 = vrot.slane %v7578_v35, %v7111_v51  ;;  %v3108_v5 = vcombine.low %v3043_v6, %v3059_v8 }
 0x945   : > { %v3116_v15 = vcombine.low %v3051_v30, %v3067_v29  ;;  %v3497_v22 = vrot.slane %v7580_v12, %v7111_v51  ;;  %v3505_v62 = vrot.slane %v7582_v47, %v7111_v51  ;;  %v3095_v1 = vpack.i.b16 %v3094_v56, %v3093_v57 }
 0x946   : > { %v3124_v24 = vcombine.low %v3075_v28, %v3091_v4  ;;  %v8413_v23 = vrot.slane %v7566_v41, %v7111_v51  ;;  %v3539_v18 = vrot.slane %v3532_v38, %v7111_v51  ;;  %v7648_v32 = vrot.slane %v3473_v2, %v7119_v7  ;;  %v2888_v28 = vpop.permute.xlu1 %2887 }
 0x947   : > { %v3514_v35 = vcombine.low %v3497_v22, %v3505_v62  ;;  %v8414_v29 = vcombine.low %v7556_v13, %v7562_v33  ;;  %v3548_v12 = vcombine.low %v7572_v27, %v7587_v52  ;;  %v3103_v47 = vpack.i.b16 %v3102_v14, %v3101_v0 }
 0x948   : > { %v3506_v25 = vcombine.low %v8413_v23, %v3489_v58  ;;  %v3132_v56 = vcombine.low %v3083_v16, %v3099_v45  ;;  %v3158_v4 = vcombine.low %v3047_v10, %v3063_v26  ;;  %v3166_v41 = vcombine.low %v3055_v39, %v3071_v17 }
 0x949   : > { %v3531_v30 = vrot.slane %v8414_v29, %v7111_v51  ;;  %v3521_v38 = vrot.slane %v3514_v35, %v7119_v7  ;;  %v8415_v2 = vcombine.low %v7568_v43, %v7574_v42  ;;  %v3555_v49 = vrot.slane %v3548_v12, %v7111_v51 }
 0x94a   : > { %v3174_v13 = vcombine.low %v3079_v20, %v3095_v1  ;;  %v3023_v33 = vcombine.low %v7500_v61, %v2883_v31  ;;  %v3513_v27 = vrot.slane %v3506_v25, %v7119_v7  ;;  %v3123_v16 = vrot.slane %v3116_v15, %v7111_v51 }
 0x94b   : > { %v3547_v21 = vrot.slane %v8415_v2, %v7111_v51  ;;  %v3556_v40 = vcombine.low %v3531_v30, %v3539_v18  ;;  %v3115_v39 = vrot.slane %v3108_v5, %v7111_v51  ;;  %v3033_v17 = vcombine.low %v2878_v44, %v2888_v28 }
 0x94c   : > { %v8416_v52 = vmov 0   ;;  %v3522_v43 = vcombine.low %v3513_v27, %v3521_v38  ;;  %v3131_v42 = vrot.slane %v3124_v24, %v7111_v51  ;;  %v3139_v37 = vrot.slane %v3132_v56, %v7111_v51 }
 0x94d   : > { %v3564_v26 = vcombine.low %v3547_v21, %v3555_v49  ;;  %v7668_v34 = vcombine.high %v7648_v32, %v8416_v52  ;;  %v3173_v53 = vrot.slane %v3166_v41, %v7111_v51  ;;  %v3563_v61 = vrot.slane %v3556_v40, %v7119_v7 }
 0x94e   : > { %v3165_v11 = vrot.slane %v3158_v4, %v7111_v51  ;;  %v3182_v46 = vcombine.low %v3087_v19, %v3103_v47  ;;  %v7676_v44 = vcombine.high %v3513_v27, %v3521_v38  ;;  %v3140_v48 = vcombine.low %v3115_v39, %v3123_v16 }
 0x94f   : > { %v3571_v54 = vrot.slane %v3564_v26, %v7119_v7  ;;  %v3148_v57 = vcombine.low %v3131_v42, %v3139_v37  ;;  %v3181_v50 = vrot.slane %v3174_v13, %v7111_v51  ;;  %v3040_v3 = vrot.slane %v3033_v17, %v7119_v7 }
 0x950   : > { %v3189_v63 = vrot.slane %v3182_v46, %v7111_v51  ;;  %v3190_v60 = vcombine.low %v3165_v11, %v3173_v53  ;;  %v3030_v19 = vrot.slane %v3023_v33, %v7119_v7  ;;  %v3596_v20 = vpack.i.b16 %v8416_v52, %v7648_v32 }
 0x951   : > { %v3572_v0 = vcombine.low %v3563_v61, %v3571_v54  ;;  %v3573_v59 = vcombine.high %v3563_v61, %v3571_v54  ;;  %v3155_v6 = vrot.slane %v3148_v57, %v7119_v7  ;;  %v3600_v45 = vpack.i.b16 %v8416_v52, %v7668_v34 }
 0x952   : > { %v3198_v10 = vcombine.low %v3181_v50, %v3189_v63  ;;  %v3147_v14 = vrot.slane %v3140_v48, %v7119_v7  ;;  %v3197_v15 = vrot.slane %v3190_v60, %v7119_v7  ;;  %v3107_v62 = vpack.i.b16 %v3040_v3, %v3030_v19 }
 0x953   : > { %v3585_v8 = vpack.i.b16 %v3572_v0, %v3522_v43  ;;  %v3591_v9 = vpack.i.b16 %v3573_v59, %v7676_v44  ;;  %v3587_v35 = vshrl.u32 %v3572_v0, 16  ;;  %v3586_v30 = vshrl.u32 %v3522_v43, 16 }
 0x954   : > { %v3205_v22 = vrot.slane %v3198_v10, %v7119_v7  ;;  %v3156_v1 = vcombine.low %v3147_v14, %v3155_v6  ;;  %v3157_v23 = vcombine.high %v3147_v14, %v3155_v6  ;;  %v3215_v29 = vrot.slane %v3107_v62, %v7119_v7 }
 0x955   : > { %6531 = vmatprep.subr.msk.bf16.mxu1 %vm1696_vm1, %v3585_v8  ;;  %6535 = vmatprep.subr.msk.bf16.mxu0 %vm1696_vm1, %v3591_v9  ;;  %v3980_v58 = vsel %vm1696_vm1, %v3585_v8, 0  ;;  %v4100_v5 = vsel %vm1696_vm1, %v3591_v9, 0  ;;  %v3983_v12 = vsel %vm1696_vm1, %v3596_v20, 0  ;;  %v4103_v47 = vsel %vm1696_vm1, %v3600_v45, 0 }
 0x956   : > { %6448 = vmatpush3.bf16.xpose.msra.mxu1 %v3980_v58  ;;  %6464 = vmatpush3.bf16.xpose.msra.mxu0 %v4100_v5  ;;  %v3206_v24 = vcombine.low %v3197_v15, %v3205_v22  ;;  %v3207_v25 = vcombine.high %v3197_v15, %v3205_v22  ;;  %v3588_v56 = vpack.i.b16 %v3587_v35, %v3586_v30  ;;  %v3597_v28 = vshrl.u32 %v7648_v32, 16 }
 0x957   : > { %6532 = vmatprep.subr.msk.bf16.mxu1 %vm1696_vm1, %v3596_v20  ;;  %6536 = vmatprep.subr.msk.bf16.mxu0 %vm1696_vm1, %v3600_v45  ;;  %v3216_v4 = vcombine.high %v3215_v29, %v8416_v52  ;;  %v3220_v38 = vshrl.u32 %v3156_v1, 16  ;;  %v3230_v2 = vpack.i.b16 %v8416_v52, %v3215_v29  ;;  %v3593_v32 = vshrl.u32 %v3573_v59, 16 }
 0x958   : > { %v3219_v18 = vpack.i.b16 %v3206_v24, %v3156_v1  ;;  %v3225_v31 = vpack.i.b16 %v3207_v25, %v3157_v23  ;;  %v3221_v41 = vshrl.u32 %v3206_v24, 16  ;;  %v4040_v40 = vsel %vm1696_vm1, %v3588_v56, 0 }
 0x959   : > { %v3234_v21 = vpack.i.b16 %v8416_v52, %v3216_v4  ;;  %v3598_v13 = vpack.i.b16 %v8416_v52, %v3597_v28  ;;  %v3592_v33 = vshrl.u32 %v7676_v44, 16  ;;  %v3231_v39 = vshrl.u32 %v3215_v29, 16 }
 0x95a   : > { %6451 = vmatprep.mubr.msk.bf16.mxu1 %vm1696_vm1, %v3219_v18  ;;  %6467 = vmatprep.mubr.msk.bf16.mxu0 %vm1696_vm1, %v3225_v31  ;;  %v3222_v49 = vpack.i.b16 %v3221_v41, %v3220_v38  ;;  %v3227_v17 = vshrl.u32 %v3207_v25, 16  ;;  %v3601_v26 = vshrl.u32 %v7668_v34, 16  ;;  %v3226_v43 = vshrl.u32 %v3157_v23, 16 }
 0x95b   : > { %v4043_v27 = vsel %vm1696_vm1, %v3598_v13, 0  ;;  %v3594_v16 = vpack.i.b16 %v3593_v32, %v3592_v33  ;;  %v3232_v42 = vpack.i.b16 %v8416_v52, %v3231_v39  ;;  %v3235_v11 = vshrl.u32 %v3216_v4, 16 }
 0x95c   : > { %v3228_v37 = vpack.i.b16 %v3227_v17, %v3226_v43  ;;  %v3602_v61 = vpack.i.b16 %v8416_v52, %v3601_v26 }
 0x95d   : > { %v4160_v53 = vsel %vm1696_vm1, %v3594_v16, 0  ;;  %v3236_v34 = vpack.i.b16 %v8416_v52, %v3235_v11 }
 0x95e   : > { %6450 = vmatpush3.bf16.xpose.msra.mxu1 %v3983_v12  ;;  %6466 = vmatpush3.bf16.xpose.msra.mxu0 %v4103_v47  ;;  %v4163_v54 = vsel %vm1696_vm1, %v3602_v61, 0 }
 0x95f   : > { %6533 = vmatprep.subr.msk.bf16.mxu1 %vm1696_vm1, %v3588_v56 }
 0x965   : > { %6452 = vmatmul.mubr.msk.bf16.vlgmr.msra.gmra.mrb[28].mxu1 %vm1696_vm1, %v3230_v2  ;;  %6468 = vmatmul.mubr.msk.bf16.vlgmr.msra.gmra.mrb[20].mxu0 %vm1696_vm1, %v3234_v21  ;;  %v7757_v21 = vpop.permute.xlu1 %3607 }
 0x966   : > { %6456 = vmatpush3.bf16.xpose.msra.mxu1 %v4040_v40  ;;  %6459 = vmatprep.mubr.msk.bf16.mxu1 %vm1696_vm1, %v3222_v49 }
 0x967   : > { %6534 = vmatprep.subr.msk.bf16.mxu1 %vm1696_vm1, %v3598_v13 }
 0x96e   : > { %6458 = vmatpush3.bf16.xpose.msra.mxu1 %v4043_v27 }
 0x96f   : > { %6537 = vmatprep.subr.msk.bf16.mxu1 %vm1696_vm1, %v3594_v16 }
 0x975   : > { %6460 = vmatmul.mubr.msk.bf16.vlgmr.msra.gmra.mrb[32].mxu1 %vm1696_vm1, %v3232_v42 }
 0x976   : > { %6472 = vmatpush3.bf16.xpose.msra.mxu1 %v4160_v53  ;;  %6475 = vmatprep.mubr.msk.bf16.mxu1 %vm1696_vm1, %v3228_v37 }
 0x977   : > { %6538 = vmatprep.subr.msk.bf16.mxu1 %vm1696_vm1, %v3602_v61 }
 0x97e   : > { %6474 = vmatpush3.bf16.xpose.msra.mxu1 %v4163_v54 }
 0x985   : > { %6476 = vmatmul.mubr.msk.bf16.vlgmr.msra.gmra.mrb[36].mxu1 %vm1696_vm1, %v3236_v34 }
 0xa38   : > { %v6453_v46 = vpop.f32.mrb[28].mxu1  ;;  %v6469_v44 = vpop.f32.mrb[20].mxu0 }
 0xa39   : > { %v4215_v48 = vmul.f32 0.17677669, %v6453_v46  ;;  %v4019_v57 = vpop.f32.mrb[29].mxu1  ;;  %v4139_v50 = vpop.f32.mrb[21].mxu0  ;;  %v4221_v60 = vmul.f32 0.17677669, %v6469_v44 }
 0xa3a   : > { %v4213_v0 = vmul.f32 0.17677669, %v4019_v57  ;;  %v6454_v59 = vpop.f32.mrb[30].mxu1  ;;  %v6470_v63 = vpop.f32.mrb[22].mxu0  ;;  %v4219_v19 = vmul.f32 0.17677669, %v4139_v50 }
 0xa3b   : > { %v4022_v3 = vpop.f32.mrb[31].mxu1  ;;  %v4142_v6 = vpop.f32.mrb[23].mxu0  ;;  %v4233_v8 = vsel %vm4232_vm6, %v4215_v48, -inf  ;;  %v4251_v20 = vsel %vm4232_vm6, %v4221_v60, -inf }
 0xa3c   : > { %v4220_v9 = vmul.f32 0.17677669, %v4142_v6  ;;  %4234 = vmax.xlane.f32.xlu1 %v4233_v8  ;;  %v4226_v10 = vsel %vm4225_vm7, %v4213_v0, -inf  ;;  %v4214_v14 = vmul.f32 0.17677669, %v4022_v3  ;;  %v4245_v58 = vsel %vm4225_vm7, %v4219_v19, -inf }
 0xa3d   : > { %4227 = vmax.xlane.f32.xlu0 %v4226_v10 }
 0xa3e   : > { %v4248_v45 = vsel %vm4225_vm7, %v4220_v9, -inf  ;;  %v4229_v5 = vsel %vm4225_vm7, %v4214_v14, -inf }
 0xa40   : > { %4252 = vmax.xlane.f32.xlu1 %v4251_v20 }
 0xa41   : > { %4249 = vmax.xlane.f32.xlu0 %v4248_v45 }
 0xa44   : > { %4246 = vmax.xlane.f32.xlu1 %v4245_v58 }
 0xa48   : > { %4230 = vmax.xlane.f32.xlu1 %v4229_v5  ;;  %v6461_v15 = vpop.f32.mrb[32].mxu1 }
 0xa49   : > { %v4218_v22 = vmul.f32 0.17677669, %v6461_v15  ;;  %v4079_v62 = vpop.f32.mrb[33].mxu1 }
 0xa4a   : > { %v6462_v1 = vpop.f32.mrb[34].mxu1  ;;  %v7732_v24 = vmul.f32 0.17677669, %v4079_v62 }
 0xa4b   : > { %v4082_v23 = vpop.f32.mrb[35].mxu1  ;;  %v4242_v25 = vsel %vm4232_vm6, %v4218_v22, -inf }
 0xa4c   : > { %4243 = vmax.xlane.f32.xlu0 %v4242_v25  ;;  %v7735_v18 = vmul.f32 0.17677669, %v4082_v23  ;;  %v4236_v31 = vsel %vm4225_vm7, %v7732_v24, -inf }
 0xa4e   : > { %v4239_v35 = vsel %vm4225_vm7, %v7735_v18, -inf }
 0xa50   : > { %4237 = vmax.xlane.f32.xlu0 %v4236_v31  ;;  %v3688_v31 = vcombine.high %v7757_v21, %v8416_v52 }
 0xa54   : > { %4240 = vmax.xlane.f32.xlu0 %v4239_v35 }
 0xa58   : > { %v6477_v29 = vpop.f32.mrb[36].mxu1 }
 0xa59   : > { %v7741_v30 = vmul.f32 0.17677669, %v6477_v29  ;;  %v4199_v12 = vpop.f32.mrb[37].mxu1 }
 0xa5a   : > { %v7743_v47 = vmul.f32 0.17677669, %v4199_v12  ;;  %v6478_v56 = vpop.f32.mrb[38].mxu1 }
 0xa5b   : > { %v4202_v4 = vpop.f32.mrb[39].mxu1  ;;  %v4260_v41 = vsel %vm4232_vm6, %v7741_v30, -inf }
 0xa5c   : > { %v7747_v28 = vmul.f32 0.17677669, %v4202_v4  ;;  %4261 = vmax.xlane.f32.xlu0 %v4260_v41  ;;  %v4254_v38 = vsel %vm4225_vm7, %v7743_v47, -inf }
 0xa5d   : > { %4255 = vmax.xlane.f32.xlu1 %v4254_v38 }
 0xa5e   : > { %v4257_v2 = vsel %vm4225_vm7, %v7747_v28, -inf }
 0xa60   : > { %4258 = vmax.xlane.f32.xlu0 %v4257_v2  ;;  %v3702_v2 = vrot.slane %v3688_v31, %v7111_v51 }
 0xa6e   : > { %3617 = vrot.lane.b32.xlu1 %v7486_v55, %s6875_s3 }
 0xa76   : > { %3612 = vrot.lane.b32.xlu0 %v7486_v55, %s6877_s27 }
 0xac9   : > { %v4235_v49 = vpop.xlane.xlu1 %4234 }
 0xaca   : > { %v4265_v40 = vsub.f32 %v4215_v48, %v4235_v49  ;;  %v4228_v13 = vpop.xlane.xlu0 %4227  ;;  %v3622_v49 = vcombine.high %v7486_v55, %v8416_v52 }
 0xacb   : > { %v4263_v32 = vsub.f32 %v4213_v0, %v4228_v13 }
 0xacc   : > { %v4279_v33 = vmul.f32 1.442695, %v4265_v40 }
 0xacd   : > { %v4275_v27 = vmul.f32 1.442695, %v4263_v32  ;;  %v4253_v16 = vpop.xlane.xlu1 %4252 }
 0xace   : > { %6768 = vpow2.f32 %v4279_v33  ;;  %v4271_v39 = vsub.f32 %v4221_v60, %v4253_v16  ;;  %v4250_v17 = vpop.xlane.xlu0 %4249 }
 0xacf   : > { %6770 = vpow2.f32 %v4275_v27  ;;  %v4270_v26 = vsub.f32 %v4220_v9, %v4250_v17  ;;  %v3629_v27 = vrot.slane %v7486_v55, %v7111_v51 }
 0xad0   : > { %v4291_v43 = vmul.f32 1.442695, %v4271_v39 }
 0xad1   : > { %v4289_v42 = vmul.f32 1.442695, %v4270_v26  ;;  %v4247_v37 = vpop.xlane.xlu1 %4246 }
 0xad2   : > { %6772 = vpow2.f32 %v4291_v43  ;;  %v4269_v53 = vsub.f32 %v4219_v19, %v4247_v37  ;;  %v3636_v37 = vrot.slane %v3622_v49, %v7111_v51 }
 0xad3   : > { %6774 = vpow2.f32 %v4289_v42 }
 0xad4   : > { %v4287_v61 = vmul.f32 1.442695, %v4269_v53 }
 0xad5   : > { %v4231_v54 = vpop.xlane.xlu1 %4230 }
 0xad6   : > { %6776 = vpow2.f32 %v4287_v61  ;;  %v4264_v11 = vsub.f32 %v4214_v14, %v4231_v54 }
 0xad8   : > { %v7759_v34 = vpop.eup %6768  ;;  %v4277_v46 = vmul.f32 1.442695, %v4264_v11 }
 0xad9   : > { %v7761_v44 = vpop.eup %6770  ;;  %v4244_v48 = vpop.xlane.xlu0 %4243  ;;  %v4305_v57 = vsel %vm4232_vm6, %v7759_v34, 0.0 }
 0xada   : > { %6778 = vpow2.f32 %v4277_v46  ;;  %v4268_v50 = vsub.f32 %v4218_v22, %v4244_v48  ;;  %4306 = vadd.xlane.f32.xlu0 %v4305_v57  ;;  %v4299_v0 = vsel %vm4225_vm7, %v7761_v44, 0.0 }
 0xadb   : > { %4300 = vadd.xlane.f32.xlu1 %v4299_v0 }
 0xadc   : > { %v7767_v59 = vpop.eup %6772  ;;  %v4285_v63 = vmul.f32 1.442695, %v4268_v50 }
 0xadd   : > { %v7769_v60 = vpop.eup %6774  ;;  %v4238_v3 = vpop.xlane.xlu0 %4237  ;;  %v4323_v6 = vsel %vm4232_vm6, %v7767_v59, 0.0 }
 0xade   : > { %6780 = vpow2.f32 %v4285_v63  ;;  %v4266_v8 = vsub.f32 %v7732_v24, %v4238_v3  ;;  %4324 = vadd.xlane.f32.xlu0 %v4323_v6  ;;  %v4320_v9 = vsel %vm4225_vm7, %v7769_v60, 0.0 }
 0xadf   : > { %4321 = vadd.xlane.f32.xlu1 %v4320_v9 }
 0xae0   : > { %v7776_v10 = vpop.eup %6776  ;;  %v4281_v19 = vmul.f32 1.442695, %v4266_v8 }
 0xae1   : > { %v4241_v20 = vpop.xlane.xlu0 %4240  ;;  %v4317_v45 = vsel %vm4225_vm7, %v7776_v10, 0.0 }
 0xae2   : > { %6782 = vpow2.f32 %v4281_v19  ;;  %v4267_v14 = vsub.f32 %v7735_v18, %v4241_v20  ;;  %4318 = vadd.xlane.f32.xlu0 %v4317_v45 }
 0xae4   : > { %v7781_v58 = vpop.eup %6778  ;;  %v4283_v5 = vmul.f32 1.442695, %v4267_v14 }
 0xae5   : > { %v4302_v15 = vsel %vm4225_vm7, %v7781_v58, 0.0 }
 0xae6   : > { %6784 = vpow2.f32 %v4283_v5  ;;  %4303 = vadd.xlane.f32.xlu0 %v4302_v15 }
 0xae8   : > { %v7785_v22 = vpop.eup %6780 }
 0xae9   : > { %v4262_v62 = vpop.xlane.xlu0 %4261  ;;  %v4314_v1 = vsel %vm4232_vm6, %v7785_v22, 0.0 }
 0xaea   : > { %v4274_v24 = vsub.f32 %v7741_v30, %v4262_v62  ;;  %4315 = vadd.xlane.f32.xlu1 %v4314_v1  ;;  %v4256_v23 = vpop.xlane.xlu1 %4255  ;;  %v3695_v30 = vrot.slane %v7757_v21, %v7111_v51 }
 0xaeb   : > { %v4272_v25 = vsub.f32 %v7743_v47, %v4256_v23 }
 0xaec   : > { %v7791_v18 = vpop.eup %6782  ;;  %v4297_v35 = vmul.f32 1.442695, %v4274_v24 }
 0xaed   : > { %v7795_v29 = vpop.xlane.xlu0 %4258  ;;  %v4308_v12 = vsel %vm4225_vm7, %v7791_v18, 0.0  ;;  %v4293_v56 = vmul.f32 1.442695, %v4272_v25 }
 0xaee   : > { %v3618_v4 = vpop.permute.xlu1 %3617  ;;  %4309 = vadd.xlane.f32.xlu0 %v4308_v12  ;;  %6786 = vpow2.f32 %v4297_v35 }
 0xaef   : > { %v3703_v41 = vcombine.high %v3618_v4, %v8416_v52  ;;  %v3710_v47 = vrot.slane %v3618_v4, %v7111_v51  ;;  %6788 = vpow2.f32 %v4293_v56 }
 0xaf0   : > { %v7803_v38 = vpop.eup %6784 }
 0xaf1   : > { %v3717_v40 = vrot.slane %v3703_v41, %v7111_v51  ;;  %v3718_v13 = vcombine.low %v3695_v30, %v3710_v47  ;;  %v3719_v32 = vcombine.high %v3695_v30, %v3710_v47  ;;  %v3613_v33 = vpop.permute.xlu0 %3612  ;;  %v4311_v21 = vsel %vm4225_vm7, %v7803_v38, 0.0 }
 0xaf2   : > { %v3637_v16 = vcombine.high %v3613_v33, %v8416_v52  ;;  %v3644_v39 = vrot.slane %v3613_v33, %v7111_v51  ;;  %4312 = vadd.xlane.f32.xlu1 %v4311_v21 }
 0xaf3   : > { %v3726_v17 = vrot.slane %v3718_v13, %v7119_v7  ;;  %v3733_v26 = vrot.slane %v3719_v32, %v7119_v7  ;;  %v3734_v43 = vcombine.low %v3702_v2, %v3717_v40  ;;  %v3735_v42 = vcombine.high %v3702_v2, %v3717_v40 }
 0xaf4   : > { %v3651_v53 = vrot.slane %v3637_v16, %v7111_v51  ;;  %v3652_v61 = vcombine.low %v3629_v27, %v3644_v39  ;;  %v3653_v54 = vcombine.high %v3629_v27, %v3644_v39 }
 0xaf5   : > { %v3742_v11 = vrot.slane %v3734_v43, %v7119_v7  ;;  %v3749_v55 = vrot.slane %v3735_v42, %v7119_v7  ;;  %v3750_v46 = vcombine.high %v3726_v17, %v8416_v52  ;;  %v3751_v48 = vcombine.high %v3733_v26, %v8416_v52 }
 0xaf6   : > { %v3778_v57 = vshrl.u32 %v3726_v17, 16  ;;  %v3794_v50 = vshrl.u32 %v3733_v26, 16  ;;  %v3660_v0 = vrot.slane %v3652_v61, %v7119_v7  ;;  %v3667_v63 = vrot.slane %v3653_v54, %v7119_v7 }
 0xaf7   : > { %v3752_v3 = vcombine.high %v3742_v11, %v8416_v52  ;;  %v3753_v6 = vcombine.high %v3749_v55, %v8416_v52  ;;  %v3786_v8 = vshrl.u32 %v3750_v46, 16  ;;  %v3802_v9 = vshrl.u32 %v3751_v48, 16 }
 0xaf8   : > { %v3810_v19 = vshrl.u32 %v3742_v11, 16  ;;  %v3826_v20 = vshrl.u32 %v3749_v55, 16  ;;  %v3668_v45 = vcombine.low %v3636_v37, %v3651_v53  ;;  %v3669_v14 = vcombine.high %v3636_v37, %v3651_v53  ;;  %v7829_v24 = vpop.eup %6786 }
 0xaf9   : > { %v3818_v5 = vshrl.u32 %v3752_v3, 16  ;;  %v3834_v15 = vshrl.u32 %v3753_v6, 16  ;;  %v3684_v62 = vcombine.high %v3660_v0, %v8416_v52  ;;  %v3685_v1 = vcombine.high %v3667_v63, %v8416_v52  ;;  %v7833_v41 = vpop.eup %6788 }
 0xafa   : > { %v3676_v23 = vrot.slane %v3668_v45, %v7119_v7  ;;  %v3683_v25 = vrot.slane %v3669_v14, %v7119_v7  ;;  %v3775_v31 = vpack.i.b16 %v3726_v17, %v3660_v0  ;;  %v3777_v35 = vshrl.u32 %v3660_v0, 16 }
 0xafb   : > { %v3783_v12 = vpack.i.b16 %v3750_v46, %v3684_v62  ;;  %v3785_v56 = vshrl.u32 %v3684_v62, 16  ;;  %v3791_v4 = vpack.i.b16 %v3733_v26, %v3667_v63  ;;  %v3793_v30 = vshrl.u32 %v3667_v63, 16 }
 0xafc   : > { %v3686_v47 = vcombine.high %v3676_v23, %v8416_v52  ;;  %v3687_v2 = vcombine.high %v3683_v25, %v8416_v52  ;;  %v3779_v49 = vpack.i.b16 %v3778_v57, %v3777_v35  ;;  %v3799_v40 = vpack.i.b16 %v3751_v48, %v3685_v1 }
 0xafd   : > { %v3787_v13 = vpack.i.b16 %v3786_v8, %v3785_v56  ;;  %v3795_v32 = vpack.i.b16 %v3794_v50, %v3793_v30  ;;  %v3801_v33 = vshrl.u32 %v3685_v1, 16  ;;  %v3807_v21 = vpack.i.b16 %v3742_v11, %v3676_v23 }
 0xafe   : > { %v3809_v27 = vshrl.u32 %v3676_v23, 16  ;;  %v3815_v16 = vpack.i.b16 %v3752_v3, %v3686_v47  ;;  %v3817_v39 = vshrl.u32 %v3686_v47, 16  ;;  %v3823_v17 = vpack.i.b16 %v3749_v55, %v3683_v25 }
 0xaff   : > { %v3803_v43 = vpack.i.b16 %v3802_v9, %v3801_v33  ;;  %v3825_v42 = vshrl.u32 %v3683_v25, 16  ;;  %v3831_v26 = vpack.i.b16 %v3753_v6, %v3687_v2  ;;  %v3833_v37 = vshrl.u32 %v3687_v2, 16 }
 0xb00   : > { %v3811_v53 = vpack.i.b16 %v3810_v19, %v3809_v27  ;;  %v3840_v61 = vcombine.low %v3775_v31, %v3791_v4  ;;  %v4332_v54 = vsel %vm4232_vm6, %v7829_v24, 0.0  ;;  %v4326_v46 = vsel %vm4225_vm7, %v7833_v41, 0.0 }
 0xb01   : > { %v3827_v48 = vpack.i.b16 %v3826_v20, %v3825_v42  ;;  %4333 = vadd.xlane.f32.xlu1 %v4332_v54  ;;  %4327 = vadd.xlane.f32.xlu0 %v4326_v46  ;;  %v3819_v11 = vpack.i.b16 %v3818_v5, %v3817_v39  ;;  %v3835_v57 = vpack.i.b16 %v3834_v15, %v3833_v37 }
 0xb02   : > { %v3848_v50 = vcombine.low %v3783_v12, %v3799_v40  ;;  %v3856_v0 = vcombine.low %v3807_v21, %v3823_v17  ;;  %v3864_v55 = vcombine.low %v3815_v16, %v3831_v26  ;;  %v3890_v63 = vcombine.low %v3779_v49, %v3795_v32 }
 0xb03   : > { %v3898_v3 = vcombine.low %v3787_v13, %v3803_v43  ;;  %v3906_v6 = vcombine.low %v3811_v53, %v3827_v48  ;;  %v3914_v8 = vcombine.low %v3819_v11, %v3835_v57  ;;  %v3847_v9 = vrot.slane %v3840_v61, %v7111_v51 }
 0xb04   : > { %v3855_v19 = vrot.slane %v3848_v50, %v7111_v51  ;;  %v3863_v45 = vrot.slane %v3856_v0, %v7111_v51  ;;  %v3871_v14 = vrot.slane %v3864_v55, %v7111_v51  ;;  %v3897_v20 = vrot.slane %v3890_v63, %v7111_v51 }
 0xb05   : > { %v3905_v5 = vrot.slane %v3898_v3, %v7111_v51  ;;  %v3913_v15 = vrot.slane %v3906_v6, %v7111_v51  ;;  %v3921_v62 = vrot.slane %v3914_v8, %v7111_v51  ;;  %v3604_v17 = vpack.c.bf16 %v7484_v36, %v7484_v36 }
 0xb06   : > { %v3872_v1 = vcombine.low %v3847_v9, %v3855_v19  ;;  %v3880_v23 = vcombine.low %v3863_v45, %v3871_v14  ;;  %v4273_v43 = vsub.f32 %v7747_v28, %v7795_v29 }
 0xb07   : > { %v3922_v25 = vcombine.low %v3897_v20, %v3905_v5  ;;  %v3930_v31 = vcombine.low %v3913_v15, %v3921_v62 }
 0xb08   : > { %v3879_v35 = vrot.slane %v3872_v1, %v7119_v7  ;;  %v3887_v12 = vrot.slane %v3880_v23, %v7119_v7  ;;  %v4295_v42 = vmul.f32 1.442695, %v4273_v43 }
 0xb09   : > { %v3929_v56 = vrot.slane %v3922_v25, %v7119_v7  ;;  %v3937_v4 = vrot.slane %v3930_v31, %v7119_v7 }
 0xb0a   : > { %v3888_v30 = vcombine.low %v3879_v35, %v3887_v12  ;;  %v3889_v47 = vcombine.high %v3879_v35, %v3887_v12  ;;  %6790 = vpow2.f32 %v4295_v42 }
 0xb0b   : > { %v3938_v2 = vcombine.low %v3929_v56, %v3937_v4  ;;  %v3939_v49 = vcombine.high %v3929_v56, %v3937_v4  ;;  %v4374_v56 = vsel %vm2527_vm5, 65535, %v8416_v52 }
 0xb0c   : > { %v3953_v40 = vshrl.u32 %v3888_v30, 16  ;;  %v3961_v13 = vshrl.u32 %v3889_v47, 16 }
 0xb0d   : > { %v3951_v32 = vpack.i.b16 %v3938_v2, %v3888_v30  ;;  %v3954_v33 = vshrl.u32 %v3938_v2, 16  ;;  %v7853_v21 = vpack.i.b16 %v3939_v49, %v3889_v47  ;;  %v3962_v27 = vshrl.u32 %v3939_v49, 16 }
 0xb0f   : > { %6479 = vmatprep.subr.bf16.mxu0 %v3951_v32  ;;  %v3955_v16 = vpack.i.b16 %v3954_v33, %v3953_v40  ;;  %v7855_v39 = vpack.i.b16 %v3962_v27, %v3961_v13 }
 0xb10   : > { %6480 = vmatpush3.bf16.msra.mxu0 %v3951_v32 }
 0xb11   : > { %6487 = vmatprep.subr.bf16.mxu1 %v3955_v16 }
 0xb12   : > { %3614 = vrot.lane.b32.xlu1 %v3604_v17, %s6877_s27  ;;  %6488 = vmatpush3.bf16.msra.mxu1 %v3955_v16 }
 0xb14   : > { %v7863_v26 = vpop.eup %6790 }
 0xb15   : > { %v4329_v37 = vsel %vm4225_vm7, %v7863_v26, 0.0 }
 0xb17   : > { %3609 = vrot.lane.b32.xlu0 %v3604_v17, %s6876_s26 }
 0xb36   : > { %4330 = vadd.xlane.f32.xlu1 %v4329_v37 }
 0xb47   : > { %3619 = vrot.lane.b32.xlu1 %v3604_v17, %s6875_s3 }
 0xb67   : > { %v4307_v36 = vpop.xlane.xlu0 %4306 }
 0xb68   : > { %v4301_v53 = vpop.xlane.xlu1 %4300 }
 0xb6b   : > { %v4325_v61 = vpop.xlane.xlu0 %4324 }
 0xb6c   : > { %v4322_v54 = vpop.xlane.xlu1 %4321 }
 0xb6d   : > { %6792 = vrcp.f32 %v4322_v54 }
 0xb6f   : > { %v4319_v46 = vpop.xlane.xlu0 %4318 }
 0xb70   : > { %6794 = vrcp.f32 %v4319_v46 }
 0xb71   : > { %6796 = vrcp.f32 %v4301_v53 }
 0xb73   : > { %v4304_v48 = vpop.xlane.xlu0 %4303 }
 0xb74   : > { %6798 = vrcp.f32 %v4304_v48 }
 0xb77   : > { %v6793_v28 = vpop.eup %6792  ;;  %v4316_v11 = vpop.xlane.xlu1 %4315 }
 0xb78   : > { %v7872_v0 = vmul.f32 %v6793_v28, %v7769_v60 }
 0xb7a   : > { %v6795_v29 = vpop.eup %6794 }
 0xb7b   : > { %v4310_v57 = vpop.xlane.xlu0 %4309  ;;  %v7869_v50 = vmul.f32 %v6795_v29, %v7776_v10  ;;  %v6797_v55 = vpop.eup %6796 }
 0xb7c   : > { %6800 = vrcp.f32 %v4310_v57  ;;  %v4347_v8 = vmul.f32 %v6797_v55, %v7761_v44 }
 0xb7d   : > { %v4363_v63 = vpack.c.bf16 %v7872_v0, %v7869_v50 }
 0xb7e   : > { %v6799_v3 = vpop.eup %6798 }
 0xb7f   : > { %v4313_v6 = vpop.xlane.xlu1 %4312  ;;  %v4348_v9 = vmul.f32 %v6799_v3, %v7781_v58 }
 0xb80   : > { %6802 = vrcp.f32 %v4313_v6 }
 0xb81   : > { %v4359_v19 = vpack.c.bf16 %v4348_v9, %v4347_v8  ;;  %6804 = vrcp.f32 %v4307_v36 }
 0xb82   : > { %6806 = vrcp.f32 %v4316_v11 }
 0xb83   : > { %6483 = vmatprep.mubr.msk.bf16.mxu0 %vm4225_vm7, %v4359_v19 }
 0xb86   : > { %v6801_v10 = vpop.eup %6800 }
 0xb87   : > { %v4350_v60 = vmul.f32 %v6801_v10, %v7791_v18 }
 0xb8a   : > { %v6803_v45 = vpop.eup %6802 }
 0xb8b   : > { %v4351_v14 = vmul.f32 %v6803_v45, %v7803_v38  ;;  %v6805_v12 = vpop.eup %6804 }
 0xb8c   : > { %v6807_v2 = vpop.eup %6806  ;;  %v4349_v40 = vmul.f32 %v6805_v12, %v7759_v34 }
 0xb8d   : > { %v4361_v20 = vpack.c.bf16 %v4351_v14, %v4350_v60  ;;  %v4352_v16 = vmul.f32 %v6807_v2, %v7785_v22 }
 0xb8e   : > { %v4334_v5 = vpop.xlane.xlu1 %4333  ;;  %v4328_v62 = vpop.xlane.xlu0 %4327  ;;  %v4360_v37 = vpack.c.bf16 %v4349_v40, %v4349_v40 }
 0xb8f   : > { %6491 = vmatprep.mubr.msk.bf16.mxu1 %vm4225_vm7, %v4361_v20  ;;  %v4362_v22 = vpack.c.bf16 %v4352_v16, %v4352_v16 }
 0xb92   : > { %v3615_v15 = vpop.permute.xlu1 %3614  ;;  %v3610_v58 = vpop.permute.xlu0 %3609 }
 0xb93   : > { %v3755_v44 = vcombine.low %v3604_v17, %v3615_v15 }
 0xb95   : > { %v3762_v31 = vrot.slane %v3755_v44, %v7119_v7 }
 0xbc3   : > { %v4331_v1 = vpop.xlane.xlu1 %4330 }
 0xbc4   : > { %6808 = vrcp.f32 %v4331_v1 }
 0xbc5   : > { %6810 = vrcp.f32 %v4328_v62 }
 0xbc6   : > { %6812 = vrcp.f32 %v4325_v61 }
 0xbc7   : > { %v3620_v23 = vpop.permute.xlu1 %3619  ;;  %6814 = vrcp.f32 %v4334_v5 }
 0xbc8   : > { %v3765_v25 = vcombine.low %v3610_v58, %v3620_v23 }
 0xbca   : > { %v3772_v18 = vrot.slane %v3765_v25, %v7119_v7 }
 0xbcc   : > { %v3839_v38 = vpack.i.b16 %v3772_v18, %v3762_v31 }
 0xbce   : > { %v3947_v35 = vrot.slane %v3839_v38, %v7119_v7  ;;  %v6809_v49 = vpop.eup %6808 }
 0xbcf   : > { %v6811_v27 = vpop.eup %6810  ;;  %v4357_v42 = vmul.f32 %v6809_v49, %v7863_v26 }
 0xbd0   : > { %v3966_v4 = vpack.i.b16 %v8416_v52, %v3947_v35  ;;  %v3967_v30 = vshrl.u32 %v3947_v35, 16  ;;  %v3948_v47 = vcombine.high %v3947_v35, %v8416_v52  ;;  %v6813_v36 = vpop.eup %6812  ;;  %v4356_v53 = vmul.f32 %v6811_v27, %v7833_v41 }
 0xbd1   : > { %v6815_v54 = vpop.eup %6814  ;;  %v4355_v46 = vmul.f32 %v6813_v36, %v7767_v59  ;;  %v6638_v59 = vld [vmem:[%s8369_s12] sm:$0xff]  }
 0xbd2   : > { %v4376_v13 = vand.u32 %v4374_v56, %v3966_v4  ;;  %v3968_v32 = vpack.i.b16 %v8416_v52, %v3967_v30  ;;  %v3971_v33 = vshrl.u32 %v3948_v47, 16  ;;  %v3970_v43 = vpack.i.b16 %v8416_v52, %v3948_v47 }
 0xbd3   : > { %v4365_v26 = vpack.c.bf16 %v4357_v42, %v4356_v53  ;;  %v4358_v48 = vmul.f32 %v6815_v54, %v7829_v24  ;;  %v6640_v24 = vld [vmem:[%s8369_s12 + $0x10] sm:$0xff]  }
 0xbd4   : > { %6481 = vmatprep.subr.bf16.mxu0 %v4376_v13  ;;  %v4433_v17 = vand.u32 %v4374_v56, %v3968_v32  ;;  %v3972_v34 = vpack.i.b16 %v8416_v52, %v3971_v33  ;;  %v4490_v61 = vand.u32 %v4374_v56, %v3970_v43 }
 0xbd5   : > { %6482 = vmatpush3.bf16.msra.mxu0 %v4376_v13  ;;  %v4366_v28 = vpack.c.bf16 %v4358_v48, %v4358_v48  ;;  %v6641_v13 = vld [vmem:[%s8369_s12 + $0x18] sm:$0xff]  }
 0xbd6   : > { %6489 = vmatprep.subr.bf16.mxu1 %v4433_v17  ;;  %6495 = vmatprep.subr.bf16.mxu0 %v7853_v21  ;;  %v4547_v41 = vand.u32 %v4374_v56, %v3972_v34 }
 0xbd7   : > { %6490 = vmatpush3.bf16.msra.mxu1 %v4433_v17 }
 0xbd8   : > { %6484 = vmatmul.mubr.msk.bf16.vlgmr.msra.gmra.mrb[24].mxu0 %vm4225_vm7, %v4360_v37  ;;  %6503 = vmatprep.subr.bf16.mxu1 %v7855_v39 }
 0xbd9   : > { %6496 = vmatpush3.bf16.msra.mxu0 %v7853_v21  ;;  %6499 = vmatprep.mubr.msk.bf16.mxu0 %vm4225_vm7, %v4363_v63  ;;  %v4364_v21 = vpack.c.bf16 %v4355_v46, %v4355_v46 }
 0xbda   : > { %6492 = vmatmul.mubr.msk.bf16.vlgmr.msra.gmra.mrb[40].mxu1 %vm4225_vm7, %v4362_v22  ;;  %6497 = vmatprep.subr.bf16.mxu0 %v4490_v61 }
 0xbdb   : > { %6504 = vmatpush3.bf16.msra.mxu1 %v7855_v39  ;;  %6507 = vmatprep.mubr.msk.bf16.mxu1 %vm4225_vm7, %v4365_v26  ;;  %v6639_v39 = vld [vmem:[%s8369_s12 + $0x8] sm:$0xff]  }
 0xbdc   : > { %6505 = vmatprep.subr.bf16.mxu1 %v4547_v41 }
 0xbdd   : > { %6498 = vmatpush3.bf16.msra.mxu0 %v4490_v61 }
 0xbde   : > { %6511 = vmatprep.subr.bf16.mxu0 %v6638_v59 }
 0xbdf   : > { %6506 = vmatpush3.bf16.msra.mxu1 %v4547_v41  ;;  %v6642_v41 = vld [vmem:[%s8369_s12 + $0x20] sm:$0xff]  }
 0xbe0   : > { %6500 = vmatmul.mubr.msk.bf16.vlgmr.msra.gmra.mrb[28].mxu0 %vm4225_vm7, %v4364_v21 }
 0xbe1   : > { %6512 = vmatpush3.bf16.msra.mxu0 %v6638_v59 }
 0xbe2   : > { %6508 = vmatmul.mubr.msk.bf16.vlgmr.msra.gmra.mrb[44].mxu1 %vm4225_vm7, %v4366_v28  ;;  %6513 = vmatprep.subr.bf16.mxu0 %v6639_v39 }
 0xbe3   : > { %5389 = vmatprep.mubr.bf16.mxu1 %v8416_v52 }
 0xbe5   : > { %6514 = vmatpush3.bf16.msra.mxu0 %v6639_v39 }
 0xbe6   : > { %6515 = vmatprep.subr.bf16.mxu0 %v6640_v24 }
 0xbe9   : > { %6516 = vmatpush3.bf16.msra.mxu0 %v6640_v24 }
 0xbea   : > { %6517 = vmatprep.subr.bf16.mxu0 %v6641_v13 }
 0xbed   : > { %6518 = vmatpush3.bf16.msra.mxu0 %v6641_v13 }
 0xbee   : > { %6519 = vmatprep.subr.bf16.mxu0 %v6642_v41 }
 0xbf1   : > { %6520 = vmatpush3.bf16.msra.mxu0 %v6642_v41 }
 0xcab   : > { %v6485_v29 = vpop.f32.mrb[24].mxu0 }
 0xcac   : > { %v4412_v11 = vpop.f32.mrb[25].mxu0 }
 0xcad   : > { %v6486_v57 = vpop.f32.mrb[26].mxu0  ;;  %v6493_v50 = vpop.f32.mrb[40].mxu1 }
 0xcae   : > { %v4415_v0 = vpop.f32.mrb[27].mxu0  ;;  %v4469_v55 = vpop.f32.mrb[41].mxu1 }
 0xcaf   : > { %v6494_v63 = vpop.f32.mrb[42].mxu1 }
 0xcb0   : > { %v4472_v3 = vpop.f32.mrb[43].mxu1 }
 0xcb3   : > { %v6501_v6 = vpop.f32.mrb[28].mxu0 }
 0xcb4   : > { %v4733_v8 = vcombine.low %v6485_v29, %v6501_v6  ;;  %v4526_v9 = vpop.f32.mrb[29].mxu0 }
 0xcb5   : > { %v4597_v19 = vcombine.low %v4412_v11, %v4526_v9  ;;  %v4598_v10 = vcombine.high %v4412_v11, %v4526_v9  ;;  %v6502_v45 = vpop.f32.mrb[30].mxu0  ;;  %v6509_v60 = vpop.f32.mrb[44].mxu1 }
 0xcb6   : > { %v4741_v14 = vcombine.low %v6493_v50, %v6509_v60  ;;  %v4529_v20 = vpop.f32.mrb[31].mxu0  ;;  %v4583_v5 = vpop.f32.mrb[45].mxu1  ;;  %v4740_v44 = vrot.slane %v4733_v8, %v7111_v51  ;;  %v8417_v45 = vmov 0.0  }
 0xcb7   : > { %v4665_v15 = vcombine.low %v4415_v0, %v4529_v20  ;;  %v4666_v62 = vcombine.high %v4415_v0, %v4529_v20  ;;  %v6510_v1 = vpop.f32.mrb[46].mxu1  ;;  %v4613_v23 = vcombine.low %v4469_v55, %v4583_v5  ;;  %v4614_v25 = vcombine.high %v4469_v55, %v4583_v5 }
 0xcb8   : > { %v4748_v58 = vrot.slane %v4741_v14, %v7111_v51  ;;  %v4586_v31 = vpop.f32.mrb[47].mxu1  ;;  %v4605_v18 = vrot.slane %v4597_v19, %v7111_v51  ;;  %v4612_v12 = vrot.slane %v4598_v10, %v7111_v51  ;;  %v6643_v14 = vld [vmem:[%s8369_s12 + $0x28] sm:$0xff]  }
 0xcb9   : > { %v4681_v38 = vcombine.low %v4472_v3, %v4586_v31  ;;  %v4682_v35 = vcombine.high %v4472_v3, %v4586_v31  ;;  %v4621_v4 = vrot.slane %v4613_v23, %v7111_v51  ;;  %v4628_v30 = vrot.slane %v4614_v25, %v7111_v51  ;;  %6521 = vmatprep.subr.bf16.mxu0 %v6643_v14 }
 0xcba   : > { %v4749_v56 = vcombine.low %v4740_v44, %v4748_v58  ;;  %v4673_v47 = vrot.slane %v4665_v15, %v7111_v51  ;;  %v4680_v2 = vrot.slane %v4666_v62, %v7111_v51  ;;  %6522 = vmatpush3.bf16.msra.mxu0 %v6643_v14  ;;  %v8418_v14 = vld [vmem:[#allocation7_spill] sm:$0xff] }
 0xcbb   : > { %v4689_v49 = vrot.slane %v4681_v38, %v7111_v51  ;;  %v4696_v40 = vrot.slane %v4682_v35, %v7111_v51  ;;  %v4629_v33 = vcombine.low %v4605_v18, %v4621_v4  ;;  %v4630_v27 = vcombine.high %v4605_v18, %v4621_v4  ;;  %v6644_v18 = vld [vmem:[%s8369_s12 + $0x30] sm:$0xff]  }
 0xcbc   : > { %v4892_v32 = vrot.slane %v4749_v56, %v7119_v7  ;;  %v4645_v16 = vcombine.low %v4612_v12, %v4628_v30  ;;  %v4646_v17 = vcombine.high %v4612_v12, %v4628_v30  ;;  %6523 = vmatprep.subr.bf16.mxu0 %v6644_v18 }
 0xcbd   : > { %v4697_v43 = vcombine.low %v4673_v47, %v4689_v49  ;;  %v4698_v42 = vcombine.high %v4673_v47, %v4689_v49  ;;  %v4713_v37 = vcombine.low %v4680_v2, %v4696_v40  ;;  %v4637_v34 = vrot.slane %v4629_v33, %v7119_v7 }
 0xcbe   : > { %v4644_v36 = vrot.slane %v4630_v27, %v7119_v7  ;;  %v4653_v53 = vrot.slane %v4645_v16, %v7119_v7  ;;  %v4714_v22 = vcombine.high %v4680_v2, %v4696_v40  ;;  %v4660_v61 = vrot.slane %v4646_v17, %v7119_v7  ;;  %v6645_v2 = vld [vmem:[%s8369_s12 + $0x38] sm:$0xff]   ;;  %6524 = vmatpush3.bf16.msra.mxu0 %v6644_v18  ;;  %v6654_v18 = vld [vmem:[%s8373_s16 + $0x24] ss:$16 sps:$4 sm:$0xff]  }
 0xcbf   : > { %v4705_v54 = vrot.slane %v4697_v43, %v7119_v7  ;;  %v4712_v26 = vrot.slane %v4698_v42, %v7119_v7  ;;  %v4721_v46 = vrot.slane %v4713_v37, %v7119_v7  ;;  %v4899_v59 = vrot.slane %v4892_v32, %v7111_v51  ;;  %6525 = vmatprep.subr.bf16.mxu0 %v6645_v2 }
 0xcc0   : > { %v4750_v48 = vcombine.low %v4637_v34, %v4644_v36  ;;  %v6152_v21 = vcombine.high %v4637_v34, %v4644_v36  ;;  %v4728_v28 = vrot.slane %v4714_v22, %v7119_v7  ;;  %v4766_v39 = vcombine.low %v4653_v53, %v4660_v61 }
 0xcc1   : > { %v6153_v24 = vcombine.high %v4653_v53, %v4660_v61  ;;  %v4818_v29 = vcombine.low %v4705_v54, %v4712_v26  ;;  %v6154_v11 = vcombine.high %v4705_v54, %v4712_v26  ;;  %v4907_v10 = vrot.slane %v4899_v59, %v7119_v7 }
 0xcc2   : > { %v4757_v57 = vrot.slane %v4750_v48, %v7111_v51  ;;  %v4765_v50 = vrot.slane %v6152_v21, %v7111_v51  ;;  %v4834_v0 = vcombine.low %v4721_v46, %v4728_v28  ;;  %v6155_v55 = vcombine.high %v4721_v46, %v4728_v28  ;;  %6526 = vmatpush3.bf16.msra.mxu0 %v6645_v2 }
 0xcc3   : > { %v4773_v63 = vrot.slane %v4766_v39, %v7111_v51  ;;  %v4781_v3 = vrot.slane %v6153_v24, %v7111_v51  ;;  %v4825_v6 = vrot.slane %v4818_v29, %v7111_v51  ;;  %v4833_v8 = vrot.slane %v6154_v11, %v7111_v51 }
 0xcc4   : > { %v4841_v9 = vrot.slane %v4834_v0, %v7111_v51  ;;  %v4849_v19 = vrot.slane %v6155_v55, %v7111_v51  ;;  %v4900_v60 = vcombine.high %v4899_v59, %v8417_v45  ;;  %v4782_v20 = vcombine.low %v4757_v57, %v4765_v50 }
 0xcc5   : > { %v4798_v5 = vcombine.low %v4773_v63, %v4781_v3  ;;  %v4850_v15 = vcombine.low %v4825_v6, %v4833_v8  ;;  %v4783_v62 = vcombine.high %v4757_v57, %v4765_v50  ;;  %v4915_v1 = vcombine.high %v4907_v10, %v8417_v45 }
 0xcc6   : > { %v4866_v44 = vcombine.low %v4841_v9, %v4849_v19  ;;  %v4799_v58 = vcombine.high %v4773_v63, %v4781_v3  ;;  %v4790_v23 = vrot.slane %v4782_v20, %v7119_v7  ;;  %v4851_v12 = vcombine.high %v4825_v6, %v4833_v8  ;;  %v6156_v6 = vld [vmem:[%s8370_s13] ss:$0 sm:$0xff] }
 0xcc7   : > { %v4806_v51 = vrot.slane %v4798_v5, %v7119_v7  ;;  %v4858_v25 = vrot.slane %v4850_v15, %v7119_v7  ;;  %v4797_v31 = vrot.slane %v4783_v62, %v7119_v7  ;;  %4924 = vrot.lane.b32.xlu1 %v4915_v1, %s6875_s3  ;;  %v4914_v56 = vrot.slane %v4900_v60, %v7119_v7  ;;  %v8419_v15 = vld [vmem:[#allocation8_spill] sm:$0xff]  ;;  %v8420_v1 = vld [vmem:[#allocation9_spill] sm:$0xff] }
 0xcc8   : > { %v4874_v38 = vrot.slane %v4866_v44, %v7119_v7  ;;  %v4813_v35 = vrot.slane %v4799_v58, %v7119_v7  ;;  %v4867_v47 = vcombine.high %v4841_v9, %v4849_v19  ;;  %v4865_v32 = vrot.slane %v4851_v12, %v7119_v7  ;;  %v6655_v12 = vld [vmem:[%s8373_s16 + $0x28] ss:$16 sps:$4 sm:$0xff]  }
 0xcc9   : > { %v4814_v4 = vcombine.low %v4790_v23, %v4806_v51  ;;  %v4815_v30 = vcombine.high %v4790_v23, %v4806_v51  ;;  %v4916_v42 = vcombine.high %v4914_v56, %v8417_v45  ;;  %v6646_v23 = vld [vmem:[%s8373_s16] ss:$16 sps:$4 sm:$0xff]   ;;  %v6648_v51 = vld [vmem:[%s8373_s16 + $0x4] ss:$16 sps:$4 sm:$0xff]  }
 0xcca   : > { %v4883_v49 = vcombine.high %v4858_v25, %v4874_v38  ;;  %v4882_v40 = vcombine.low %v4858_v25, %v4874_v38  ;;  %v4816_v13 = vcombine.low %v4797_v31, %v4813_v35  ;;  %v4881_v33 = vrot.slane %v4867_v47, %v7119_v7  ;;  %v6649_v25 = vld [vmem:[%s8373_s16 + $0x8] ss:$16 sps:$4 sm:$0xff]   ;;  %5357 = vmatprep.subr.bf16.mxu1 %v6648_v51  ;;  %v6657_v38 = vld [vmem:[%s8373_s16 + $0x2c] ss:$16 sps:$4 sm:$0xff]  }
 0xccb   : > { %v4817_v27 = vcombine.high %v4797_v31, %v4813_v35  ;;  %4936 = vrot.lane.b32.xlu1 %v4914_v56, %s6877_s27  ;;  %v6651_v31 = vld [vmem:[%s8373_s16 + $0xc] ss:$16 sps:$4 sm:$0xff]   ;;  %5358 = vmatpush1.bf16.msra.mxu1 %v6646_v23  ;;  %v6652_v35 = vld [vmem:[%s8373_s16 + $0x20] ss:$16 sps:$4 sm:$0xff]  }
 0xccc   : > { %v6567_v16 = vpack.i.bf16 %v4883_v49, %v4815_v30  ;;  %v4884_v17 = vcombine.low %v4865_v32, %v4881_v33  ;;  %v4885_v43 = vcombine.high %v4865_v32, %v4881_v33  ;;  %5408 = vmatprep.subr.bf16.mxu0 %v6651_v31  ;;  %5359 = vmatprep.subr.bf16.mxu1 %v6654_v18  ;;  %v6166_v23 = vld [vmem:[%s8372_s15] ss:$0 sm:$0xff] }
 0xcce   : > { %6568 = vrot.lane.b32.xlu0 %v6567_v16, %s6875_s3  ;;  %v6572_v37 = vpack.i.bf16 %v4884_v17, %v4816_v13  ;;  %v6577_v34 = vpack.i.bf16 %v4885_v43, %v4817_v27  ;;  %v6660_v43 = vld [vmem:[%s8373_s16 + $0x44] ss:$16 sps:$4 sm:$0xff]   ;;  %s8427_s3 = sld [smem:[#allocation17_spill]] }
 0xccf   : > { %4948 = vrot.lane.b32.xlu1 %v4916_v42, %s6876_s26  ;;  %5360 = vmatpush1.bf16.msra.mxu1 %v6652_v35  ;;  %v6663_v42 = vld [vmem:[%s8373_s16 + $0x4c] ss:$16 sps:$4 sm:$0xff]  }
 0xcd0   : > { %5361 = vmatprep.subr.bf16.mxu1 %v6660_v43  ;;  %v6706_v43 = vld [vmem:[%s8421_s18 + $0x58] sm:$0xff]  }
 0xcd2   : > { %6573 = vrot.lane.b32.xlu0 %v6572_v37, %s6877_s27  ;;  %v6658_v37 = vld [vmem:[%s8373_s16 + $0x40] ss:$16 sps:$4 sm:$0xff]  }
 0xcd3   : > { %5362 = vmatpush1.bf16.msra.mxu1 %v6658_v37  ;;  %v6708_v37 = vld [vmem:[%s8421_s18 + $0x18] sm:$0xff]  }
 0xcd6   : > { %6578 = vrot.lane.b32.xlu0 %v6577_v34, %s6876_s26  ;;  %v6661_v34 = vld [vmem:[%s8373_s16 + $0x48] ss:$16 sps:$4 sm:$0xff]  }
 0xd39   : > { %v4925_v7 = vpop.permute.xlu1 %4924 }
 0xd3a   : > { %v4955_v41 = vsel %vm1696_vm1, %v4907_v10, %v4925_v7  ;;  %v6666_v7 = vld [vmem:[%s8373_s16 + $0x64] ss:$16 sps:$4 sm:$0xff]  }
 0xd3b   : > { %5363 = vmatprep.subr.bf16.mxu1 %v6666_v7  ;;  %v6710_v7 = vld [vmem:[%s8421_s18 + $0x60] sm:$0xff]  }
 0xd3d   : > { %v4937_v53 = vpop.permute.xlu1 %4936 }
 0xd3e   : > { %v4958_v21 = vsel %vm2469_vm3, %v4955_v41, %v4937_v53  ;;  %v6664_v53 = vld [vmem:[%s8373_s16 + $0x60] ss:$16 sps:$4 sm:$0xff]   ;;  %v6678_v41 = vld [vmem:[%s8373_s16 + $0xa4] ss:$16 sps:$4 sm:$0xff]  }
 0xd3f   : > { %5364 = vmatpush1.bf16.msra.mxu1 %v6664_v53  ;;  %v6712_v53 = vld [vmem:[%s8421_s18 + $0x20] sm:$0xff]  }
 0xd40   : > { %v6569_v36 = vpop.permute.xlu0 %6568 }
 0xd41   : > { %v6571_v61 = vunpack.i.h.bf16 %v6569_v36  ;;  %v6570_v54 = vunpack.i.l.bf16 %v6569_v36  ;;  %v4949_v48 = vpop.permute.xlu1 %4948  ;;  %v6669_v36 = vld [vmem:[%s8373_s16 + $0x6c] ss:$16 sps:$4 sm:$0xff]  }
 0xd42   : > { %v4961_v11 = vsel %vm2472_vm4, %v4958_v21, %v4949_v48  ;;  %v6681_v48 = vld [vmem:[%s8373_s16 + $0xac] ss:$16 sps:$4 sm:$0xff]   ;;  %v6676_v21 = vld [vmem:[%s8373_s16 + $0xa0] ss:$16 sps:$4 sm:$0xff]  }
 0xd43   : > { %v4953_v59 = vsel %vm1696_vm1, %v4814_v4, %v6570_v54  ;;  %v4954_v39 = vsel %vm1696_vm1, %v4882_v40, %v6571_v61  ;;  %v4963_v3 = vpack.c.bf16 %v4961_v11, %v4961_v11  ;;  %v6672_v61 = vld [vmem:[%s8373_s16 + $0x84] ss:$16 sps:$4 sm:$0xff]   ;;  %v6675_v54 = vld [vmem:[%s8373_s16 + $0x8c] ss:$16 sps:$4 sm:$0xff]  }
 0xd44   : > { %v6574_v22 = vpop.permute.xlu0 %6573  ;;  %5365 = vmatprep.subr.bf16.mxu1 %v6672_v61  ;;  %v6690_v11 = vld [vmem:[%s8373_s16 + $0xe4] ss:$16 sps:$4 sm:$0xff]   ;;  %v6714_v61 = vld [vmem:[%s8421_s18 + $0x68] sm:$0xff]  }
 0xd45   : > { %v6576_v26 = vunpack.i.h.bf16 %v6574_v22  ;;  %v6575_v46 = vunpack.i.l.bf16 %v6574_v22  ;;  %v6667_v22 = vld [vmem:[%s8373_s16 + $0x68] ss:$16 sps:$4 sm:$0xff]  }
 0xd47   : > { %v4956_v57 = vsel %vm2469_vm3, %v4953_v59, %v6575_v46  ;;  %v4957_v50 = vsel %vm2469_vm3, %v4954_v39, %v6576_v26  ;;  %v6670_v26 = vld [vmem:[%s8373_s16 + $0x80] ss:$16 sps:$4 sm:$0xff]   ;;  %v6673_v46 = vld [vmem:[%s8373_s16 + $0x88] ss:$16 sps:$4 sm:$0xff]   ;;  %v6684_v39 = vld [vmem:[%s8373_s16 + $0xc4] ss:$16 sps:$4 sm:$0xff]  }
 0xd48   : > { %v6579_v28 = vpop.permute.xlu0 %6578  ;;  %5366 = vmatpush1.bf16.msra.mxu1 %v6670_v26  ;;  %v6682_v59 = vld [vmem:[%s8373_s16 + $0xc0] ss:$16 sps:$4 sm:$0xff]   ;;  %v6716_v26 = vld [vmem:[%s8421_s18 + $0x28] sm:$0xff]  }
 0xd49   : > { %v6581_v24 = vunpack.i.h.bf16 %v6579_v28  ;;  %v6580_v29 = vunpack.i.l.bf16 %v6579_v28  ;;  %v6679_v28 = vld [vmem:[%s8373_s16 + $0xa8] ss:$16 sps:$4 sm:$0xff]   ;;  %5367 = vmatprep.subr.bf16.mxu1 %v6678_v41  ;;  %v6718_v41 = vld [vmem:[%s8421_s18 + $0x70] sm:$0xff]  }
 0xd4b   : > { %v4959_v0 = vsel %vm2472_vm4, %v4956_v57, %v6580_v29  ;;  %v4960_v55 = vsel %vm2472_vm4, %v4957_v50, %v6581_v24  ;;  %v6685_v24 = vld [vmem:[%s8373_s16 + $0xc8] ss:$16 sps:$4 sm:$0xff]   ;;  %v6687_v29 = vld [vmem:[%s8373_s16 + $0xcc] ss:$16 sps:$4 sm:$0xff]   ;;  %v6688_v50 = vld [vmem:[%s8373_s16 + $0xe0] ss:$16 sps:$4 sm:$0xff]  }
 0xd4c   : > { %v4962_v63 = vpack.c.bf16 %v4960_v55, %v4959_v0  ;;  %5368 = vmatpush1.bf16.msra.mxu1 %v6676_v21  ;;  %v6693_v57 = vld [vmem:[%s8373_s16 + $0xec] ss:$16 sps:$4 sm:$0xff]   ;;  %v6691_v0 = vld [vmem:[%s8373_s16 + $0xe8] ss:$16 sps:$4 sm:$0xff]   ;;  %v6720_v21 = vld [vmem:[%s8421_s18 + $0x30] sm:$0xff]  }
 0xd4d   : > { %5369 = vmatprep.subr.bf16.mxu1 %v6684_v39  ;;  %v6723_v39 = vld [vmem:[%s8421_s18 + $0xf8] sm:$0xff]  }
 0xd4e   : > { %6527 = vmatprep.mubr.bf16.mxu0 %v4962_v63 }
 0xd4f   : > { %6528 = vmatmul.mubr.bf16.vlgmr.msra.gmra.mrb[32].mxu0 %v4963_v3 }
 0xd50   : > { %5440 = vmatprep.mubr.bf16.mxu0 %v8416_v52  ;;  %5409 = vmatpush1.bf16.msra.mxu0 %v6649_v25 }
 0xd51   : > { %5410 = vmatprep.subr.bf16.mxu0 %v6657_v38  ;;  %5370 = vmatpush1.bf16.msra.mxu1 %v6682_v59  ;;  %v6722_v59 = vld [vmem:[%s8421_s18 + $0x78] sm:$0xff]  }
 0xd52   : > { %5371 = vmatprep.subr.bf16.mxu1 %v6690_v11  ;;  %v5175_v11 = vld [vmem:[%s8422_s25] sm:$0xf] }
 0xd54   : > { %5411 = vmatpush1.bf16.msra.mxu0 %v6655_v12 }
 0xd55   : > { %5412 = vmatprep.subr.bf16.mxu0 %v6663_v42  ;;  %5372 = vmatpush1.bf16.msra.mxu1 %v6688_v50  ;;  %v6707_v42 = vld [vmem:[%s8421_s18 + $0xd8] sm:$0xff]  }
 0xd58   : > { %5413 = vmatpush1.bf16.msra.mxu0 %v6661_v34  ;;  %v6709_v34 = vld [vmem:[%s8421_s18 + $0x98] sm:$0xff]  }
 0xd59   : > { %5414 = vmatprep.subr.bf16.mxu0 %v6669_v36  ;;  %v6711_v36 = vld [vmem:[%s8421_s18 + $0xe0] sm:$0xff]  }
 0xd5c   : > { %5415 = vmatpush1.bf16.msra.mxu0 %v6667_v22  ;;  %v6713_v22 = vld [vmem:[%s8421_s18 + $0xa0] sm:$0xff]  }
 0xd5d   : > { %5416 = vmatprep.subr.bf16.mxu0 %v6675_v54  ;;  %v6715_v54 = vld [vmem:[%s8421_s18 + $0xe8] sm:$0xff]  }
 0xd60   : > { %5417 = vmatpush1.bf16.msra.mxu0 %v6673_v46  ;;  %v6717_v46 = vld [vmem:[%s8421_s18 + $0xa8] sm:$0xff]  }
 0xd61   : > { %5418 = vmatprep.subr.bf16.mxu0 %v6681_v48  ;;  %v6719_v48 = vld [vmem:[%s8421_s18 + $0xf0] sm:$0xff]  }
 0xd64   : > { %5419 = vmatpush1.bf16.msra.mxu0 %v6679_v28  ;;  %v6721_v28 = vld [vmem:[%s8421_s18 + $0xb0] sm:$0xff]  }
 0xd65   : > { %5420 = vmatprep.subr.bf16.mxu0 %v6687_v29  ;;  %v6725_v29 = vld [vmem:[%s8421_s18 + $0xb8] sm:$0xff]  }
 0xd68   : > { %5421 = vmatpush1.bf16.msra.mxu0 %v6685_v24  ;;  %v6724_v24 = vld [vmem:[%s8421_s18 + $0x38] sm:$0xff]  }
 0xd69   : > { %5422 = vmatprep.subr.bf16.mxu0 %v6693_v57  ;;  %v8423_v57 = vld [vmem:[#allocation6_spill] sm:$0xff] }
 0xd6a   : > { %v5191_v50 = vsub.s32 3, %v8423_v57 }
 0xd6c   : > { %5423 = vmatpush1.bf16.msra.mxu0 %v6691_v0  ;;  %v8424_v0 = vsub.s32 0, %v8423_v57 }
 0xe22   : > { %v6529_v8 = vpop.f32.mrb[32].mxu0 }
 0xe23   : > { %v5078_v9 = vadd.f32 %v6529_v8, %v6156_v6  ;;  %v5069_v19 = vpop.f32.mrb[33].mxu0 }
 0xe24   : > { %v5070_v10 = vadd.f32 %v6156_v6, %v5069_v19  ;;  %v6530_v45 = vpop.f32.mrb[34].mxu0 }
 0xe25   : > { %v5072_v60 = vpop.f32.mrb[35].mxu0  ;;  %v8000_v62 = vadd.f32 %v5078_v9, %v8419_v15 }
 0xe26   : > { %v7997_v20 = vadd.f32 %v5070_v10, %v8418_v14  ;;  %v5073_v5 = vadd.f32 %v6156_v6, %v5072_v60  ;;  %v6165_v14 = vld [vmem:[%s8371_s14] ss:$0 sm:$0xff] }
 0xe27   : > { %v5092_v58 = vsel %vm2527_vm5, %v8000_v62, 0.0 }
 0xe28   : > { %v8003_v44 = vadd.f32 %v5073_v5, %v8420_v1  ;;  %5088 = vadd.xlane.f32.xlu0 %v7997_v20 }
 0xe2a   : > { %5090 = vadd.xlane.f32.xlu1 %v8003_v44 }
 0xe2c   : > { %5093 = vadd.xlane.f32.xlu0 %v5092_v58 }
 0xeb5   : > { %v5089_v56 = vpop.xlane.xlu0 %5088 }
 0xeb6   : > { %v5095_v4 = vmul.f32 0.0078125, %v5089_v56 }
 0xeb7   : > { %v5091_v30 = vpop.xlane.xlu1 %5090 }
 0xeb8   : > { %v8034_v47 = vsub.f32 %v7997_v20, %v5095_v4  ;;  %v5096_v2 = vmul.f32 0.0078125, %v5091_v30  ;;  %v6694_v30 = vld [vmem:[%s8421_s18 + $0x40] sm:$0xff]  }
 0xeb9   : > { %v5094_v49 = vpop.xlane.xlu0 %5093  ;;  %6323 = vmatprep.subr.bf16.mxu1 %v6694_v30 }
 0xeba   : > { %v8037_v40 = vsub.f32 %v8003_v44, %v5096_v2  ;;  %v5097_v13 = vmul.f32 0.0078125, %v5094_v49  ;;  %v5101_v32 = vmul.f32 %v8034_v47, %v8034_v47  ;;  %v6696_v2 = vld [vmem:[%s8421_s18] sm:$0xff]   ;;  %v6698_v49 = vld [vmem:[%s8421_s18 + $0x48] sm:$0xff]  }
 0xebc   : > { %v8042_v33 = vsub.f32 %v8000_v62, %v5097_v13  ;;  %5104 = vadd.xlane.f32.xlu0 %v5101_v32  ;;  %v5102_v27 = vmul.f32 %v8037_v40, %v8037_v40  ;;  %v6700_v13 = vld [vmem:[%s8421_s18 + $0x8] sm:$0xff]  }
 0xebd   : > { %v6701_v32 = vld [vmem:[%s8421_s18 + $0x88] sm:$0xff]  }
 0xebe   : > { %5106 = vadd.xlane.f32.xlu1 %v5102_v27  ;;  %v5103_v16 = vmul.f32 %v8042_v33, %v8042_v33  ;;  %v6703_v27 = vld [vmem:[%s8421_s18 + $0xd0] sm:$0xff]  }
 0xec0   : > { %v5108_v17 = vsel %vm2527_vm5, %v5103_v16, 0.0  ;;  %v6704_v16 = vld [vmem:[%s8421_s18 + $0x10] sm:$0xff]  }
 0xec1   : > { %5109 = vadd.xlane.f32.xlu0 %v5108_v17  ;;  %v6705_v17 = vld [vmem:[%s8421_s18 + $0x90] sm:$0xff]  }
 0xf49   : > { %v5105_v55 = vpop.xlane.xlu0 %5104 }
 0xf4a   : > { %v5111_v63 = vmul.f32 0.0078125, %v5105_v55  ;;  %v8234_v55 = vrot.slane %v5175_v11, %v8424_v0 }
 0xf4b   : > { %v5107_v3 = vpop.xlane.xlu1 %5106 }
 0xf4c   : > { %v5114_v6 = vadd.f32 1e-06, %v5111_v63  ;;  %v5112_v8 = vmul.f32 0.0078125, %v5107_v3  ;;  %v8425_v63 = vsub.s32 2, %v8423_v57 }
 0xf4e   : > { %6816 = vrsqrt.f32 %v5114_v6  ;;  %v5115_v9 = vadd.f32 1e-06, %v5112_v8  ;;  %v5110_v19 = vpop.xlane.xlu0 %5109  ;;  %v8238_v3 = vrot.slane %v5175_v11, %v8425_v63  ;;  %v8426_v6 = vsub.s32 1, %v8423_v57 }
 0xf4f   : > { %v5113_v10 = vmul.f32 0.0078125, %v5110_v19 }
 0xf50   : > { %6818 = vrsqrt.f32 %v5115_v9  ;;  %v8242_v8 = vrot.slane %v5175_v11, %v8426_v6  ;;  %v8244_v9 = vrot.slane %v5175_v11, %v5191_v50 }
 0xf51   : > { %v5116_v45 = vadd.f32 1e-06, %v5113_v10 }
 0xf53   : > { %6820 = vrsqrt.f32 %v5116_v45 }
 0xf58   : > { %v6817_v60 = vpop.eup %6816 }
 0xf59   : > { %v5120_v5 = vmul.f32 %v6817_v60, %v8034_v47  ;;  %v6695_v47 = vld [vmem:[%s8421_s18 + $0xc0] sm:$0xff]  }
 0xf5a   : > { %v6819_v15 = vpop.eup %6818  ;;  %6351 = vmatprep.subr.bf16.mxu0 %v6695_v47 }
 0xf5b   : > { %v5121_v1 = vmul.f32 %v6819_v15, %v8037_v40  ;;  %v5129_v58 = vmul.f32 %v6165_v14, %v5120_v5  ;;  %v6699_v40 = vld [vmem:[%s8421_s18 + $0xc8] sm:$0xff]  }
 0xf5d   : > { %v6821_v51 = vpop.eup %6820  ;;  %v5130_v25 = vmul.f32 %v6165_v14, %v5121_v1  ;;  %v5138_v18 = vadd.f32 %v6166_v23, %v5129_v58 }
 0xf5e   : > { %v5122_v31 = vmul.f32 %v6821_v51, %v8042_v33  ;;  %v6702_v33 = vld [vmem:[%s8421_s18 + $0x50] sm:$0xff]  }
 0xf5f   : > { %v5139_v38 = vadd.f32 %v6166_v23, %v5130_v25 }
 0xf60   : > { %v5131_v12 = vmul.f32 %v6165_v14, %v5122_v31 }
 0xf61   : > { %v5141_v35 = vpack.c.bf16 %v5139_v38, %v5138_v18 }
 0xf62   : > { %v5140_v56 = vadd.f32 %v6166_v23, %v5131_v12 }
 0xf63   : > { %5390 = vmatmul.mubr.bf16.vlgmr.msra.gmra.mrb[48].mxu1 %v5141_v35  ;;  %5441 = vmatmul.mubr.bf16.vlgmr.msra.gmra.mrb[36].mxu0 %v5141_v35 }
 0xf64   : > { %5399 = vmatprep.mubr.bf16.mxu1 %v8416_v52  ;;  %5450 = vmatprep.mubr.bf16.mxu0 %v8416_v52  ;;  %v5142_v4 = vpack.c.bf16 %v5140_v56, %v5140_v56  ;;  %v6697_v52 = vld [vmem:[%s8421_s18 + $0x80] sm:$0xff]  }
 0xf65   : > { %6324 = vmatpush3.bf16.msra.mxu1 %v6696_v2  ;;  %6352 = vmatpush3.bf16.msra.mxu0 %v6697_v52 }
 0xf66   : > { %6325 = vmatprep.subr.bf16.mxu1 %v6698_v49  ;;  %6353 = vmatprep.subr.bf16.mxu0 %v6699_v40 }
 0xf69   : > { %6326 = vmatpush3.bf16.msra.mxu1 %v6700_v13  ;;  %6354 = vmatpush3.bf16.msra.mxu0 %v6701_v32 }
 0xf6a   : > { %6327 = vmatprep.subr.bf16.mxu1 %v6702_v33  ;;  %6355 = vmatprep.subr.bf16.mxu0 %v6703_v27 }
 0xf6b   : > { %5400 = vmatmul.mubr.bf16.gmra.mrb[52].mxu1 %v5142_v4  ;;  %5451 = vmatmul.mubr.bf16.gmra.mrb[40].mxu0 %v5142_v4 }
 0xf6d   : > { %6328 = vmatpush3.bf16.msra.mxu1 %v6704_v16  ;;  %6356 = vmatpush3.bf16.msra.mxu0 %v6705_v17 }
 0xf6e   : > { %6329 = vmatprep.subr.bf16.mxu1 %v6706_v43  ;;  %6357 = vmatprep.subr.bf16.mxu0 %v6707_v42 }
 0xf71   : > { %6330 = vmatpush3.bf16.msra.mxu1 %v6708_v37  ;;  %6358 = vmatpush3.bf16.msra.mxu0 %v6709_v34 }
 0xf72   : > { %6331 = vmatprep.subr.bf16.mxu1 %v6710_v7  ;;  %6359 = vmatprep.subr.bf16.mxu0 %v6711_v36 }
 0xf75   : > { %6332 = vmatpush3.bf16.msra.mxu1 %v6712_v53  ;;  %6360 = vmatpush3.bf16.msra.mxu0 %v6713_v22 }
 0xf76   : > { %6333 = vmatprep.subr.bf16.mxu1 %v6714_v61  ;;  %6361 = vmatprep.subr.bf16.mxu0 %v6715_v54 }
 0xf79   : > { %6334 = vmatpush3.bf16.msra.mxu1 %v6716_v26  ;;  %6362 = vmatpush3.bf16.msra.mxu0 %v6717_v46 }
 0xf7a   : > { %6335 = vmatprep.subr.bf16.mxu1 %v6718_v41  ;;  %6363 = vmatprep.subr.bf16.mxu0 %v6719_v48 }
 0xf7d   : > { %6336 = vmatpush3.bf16.msra.mxu1 %v6720_v21  ;;  %6364 = vmatpush3.bf16.msra.mxu0 %v6721_v28 }
 0xf7e   : > { %6337 = vmatprep.subr.bf16.mxu1 %v6722_v59  ;;  %6365 = vmatprep.subr.bf16.mxu0 %v6723_v39 }
 0xf81   : > { %6338 = vmatpush3.bf16.msra.mxu1 %v6724_v24  ;;  %6366 = vmatpush3.bf16.msra.mxu0 %v6725_v29 }
0x1036   : > { %v5391_v19 = vpop.f32.mrb[48].mxu1  ;;  %v5442_v10 = vpop.f32.mrb[36].mxu0 }
0x1037   : > { %v8247_v45 = vadd.f32 %v5391_v19, %v8234_v55  ;;  %v8250_v60 = vadd.f32 %v5442_v10, %v8238_v3  ;;  %v5393_v14 = vpop.f32.mrb[49].mxu1  ;;  %v5444_v5 = vpop.f32.mrb[37].mxu0 }
0x1038   : > { %v8253_v15 = vadd.f32 %v5393_v14, %v8242_v8  ;;  %v8256_v1 = vadd.f32 %v5444_v5, %v8244_v9  ;;  %v5395_v58 = vpop.f32.mrb[50].mxu1  ;;  %v5446_v23 = vpop.f32.mrb[38].mxu0 }
0x1039   : > { %v5459_v51 = vmul.f32 %v8247_v45, %v8247_v45  ;;  %v5461_v25 = vmul.f32 %v8250_v60, %v8250_v60  ;;  %v8263_v31 = vadd.f32 %v5395_v58, %v8234_v55  ;;  %v8266_v18 = vadd.f32 %v5446_v23, %v8238_v3  ;;  %v5397_v38 = vpop.f32.mrb[51].mxu1  ;;  %v5448_v35 = vpop.f32.mrb[39].mxu0 }
0x103a   : > { %v5460_v12 = vmul.f32 %v8253_v15, %v8253_v15  ;;  %v5462_v56 = vmul.f32 %v8256_v1, %v8256_v1  ;;  %v8273_v4 = vadd.f32 %v5397_v38, %v8242_v8  ;;  %v8276_v30 = vadd.f32 %v5448_v35, %v8244_v9 }
0x103b   : > { %v5471_v47 = vmul.f32 %v5459_v51, %v8247_v45  ;;  %v5473_v2 = vmul.f32 %v5461_v25, %v8250_v60  ;;  %v5463_v52 = vmul.f32 %v8263_v31, %v8263_v31  ;;  %v5465_v49 = vmul.f32 %v8266_v18, %v8266_v18 }
0x103c   : > { %v5472_v40 = vmul.f32 %v5460_v12, %v8253_v15  ;;  %v5474_v13 = vmul.f32 %v5462_v56, %v8256_v1  ;;  %v5464_v32 = vmul.f32 %v8273_v4, %v8273_v4  ;;  %v5466_v33 = vmul.f32 %v8276_v30, %v8276_v30 }
0x103d   : > { %v5483_v27 = vmul.f32 0.044715, %v5471_v47  ;;  %v5485_v16 = vmul.f32 0.044715, %v5473_v2  ;;  %v5475_v17 = vmul.f32 %v5463_v52, %v8263_v31  ;;  %v5477_v43 = vmul.f32 %v5465_v49, %v8266_v18 }
0x103e   : > { %v5484_v42 = vmul.f32 0.044715, %v5472_v40  ;;  %v5486_v37 = vmul.f32 0.044715, %v5474_v13  ;;  %v5476_v34 = vmul.f32 %v5464_v32, %v8273_v4  ;;  %v5478_v7 = vmul.f32 %v5466_v33, %v8276_v30  ;;  %v5401_v36 = vpop.f32.mrb[52].mxu1  ;;  %v5452_v53 = vpop.f32.mrb[40].mxu0 }
0x103f   : > { %v5495_v22 = vadd.f32 %v5483_v27, %v8247_v45  ;;  %v5497_v61 = vadd.f32 %v5485_v16, %v8250_v60  ;;  %v5487_v54 = vmul.f32 0.044715, %v5475_v17  ;;  %v5489_v26 = vmul.f32 0.044715, %v5477_v43  ;;  %v5403_v46 = vpop.f32.mrb[53].mxu1  ;;  %v5454_v41 = vpop.f32.mrb[41].mxu0 }
0x1040   : > { %v5496_v48 = vadd.f32 %v5484_v42, %v8253_v15  ;;  %v5498_v21 = vadd.f32 %v5486_v37, %v8256_v1  ;;  %v5488_v28 = vmul.f32 0.044715, %v5476_v34  ;;  %v5490_v59 = vmul.f32 0.044715, %v5478_v7  ;;  %v5405_v39 = vpop.f32.mrb[54].mxu1  ;;  %v5456_v24 = vpop.f32.mrb[42].mxu0 }
0x1041   : > { %v5507_v29 = vmul.f32 0.7978846, %v5495_v22  ;;  %v5509_v11 = vmul.f32 0.7978846, %v5497_v61  ;;  %v5499_v57 = vadd.f32 %v5487_v54, %v8263_v31  ;;  %v5501_v50 = vadd.f32 %v5489_v26, %v8266_v18  ;;  %v5406_v0 = vpop.f32.mrb[55].mxu1  ;;  %v5457_v63 = vpop.f32.mrb[43].mxu0 }
0x1042   : > { %v5508_v6 = vmul.f32 0.7978846, %v5496_v48  ;;  %v5510_v19 = vmul.f32 0.7978846, %v5498_v21  ;;  %v5500_v10 = vadd.f32 %v5488_v28, %v8273_v4  ;;  %v5502_v14 = vadd.f32 %v5490_v59, %v8276_v30 }
0x1043   : > { %6822 = vtanh.f32 %v5507_v29  ;;  %v5511_v5 = vmul.f32 0.7978846, %v5499_v57  ;;  %v8303_v58 = vadd.f32 %v5401_v36, %v8234_v55  ;;  %v5513_v23 = vmul.f32 0.7978846, %v5501_v50 }
0x1044   : > { %6824 = vtanh.f32 %v5509_v11  ;;  %v5512_v51 = vmul.f32 0.7978846, %v5500_v10  ;;  %v8306_v25 = vadd.f32 %v5452_v53, %v8238_v3  ;;  %v8311_v35 = vadd.f32 %v5403_v46, %v8242_v8 }
0x1045   : > { %6826 = vtanh.f32 %v5508_v6  ;;  %v5467_v38 = vmul.f32 %v8303_v58, %v8303_v58  ;;  %v8314_v12 = vadd.f32 %v5454_v41, %v8244_v9  ;;  %v5514_v56 = vmul.f32 0.7978846, %v5502_v14 }
0x1046   : > { %6828 = vtanh.f32 %v5510_v19  ;;  %v5469_v55 = vmul.f32 %v8306_v25, %v8306_v25  ;;  %v5468_v3 = vmul.f32 %v8311_v35, %v8311_v35 }
0x1047   : > { %6830 = vtanh.f32 %v5511_v5  ;;  %v5479_v47 = vmul.f32 %v5467_v38, %v8303_v58  ;;  %v5470_v2 = vmul.f32 %v8314_v12, %v8314_v12 }
0x1048   : > { %6832 = vtanh.f32 %v5513_v23  ;;  %v5481_v8 = vmul.f32 %v5469_v55, %v8306_v25  ;;  %v5480_v52 = vmul.f32 %v5468_v3, %v8311_v35 }
0x1049   : > { %6834 = vtanh.f32 %v5512_v51  ;;  %v5491_v9 = vmul.f32 0.044715, %v5479_v47  ;;  %v5482_v49 = vmul.f32 %v5470_v2, %v8314_v12 }
0x104a   : > { %6836 = vtanh.f32 %v5514_v56  ;;  %v5493_v40 = vmul.f32 0.044715, %v5481_v8  ;;  %v5492_v32 = vmul.f32 0.044715, %v5480_v52 }
0x104b   : > { %v5503_v13 = vadd.f32 %v5491_v9, %v8303_v58  ;;  %v5494_v33 = vmul.f32 0.044715, %v5482_v49 }
0x104c   : > { %v5505_v27 = vadd.f32 %v5493_v40, %v8306_v25  ;;  %v5504_v43 = vadd.f32 %v5492_v32, %v8311_v35 }
0x104d   : > { %v6823_v16 = vpop.eup %6822  ;;  %v5515_v17 = vmul.f32 0.7978846, %v5503_v13  ;;  %v5506_v42 = vadd.f32 %v5494_v33, %v8314_v12 }
0x104e   : > { %v6825_v37 = vpop.eup %6824  ;;  %v5531_v34 = vadd.f32 1.0, %v6823_v16  ;;  %v5517_v7 = vmul.f32 0.7978846, %v5505_v27  ;;  %v5516_v22 = vmul.f32 0.7978846, %v5504_v43 }
0x104f   : > { %v6827_v36 = vpop.eup %6826  ;;  %v5533_v53 = vadd.f32 1.0, %v6825_v37  ;;  %6838 = vtanh.f32 %v5515_v17  ;;  %v5518_v61 = vmul.f32 0.7978846, %v5506_v42 }
0x1050   : > { %v6829_v54 = vpop.eup %6828  ;;  %6840 = vtanh.f32 %v5517_v7  ;;  %v5532_v26 = vadd.f32 1.0, %v6827_v36  ;;  %v5543_v21 = vmul.f32 0.5, %v5531_v34 }
0x1051   : > { %v6831_v46 = vpop.eup %6830  ;;  %6842 = vtanh.f32 %v5516_v22  ;;  %v5534_v41 = vadd.f32 1.0, %v6829_v54  ;;  %v5545_v39 = vmul.f32 0.5, %v5533_v53 }
0x1052   : > { %v6833_v48 = vpop.eup %6832  ;;  %v5535_v28 = vadd.f32 1.0, %v6831_v46  ;;  %6844 = vtanh.f32 %v5518_v61  ;;  %v5544_v50 = vmul.f32 0.5, %v5532_v26  ;;  %v5555_v19 = vmul.f32 %v5543_v21, %v8247_v45 }
0x1053   : > { %v6835_v59 = vpop.eup %6834  ;;  %v5537_v24 = vadd.f32 1.0, %v6833_v48  ;;  %v5546_v6 = vmul.f32 0.5, %v5534_v41  ;;  %v5557_v5 = vmul.f32 %v5545_v39, %v8250_v60 }
0x1054   : > { %v6837_v29 = vpop.eup %6836  ;;  %v5547_v11 = vmul.f32 0.5, %v5535_v28  ;;  %v5536_v57 = vadd.f32 1.0, %v6835_v59  ;;  %v5556_v56 = vmul.f32 %v5544_v50, %v8253_v15 }
0x1055   : > { %v5549_v0 = vmul.f32 0.5, %v5537_v24  ;;  %v5538_v63 = vadd.f32 1.0, %v6837_v29  ;;  %v5558_v2 = vmul.f32 %v5546_v6, %v8256_v1 }
0x1056   : > { %v5559_v10 = vmul.f32 %v5547_v11, %v8263_v31  ;;  %v5548_v14 = vmul.f32 0.5, %v5536_v57 }
0x1057   : > { %v5561_v23 = vmul.f32 %v5549_v0, %v8266_v18  ;;  %v5550_v51 = vmul.f32 0.5, %v5538_v63 }
0x1058   : > { %v5567_v38 = vpack.c.bf16 %v5559_v10, %v5555_v19  ;;  %v5560_v55 = vmul.f32 %v5548_v14, %v8273_v4 }
0x1059   : > { %v6839_v47 = vpop.eup %6838  ;;  %v5569_v3 = vpack.c.bf16 %v5561_v23, %v5557_v5  ;;  %v5562_v8 = vmul.f32 %v5550_v51, %v8276_v30 }
0x105a   : > { %v6841_v45 = vpop.eup %6840  ;;  %v5568_v9 = vpack.c.bf16 %v5560_v55, %v5556_v56  ;;  %v5539_v31 = vadd.f32 1.0, %v6839_v47 }
0x105b   : > { %v6843_v52 = vpop.eup %6842  ;;  %v5570_v49 = vpack.c.bf16 %v5562_v8, %v5558_v2  ;;  %v5541_v60 = vadd.f32 1.0, %v6841_v45 }
0x105c   : > { %v6845_v40 = vpop.eup %6844  ;;  %5870 = vmatprep.mubr.bf16.mxu1 %v5568_v9  ;;  %v5540_v18 = vadd.f32 1.0, %v6843_v52  ;;  %v5551_v13 = vmul.f32 0.5, %v5539_v31 }
0x105d   : > { %5918 = vmatprep.mubr.bf16.mxu0 %v5570_v49  ;;  %5871 = vmatmul.mubr.bf16.vlgmr.msra.gmra.mrb[56].mxu1 %v5567_v38  ;;  %v5542_v15 = vadd.f32 1.0, %v6845_v40  ;;  %v5553_v4 = vmul.f32 0.5, %v5541_v60 }
0x105e   : > { %5919 = vmatmul.mubr.bf16.vlgmr.msra.gmra.mrb[44].mxu0 %v5569_v3  ;;  %v5552_v32 = vmul.f32 0.5, %v5540_v18  ;;  %v5563_v1 = vmul.f32 %v5551_v13, %v8303_v58  ;;  %v6199_v58 = vld [vmem:[%s8427_s3] ss:$0 sm:$0xff] }
0x105f   : > { %v5554_v33 = vmul.f32 0.5, %v5542_v15  ;;  %v5565_v27 = vmul.f32 %v5553_v4, %v8306_v25 }
0x1060   : > { %v5564_v30 = vmul.f32 %v5552_v32, %v8311_v35  ;;  %v5571_v42 = vpack.c.bf16 %v5563_v1, %v5563_v1 }
0x1061   : > { %v5566_v16 = vmul.f32 %v5554_v33, %v8314_v12  ;;  %v5573_v37 = vpack.c.bf16 %v5565_v27, %v5565_v27 }
0x1062   : > { %v5572_v17 = vpack.c.bf16 %v5564_v30, %v5564_v30 }
0x1063   : > { %v5574_v43 = vpack.c.bf16 %v5566_v16, %v5566_v16 }
0x1064   : > { %5878 = vmatprep.mubr.bf16.mxu1 %v5572_v17 }
0x1065   : > { %5926 = vmatprep.mubr.bf16.mxu0 %v5574_v43  ;;  %5879 = vmatmul.mubr.bf16.gmra.mrb[60].mxu1 %v5571_v42 }
0x1066   : > { %5927 = vmatmul.mubr.bf16.gmra.mrb[48].mxu0 %v5573_v37 }
0x1130   : > { %v6339_v34 = vpop.f32.mrb[56].mxu1 }
0x1131   : > { %v6367_v7 = vpop.f32.mrb[44].mxu0  ;;  %v6340_v36 = vpop.f32.mrb[57].mxu1 }
0x1132   : > { %v6341_v35 = vadd.f32 %v6340_v36, %v6339_v34  ;;  %v6368_v53 = vpop.f32.mrb[45].mxu0  ;;  %v6342_v25 = vpop.f32.mrb[58].mxu1 }
0x1133   : > { %v6369_v22 = vadd.f32 %v6368_v53, %v6367_v7  ;;  %v6370_v12 = vpop.f32.mrb[46].mxu0  ;;  %v6343_v61 = vpop.f32.mrb[59].mxu1 }
0x1134   : > { %v5873_v54 = vadd.f32 %v6341_v35, %v6199_v58  ;;  %v6344_v26 = vadd.f32 %v6343_v61, %v6342_v25  ;;  %v6371_v46 = vpop.f32.mrb[47].mxu0 }
0x1135   : > { %v6372_v41 = vadd.f32 %v6371_v46, %v6370_v12 }
0x1136   : > { %v5921_v48 = vadd.f32 %v6369_v22, %v5873_v54  ;;  %v5876_v21 = vadd.f32 %v6344_v26, %v6199_v58 }
0x1138   : > { %v5924_v28 = vadd.f32 %v6372_v41, %v5876_v21  ;;  %v6345_v59 = vpop.f32.mrb[60].mxu1  ;;  %v5934_v29 = vadd.f32 %v5921_v48, %v7997_v20 }
0x1139   : > { %v6373_v39 = vpop.f32.mrb[48].mxu0  ;;  %v6346_v24 = vpop.f32.mrb[61].mxu1 }
0x113a   : > { %v5935_v11 = vadd.f32 %v5924_v28, %v8003_v44  ;;  %v6347_v57 = vadd.f32 %v6346_v24, %v6345_v59  ;;  %v6374_v50 = vpop.f32.mrb[49].mxu0  ;;  %v6348_v0 = vpop.f32.mrb[62].mxu1  ;;  %v5955_v44 = vld [vmem:[%s683_s19 + $0x8] sm:$0x1] }
0x113b   : > { %v6375_v63 = vadd.f32 %v6374_v50, %v6373_v39  ;;  %v6376_v6 = vpop.f32.mrb[50].mxu0  ;;  %v6349_v19 = vpop.f32.mrb[63].mxu1 }
0x113c   : > { %v6253_v10 = vpack.c.bf16 %v5935_v11, %v5934_v29  ;;  %v5881_v14 = vadd.f32 %v6347_v57, %v6199_v58  ;;  %v6377_v5 = vpop.f32.mrb[51].mxu0 }
0x113e   : > { %6254 = vst [vmem:[%s683_s19] sm:$0xff] %v6253_v10   ;;  %v5929_v23 = vadd.f32 %v6375_v63, %v5881_v14 }
0x1140   : > { %v5936_v20 = vadd.f32 %v5929_v23, %v8000_v62 }
0x1142   : > { %v6241_v51 = vpack.c.bf16 %v5936_v20, %v5936_v20 }
0x1144   : > { %v5956_v38 = vsel %vm5954_vm9, %v6241_v51, %v5955_v44 }
0x1145   : > { %5957 = vst [vmem:[%s683_s19 + $0x8] sm:$0x1] %v5956_v38 }
0x1146 PF: > { %s8429_s22 = sld [smem:[#allocation5_spill]] }
0x114c   : > { %s31_s1 = sadd.s32 1, %s8429_s22  }
0x114d   : > { %p28_p1 = scmp.ge.s32.totalorder %s31_s1, 4  }
0x114f   :  { %30 = sbr.rel (!%p28_p1) target bundleno = 11 (0xb), region = 141 }
0x1156   :  { %5979 = vsyncpa [#allocation3], 1 }
0x1157   :  { %5981 = vsyncpa [#allocation3 + $0x1], 1 }

</bundles_post_ra>
